<compile_context>
chip_gen: v7x
topology: tpu7x:2x2x1
jax: 0.10.0
libtpu: 0.0.40
codegen_flags: <defaults>
</compile_context>

<pallas_src>
import jax
import jax.numpy as jnp
from jax.experimental import pallas as pl
from jax.experimental.pallas import tpu as pltpu

NGF = 64           # ngf in the PyTorch module
NZ = 16            # nz default
NUM_CLASSES = 1000


def _round_up(x, m):
    return (x + m - 1) // m * m


# ---------------------------------------------------------------------------
# Pallas kernel: fused  act((A @ W) + bias [+ residual]), bf16 MXU, f32 epilogue
# ---------------------------------------------------------------------------
def _make_kernel(activation, with_residual):
    def kernel(*refs):
        if with_residual:
            a_ref, w_ref, b_ref, r_ref, o_ref = refs
        else:
            a_ref, w_ref, b_ref, o_ref = refs
        acc = jnp.dot(a_ref[...], w_ref[...], preferred_element_type=jnp.float32)
        y = acc + b_ref[...]
        if with_residual:
            y = y + r_ref[...].astype(jnp.float32)
        if activation == "relu":
            y = jnp.maximum(y, 0.0)
        elif activation == "tanh01":
            y = (jnp.tanh(y) + 1.0) * 0.5
        o_ref[...] = y.astype(o_ref.dtype)
    return kernel


def matmul_bias_act(a, w, bias, activation="none", residual=None, out_dtype=jnp.bfloat16):
    """act(A @ W + bias [+ residual]) on the MXU.  W is a pre-folded bf16 (Kp, Np) matrix."""
    M, Ka = a.shape
    Kp, Np = w.shape
    a = a.astype(jnp.bfloat16)
    if Ka < Kp:
        a = jnp.pad(a, ((0, 0), (0, Kp - Ka)))

    tm = min(128, _round_up(M, 8))
    Mp = _round_up(M, tm)
    if Np % 256 == 0:
        tn = 256
    elif Np % 128 == 0:
        tn = 128
    else:
        tn = Np
    # give the grid >= 2 parallel steps when cheap (keeps both v7x TensorCores busy)
    if Mp // tm == 1 and Np // tn == 1 and tm % 16 == 0:
        tm //= 2

    if Mp > M:
        a = jnp.pad(a, ((0, Mp - M), (0, 0)))

    bias2d = bias.reshape(1, Np).astype(jnp.float32)

    inputs = [a, w, bias2d]
    in_specs = [
        pl.BlockSpec((tm, Kp), lambda i, j: (i, 0)),
        pl.BlockSpec((Kp, tn), lambda i, j: (0, j)),
        pl.BlockSpec((1, tn), lambda i, j: (0, j)),
    ]
    if residual is not None:
        r = residual
        if Mp > M:
            r = jnp.pad(r, ((0, Mp - M), (0, 0)))
        inputs.append(r)
        in_specs.append(pl.BlockSpec((tm, tn), lambda i, j: (i, j)))

    out = pl.pallas_call(
        _make_kernel(activation, residual is not None),
        out_shape=jax.ShapeDtypeStruct((Mp, Np), out_dtype),
        grid=(Mp // tm, Np // tn),
        in_specs=in_specs,
        out_specs=pl.BlockSpec((tm, tn), lambda i, j: (i, j)),
        compiler_params=pltpu.CompilerParams(
            dimension_semantics=("parallel", "parallel"),
            vmem_limit_bytes=32 * 1024 * 1024,
        ),
    )(*inputs)
    return out[:M] if Mp > M else out


# ---------------------------------------------------------------------------
# Convolution glue (bf16 im2col in plain JAX, matmul in Pallas)
# ---------------------------------------------------------------------------
def _im2col(x, kh, kw, stride, k_pad=0):
    n, h, w, c = x.shape
    ho = (h - kh) // stride + 1
    wo = (w - kw) // stride + 1
    patches = []
    for i in range(kh):
        for j in range(kw):
            patches.append(x[:, i:i + ho * stride:stride, j:j + wo * stride:stride, :])
    if k_pad:
        # K padding fused into the same concatenate (weights are pre-padded to match)
        patches.append(jnp.zeros((n, ho, wo, k_pad), x.dtype))
    cols = jnp.concatenate(patches, axis=-1)
    return cols.reshape(n * ho * wo, kh * kw * c + k_pad), (n, ho, wo)


def conv2d(x, w, b, kh, kw, stride=1, activation="relu", residual=None,
           cout=None, out_dtype=jnp.bfloat16):
    """x: NHWC (already spatially padded); w: pre-folded (Kp, Np) bf16 matmul weight."""
    Kp, Np = w.shape
    cout = Np if cout is None else cout
    cin = x.shape[-1]
    cols, (n, ho, wo) = _im2col(x.astype(jnp.bfloat16), kh, kw, stride,
                                k_pad=Kp - kh * kw * cin)
    res = residual.reshape(n * ho * wo, Np) if residual is not None else None
    out = matmul_bias_act(cols, w, b, activation=activation, residual=res,
                          out_dtype=out_dtype)
    if cout != Np:
        out = out[:, :cout]
    return out.reshape(n, ho, wo, cout)


def upsample2x(x, w, b):
    """ConvTranspose2d(k=3,s=2,p=1,op=1) + BN + ReLU via parity decomposition.

    A single matmul over a 2x2 input window produces the 4 output parities
    (K = 4*Cin, N = 4*Cout); they are then interleaved into the 2x upsampled map."""
    n, h, ww, c = x.shape
    cout = w.shape[1] // 4
    xp = jnp.pad(x, ((0, 0), (0, 1), (0, 1), (0, 0)))
    cols, _ = _im2col(xp.astype(jnp.bfloat16), 2, 2, 1, k_pad=w.shape[0] - 4 * c)
    out = matmul_bias_act(cols, w, b, activation="relu")
    out = out.reshape(n, h, ww, 2, 2, cout).transpose(0, 1, 3, 2, 4, 5)
    return out.reshape(n, 2 * h, 2 * ww, cout)


def resblock(x, rb):
    r = jnp.pad(x, ((0, 0), (1, 1), (1, 1), (0, 0)), mode="reflect")
    r = conv2d(r, rb["w1"], rb["b1"], 3, 3, activation="relu")
    # TODO(synk): Dropout(0.5) is identity in eval mode.
    r = jnp.pad(r, ((0, 0), (1, 1), (1, 1), (0, 0)), mode="reflect")
    # residual add (pre-activation, like the reference) fused in the kernel epilogue
    return conv2d(r, rb["w2"], rb["b2"], 3, 3, activation="none", residual=x)


# ---------------------------------------------------------------------------
# Deterministic parameter construction (weights pre-folded / pre-padded / bf16)
# ---------------------------------------------------------------------------
def _spectral_normalize(w, key, n_iter=30, eps=1e-12):
    # w: (out_features, in_features) — same role as PyTorch spectral_norm.
    u = jax.random.normal(key, (w.shape[0],))
    u = u / (jnp.linalg.norm(u) + eps)
    v = jnp.zeros((w.shape[1],))
    for _ in range(n_iter):
        v = w.T @ u
        v = v / (jnp.linalg.norm(v) + eps)
        u = w @ v
        u = u / (jnp.linalg.norm(u) + eps)
    sigma = u @ (w @ v)
    return w / sigma


def init_params(key):
    keys = iter(jax.random.split(key, 256))

    def conv_w(cout, cin, k):
        return jax.random.normal(next(keys), (k, k, cin, cout), jnp.float32) * 0.05

    def bn(c, eps=1e-5):
        gamma = jax.random.uniform(next(keys), (c,), minval=0.5, maxval=1.5)
        beta = jax.random.normal(next(keys), (c,)) * 0.1
        mean = jax.random.normal(next(keys), (c,)) * 0.1
        var = jax.random.uniform(next(keys), (c,), minval=0.5, maxval=1.5)
        scale = gamma / jnp.sqrt(var + eps)
        bias = beta - mean * scale
        return scale.astype(jnp.float32), bias.astype(jnp.float32)

    def fold_conv(w, scale, bias, min_n=None):
        """(kh,kw,cin,cout) conv weight + folded BN -> pre-padded bf16 (Kp, Np) matrix."""
        kh, kw, cin, cout = w.shape
        k = kh * kw * cin
        kp = _round_up(k, 128)
        np_ = cout if min_n is None else max(cout, min_n)
        w_mat = (w * scale[None, None, None, :]).reshape(k, cout)
        w_p = jnp.zeros((kp, np_), jnp.float32).at[:k, :cout].set(w_mat)
        b_p = jnp.zeros((np_,), jnp.float32).at[:cout].set(bias)
        return w_p.astype(jnp.bfloat16), b_p

    p = {}

    # spectral-norm Linear(1000 -> NZ, bias=False); z_cond = onehot @ p_lin
    w_lin = jax.random.normal(next(keys), (NZ, NUM_CLASSES), jnp.float32) * 0.05
    w_lin = _spectral_normalize(w_lin, next(keys))
    p_lin = w_lin.T                                           # (1000, NZ)

    # block1: ReflectionPad(3) + Conv7x7(3+NZ -> NGF, no bias) + BN + ReLU
    w1 = conv_w(NGF, 3 + NZ, 7)
    s1, bias1 = bn(NGF)
    p["b1_w"], p["b1_b"] = fold_conv(w1[:, :, :3, :], s1, bias1)
    # The z channels are spatially constant and reflection-padding keeps them constant,
    # so their contribution folds exactly into a per-image bias: z_cond @ (sum_taps Wz) * bn_scale.
    wz_sum = w1[:, :, 3:, :].sum(axis=(0, 1)) * s1[None, :]   # (NZ, NGF)

    # fused projection:  onehot @ [p_lin | p_lin @ wz_sum] -> [z_cond (NZ) | block1 z-bias (NGF)]
    zc = jnp.concatenate([p_lin, p_lin @ wz_sum], axis=1)     # (1000, NZ + NGF)
    kz, nz = _round_up(NUM_CLASSES, 128), _round_up(NZ + NGF, 128)
    p["zproj_w"] = (jnp.zeros((kz, nz), jnp.float32)
                    .at[:NUM_CLASSES, :NZ + NGF].set(zc).astype(jnp.bfloat16))
    p["zproj_b"] = jnp.zeros((nz,), jnp.float32)

    # block2 / block3 (z concatenated — zero padding makes the border contribution vary)
    w2 = conv_w(NGF * 2, NGF + NZ, 3)
    s2, bias2 = bn(NGF * 2)
    p["b2_w"], p["b2_b"] = fold_conv(w2, s2, bias2)
    w3 = conv_w(NGF * 4, NGF * 2 + NZ, 3)
    s3, bias3 = bn(NGF * 4)
    p["b3_w"], p["b3_b"] = fold_conv(w3, s3, bias3)

    # residual blocks (data_dim == 'high' -> 6)
    resblocks = []
    for _ in range(6):
        wa = conv_w(NGF * 4, NGF * 4, 3)
        sa, ba = bn(NGF * 4)
        wb = conv_w(NGF * 4, NGF * 4, 3)
        sb, bb = bn(NGF * 4)
        wap, bap = fold_conv(wa, sa, ba)
        wbp, bbp = fold_conv(wb, sb, bb)
        resblocks.append({"w1": wap, "b1": bap, "w2": wbp, "b2": bbp})
    p["resblocks"] = resblocks

    # ConvTranspose2d(k=3,s=2,p=1,op=1) + BN + ReLU, parity-decomposed into a (4Cin, 4Cout) matrix
    def fold_upsample(cin, cout):
        # PyTorch ConvTranspose2d weight layout: (Cin, Cout, 3, 3)
        w_t = jax.random.normal(next(keys), (cin, cout, 3, 3), jnp.float32) * 0.05
        s, b = bn(cout)
        wf = jnp.flip(w_t, axis=(2, 3)).transpose(2, 3, 0, 1)   # equivalent conv kernel (3,3,cin,cout)
        # (input tap di,dj, cin, output parity dy,dx, cout)
        Wc = jnp.zeros((2, 2, cin, 2, 2, cout), jnp.float32)
        Wc = Wc.at[0, 0, :, 0, 0, :].set(wf[1, 1])              # even, even
        Wc = Wc.at[0, 0, :, 0, 1, :].set(wf[1, 0])              # even, odd
        Wc = Wc.at[0, 1, :, 0, 1, :].set(wf[1, 2])
        Wc = Wc.at[0, 0, :, 1, 0, :].set(wf[0, 1])              # odd, even
        Wc = Wc.at[1, 0, :, 1, 0, :].set(wf[2, 1])
        Wc = Wc.at[0, 0, :, 1, 1, :].set(wf[0, 0])              # odd, odd
        Wc = Wc.at[0, 1, :, 1, 1, :].set(wf[0, 2])
        Wc = Wc.at[1, 0, :, 1, 1, :].set(wf[2, 0])
        Wc = Wc.at[1, 1, :, 1, 1, :].set(wf[2, 2])
        Wc = Wc * s[None, None, None, None, None, :]
        return Wc.reshape(4 * cin, 4 * cout).astype(jnp.bfloat16), jnp.tile(b, 4)

    p["u1_w"], p["u1_b"] = fold_upsample(NGF * 4, NGF * 2)
    p["u2_w"], p["u2_b"] = fold_upsample(NGF * 2, NGF)

    # blockf: ReflectionPad(3) + Conv7x7(NGF -> 3, with bias); N padded to 128 lanes, sliced at the end
    wf_ = conv_w(3, NGF, 7)
    bf_bias = jax.random.normal(next(keys), (3,), jnp.float32) * 0.05
    p["bf_w"], p["bf_b"] = fold_conv(wf_, jnp.ones((3,), jnp.float32), bf_bias, min_n=128)
    return p


# ---------------------------------------------------------------------------
# Forward pass (layer=1, loc=[1,1,1], data_dim='high', inception=False)
# ---------------------------------------------------------------------------
def forward(params, x_nchw, z_one_hot):
    x = jnp.transpose(x_nchw, (0, 2, 3, 1)).astype(jnp.bfloat16)     # NCHW -> NHWC
    B, H, W, _ = x.shape

    # snlinear(onehot) and block1's folded z-bias from ONE fused matmul
    z_all = matmul_bias_act(z_one_hot, params["zproj_w"], params["zproj_b"],
                            activation="none", out_dtype=jnp.float32)
    z_cond = z_all[:, :NZ]                                           # (B, NZ)
    z_b1 = z_all[:, NZ:NZ + NGF]                                     # (B, NGF) per-image bias

    # block1: ReflectionPad(3) + Conv7x7 + BN + ReLU (z folded into per-image bias)
    h = jnp.pad(x, ((0, 0), (3, 3), (3, 3), (0, 0)), mode="reflect")
    res1 = jnp.broadcast_to(z_b1[:, None, None, :], (B, H, W, NGF))
    h = conv2d(h, params["b1_w"], params["b1_b"], 7, 7, activation="relu", residual=res1)

    z_cond_b = z_cond.astype(jnp.bfloat16)

    def concat_z(feat):
        b, hh, ww, _ = feat.shape
        z_img = jnp.broadcast_to(z_cond_b[:, None, None, :], (b, hh, ww, NZ))
        return jnp.concatenate([feat, z_img], axis=-1)

    # block2: Conv3x3 s2 p1 + BN + ReLU
    h = concat_z(h)
    h = jnp.pad(h, ((0, 0), (1, 1), (1, 1), (0, 0)))
    h = conv2d(h, params["b2_w"], params["b2_b"], 3, 3, stride=2, activation="relu")

    # block3: Conv3x3 s2 p1 + BN + ReLU
    h = concat_z(h)
    h = jnp.pad(h, ((0, 0), (1, 1), (1, 1), (0, 0)))
    h = conv2d(h, params["b3_w"], params["b3_b"], 3, 3, stride=2, activation="relu")

    # 6 residual blocks
    for rb in params["resblocks"]:
        h = resblock(h, rb)

    # two ConvTranspose upsamplings (parity decomposition)
    h = upsample2x(h, params["u1_w"], params["u1_b"])
    h = upsample2x(h, params["u2_w"], params["u2_b"])

    # blockf: ReflectionPad(3) + Conv7x7 (with bias), (tanh + 1) / 2 fused in the kernel
    h = jnp.pad(h, ((0, 0), (3, 3), (3, 3), (0, 0)), mode="reflect")
    h = conv2d(h, params["bf_w"], params["bf_b"], 7, 7, activation="tanh01",
               cout=3, out_dtype=jnp.float32)

    return jnp.transpose(h, (0, 3, 1, 2))                            # back to NCHW


if __name__ == "__main__":
    key = jax.random.PRNGKey(0)
    kp, kx, kz = jax.random.split(key, 3)

    params = init_params(kp)
    x = jax.random.normal(kx, (2, 3, 16, 16), jnp.float32)           # NCHW like PyTorch
    labels = jax.random.randint(kz, (2,), 0, NUM_CLASSES)
    z_one_hot = jax.nn.one_hot(labels, NUM_CLASSES, dtype=jnp.float32)

    out = jax.jit(forward)(params, x, z_one_hot)
    out = jax.block_until_ready(out)

    assert out.shape == (2, 3, 16, 16), out.shape
    assert bool(jnp.all(jnp.isfinite(out)))
    assert bool(jnp.all(out >= 0.0)) and bool(jnp.all(out <= 1.0))   # (tanh+1)/2 range
    print("KERNEL_OK")
</pallas_src>

<mosaic_0001>
module attributes {stable_mosaic.version = 11 : i64} {
  func.func @kernel(%arg0: i32, %arg1: i32, %arg2: memref<8x1024xbf16, #tpu.memory_space<vmem>>, %arg3: memref<1024x128xbf16, #tpu.memory_space<vmem>>, %arg4: memref<1x128xf32, #tpu.memory_space<vmem>>, %arg5: memref<8x128xf32, #tpu.memory_space<vmem>>) attributes {dimension_semantics = [#tpu.dimension_semantics<parallel>, #tpu.dimension_semantics<parallel>], iteration_bounds = array<i64: 1, 1>, scalar_prefetch = 0 : i64, scratch_operands = 0 : i64, tpu.core_type = #tpu.core_type<tc>, window_params = [{transform_indices = @transform_0, window_bounds = array<i64: 8, 1024>}, {transform_indices = @transform_1, window_bounds = array<i64: 1024, 128>}, {transform_indices = @transform_2, window_bounds = array<i64: 1, 128>}, {transform_indices = @transform_3, window_bounds = array<i64: 8, 128>}]} {
    %c0 = arith.constant 0 : index
    %c0_0 = arith.constant 0 : index
    %0 = vector.load %arg2[%c0, %c0_0] : memref<8x1024xbf16, #tpu.memory_space<vmem>>, vector<8x1024xbf16>
    %c0_1 = arith.constant 0 : index
    %c0_2 = arith.constant 0 : index
    %1 = vector.load %arg3[%c0_1, %c0_2] : memref<1024x128xbf16, #tpu.memory_space<vmem>>, vector<1024x128xbf16>
    %cst = arith.constant dense<0.000000e+00> : vector<8x128xf32>
    %2 = tpu.matmul %0, %1, %cst {dimension_numbers = #tpu.dot_dimension_numbers<[1], [0], [0], [1], [0, 0, 1, 1], [], []>} : vector<8x1024xbf16>, vector<1024x128xbf16>, vector<8x128xf32> -> vector<8x128xf32>
    %c0_3 = arith.constant 0 : index
    %c0_4 = arith.constant 0 : index
    %3 = vector.load %arg4[%c0_3, %c0_4] : memref<1x128xf32, #tpu.memory_space<vmem>>, vector<1x128xf32>
    %4 = vector.broadcast %3 : vector<1x128xf32> to vector<8x128xf32>
    %5 = arith.addf %2, %4 : vector<8x128xf32>
    %c0_5 = arith.constant 0 : index
    %c0_6 = arith.constant 0 : index
    %6 = vector.load %arg5[%c0_5, %c0_6] : memref<8x128xf32, #tpu.memory_space<vmem>>, vector<8x128xf32>
    tpu.vector_store %arg5[%c0_5, %c0_6], %5 {strides = array<i32>} : memref<8x128xf32, #tpu.memory_space<vmem>>, vector<8x128xf32>,
    return
  }
  func.func @transform_0(%arg0: i32, %arg1: i32) -> (i32, i32) {
    %c0_i32 = arith.constant 0 : i32
    %c0_i32_0 = arith.constant 0 : i32
    return %arg0, %c0_i32 : i32, i32
  }
  func.func @transform_1(%arg0: i32, %arg1: i32) -> (i32, i32) {
    %c0_i32 = arith.constant 0 : i32
    %c0_i32_0 = arith.constant 0 : i32
    return %c0_i32, %arg1 : i32, i32
  }
  func.func @transform_2(%arg0: i32, %arg1: i32) -> (i32, i32) {
    %c0_i32 = arith.constant 0 : i32
    %c0_i32_0 = arith.constant 0 : i32
    return %c0_i32, %arg1 : i32, i32
  }
  func.func @transform_3(%arg0: i32, %arg1: i32) -> (i32, i32) {
    %c0_i32 = arith.constant 0 : i32
    return %arg0, %arg1 : i32, i32
  }
}

module attributes {stable_mosaic.version = 11 : i64} {
  func.func @kernel(%arg0: i32, %arg1: i32, %arg2: memref<128x256xbf16, #tpu.memory_space<vmem>>, %arg3: memref<256x64xbf16, #tpu.memory_space<vmem>>, %arg4: memref<1x64xf32, #tpu.memory_space<vmem>>, %arg5: memref<128x64xf32, #tpu.memory_space<vmem>>, %arg6: memref<128x64xbf16, #tpu.memory_space<vmem>>) attributes {dimension_semantics = [#tpu.dimension_semantics<parallel>, #tpu.dimension_semantics<parallel>], iteration_bounds = array<i64: 4, 1>, scalar_prefetch = 0 : i64, scratch_operands = 0 : i64, tpu.core_type = #tpu.core_type<tc>, window_params = [{transform_indices = @transform_0, window_bounds = array<i64: 128, 256>}, {transform_indices = @transform_1, window_bounds = array<i64: 256, 64>}, {transform_indices = @transform_2, window_bounds = array<i64: 1, 64>}, {transform_indices = @transform_3, window_bounds = array<i64: 128, 64>}, {transform_indices = @transform_4, window_bounds = array<i64: 128, 64>}]} {
    %c0 = arith.constant 0 : index
    %c0_0 = arith.constant 0 : index
    %0 = vector.load %arg2[%c0, %c0_0] : memref<128x256xbf16, #tpu.memory_space<vmem>>, vector<128x256xbf16>
    %c0_1 = arith.constant 0 : index
    %c0_2 = arith.constant 0 : index
    %1 = vector.load %arg3[%c0_1, %c0_2] : memref<256x64xbf16, #tpu.memory_space<vmem>>, vector<256x64xbf16>
    %cst = arith.constant dense<0.000000e+00> : vector<128x64xf32>
    %2 = tpu.matmul %0, %1, %cst {dimension_numbers = #tpu.dot_dimension_numbers<[1], [0], [0], [1], [0, 0, 1, 1], [], []>} : vector<128x256xbf16>, vector<256x64xbf16>, vector<128x64xf32> -> vector<128x64xf32>
    %c0_3 = arith.constant 0 : index
    %c0_4 = arith.constant 0 : index
    %3 = vector.load %arg4[%c0_3, %c0_4] : memref<1x64xf32, #tpu.memory_space<vmem>>, vector<1x64xf32>
    %4 = vector.broadcast %3 : vector<1x64xf32> to vector<128x64xf32>
    %5 = arith.addf %2, %4 : vector<128x64xf32>
    %c0_5 = arith.constant 0 : index
    %c0_6 = arith.constant 0 : index
    %6 = vector.load %arg5[%c0_5, %c0_6] : memref<128x64xf32, #tpu.memory_space<vmem>>, vector<128x64xf32>
    %7 = arith.addf %5, %6 : vector<128x64xf32>
    %cst_7 = arith.constant 0.000000e+00 : f32
    %8 = vector.broadcast %cst_7 : f32 to vector<128x64xf32>
    %9 = arith.maximumf %7, %8 : vector<128x64xf32>
    %10 = arith.truncf %9 : vector<128x64xf32> to vector<128x64xbf16>
    %c0_8 = arith.constant 0 : index
    %c0_9 = arith.constant 0 : index
    %11 = vector.load %arg6[%c0_8, %c0_9] : memref<128x64xbf16, #tpu.memory_space<vmem>>, vector<128x64xbf16>
    tpu.vector_store %arg6[%c0_8, %c0_9], %10 {strides = array<i32>} : memref<128x64xbf16, #tpu.memory_space<vmem>>, vector<128x64xbf16>,
    return
  }
  func.func @transform_0(%arg0: i32, %arg1: i32) -> (i32, i32) {
    %c0_i32 = arith.constant 0 : i32
    %c0_i32_0 = arith.constant 0 : i32
    return %arg0, %c0_i32 : i32, i32
  }
  func.func @transform_1(%arg0: i32, %arg1: i32) -> (i32, i32) {
    %c0_i32 = arith.constant 0 : i32
    %c0_i32_0 = arith.constant 0 : i32
    return %c0_i32, %arg1 : i32, i32
  }
  func.func @transform_2(%arg0: i32, %arg1: i32) -> (i32, i32) {
    %c0_i32 = arith.constant 0 : i32
    %c0_i32_0 = arith.constant 0 : i32
    return %c0_i32, %arg1 : i32, i32
  }
  func.func @transform_3(%arg0: i32, %arg1: i32) -> (i32, i32) {
    %c0_i32 = arith.constant 0 : i32
    return %arg0, %arg1 : i32, i32
  }
  func.func @transform_4(%arg0: i32, %arg1: i32) -> (i32, i32) {
    %c0_i32 = arith.constant 0 : i32
    return %arg0, %arg1 : i32, i32
  }
}

module attributes {stable_mosaic.version = 11 : i64} {
  func.func @kernel(%arg0: i32, %arg1: i32, %arg2: memref<64x768xbf16, #tpu.memory_space<vmem>>, %arg3: memref<768x128xbf16, #tpu.memory_space<vmem>>, %arg4: memref<1x128xf32, #tpu.memory_space<vmem>>, %arg5: memref<64x128xbf16, #tpu.memory_space<vmem>>) attributes {dimension_semantics = [#tpu.dimension_semantics<parallel>, #tpu.dimension_semantics<parallel>], iteration_bounds = array<i64: 2, 1>, scalar_prefetch = 0 : i64, scratch_operands = 0 : i64, tpu.core_type = #tpu.core_type<tc>, window_params = [{transform_indices = @transform_0, window_bounds = array<i64: 64, 768>}, {transform_indices = @transform_1, window_bounds = array<i64: 768, 128>}, {transform_indices = @transform_2, window_bounds = array<i64: 1, 128>}, {transform_indices = @transform_3, window_bounds = array<i64: 64, 128>}]} {
    %c0 = arith.constant 0 : index
    %c0_0 = arith.constant 0 : index
    %0 = vector.load %arg2[%c0, %c0_0] : memref<64x768xbf16, #tpu.memory_space<vmem>>, vector<64x768xbf16>
    %c0_1 = arith.constant 0 : index
    %c0_2 = arith.constant 0 : index
    %1 = vector.load %arg3[%c0_1, %c0_2] : memref<768x128xbf16, #tpu.memory_space<vmem>>, vector<768x128xbf16>
    %cst = arith.constant dense<0.000000e+00> : vector<64x128xf32>
    %2 = tpu.matmul %0, %1, %cst {dimension_numbers = #tpu.dot_dimension_numbers<[1], [0], [0], [1], [0, 0, 1, 1], [], []>} : vector<64x768xbf16>, vector<768x128xbf16>, vector<64x128xf32> -> vector<64x128xf32>
    %c0_3 = arith.constant 0 : index
    %c0_4 = arith.constant 0 : index
    %3 = vector.load %arg4[%c0_3, %c0_4] : memref<1x128xf32, #tpu.memory_space<vmem>>, vector<1x128xf32>
    %4 = vector.broadcast %3 : vector<1x128xf32> to vector<64x128xf32>
    %5 = arith.addf %2, %4 : vector<64x128xf32>
    %cst_5 = arith.constant 0.000000e+00 : f32
    %6 = vector.broadcast %cst_5 : f32 to vector<64x128xf32>
    %7 = arith.maximumf %5, %6 : vector<64x128xf32>
    %8 = arith.truncf %7 : vector<64x128xf32> to vector<64x128xbf16>
    %c0_6 = arith.constant 0 : index
    %c0_7 = arith.constant 0 : index
    %9 = vector.load %arg5[%c0_6, %c0_7] : memref<64x128xbf16, #tpu.memory_space<vmem>>, vector<64x128xbf16>
    tpu.vector_store %arg5[%c0_6, %c0_7], %8 {strides = array<i32>} : memref<64x128xbf16, #tpu.memory_space<vmem>>, vector<64x128xbf16>,
    return
  }
  func.func @transform_0(%arg0: i32, %arg1: i32) -> (i32, i32) {
    %c0_i32 = arith.constant 0 : i32
    %c0_i32_0 = arith.constant 0 : i32
    return %arg0, %c0_i32 : i32, i32
  }
  func.func @transform_1(%arg0: i32, %arg1: i32) -> (i32, i32) {
    %c0_i32 = arith.constant 0 : i32
    %c0_i32_0 = arith.constant 0 : i32
    return %c0_i32, %arg1 : i32, i32
  }
  func.func @transform_2(%arg0: i32, %arg1: i32) -> (i32, i32) {
    %c0_i32 = arith.constant 0 : i32
    %c0_i32_0 = arith.constant 0 : i32
    return %c0_i32, %arg1 : i32, i32
  }
  func.func @transform_3(%arg0: i32, %arg1: i32) -> (i32, i32) {
    %c0_i32 = arith.constant 0 : i32
    return %arg0, %arg1 : i32, i32
  }
}

module attributes {stable_mosaic.version = 11 : i64} {
  func.func @kernel(%arg0: i32, %arg1: i32, %arg2: memref<16x1408xbf16, #tpu.memory_space<vmem>>, %arg3: memref<1408x256xbf16, #tpu.memory_space<vmem>>, %arg4: memref<1x256xf32, #tpu.memory_space<vmem>>, %arg5: memref<16x256xbf16, #tpu.memory_space<vmem>>) attributes {dimension_semantics = [#tpu.dimension_semantics<parallel>, #tpu.dimension_semantics<parallel>], iteration_bounds = array<i64: 2, 1>, scalar_prefetch = 0 : i64, scratch_operands = 0 : i64, tpu.core_type = #tpu.core_type<tc>, window_params = [{transform_indices = @transform_0, window_bounds = array<i64: 16, 1408>}, {transform_indices = @transform_1, window_bounds = array<i64: 1408, 256>}, {transform_indices = @transform_2, window_bounds = array<i64: 1, 256>}, {transform_indices = @transform_3, window_bounds = array<i64: 16, 256>}]} {
    %c0 = arith.constant 0 : index
    %c0_0 = arith.constant 0 : index
    %0 = vector.load %arg2[%c0, %c0_0] : memref<16x1408xbf16, #tpu.memory_space<vmem>>, vector<16x1408xbf16>
    %c0_1 = arith.constant 0 : index
    %c0_2 = arith.constant 0 : index
    %1 = vector.load %arg3[%c0_1, %c0_2] : memref<1408x256xbf16, #tpu.memory_space<vmem>>, vector<1408x256xbf16>
    %cst = arith.constant dense<0.000000e+00> : vector<16x256xf32>
    %2 = tpu.matmul %0, %1, %cst {dimension_numbers = #tpu.dot_dimension_numbers<[1], [0], [0], [1], [0, 0, 1, 1], [], []>} : vector<16x1408xbf16>, vector<1408x256xbf16>, vector<16x256xf32> -> vector<16x256xf32>
    %c0_3 = arith.constant 0 : index
    %c0_4 = arith.constant 0 : index
    %3 = vector.load %arg4[%c0_3, %c0_4] : memref<1x256xf32, #tpu.memory_space<vmem>>, vector<1x256xf32>
    %4 = vector.broadcast %3 : vector<1x256xf32> to vector<16x256xf32>
    %5 = arith.addf %2, %4 : vector<16x256xf32>
    %cst_5 = arith.constant 0.000000e+00 : f32
    %6 = vector.broadcast %cst_5 : f32 to vector<16x256xf32>
    %7 = arith.maximumf %5, %6 : vector<16x256xf32>
    %8 = arith.truncf %7 : vector<16x256xf32> to vector<16x256xbf16>
    %c0_6 = arith.constant 0 : index
    %c0_7 = arith.constant 0 : index
    %9 = vector.load %arg5[%c0_6, %c0_7] : memref<16x256xbf16, #tpu.memory_space<vmem>>, vector<16x256xbf16>
    tpu.vector_store %arg5[%c0_6, %c0_7], %8 {strides = array<i32>} : memref<16x256xbf16, #tpu.memory_space<vmem>>, vector<16x256xbf16>,
    return
  }
  func.func @transform_0(%arg0: i32, %arg1: i32) -> (i32, i32) {
    %c0_i32 = arith.constant 0 : i32
    %c0_i32_0 = arith.constant 0 : i32
    return %arg0, %c0_i32 : i32, i32
  }
  func.func @transform_1(%arg0: i32, %arg1: i32) -> (i32, i32) {
    %c0_i32 = arith.constant 0 : i32
    %c0_i32_0 = arith.constant 0 : i32
    return %c0_i32, %arg1 : i32, i32
  }
  func.func @transform_2(%arg0: i32, %arg1: i32) -> (i32, i32) {
    %c0_i32 = arith.constant 0 : i32
    %c0_i32_0 = arith.constant 0 : i32
    return %c0_i32, %arg1 : i32, i32
  }
  func.func @transform_3(%arg0: i32, %arg1: i32) -> (i32, i32) {
    %c0_i32 = arith.constant 0 : i32
    return %arg0, %arg1 : i32, i32
  }
}

module attributes {stable_mosaic.version = 11 : i64} {
  func.func @kernel(%arg0: i32, %arg1: i32, %arg2: memref<16x2304xbf16, #tpu.memory_space<vmem>>, %arg3: memref<2304x256xbf16, #tpu.memory_space<vmem>>, %arg4: memref<1x256xf32, #tpu.memory_space<vmem>>, %arg5: memref<16x256xbf16, #tpu.memory_space<vmem>>) attributes {dimension_semantics = [#tpu.dimension_semantics<parallel>, #tpu.dimension_semantics<parallel>], iteration_bounds = array<i64: 2, 1>, scalar_prefetch = 0 : i64, scratch_operands = 0 : i64, tpu.core_type = #tpu.core_type<tc>, window_params = [{transform_indices = @transform_0, window_bounds = array<i64: 16, 2304>}, {transform_indices = @transform_1, window_bounds = array<i64: 2304, 256>}, {transform_indices = @transform_2, window_bounds = array<i64: 1, 256>}, {transform_indices = @transform_3, window_bounds = array<i64: 16, 256>}]} {
    %c0 = arith.constant 0 : index
    %c0_0 = arith.constant 0 : index
    %0 = vector.load %arg2[%c0, %c0_0] : memref<16x2304xbf16, #tpu.memory_space<vmem>>, vector<16x2304xbf16>
    %c0_1 = arith.constant 0 : index
    %c0_2 = arith.constant 0 : index
    %1 = vector.load %arg3[%c0_1, %c0_2] : memref<2304x256xbf16, #tpu.memory_space<vmem>>, vector<2304x256xbf16>
    %cst = arith.constant dense<0.000000e+00> : vector<16x256xf32>
    %2 = tpu.matmul %0, %1, %cst {dimension_numbers = #tpu.dot_dimension_numbers<[1], [0], [0], [1], [0, 0, 1, 1], [], []>} : vector<16x2304xbf16>, vector<2304x256xbf16>, vector<16x256xf32> -> vector<16x256xf32>
    %c0_3 = arith.constant 0 : index
    %c0_4 = arith.constant 0 : index
    %3 = vector.load %arg4[%c0_3, %c0_4] : memref<1x256xf32, #tpu.memory_space<vmem>>, vector<1x256xf32>
    %4 = vector.broadcast %3 : vector<1x256xf32> to vector<16x256xf32>
    %5 = arith.addf %2, %4 : vector<16x256xf32>
    %cst_5 = arith.constant 0.000000e+00 : f32
    %6 = vector.broadcast %cst_5 : f32 to vector<16x256xf32>
    %7 = arith.maximumf %5, %6 : vector<16x256xf32>
    %8 = arith.truncf %7 : vector<16x256xf32> to vector<16x256xbf16>
    %c0_6 = arith.constant 0 : index
    %c0_7 = arith.constant 0 : index
    %9 = vector.load %arg5[%c0_6, %c0_7] : memref<16x256xbf16, #tpu.memory_space<vmem>>, vector<16x256xbf16>
    tpu.vector_store %arg5[%c0_6, %c0_7], %8 {strides = array<i32>} : memref<16x256xbf16, #tpu.memory_space<vmem>>, vector<16x256xbf16>,
    return
  }
  func.func @transform_0(%arg0: i32, %arg1: i32) -> (i32, i32) {
    %c0_i32 = arith.constant 0 : i32
    %c0_i32_0 = arith.constant 0 : i32
    return %arg0, %c0_i32 : i32, i32
  }
  func.func @transform_1(%arg0: i32, %arg1: i32) -> (i32, i32) {
    %c0_i32 = arith.constant 0 : i32
    %c0_i32_0 = arith.constant 0 : i32
    return %c0_i32, %arg1 : i32, i32
  }
  func.func @transform_2(%arg0: i32, %arg1: i32) -> (i32, i32) {
    %c0_i32 = arith.constant 0 : i32
    %c0_i32_0 = arith.constant 0 : i32
    return %c0_i32, %arg1 : i32, i32
  }
  func.func @transform_3(%arg0: i32, %arg1: i32) -> (i32, i32) {
    %c0_i32 = arith.constant 0 : i32
    return %arg0, %arg1 : i32, i32
  }
}

module attributes {stable_mosaic.version = 11 : i64} {
  func.func @kernel(%arg0: i32, %arg1: i32, %arg2: memref<16x2304xbf16, #tpu.memory_space<vmem>>, %arg3: memref<2304x256xbf16, #tpu.memory_space<vmem>>, %arg4: memref<1x256xf32, #tpu.memory_space<vmem>>, %arg5: memref<16x256xbf16, #tpu.memory_space<vmem>>, %arg6: memref<16x256xbf16, #tpu.memory_space<vmem>>) attributes {dimension_semantics = [#tpu.dimension_semantics<parallel>, #tpu.dimension_semantics<parallel>], iteration_bounds = array<i64: 2, 1>, scalar_prefetch = 0 : i64, scratch_operands = 0 : i64, tpu.core_type = #tpu.core_type<tc>, window_params = [{transform_indices = @transform_0, window_bounds = array<i64: 16, 2304>}, {transform_indices = @transform_1, window_bounds = array<i64: 2304, 256>}, {transform_indices = @transform_2, window_bounds = array<i64: 1, 256>}, {transform_indices = @transform_3, window_bounds = array<i64: 16, 256>}, {transform_indices = @transform_4, window_bounds = array<i64: 16, 256>}]} {
    %c0 = arith.constant 0 : index
    %c0_0 = arith.constant 0 : index
    %0 = vector.load %arg2[%c0, %c0_0] : memref<16x2304xbf16, #tpu.memory_space<vmem>>, vector<16x2304xbf16>
    %c0_1 = arith.constant 0 : index
    %c0_2 = arith.constant 0 : index
    %1 = vector.load %arg3[%c0_1, %c0_2] : memref<2304x256xbf16, #tpu.memory_space<vmem>>, vector<2304x256xbf16>
    %cst = arith.constant dense<0.000000e+00> : vector<16x256xf32>
    %2 = tpu.matmul %0, %1, %cst {dimension_numbers = #tpu.dot_dimension_numbers<[1], [0], [0], [1], [0, 0, 1, 1], [], []>} : vector<16x2304xbf16>, vector<2304x256xbf16>, vector<16x256xf32> -> vector<16x256xf32>
    %c0_3 = arith.constant 0 : index
    %c0_4 = arith.constant 0 : index
    %3 = vector.load %arg4[%c0_3, %c0_4] : memref<1x256xf32, #tpu.memory_space<vmem>>, vector<1x256xf32>
    %4 = vector.broadcast %3 : vector<1x256xf32> to vector<16x256xf32>
    %5 = arith.addf %2, %4 : vector<16x256xf32>
    %c0_5 = arith.constant 0 : index
    %c0_6 = arith.constant 0 : index
    %6 = vector.load %arg5[%c0_5, %c0_6] : memref<16x256xbf16, #tpu.memory_space<vmem>>, vector<16x256xbf16>
    %7 = arith.extf %6 : vector<16x256xbf16> to vector<16x256xf32>
    %8 = arith.addf %5, %7 : vector<16x256xf32>
    %9 = arith.truncf %8 : vector<16x256xf32> to vector<16x256xbf16>
    %c0_7 = arith.constant 0 : index
    %c0_8 = arith.constant 0 : index
    %10 = vector.load %arg6[%c0_7, %c0_8] : memref<16x256xbf16, #tpu.memory_space<vmem>>, vector<16x256xbf16>
    tpu.vector_store %arg6[%c0_7, %c0_8], %9 {strides = array<i32>} : memref<16x256xbf16, #tpu.memory_space<vmem>>, vector<16x256xbf16>,
    return
  }
  func.func @transform_0(%arg0: i32, %arg1: i32) -> (i32, i32) {
    %c0_i32 = arith.constant 0 : i32
    %c0_i32_0 = arith.constant 0 : i32
    return %arg0, %c0_i32 : i32, i32
  }
  func.func @transform_1(%arg0: i32, %arg1: i32) -> (i32, i32) {
    %c0_i32 = arith.constant 0 : i32
    %c0_i32_0 = arith.constant 0 : i32
    return %c0_i32, %arg1 : i32, i32
  }
  func.func @transform_2(%arg0: i32, %arg1: i32) -> (i32, i32) {
    %c0_i32 = arith.constant 0 : i32
    %c0_i32_0 = arith.constant 0 : i32
    return %c0_i32, %arg1 : i32, i32
  }
  func.func @transform_3(%arg0: i32, %arg1: i32) -> (i32, i32) {
    %c0_i32 = arith.constant 0 : i32
    return %arg0, %arg1 : i32, i32
  }
  func.func @transform_4(%arg0: i32, %arg1: i32) -> (i32, i32) {
    %c0_i32 = arith.constant 0 : i32
    return %arg0, %arg1 : i32, i32
  }
}

module attributes {stable_mosaic.version = 11 : i64} {
  func.func @kernel(%arg0: i32, %arg1: i32, %arg2: memref<32x1024xbf16, #tpu.memory_space<vmem>>, %arg3: memref<1024x256xbf16, #tpu.memory_space<vmem>>, %arg4: memref<1x256xf32, #tpu.memory_space<vmem>>, %arg5: memref<32x256xbf16, #tpu.memory_space<vmem>>) attributes {dimension_semantics = [#tpu.dimension_semantics<parallel>, #tpu.dimension_semantics<parallel>], iteration_bounds = array<i64: 1, 2>, scalar_prefetch = 0 : i64, scratch_operands = 0 : i64, tpu.core_type = #tpu.core_type<tc>, window_params = [{transform_indices = @transform_0, window_bounds = array<i64: 32, 1024>}, {transform_indices = @transform_1, window_bounds = array<i64: 1024, 256>}, {transform_indices = @transform_2, window_bounds = array<i64: 1, 256>}, {transform_indices = @transform_3, window_bounds = array<i64: 32, 256>}]} {
    %c0 = arith.constant 0 : index
    %c0_0 = arith.constant 0 : index
    %0 = vector.load %arg2[%c0, %c0_0] : memref<32x1024xbf16, #tpu.memory_space<vmem>>, vector<32x1024xbf16>
    %c0_1 = arith.constant 0 : index
    %c0_2 = arith.constant 0 : index
    %1 = vector.load %arg3[%c0_1, %c0_2] : memref<1024x256xbf16, #tpu.memory_space<vmem>>, vector<1024x256xbf16>
    %cst = arith.constant dense<0.000000e+00> : vector<32x256xf32>
    %2 = tpu.matmul %0, %1, %cst {dimension_numbers = #tpu.dot_dimension_numbers<[1], [0], [0], [1], [0, 0, 1, 1], [], []>} : vector<32x1024xbf16>, vector<1024x256xbf16>, vector<32x256xf32> -> vector<32x256xf32>
    %c0_3 = arith.constant 0 : index
    %c0_4 = arith.constant 0 : index
    %3 = vector.load %arg4[%c0_3, %c0_4] : memref<1x256xf32, #tpu.memory_space<vmem>>, vector<1x256xf32>
    %4 = vector.broadcast %3 : vector<1x256xf32> to vector<32x256xf32>
    %5 = arith.addf %2, %4 : vector<32x256xf32>
    %cst_5 = arith.constant 0.000000e+00 : f32
    %6 = vector.broadcast %cst_5 : f32 to vector<32x256xf32>
    %7 = arith.maximumf %5, %6 : vector<32x256xf32>
    %8 = arith.truncf %7 : vector<32x256xf32> to vector<32x256xbf16>
    %c0_6 = arith.constant 0 : index
    %c0_7 = arith.constant 0 : index
    %9 = vector.load %arg5[%c0_6, %c0_7] : memref<32x256xbf16, #tpu.memory_space<vmem>>, vector<32x256xbf16>
    tpu.vector_store %arg5[%c0_6, %c0_7], %8 {strides = array<i32>} : memref<32x256xbf16, #tpu.memory_space<vmem>>, vector<32x256xbf16>,
    return
  }
  func.func @transform_0(%arg0: i32, %arg1: i32) -> (i32, i32) {
    %c0_i32 = arith.constant 0 : i32
    %c0_i32_0 = arith.constant 0 : i32
    return %arg0, %c0_i32 : i32, i32
  }
  func.func @transform_1(%arg0: i32, %arg1: i32) -> (i32, i32) {
    %c0_i32 = arith.constant 0 : i32
    %c0_i32_0 = arith.constant 0 : i32
    return %c0_i32, %arg1 : i32, i32
  }
  func.func @transform_2(%arg0: i32, %arg1: i32) -> (i32, i32) {
    %c0_i32 = arith.constant 0 : i32
    %c0_i32_0 = arith.constant 0 : i32
    return %c0_i32, %arg1 : i32, i32
  }
  func.func @transform_3(%arg0: i32, %arg1: i32) -> (i32, i32) {
    %c0_i32 = arith.constant 0 : i32
    return %arg0, %arg1 : i32, i32
  }
}

module attributes {stable_mosaic.version = 11 : i64} {
  func.func @kernel(%arg0: i32, %arg1: i32, %arg2: memref<64x512xbf16, #tpu.memory_space<vmem>>, %arg3: memref<512x256xbf16, #tpu.memory_space<vmem>>, %arg4: memref<1x256xf32, #tpu.memory_space<vmem>>, %arg5: memref<64x256xbf16, #tpu.memory_space<vmem>>) attributes {dimension_semantics = [#tpu.dimension_semantics<parallel>, #tpu.dimension_semantics<parallel>], iteration_bounds = array<i64: 2, 1>, scalar_prefetch = 0 : i64, scratch_operands = 0 : i64, tpu.core_type = #tpu.core_type<tc>, window_params = [{transform_indices = @transform_0, window_bounds = array<i64: 64, 512>}, {transform_indices = @transform_1, window_bounds = array<i64: 512, 256>}, {transform_indices = @transform_2, window_bounds = array<i64: 1, 256>}, {transform_indices = @transform_3, window_bounds = array<i64: 64, 256>}]} {
    %c0 = arith.constant 0 : index
    %c0_0 = arith.constant 0 : index
    %0 = vector.load %arg2[%c0, %c0_0] : memref<64x512xbf16, #tpu.memory_space<vmem>>, vector<64x512xbf16>
    %c0_1 = arith.constant 0 : index
    %c0_2 = arith.constant 0 : index
    %1 = vector.load %arg3[%c0_1, %c0_2] : memref<512x256xbf16, #tpu.memory_space<vmem>>, vector<512x256xbf16>
    %cst = arith.constant dense<0.000000e+00> : vector<64x256xf32>
    %2 = tpu.matmul %0, %1, %cst {dimension_numbers = #tpu.dot_dimension_numbers<[1], [0], [0], [1], [0, 0, 1, 1], [], []>} : vector<64x512xbf16>, vector<512x256xbf16>, vector<64x256xf32> -> vector<64x256xf32>
    %c0_3 = arith.constant 0 : index
    %c0_4 = arith.constant 0 : index
    %3 = vector.load %arg4[%c0_3, %c0_4] : memref<1x256xf32, #tpu.memory_space<vmem>>, vector<1x256xf32>
    %4 = vector.broadcast %3 : vector<1x256xf32> to vector<64x256xf32>
    %5 = arith.addf %2, %4 : vector<64x256xf32>
    %cst_5 = arith.constant 0.000000e+00 : f32
    %6 = vector.broadcast %cst_5 : f32 to vector<64x256xf32>
    %7 = arith.maximumf %5, %6 : vector<64x256xf32>
    %8 = arith.truncf %7 : vector<64x256xf32> to vector<64x256xbf16>
    %c0_6 = arith.constant 0 : index
    %c0_7 = arith.constant 0 : index
    %9 = vector.load %arg5[%c0_6, %c0_7] : memref<64x256xbf16, #tpu.memory_space<vmem>>, vector<64x256xbf16>
    tpu.vector_store %arg5[%c0_6, %c0_7], %8 {strides = array<i32>} : memref<64x256xbf16, #tpu.memory_space<vmem>>, vector<64x256xbf16>,
    return
  }
  func.func @transform_0(%arg0: i32, %arg1: i32) -> (i32, i32) {
    %c0_i32 = arith.constant 0 : i32
    %c0_i32_0 = arith.constant 0 : i32
    return %arg0, %c0_i32 : i32, i32
  }
  func.func @transform_1(%arg0: i32, %arg1: i32) -> (i32, i32) {
    %c0_i32 = arith.constant 0 : i32
    %c0_i32_0 = arith.constant 0 : i32
    return %c0_i32, %arg1 : i32, i32
  }
  func.func @transform_2(%arg0: i32, %arg1: i32) -> (i32, i32) {
    %c0_i32 = arith.constant 0 : i32
    %c0_i32_0 = arith.constant 0 : i32
    return %c0_i32, %arg1 : i32, i32
  }
  func.func @transform_3(%arg0: i32, %arg1: i32) -> (i32, i32) {
    %c0_i32 = arith.constant 0 : i32
    return %arg0, %arg1 : i32, i32
  }
}

module attributes {stable_mosaic.version = 11 : i64} {
  func.func @kernel(%arg0: i32, %arg1: i32, %arg2: memref<128x3200xbf16, #tpu.memory_space<vmem>>, %arg3: memref<3200x128xbf16, #tpu.memory_space<vmem>>, %arg4: memref<1x128xf32, #tpu.memory_space<vmem>>, %arg5: memref<128x128xf32, #tpu.memory_space<vmem>>) attributes {dimension_semantics = [#tpu.dimension_semantics<parallel>, #tpu.dimension_semantics<parallel>], iteration_bounds = array<i64: 4, 1>, scalar_prefetch = 0 : i64, scratch_operands = 0 : i64, tpu.core_type = #tpu.core_type<tc>, window_params = [{transform_indices = @transform_0, window_bounds = array<i64: 128, 3200>}, {transform_indices = @transform_1, window_bounds = array<i64: 3200, 128>}, {transform_indices = @transform_2, window_bounds = array<i64: 1, 128>}, {transform_indices = @transform_3, window_bounds = array<i64: 128, 128>}]} {
    %c0 = arith.constant 0 : index
    %c0_0 = arith.constant 0 : index
    %0 = vector.load %arg2[%c0, %c0_0] : memref<128x3200xbf16, #tpu.memory_space<vmem>>, vector<128x3200xbf16>
    %c0_1 = arith.constant 0 : index
    %c0_2 = arith.constant 0 : index
    %1 = vector.load %arg3[%c0_1, %c0_2] : memref<3200x128xbf16, #tpu.memory_space<vmem>>, vector<3200x128xbf16>
    %cst = arith.constant dense<0.000000e+00> : vector<128x128xf32>
    %2 = tpu.matmul %0, %1, %cst {dimension_numbers = #tpu.dot_dimension_numbers<[1], [0], [0], [1], [0, 0, 1, 1], [], []>} : vector<128x3200xbf16>, vector<3200x128xbf16>, vector<128x128xf32> -> vector<128x128xf32>
    %c0_3 = arith.constant 0 : index
    %c0_4 = arith.constant 0 : index
    %3 = vector.load %arg4[%c0_3, %c0_4] : memref<1x128xf32, #tpu.memory_space<vmem>>, vector<1x128xf32>
    %4 = vector.broadcast %3 : vector<1x128xf32> to vector<128x128xf32>
    %5 = arith.addf %2, %4 : vector<128x128xf32>
    %6 = math.tanh %5 : vector<128x128xf32>
    %cst_5 = arith.constant 1.000000e+00 : f32
    %7 = vector.broadcast %cst_5 : f32 to vector<128x128xf32>
    %8 = arith.addf %6, %7 : vector<128x128xf32>
    %cst_6 = arith.constant 5.000000e-01 : f32
    %9 = vector.broadcast %cst_6 : f32 to vector<128x128xf32>
    %10 = arith.mulf %8, %9 : vector<128x128xf32>
    %c0_7 = arith.constant 0 : index
    %c0_8 = arith.constant 0 : index
    %11 = vector.load %arg5[%c0_7, %c0_8] : memref<128x128xf32, #tpu.memory_space<vmem>>, vector<128x128xf32>
    tpu.vector_store %arg5[%c0_7, %c0_8], %10 {strides = array<i32>} : memref<128x128xf32, #tpu.memory_space<vmem>>, vector<128x128xf32>,
    return
  }
  func.func @transform_0(%arg0: i32, %arg1: i32) -> (i32, i32) {
    %c0_i32 = arith.constant 0 : i32
    %c0_i32_0 = arith.constant 0 : i32
    return %arg0, %c0_i32 : i32, i32
  }
  func.func @transform_1(%arg0: i32, %arg1: i32) -> (i32, i32) {
    %c0_i32 = arith.constant 0 : i32
    %c0_i32_0 = arith.constant 0 : i32
    return %c0_i32, %arg1 : i32, i32
  }
  func.func @transform_2(%arg0: i32, %arg1: i32) -> (i32, i32) {
    %c0_i32 = arith.constant 0 : i32
    %c0_i32_0 = arith.constant 0 : i32
    return %c0_i32, %arg1 : i32, i32
  }
  func.func @transform_3(%arg0: i32, %arg1: i32) -> (i32, i32) {
    %c0_i32 = arith.constant 0 : i32
    return %arg0, %arg1 : i32, i32
  }
}

</mosaic_0001>

<bundles_post_ra>
// kernel: forward.19
= control target key start
LH: loop header
LB: loop body
LE: loop exit
PB: predicated region body
PF: predicated region fallthrough
CT: control target
= control target key end

     0   :  { %8 = vsyncpa [#allocation3], 0  ;;  %s1107_s0 = inlined_call_operand.vmem [shape: bf16[8,1024], index: 0, kind: input, shape index: {}]   ;;  %s1108_s1 = inlined_call_operand.hbm [shape: bf16[1024,128], index: 1, kind: input, shape index: {}]   ;;  %s1109_s2 = inlined_call_operand.hbm [shape: f32[1,128], index: 2, kind: input, shape index: {}]   ;;  %s1110_s3 = inlined_call_operand.vmem [shape: f32[8,128], index: 3, kind: output, shape index: {}]  }
   0x1   :  { %9 = vsyncpa [#allocation5], 0  ;;  %s1044_s12 = smov [#allocation2]   ;;  %s996_s16 = scalar_lea.hbm %s1108_s1, 8192 }
   0x2   :  { %s17_s13 = sshll.u32 %s1044_s12, 4  ;;  %p997_p0 = scmp.ne.s32.totalorder %s1108_s1, %s996_s16  ;;  %s18_s13 = int_to_ptr.vmem [resolvable:$true] %s17_s13 }
   0x3   :  { %p1000_p1 = scmp.lt.u32.totalorder %s996_s16, %s1108_s1 }
   0x5   :  { %p1002_p2 = pnand %p1000_p1, %p997_p0 }
   0x7   :  { %1005 = shalt.err (!%p1002_p2)
}
   0x8   :  { %s1006_s21 = scalar_lea.vmem %s18_s13, 8192  ;;  %p1011_p4 = scmp.lt.s32.totalorder %s18_s13, %s18_s13 }
   0x9   :  { %p1007_p3 = scmp.ne.s32.totalorder %s18_s13, %s1006_s21  ;;  %p1012_p5 = scmp.lt.s32.totalorder %s1006_s21, %s1006_s21 }
   0xb   :  { %p1013_p6 = por %p1012_p5, %p1011_p4 }
   0xd   :  { %p1014_p7 = pnand %p1013_p6, %p1007_p3 }
   0xf   :  { %1017 = shalt.err (!%p1014_p7)
}
  0x10   :  { %s1045_s22 = smov 64   ;;  %s1046_s23 = smov 4  }
  0x11   :  { %23 = dma.hbm_to_vmem [thread:$0]  %s1108_s1, 8192, %s18_s13, [#allocation3], %s1045_s22, %s1045_s22, %s1046_s23  }
  0x12   :  { %s1047_s26 = smov [#allocation4]   ;;  %s1018_s30 = scalar_lea.hbm %s1109_s2, 16 }
  0x13   :  { %s30_s27 = sshll.u32 %s1047_s26, 4  ;;  %p1019_p8 = scmp.ne.s32.totalorder %s1109_s2, %s1018_s30  ;;  %s31_s27 = int_to_ptr.vmem [resolvable:$true] %s30_s27 }
  0x14   :  { %p1022_p9 = scmp.lt.u32.totalorder %s1018_s30, %s1109_s2 }
  0x16   :  { %p1024_p10 = pnand %p1022_p9, %p1019_p8 }
  0x18   :  { %1027 = shalt.err (!%p1024_p10)
}
  0x19   :  { %s1028_s8 = scalar_lea.vmem %s31_s27, 16  ;;  %s1032_s1 = scalar_lea.vmem %s31_s27, 32 }
  0x1a   :  { %p1029_p11 = scmp.ne.s32.totalorder %s31_s27, %s1028_s8  ;;  %p1033_p12 = scmp.lt.s32.totalorder %s31_s27, %s31_s27 }
  0x1b   :  { %p1034_p13 = scmp.lt.s32.totalorder %s1032_s1, %s1028_s8 }
  0x1d   :  { %p1035_p0 = por %p1034_p13, %p1033_p12 }
  0x1f   :  { %p1036_p1 = pnand %p1035_p0, %p1029_p11 }
  0x21   :  { %1039 = shalt.err (!%p1036_p1)
}
  0x22   :  { %33 = dma.hbm_to_vmem [thread:$0]  %s1109_s2, 16, %s31_s27, [#allocation5]  }
  0x23   :  { %1040 = dma.done.wait [#allocation3], 8192  }
  0x24   :  { %1041 = vsyncadd [#allocation3], 4294959104 }
  0x25   :  { %1042 = dma.done.wait [#allocation5], 16  }
  0x26   :  { %1043 = vsyncadd [#allocation5], 4294967280  ;;  %v924_v0 = vld [vmem:[#allocation2 + $0x40] sm:$0xff]   ;;  %v928_v4 = vld [vmem:[#allocation2 + $0x48] sm:$0xff]  }
  0x27   :  { %v925_v1 = vld [vmem:[#allocation2 + $0xc0] sm:$0xff]   ;;  %832 = vmatprep.subr.bf16.mxu0 %v924_v0  ;;  %v929_v5 = vld [vmem:[#allocation2 + $0xc8] sm:$0xff]   ;;  %v932_v8 = vld [vmem:[#allocation2 + $0x50] sm:$0xff]  }
  0x28   :  { %v926_v2 = vld [vmem:[#allocation2] sm:$0xff]   ;;  %854 = vmatprep.subr.bf16.mxu1 %v925_v1  ;;  %v930_v6 = vld [vmem:[#allocation2 + $0x8] sm:$0xff]   ;;  %v933_v9 = vld [vmem:[#allocation2 + $0xd0] sm:$0xff]  }
  0x29   :  { %v927_v3 = vld [vmem:[#allocation2 + $0x80] sm:$0xff]   ;;  %833 = vmatpush3.bf16.msra.mxu0 %v926_v2  ;;  %v931_v7 = vld [vmem:[#allocation2 + $0x88] sm:$0xff]   ;;  %v934_v10 = vld [vmem:[#allocation2 + $0x10] sm:$0xff]  }
  0x2a   :  { %855 = vmatpush3.bf16.msra.mxu1 %v927_v3  ;;  %834 = vmatprep.subr.bf16.mxu0 %v928_v4  ;;  %v935_v11 = vld [vmem:[#allocation2 + $0x90] sm:$0xff]   ;;  %v936_v12 = vld [vmem:[#allocation2 + $0x58] sm:$0xff]   ;;  %v940_v16 = vld [vmem:[#allocation2 + $0x60] sm:$0xff]  }
  0x2b   :  { %856 = vmatprep.subr.bf16.mxu1 %v929_v5  ;;  %v937_v13 = vld [vmem:[#allocation2 + $0xd8] sm:$0xff]   ;;  %v941_v17 = vld [vmem:[#allocation2 + $0xe0] sm:$0xff]   ;;  %v944_v20 = vld [vmem:[#allocation2 + $0x68] sm:$0xff]  }
  0x2c   :  { %v938_v14 = vld [vmem:[#allocation2 + $0x18] sm:$0xff]   ;;  %v942_v18 = vld [vmem:[#allocation2 + $0x20] sm:$0xff]   ;;  %v945_v21 = vld [vmem:[#allocation2 + $0xe8] sm:$0xff]  }
  0x2d   :  { %835 = vmatpush3.bf16.msra.mxu0 %v930_v6  ;;  %v939_v15 = vld [vmem:[#allocation2 + $0x98] sm:$0xff]   ;;  %v943_v19 = vld [vmem:[#allocation2 + $0xa0] sm:$0xff]   ;;  %v946_v22 = vld [vmem:[#allocation2 + $0x28] sm:$0xff]  }
  0x2e   :  { %857 = vmatpush3.bf16.msra.mxu1 %v931_v7  ;;  %836 = vmatprep.subr.bf16.mxu0 %v932_v8  ;;  %v947_v23 = vld [vmem:[#allocation2 + $0xa8] sm:$0xff]   ;;  %v948_v24 = vld [vmem:[#allocation2 + $0x70] sm:$0xff]   ;;  %v952_v28 = vld [vmem:[#allocation2 + $0x78] sm:$0xff]  }
  0x2f   :  { %858 = vmatprep.subr.bf16.mxu1 %v933_v9  ;;  %v949_v25 = vld [vmem:[#allocation2 + $0xf0] sm:$0xff]   ;;  %v953_v29 = vld [vmem:[#allocation2 + $0xf8] sm:$0xff]   ;;  %v41_v32 = vld [vmem:[%s1107_s0] sm:$0xff] }
  0x30   :  { %v950_v26 = vld [vmem:[#allocation2 + $0x30] sm:$0xff]   ;;  %v954_v30 = vld [vmem:[#allocation2 + $0x38] sm:$0xff]   ;;  %v42_v33 = vld [vmem:[%s1107_s0 + $0x8] sm:$0xff]  ;;  %v760_v34 = vcombine.low %v41_v32, %v41_v32  ;;  %v761_v35 = vcombine.high %v41_v32, %v41_v32 }
  0x31   :  { %837 = vmatpush3.bf16.msra.mxu0 %v934_v10  ;;  %v951_v27 = vld [vmem:[#allocation2 + $0xb0] sm:$0xff]   ;;  %v955_v31 = vld [vmem:[#allocation2 + $0xb8] sm:$0xff]   ;;  %v762_v36 = vcombine.low %v42_v33, %v42_v33  ;;  %v763_v37 = vcombine.high %v42_v33, %v42_v33  ;;  %v960_v38 = vld [vmem:[#allocation2 + $0x140] sm:$0xff]  }
  0x32   :  { %859 = vmatpush3.bf16.msra.mxu1 %v935_v11  ;;  %838 = vmatprep.subr.bf16.mxu0 %v936_v12  ;;  %v961_v39 = vld [vmem:[#allocation2 + $0x1c0] sm:$0xff]   ;;  %v964_v42 = vld [vmem:[#allocation2 + $0x148] sm:$0xff]   ;;  %v968_v46 = vld [vmem:[#allocation2 + $0x150] sm:$0xff]  }
  0x33   :  { %860 = vmatprep.subr.bf16.mxu1 %v937_v13  ;;  %624 = vmatprep.mubr.bf16.mxu0 %v761_v35  ;;  %v962_v40 = vld [vmem:[#allocation2 + $0x100] sm:$0xff]   ;;  %v965_v43 = vld [vmem:[#allocation2 + $0x1c8] sm:$0xff]   ;;  %v969_v47 = vld [vmem:[#allocation2 + $0x1d0] sm:$0xff]  }
  0x34   :  { %664 = vmatprep.mubr.bf16.mxu1 %v763_v37  ;;  %v963_v41 = vld [vmem:[#allocation2 + $0x180] sm:$0xff]   ;;  %v966_v44 = vld [vmem:[#allocation2 + $0x108] sm:$0xff]   ;;  %v970_v48 = vld [vmem:[#allocation2 + $0x110] sm:$0xff]  }
  0x35   :  { %839 = vmatpush3.bf16.msra.mxu0 %v938_v14  ;;  %v967_v45 = vld [vmem:[#allocation2 + $0x188] sm:$0xff]   ;;  %v971_v49 = vld [vmem:[#allocation2 + $0x190] sm:$0xff]   ;;  %v972_v50 = vld [vmem:[#allocation2 + $0x158] sm:$0xff]  }
  0x36   :  { %861 = vmatpush3.bf16.msra.mxu1 %v939_v15  ;;  %840 = vmatprep.subr.bf16.mxu0 %v940_v16  ;;  %v973_v51 = vld [vmem:[#allocation2 + $0x1d8] sm:$0xff]   ;;  %v976_v54 = vld [vmem:[#allocation2 + $0x160] sm:$0xff]   ;;  %v980_v58 = vld [vmem:[#allocation2 + $0x168] sm:$0xff]  }
  0x37   :  { %862 = vmatprep.subr.bf16.mxu1 %v941_v17  ;;  %v974_v52 = vld [vmem:[#allocation2 + $0x118] sm:$0xff]   ;;  %v977_v55 = vld [vmem:[#allocation2 + $0x1e0] sm:$0xff]   ;;  %v981_v59 = vld [vmem:[#allocation2 + $0x1e8] sm:$0xff]  }
  0x38   :  { %v975_v53 = vld [vmem:[#allocation2 + $0x198] sm:$0xff]   ;;  %v978_v56 = vld [vmem:[#allocation2 + $0x120] sm:$0xff]   ;;  %v982_v60 = vld [vmem:[#allocation2 + $0x128] sm:$0xff]  }
  0x39   :  { %841 = vmatpush3.bf16.msra.mxu0 %v942_v18  ;;  %v979_v57 = vld [vmem:[#allocation2 + $0x1a0] sm:$0xff]   ;;  %v983_v61 = vld [vmem:[#allocation2 + $0x1a8] sm:$0xff]   ;;  %v984_v62 = vld [vmem:[#allocation2 + $0x170] sm:$0xff]  }
  0x3a   :  { %863 = vmatpush3.bf16.msra.mxu1 %v943_v19  ;;  %842 = vmatprep.subr.bf16.mxu0 %v944_v20  ;;  %v985_v63 = vld [vmem:[#allocation2 + $0x1f0] sm:$0xff]   ;;  %v988_v2 = vld [vmem:[#allocation2 + $0x178] sm:$0xff]   ;;  %v759_v14 = vld [vmem:[#allocation4] ss:$0 sm:$0xff] }
  0x3b   :  { %864 = vmatprep.subr.bf16.mxu1 %v945_v21  ;;  %v986_v0 = vld [vmem:[#allocation2 + $0x130] sm:$0xff]   ;;  %v989_v3 = vld [vmem:[#allocation2 + $0x1f8] sm:$0xff]  }
  0x3c   :  { %v987_v1 = vld [vmem:[#allocation2 + $0x1b0] sm:$0xff]   ;;  %v990_v4 = vld [vmem:[#allocation2 + $0x138] sm:$0xff]  }
  0x3d   :  { %843 = vmatpush3.bf16.msra.mxu0 %v946_v22  ;;  %v991_v5 = vld [vmem:[#allocation2 + $0x1b8] sm:$0xff]   ;;  %v43_v6 = vld [vmem:[%s1107_s0 + $0x10] sm:$0xff] }
  0x3e   :  { %865 = vmatpush3.bf16.msra.mxu1 %v947_v23  ;;  %844 = vmatprep.subr.bf16.mxu0 %v948_v24  ;;  %v764_v7 = vcombine.low %v43_v6, %v43_v6  ;;  %v765_v8 = vcombine.high %v43_v6, %v43_v6  ;;  %v44_v9 = vld [vmem:[%s1107_s0 + $0x18] sm:$0xff] }
  0x3f   :  { %866 = vmatprep.subr.bf16.mxu1 %v949_v25  ;;  %v766_v10 = vcombine.low %v44_v9, %v44_v9  ;;  %v767_v11 = vcombine.high %v44_v9, %v44_v9 }
  0x41   :  { %845 = vmatpush3.bf16.msra.mxu0 %v950_v26 }
  0x42   :  { %867 = vmatpush3.bf16.msra.mxu1 %v951_v27  ;;  %846 = vmatprep.subr.bf16.mxu0 %v952_v28 }
  0x43   :  { %868 = vmatprep.subr.bf16.mxu1 %v953_v29 }
  0x45   :  { %847 = vmatpush3.bf16.msra.mxu0 %v954_v30 }
  0x46   :  { %869 = vmatpush3.bf16.msra.mxu1 %v955_v31  ;;  %876 = vmatprep.subr.bf16.mxu0 %v960_v38 }
  0x47   :  { %898 = vmatprep.subr.bf16.mxu1 %v961_v39 }
  0x48   :  { %625 = vmatmul.mubr.bf16.vlgmr.msra.gmra.mrb[0].mxu0 %v760_v34 }
  0x49   :  { %665 = vmatmul.mubr.bf16.vlgmr.msra.gmra.mrb[0].mxu1 %v762_v36  ;;  %877 = vmatpush3.bf16.msra.mxu0 %v962_v40 }
  0x4a   :  { %899 = vmatpush3.bf16.msra.mxu1 %v963_v41  ;;  %878 = vmatprep.subr.bf16.mxu0 %v964_v42 }
  0x4b   :  { %900 = vmatprep.subr.bf16.mxu1 %v965_v43  ;;  %704 = vmatprep.mubr.bf16.mxu0 %v765_v8 }
  0x4c   :  { %744 = vmatprep.mubr.bf16.mxu1 %v767_v11 }
  0x4d   :  { %879 = vmatpush3.bf16.msra.mxu0 %v966_v44 }
  0x4e   :  { %901 = vmatpush3.bf16.msra.mxu1 %v967_v45  ;;  %880 = vmatprep.subr.bf16.mxu0 %v968_v46 }
  0x4f   :  { %902 = vmatprep.subr.bf16.mxu1 %v969_v47 }
  0x51   :  { %881 = vmatpush3.bf16.msra.mxu0 %v970_v48 }
  0x52   :  { %903 = vmatpush3.bf16.msra.mxu1 %v971_v49  ;;  %882 = vmatprep.subr.bf16.mxu0 %v972_v50 }
  0x53   :  { %904 = vmatprep.subr.bf16.mxu1 %v973_v51 }
  0x55   :  { %883 = vmatpush3.bf16.msra.mxu0 %v974_v52 }
  0x56   :  { %905 = vmatpush3.bf16.msra.mxu1 %v975_v53  ;;  %884 = vmatprep.subr.bf16.mxu0 %v976_v54 }
  0x57   :  { %906 = vmatprep.subr.bf16.mxu1 %v977_v55 }
  0x59   :  { %885 = vmatpush3.bf16.msra.mxu0 %v978_v56 }
  0x5a   :  { %907 = vmatpush3.bf16.msra.mxu1 %v979_v57  ;;  %886 = vmatprep.subr.bf16.mxu0 %v980_v58 }
  0x5b   :  { %908 = vmatprep.subr.bf16.mxu1 %v981_v59 }
  0x5d   :  { %887 = vmatpush3.bf16.msra.mxu0 %v982_v60 }
  0x5e   :  { %909 = vmatpush3.bf16.msra.mxu1 %v983_v61  ;;  %888 = vmatprep.subr.bf16.mxu0 %v984_v62 }
  0x5f   :  { %910 = vmatprep.subr.bf16.mxu1 %v985_v63 }
  0x61   :  { %889 = vmatpush3.bf16.msra.mxu0 %v986_v0 }
  0x62   :  { %911 = vmatpush3.bf16.msra.mxu1 %v987_v1  ;;  %890 = vmatprep.subr.bf16.mxu0 %v988_v2 }
  0x63   :  { %912 = vmatprep.subr.bf16.mxu1 %v989_v3 }
  0x65   :  { %891 = vmatpush3.bf16.msra.mxu0 %v990_v4 }
  0x66   :  { %913 = vmatpush3.bf16.msra.mxu1 %v991_v5 }
  0x68   :  { %705 = vmatmul.mubr.bf16.vlgmr.msra.gmra.mrb[4].mxu0 %v764_v7 }
  0x69   :  { %745 = vmatmul.mubr.bf16.vlgmr.msra.gmra.mrb[4].mxu1 %v766_v10 }
 0x11b   :  { %v848_v12 = vpop.f32.mrb[0].mxu0 }
 0x11c   :  { %v870_v13 = vpop.f32.mrb[0].mxu1  ;;  %v849_v15 = vpop.f32.mrb[1].mxu0 }
 0x11d   :  { %v871_v16 = vpop.f32.mrb[1].mxu1  ;;  %v850_v17 = vadd.f32 %v849_v15, %v848_v12  ;;  %v851_v19 = vpop.f32.mrb[2].mxu0 }
 0x11e   :  { %v872_v18 = vadd.f32 %v871_v16, %v870_v13  ;;  %v873_v20 = vpop.f32.mrb[2].mxu1  ;;  %v852_v21 = vpop.f32.mrb[3].mxu0 }
 0x11f   :  { %v874_v22 = vpop.f32.mrb[3].mxu1  ;;  %v627_v23 = vadd.f32 %v850_v17, %v759_v14 }
 0x121   :  { %v667_v24 = vadd.f32 %v872_v18, %v627_v23 }
 0x13b   :  { %v892_v25 = vpop.f32.mrb[4].mxu0 }
 0x13c   :  { %v914_v26 = vpop.f32.mrb[4].mxu1  ;;  %v893_v27 = vpop.f32.mrb[5].mxu0 }
 0x13d   :  { %v915_v28 = vpop.f32.mrb[5].mxu1  ;;  %v894_v29 = vadd.f32 %v893_v27, %v892_v25  ;;  %v895_v31 = vpop.f32.mrb[6].mxu0 }
 0x13e   :  { %v916_v30 = vadd.f32 %v915_v28, %v914_v26  ;;  %v917_v32 = vpop.f32.mrb[6].mxu1  ;;  %v896_v33 = vpop.f32.mrb[7].mxu0 }
 0x13f   :  { %v918_v34 = vpop.f32.mrb[7].mxu1  ;;  %v707_v35 = vadd.f32 %v894_v29, %v667_v24 }
 0x141   :  { %v747_v36 = vadd.f32 %v916_v30, %v707_v35 }
 0x143   :  { %752 = vst [vmem:[%s1110_s3] sm:$0xff] %v747_v36 }
 0x144   :  { %757 = vsyncpa [#allocation3], 1 }
 0x145   :  { %758 = vsyncpa [#allocation5], 1 }

// kernel: forward.20
= control target key start
LH: loop header
LB: loop body
LE: loop exit
PB: predicated region body
PF: predicated region fallthrough
CT: control target
= control target key end

     0   :  { %s1138_s15 = smov 0   ;;  %s1140_s16 = smov 0   ;;  %s1321_s0 = inlined_call_operand.vmem [shape: bf16[512,256], index: 0, kind: input, shape index: {}]   ;;  %s1322_s1 = inlined_call_operand.vmem [shape: bf16[256,64], index: 1, kind: input, shape index: {}]   ;;  %s1323_s2 = inlined_call_operand.vmem [shape: f32[1,64], index: 2, kind: input, shape index: {}]   ;;  %s1324_s3 = inlined_call_operand.vmem [shape: f32[512,64], index: 3, kind: input, shape index: {}]   ;;  %s1325_s4 = inlined_call_operand.vmem [shape: bf16[512,64], index: 4, kind: output, shape index: {}]  }
   0x1   :  { %s1142_s17 = smov 0  }
   0x2 LB: > { %s26_s18 = sadd.s32 1, %s1107_s16  ;;  %p869_p0 = scmp.ge.s32.totalorder %s1111_s17, 1  ;;  %s1111_s17 = sphi %s1142_s17, %s14_s17   ;;  %s1107_s16 = sphi %s1140_s16, %s1327_s16   ;;  %s1103_s15 = sphi %s1138_s15, %s1326_s15  }
   0x3   : > { %p28_p1 = scmp.ge.s32.totalorder %s26_s18, 4  ;;  %p211_p2 = scmp.lt.s32.totalorder %s1111_s17, 5 }
   0x5   : > { %s1329_s18 = smov (%p28_p1, %s26_s18), 0  ;;  %p212_p3 = pnand %p869_p0, %p211_p2 }
   0x6   : > { %v1049_v0 = vld [vmem:[%s1322_s1 + $0x40] sm:$0xff] (!%p212_p3)   ;;  %s870_s21 = sshll.u32 (!%p212_p3), %s1103_s15, 4  ;;  %v1051_v2 = vld [vmem:[%s1322_s1 + $0x48] sm:$0xff] (!%p212_p3)   ;;  %v1053_v4 = vld [vmem:[%s1322_s1 + $0x50] sm:$0xff] (!%p212_p3)   ;;  %vm729_vm0 = vcmask (!%p212_p3), 519168  }
   0x7   : > { %215 = sbr.rel (%p212_p3) target bundleno = 290 (0x122), region = 36  ;;  %v1050_v1 = vld [vmem:[%s1322_s1] sm:$0xff] (!%p212_p3)   ;;  %945 = vmatprep.subr.bf16.mxu0 (!%p212_p3), %v1049_v0  ;;  %1009 = vmatprep.subr.bf16.mxu1 (!%p212_p3), %v1049_v0  ;;  %v1052_v3 = vld [vmem:[%s1322_s1 + $0x8] sm:$0xff] (!%p212_p3)   ;;  %p257_p4 = scmp.lt.s32.totalorder (!%p212_p3), %s870_s21, 63  ;;  %v1054_v5 = vld [vmem:[%s1322_s1 + $0x10] sm:$0xff] (!%p212_p3)  }
   0x8   : > { %946 = vmatpush3.bf16.msra.mxu0 (!%p212_p3), %v1050_v1  ;;  %1017 = vmatpush3.bf16.msra.mxu1 (!%p212_p3), %v1050_v1  ;;  %v1055_v6 = vld [vmem:[%s1322_s1 + $0x58] sm:$0xff] (!%p212_p3)   ;;  %v1057_v8 = vld [vmem:[%s1322_s1 + $0x60] sm:$0xff] (!%p212_p3)   ;;  %v1059_v10 = vld [vmem:[%s1322_s1 + $0x68] sm:$0xff] (!%p212_p3)  }
   0x9   : > { %947 = vmatprep.subr.bf16.mxu0 (!%p212_p3), %v1051_v2  ;;  %1010 = vmatprep.subr.bf16.mxu1 (!%p212_p3), %v1051_v2  ;;  %v1056_v7 = vld [vmem:[%s1322_s1 + $0x18] sm:$0xff] (!%p212_p3)   ;;  %v1058_v9 = vld [vmem:[%s1322_s1 + $0x20] sm:$0xff] (!%p212_p3)   ;;  %v1060_v13 = vld [vmem:[%s1322_s1 + $0x28] sm:$0xff] (!%p212_p3)  }
   0xa   : > { %v1061_v14 = vld [vmem:[%s1322_s1 + $0x70] sm:$0xff] (!%p212_p3)   ;;  %v1063_v16 = vld [vmem:[%s1322_s1 + $0x78] sm:$0xff] (!%p212_p3)   ;;  %v1240_v34 = vld [vmem:[%s1323_s2] ss:$0 sm:$0xff] (!%p212_p3) }
   0xb   : > { %v1062_v15 = vld [vmem:[%s1322_s1 + $0x30] sm:$0xff] (!%p212_p3)   ;;  %v1064_v17 = vld [vmem:[%s1322_s1 + $0x38] sm:$0xff] (!%p212_p3)  }
   0xc   : > { %948 = vmatpush3.bf16.msra.mxu0 (!%p212_p3), %v1052_v3  ;;  %1018 = vmatpush3.bf16.msra.mxu1 (!%p212_p3), %v1052_v3 }
   0xd   : > { %949 = vmatprep.subr.bf16.mxu0 (!%p212_p3), %v1053_v4  ;;  %1011 = vmatprep.subr.bf16.mxu1 (!%p212_p3), %v1053_v4 }
   0xe   : > { %s1331_s21 = smov (!%p257_p4, %s870_s21), 63 }
   0xf   : > { %s928_s10 = sshll.u32 %s1331_s21, 3 }
  0x10   : > { %950 = vmatpush3.bf16.msra.mxu0 %v1054_v5  ;;  %1019 = vmatpush3.bf16.msra.mxu1 %v1054_v5  ;;  %s1191_s15 = scalar_lea.vmem %s1321_s0, %s928_s10  ;;  %s1235_s11 = scalar_lea.vmem %s1324_s3, %s928_s10 }
  0x11   : > { %951 = vmatprep.subr.bf16.mxu0 %v1055_v6  ;;  %1012 = vmatprep.subr.bf16.mxu1 %v1055_v6  ;;  %v1067_v11 = vld [vmem:[%s1191_s15 + $0x4] ss:$8 sps:$4 sm:$0xff]   ;;  %v1065_v18 = vld [vmem:[%s1191_s15] ss:$8 sps:$4 sm:$0xff]   ;;  %v1071_v20 = vld [vmem:[%s1191_s15 + $0x14] ss:$8 sps:$4 sm:$0xff]  }
  0x12   : > { %v1070_v12 = vld [vmem:[%s1191_s15 + $0x44] ss:$8 sps:$4 sm:$0xff]   ;;  %552 = vmatprep.mubr.bf16.mxu0 %v1067_v11  ;;  %v1068_v19 = vld [vmem:[%s1191_s15 + $0x40] ss:$8 sps:$4 sm:$0xff]   ;;  %v1073_v21 = vld [vmem:[%s1191_s15 + $0x54] ss:$8 sps:$4 sm:$0xff]  }
  0x13   : > { %584 = vmatprep.mubr.bf16.mxu1 %v1070_v12  ;;  %v1075_v22 = vld [vmem:[%s1191_s15 + $0x10] ss:$8 sps:$4 sm:$0xff]   ;;  %v1077_v24 = vld [vmem:[%s1191_s15 + $0x24] ss:$8 sps:$4 sm:$0xff]   ;;  %v1081_v26 = vld [vmem:[%s1191_s15 + $0x20] ss:$8 sps:$4 sm:$0xff]  }
  0x14   : > { %952 = vmatpush3.bf16.msra.mxu0 %v1056_v7  ;;  %1020 = vmatpush3.bf16.msra.mxu1 %v1056_v7  ;;  %v1076_v23 = vld [vmem:[%s1191_s15 + $0x50] ss:$8 sps:$4 sm:$0xff]   ;;  %v1079_v25 = vld [vmem:[%s1191_s15 + $0x64] ss:$8 sps:$4 sm:$0xff]   ;;  %v1082_v27 = vld [vmem:[%s1191_s15 + $0x60] ss:$8 sps:$4 sm:$0xff]  }
  0x15   : > { %953 = vmatprep.subr.bf16.mxu0 %v1057_v8  ;;  %1013 = vmatprep.subr.bf16.mxu1 %v1057_v8  ;;  %v1083_v28 = vld [vmem:[%s1191_s15 + $0x34] ss:$8 sps:$4 sm:$0xff]   ;;  %v1087_v30 = vld [vmem:[%s1191_s15 + $0x30] ss:$8 sps:$4 sm:$0xff]   ;;  %v617_v41 = vld [vmem:[%s1235_s11] sm:$0xff]  ;;  %s876_s10 = sshll.u32 %s1331_s21, 2 }
  0x16   : > { %v1085_v29 = vld [vmem:[%s1191_s15 + $0x74] ss:$8 sps:$4 sm:$0xff]   ;;  %v1088_v31 = vld [vmem:[%s1191_s15 + $0x70] ss:$8 sps:$4 sm:$0xff]   ;;  %v625_v42 = vld [vmem:[%s1235_s11 + $0x40] sm:$0xff]  ;;  %s1254_s19 = scalar_lea.vmem %s1325_s4, %s876_s10 }
  0x17   : > { %v618_v49 = vld [vmem:[%s1235_s11 + $0x8] sm:$0xff]  ;;  %v619_v11 = vld [vmem:[%s1235_s11 + $0x10] sm:$0xff] }
  0x18   : > { %954 = vmatpush3.bf16.msra.mxu0 %v1058_v9  ;;  %1021 = vmatpush3.bf16.msra.mxu1 %v1058_v9  ;;  %v626_v50 = vld [vmem:[%s1235_s11 + $0x48] sm:$0xff]  ;;  %v627_v12 = vld [vmem:[%s1235_s11 + $0x50] sm:$0xff] }
  0x19   : > { %955 = vmatprep.subr.bf16.mxu0 %v1059_v10  ;;  %1014 = vmatprep.subr.bf16.mxu1 %v1059_v10 }
  0x1c   : > { %956 = vmatpush3.bf16.msra.mxu0 %v1060_v13  ;;  %1022 = vmatpush3.bf16.msra.mxu1 %v1060_v13 }
  0x1d   : > { %957 = vmatprep.subr.bf16.mxu0 %v1061_v14  ;;  %1015 = vmatprep.subr.bf16.mxu1 %v1061_v14 }
  0x20   : > { %958 = vmatpush3.bf16.msra.mxu0 %v1062_v15  ;;  %1023 = vmatpush3.bf16.msra.mxu1 %v1062_v15 }
  0x21   : > { %959 = vmatprep.subr.bf16.mxu0 %v1063_v16  ;;  %1016 = vmatprep.subr.bf16.mxu1 %v1063_v16 }
  0x24   : > { %960 = vmatpush3.bf16.msra.mxu0 %v1064_v17  ;;  %1024 = vmatpush3.bf16.msra.mxu1 %v1064_v17  ;;  %v620_v17 = vld [vmem:[%s1235_s11 + $0x18] sm:$0xff] }
  0x27   : > { %553 = vmatmul.mubr.bf16.vlgmr.msra.gmra.mrb[0].mxu0 %v1065_v18  ;;  %585 = vmatmul.mubr.bf16.vlgmr.msra.gmra.mrb[0].mxu1 %v1068_v19  ;;  %v628_v18 = vld [vmem:[%s1235_s11 + $0x58] sm:$0xff] }
  0x28   : > { %560 = vmatprep.mubr.bf16.mxu0 %v1071_v20  ;;  %592 = vmatprep.mubr.bf16.mxu1 %v1073_v21 }
  0x2f   : > { %561 = vmatmul.mubr.bf16.gmra.mrb[4].mxu0 %v1075_v22  ;;  %593 = vmatmul.mubr.bf16.gmra.mrb[4].mxu1 %v1076_v23 }
  0x30   : > { %568 = vmatprep.mubr.bf16.mxu0 %v1077_v24  ;;  %600 = vmatprep.mubr.bf16.mxu1 %v1079_v25 }
  0x37   : > { %569 = vmatmul.mubr.bf16.gmra.mrb[8].mxu0 %v1081_v26  ;;  %601 = vmatmul.mubr.bf16.gmra.mrb[8].mxu1 %v1082_v27 }
  0x38   : > { %576 = vmatprep.mubr.bf16.mxu0 %v1083_v28  ;;  %608 = vmatprep.mubr.bf16.mxu1 %v1085_v29 }
  0x3f   : > { %577 = vmatmul.mubr.bf16.gmra.mrb[12].mxu0 %v1087_v30  ;;  %609 = vmatmul.mubr.bf16.gmra.mrb[12].mxu1 %v1088_v31 }
  0xfa   : > { %v961_v32 = vpop.f32.mrb[0].mxu0  ;;  %v985_v33 = vpop.f32.mrb[0].mxu1 }
  0xfb   : > { %v962_v35 = vpop.f32.mrb[1].mxu0  ;;  %v986_v36 = vpop.f32.mrb[1].mxu1 }
  0xfc   : > { %v963_v37 = vadd.f32 %v962_v35, %v961_v32  ;;  %v987_v38 = vadd.f32 %v986_v36, %v985_v33  ;;  %v964_v39 = vpop.f32.mrb[2].mxu0  ;;  %v988_v40 = vpop.f32.mrb[2].mxu1 }
  0xfd   : > { %v965_v43 = vpop.f32.mrb[3].mxu0  ;;  %v989_v44 = vpop.f32.mrb[3].mxu1 }
  0xfe   : > { %v555_v45 = vadd.f32 %v963_v37, %v1240_v34  ;;  %v587_v46 = vadd.f32 %v987_v38, %v1240_v34  ;;  %v966_v47 = vadd.f32 %v965_v43, %v964_v39  ;;  %v990_v48 = vadd.f32 %v989_v44, %v988_v40  ;;  %v621_v40 = vld [vmem:[%s1235_s11 + $0x20] sm:$0xff] }
 0x100   : > { %v633_v51 = vadd.f32 %v617_v41, %v555_v45  ;;  %v641_v52 = vadd.f32 %v625_v42, %v587_v46  ;;  %v558_v53 = vadd.f32 %v966_v47, %v1240_v34  ;;  %v590_v54 = vadd.f32 %v990_v48, %v1240_v34  ;;  %v629_v41 = vld [vmem:[%s1235_s11 + $0x60] sm:$0xff] }
 0x102   : > { %v649_v55 = vmax.f32 %v633_v51, 0.0  ;;  %v657_v56 = vmax.f32 %v641_v52, 0.0  ;;  %v634_v57 = vadd.f32 %v618_v49, %v558_v53  ;;  %v642_v58 = vadd.f32 %v626_v50, %v590_v54  ;;  %v967_v59 = vpop.f32.mrb[4].mxu0  ;;  %v991_v60 = vpop.f32.mrb[4].mxu1  ;;  %v622_v52 = vld [vmem:[%s1235_s11 + $0x28] sm:$0xff] }
 0x103   : > { %v968_v61 = vpop.f32.mrb[5].mxu0  ;;  %v992_v62 = vpop.f32.mrb[5].mxu1  ;;  %v630_v53 = vld [vmem:[%s1235_s11 + $0x68] sm:$0xff] }
 0x104   : > { %v929_v63 = vpack.c.bf16 %v649_v55, %v649_v55  ;;  %v937_v0 = vpack.c.bf16 %v657_v56, %v657_v56  ;;  %v650_v1 = vmax.f32 %v634_v57, 0.0  ;;  %v658_v2 = vmax.f32 %v642_v58, 0.0  ;;  %v970_v3 = vpop.f32.mrb[6].mxu0  ;;  %v994_v4 = vpop.f32.mrb[6].mxu1 }
 0x105   : > { %v969_v5 = vadd.f32 %v968_v61, %v967_v59  ;;  %v993_v6 = vadd.f32 %v992_v62, %v991_v60  ;;  %v971_v7 = vpop.f32.mrb[7].mxu0  ;;  %v995_v8 = vpop.f32.mrb[7].mxu1 }
 0x106   : > { %730 = vst.msk [vmem:[%s1254_s19] sm:$0xf] %vm729_vm0, %v929_v63  ;;  %738 = vst.msk [vmem:[%s1254_s19 + $0x20] sm:$0xf] %vm729_vm0, %v937_v0  ;;  %v930_v9 = vpack.c.bf16 %v650_v1, %v650_v1  ;;  %v938_v10 = vpack.c.bf16 %v658_v2, %v658_v2  ;;  %v972_v13 = vadd.f32 %v971_v7, %v970_v3 }
 0x107   : > { %v996_v14 = vadd.f32 %v995_v8, %v994_v4  ;;  %v563_v15 = vadd.f32 %v969_v5, %v1240_v34  ;;  %v595_v16 = vadd.f32 %v993_v6, %v1240_v34  ;;  %v623_v8 = vld [vmem:[%s1235_s11 + $0x30] sm:$0xff] }
 0x108   : > { %731 = vst.msk [vmem:[%s1254_s19 + $0x4] sm:$0xf] %vm729_vm0, %v930_v9  ;;  %739 = vst.msk [vmem:[%s1254_s19 + $0x24] sm:$0xf] %vm729_vm0, %v938_v10  ;;  %v566_v19 = vadd.f32 %v972_v13, %v1240_v34  ;;  %v631_v9 = vld [vmem:[%s1235_s11 + $0x70] sm:$0xff] }
 0x109   : > { %v598_v20 = vadd.f32 %v996_v14, %v1240_v34  ;;  %v635_v21 = vadd.f32 %v619_v11, %v563_v15  ;;  %v643_v22 = vadd.f32 %v627_v12, %v595_v16 }
 0x10a   : > { %v636_v23 = vadd.f32 %v620_v17, %v566_v19  ;;  %v973_v25 = vpop.f32.mrb[8].mxu0  ;;  %v997_v26 = vpop.f32.mrb[8].mxu1  ;;  %v632_v19 = vld [vmem:[%s1235_s11 + $0x78] sm:$0xff] }
 0x10b   : > { %v644_v24 = vadd.f32 %v628_v18, %v598_v20  ;;  %v651_v27 = vmax.f32 %v635_v21, 0.0  ;;  %v659_v28 = vmax.f32 %v643_v22, 0.0  ;;  %v974_v29 = vpop.f32.mrb[9].mxu0  ;;  %v998_v30 = vpop.f32.mrb[9].mxu1  ;;  %v624_v18 = vld [vmem:[%s1235_s11 + $0x38] sm:$0xff] }
 0x10c   : > { %v652_v31 = vmax.f32 %v636_v23, 0.0  ;;  %v975_v33 = vadd.f32 %v974_v29, %v973_v25  ;;  %v999_v35 = vadd.f32 %v998_v30, %v997_v26  ;;  %v976_v36 = vpop.f32.mrb[10].mxu0  ;;  %v1000_v37 = vpop.f32.mrb[10].mxu1 }
 0x10d   : > { %v660_v32 = vmax.f32 %v644_v24, 0.0  ;;  %v931_v38 = vpack.c.bf16 %v651_v27, %v651_v27  ;;  %v939_v39 = vpack.c.bf16 %v659_v28, %v659_v28  ;;  %v977_v42 = vpop.f32.mrb[11].mxu0  ;;  %v1001_v43 = vpop.f32.mrb[11].mxu1 }
 0x10e   : > { %v932_v44 = vpack.c.bf16 %v652_v31, %v652_v31  ;;  %v571_v46 = vadd.f32 %v975_v33, %v1240_v34  ;;  %v603_v47 = vadd.f32 %v999_v35, %v1240_v34  ;;  %v978_v48 = vadd.f32 %v977_v42, %v976_v36 }
 0x10f   : > { %v940_v45 = vpack.c.bf16 %v660_v32, %v660_v32  ;;  %732 = vst.msk [vmem:[%s1254_s19 + $0x8] sm:$0xf] %vm729_vm0, %v931_v38  ;;  %740 = vst.msk [vmem:[%s1254_s19 + $0x28] sm:$0xf] %vm729_vm0, %v939_v39  ;;  %v1002_v49 = vadd.f32 %v1001_v43, %v1000_v37 }
 0x110   : > { %733 = vst.msk [vmem:[%s1254_s19 + $0xc] sm:$0xf] %vm729_vm0, %v932_v44  ;;  %v637_v50 = vadd.f32 %v621_v40, %v571_v46  ;;  %v645_v51 = vadd.f32 %v629_v41, %v603_v47  ;;  %v574_v54 = vadd.f32 %v978_v48, %v1240_v34 }
 0x111   : > { %741 = vst.msk [vmem:[%s1254_s19 + $0x2c] sm:$0xf] %vm729_vm0, %v940_v45  ;;  %v606_v55 = vadd.f32 %v1002_v49, %v1240_v34 }
 0x112   : > { %v653_v56 = vmax.f32 %v637_v50, 0.0  ;;  %v661_v57 = vmax.f32 %v645_v51, 0.0  ;;  %v979_v58 = vpop.f32.mrb[12].mxu0  ;;  %v1003_v59 = vpop.f32.mrb[12].mxu1  ;;  %v638_v60 = vadd.f32 %v622_v52, %v574_v54 }
 0x113   : > { %v646_v61 = vadd.f32 %v630_v53, %v606_v55  ;;  %v980_v62 = vpop.f32.mrb[13].mxu0  ;;  %v1004_v63 = vpop.f32.mrb[13].mxu1 }
 0x114   : > { %v933_v0 = vpack.c.bf16 %v653_v56, %v653_v56  ;;  %v941_v1 = vpack.c.bf16 %v661_v57, %v661_v57  ;;  %v981_v2 = vadd.f32 %v980_v62, %v979_v58  ;;  %v1005_v3 = vadd.f32 %v1004_v63, %v1003_v59  ;;  %v982_v4 = vpop.f32.mrb[14].mxu0  ;;  %v1006_v5 = vpop.f32.mrb[14].mxu1 }
 0x115   : > { %v654_v6 = vmax.f32 %v638_v60, 0.0  ;;  %v662_v7 = vmax.f32 %v646_v61, 0.0  ;;  %v983_v10 = vpop.f32.mrb[15].mxu0  ;;  %v1007_v11 = vpop.f32.mrb[15].mxu1 }
 0x116   : > { %734 = vst.msk [vmem:[%s1254_s19 + $0x10] sm:$0xf] %vm729_vm0, %v933_v0  ;;  %742 = vst.msk [vmem:[%s1254_s19 + $0x30] sm:$0xf] %vm729_vm0, %v941_v1  ;;  %v579_v12 = vadd.f32 %v981_v2, %v1240_v34  ;;  %v611_v13 = vadd.f32 %v1005_v3, %v1240_v34  ;;  %v984_v14 = vadd.f32 %v983_v10, %v982_v4 }
 0x117   : > { %v1008_v15 = vadd.f32 %v1007_v11, %v1006_v5  ;;  %v934_v16 = vpack.c.bf16 %v654_v6, %v654_v6  ;;  %v942_v17 = vpack.c.bf16 %v662_v7, %v662_v7 }
 0x118   : > { %v639_v20 = vadd.f32 %v623_v8, %v579_v12  ;;  %v647_v21 = vadd.f32 %v631_v9, %v611_v13  ;;  %v582_v22 = vadd.f32 %v984_v14, %v1240_v34 }
 0x119   : > { %v614_v23 = vadd.f32 %v1008_v15, %v1240_v34  ;;  %735 = vst.msk [vmem:[%s1254_s19 + $0x14] sm:$0xf] %vm729_vm0, %v934_v16  ;;  %743 = vst.msk [vmem:[%s1254_s19 + $0x34] sm:$0xf] %vm729_vm0, %v942_v17 }
 0x11a   : > { %v655_v24 = vmax.f32 %v639_v20, 0.0  ;;  %v663_v25 = vmax.f32 %v647_v21, 0.0  ;;  %v640_v26 = vadd.f32 %v624_v18, %v582_v22 }
 0x11b   : > { %v648_v27 = vadd.f32 %v632_v19, %v614_v23 }
 0x11c   : > { %v935_v28 = vpack.c.bf16 %v655_v24, %v655_v24  ;;  %v943_v29 = vpack.c.bf16 %v663_v25, %v663_v25  ;;  %v656_v30 = vmax.f32 %v640_v26, 0.0 }
 0x11d   : > { %v664_v31 = vmax.f32 %v648_v27, 0.0 }
 0x11e   : > { %736 = vst.msk [vmem:[%s1254_s19 + $0x18] sm:$0xf] %vm729_vm0, %v935_v28  ;;  %744 = vst.msk [vmem:[%s1254_s19 + $0x38] sm:$0xf] %vm729_vm0, %v943_v29  ;;  %v936_v32 = vpack.c.bf16 %v656_v30, %v656_v30 }
 0x11f   : > { %v944_v33 = vpack.c.bf16 %v664_v31, %v664_v31 }
 0x120   : > { %737 = vst.msk [vmem:[%s1254_s19 + $0x1c] sm:$0xf] %vm729_vm0, %v936_v32 }
 0x121   : > { %745 = vst.msk [vmem:[%s1254_s19 + $0x3c] sm:$0xf] %vm729_vm0, %v944_v33 }
 0x122 PF: > { %s14_s17 = sadd.s32 1, %s1111_s17   ;;  %s1326_s15 = smov %s1107_s16 }
 0x123   : > { %p11_p5 = scmp.ge.s32.totalorder %s14_s17, 6   ;;  %s1327_s16 = smov %s1329_s18 }
 0x125   :  { %13 = sbr.rel (!%p11_p5) target bundleno = 2 (0x2), region = 75 }

// kernel: forward.21
= control target key start
LH: loop header
LB: loop body
LE: loop exit
PB: predicated region body
PF: predicated region fallthrough
CT: control target
= control target key end

     0   :  { %s1523_s12 = smov 0   ;;  %s1525_s13 = smov 0   ;;  %s1745_s0 = inlined_call_operand.vmem [shape: bf16[128,768], index: 0, kind: input, shape index: {}]   ;;  %s1746_s1 = inlined_call_operand.vmem [shape: bf16[768,128], index: 1, kind: input, shape index: {}]   ;;  %s1747_s2 = inlined_call_operand.vmem [shape: f32[1,128], index: 2, kind: input, shape index: {}]   ;;  %s1748_s3 = inlined_call_operand.vmem [shape: bf16[128,128], index: 3, kind: output, shape index: {}]  }
   0x1   :  { %s1527_s14 = smov 0  }
   0x2 LB: > { %s25_s15 = sadd.s32 1, %s1497_s13  ;;  %p1115_p0 = scmp.ge.s32.totalorder %s1501_s14, 1  ;;  %s1501_s14 = sphi %s1527_s14, %s13_s14   ;;  %s1497_s13 = sphi %s1525_s13, %s1750_s13   ;;  %s1493_s12 = sphi %s1523_s12, %s1749_s12  }
   0x3   : > { %p27_p1 = scmp.ge.s32.totalorder %s25_s15, 2  ;;  %p170_p2 = scmp.lt.s32.totalorder %s1501_s14, 3 }
   0x5   : > { %s1752_s15 = smov (%p27_p1, %s25_s15), 0  ;;  %p171_p3 = pnand %p1115_p0, %p170_p2 }
   0x6   : > { %v1395_v0 = vld [vmem:[%s1746_s1 + $0x40] sm:$0xff] (!%p171_p3)   ;;  %v1399_v4 = vld [vmem:[%s1746_s1 + $0x48] sm:$0xff] (!%p171_p3)   ;;  %v1403_v8 = vld [vmem:[%s1746_s1 + $0x50] sm:$0xff] (!%p171_p3)   ;;  %s1116_s23 = sshll.u32 (!%p171_p3), %s1493_s12, 3 }
   0x7   : > { %174 = sbr.rel (%p171_p3) target bundleno = 306 (0x132), region = 32  ;;  %v1396_v1 = vld [vmem:[%s1746_s1 + $0xc0] sm:$0xff] (!%p171_p3)   ;;  %1234 = vmatprep.subr.bf16.mxu0 (!%p171_p3), %v1395_v0  ;;  %v1400_v5 = vld [vmem:[%s1746_s1 + $0xc8] sm:$0xff] (!%p171_p3)   ;;  %v1404_v9 = vld [vmem:[%s1746_s1 + $0xd0] sm:$0xff] (!%p171_p3)   ;;  %p206_p4 = scmp.lt.s32.totalorder (!%p171_p3), %s1116_s23, 15 }
   0x8   : > { %v1397_v2 = vld [vmem:[%s1746_s1] sm:$0xff] (!%p171_p3)   ;;  %1274 = vmatprep.subr.bf16.mxu1 (!%p171_p3), %v1396_v1  ;;  %v1401_v6 = vld [vmem:[%s1746_s1 + $0x8] sm:$0xff] (!%p171_p3)   ;;  %v1405_v10 = vld [vmem:[%s1746_s1 + $0x10] sm:$0xff] (!%p171_p3)  }
   0x9   : > { %v1398_v3 = vld [vmem:[%s1746_s1 + $0x80] sm:$0xff] (!%p171_p3)   ;;  %1235 = vmatpush3.bf16.msra.mxu0 (!%p171_p3), %v1397_v2  ;;  %v1402_v7 = vld [vmem:[%s1746_s1 + $0x88] sm:$0xff] (!%p171_p3)   ;;  %v1406_v11 = vld [vmem:[%s1746_s1 + $0x90] sm:$0xff] (!%p171_p3)  }
   0xa   : > { %1275 = vmatpush3.bf16.msra.mxu1 (!%p171_p3), %v1398_v3  ;;  %1236 = vmatprep.subr.bf16.mxu0 (!%p171_p3), %v1399_v4  ;;  %v1407_v12 = vld [vmem:[%s1746_s1 + $0x58] sm:$0xff] (!%p171_p3)   ;;  %v1411_v16 = vld [vmem:[%s1746_s1 + $0x60] sm:$0xff] (!%p171_p3)   ;;  %v1415_v20 = vld [vmem:[%s1746_s1 + $0x68] sm:$0xff] (!%p171_p3)  }
   0xb   : > { %1276 = vmatprep.subr.bf16.mxu1 (!%p171_p3), %v1400_v5  ;;  %v1408_v13 = vld [vmem:[%s1746_s1 + $0xd8] sm:$0xff] (!%p171_p3)   ;;  %v1412_v17 = vld [vmem:[%s1746_s1 + $0xe0] sm:$0xff] (!%p171_p3)   ;;  %v1416_v21 = vld [vmem:[%s1746_s1 + $0xe8] sm:$0xff] (!%p171_p3)  }
   0xc   : > { %v1409_v14 = vld [vmem:[%s1746_s1 + $0x18] sm:$0xff] (!%p171_p3)   ;;  %v1413_v18 = vld [vmem:[%s1746_s1 + $0x20] sm:$0xff] (!%p171_p3)   ;;  %v1417_v22 = vld [vmem:[%s1746_s1 + $0x28] sm:$0xff] (!%p171_p3)  }
   0xd   : > { %1237 = vmatpush3.bf16.msra.mxu0 (!%p171_p3), %v1401_v6  ;;  %v1410_v15 = vld [vmem:[%s1746_s1 + $0x98] sm:$0xff] (!%p171_p3)   ;;  %v1414_v19 = vld [vmem:[%s1746_s1 + $0xa0] sm:$0xff] (!%p171_p3)   ;;  %v1418_v23 = vld [vmem:[%s1746_s1 + $0xa8] sm:$0xff] (!%p171_p3)  }
   0xe   : > { %1277 = vmatpush3.bf16.msra.mxu1 %v1402_v7  ;;  %1238 = vmatprep.subr.bf16.mxu0 %v1403_v8  ;;  %s1754_s23 = smov (!%p206_p4, %s1116_s23), 15  ;;  %v1419_v24 = vld [vmem:[%s1746_s1 + $0x70] sm:$0xff]   ;;  %v1423_v28 = vld [vmem:[%s1746_s1 + $0x78] sm:$0xff]   ;;  %v1433_v36 = vld [vmem:[%s1746_s1 + $0x140] sm:$0xff]  }
   0xf   : > { %1278 = vmatprep.subr.bf16.mxu1 %v1404_v9  ;;  %v1420_v25 = vld [vmem:[%s1746_s1 + $0xf0] sm:$0xff]   ;;  %s1370_s22 = smul.u32 24, %s1754_s23  ;;  %v1424_v29 = vld [vmem:[%s1746_s1 + $0xf8] sm:$0xff]   ;;  %v1434_v37 = vld [vmem:[%s1746_s1 + $0x100] sm:$0xff]  }
  0x10   : > { %v1421_v26 = vld [vmem:[%s1746_s1 + $0x30] sm:$0xff]   ;;  %v1425_v30 = vld [vmem:[%s1746_s1 + $0x38] sm:$0xff]   ;;  %v1435_v38 = vld [vmem:[%s1746_s1 + $0x148] sm:$0xff]  }
  0x11   : > { %1239 = vmatpush3.bf16.msra.mxu0 %v1405_v10  ;;  %v1422_v27 = vld [vmem:[%s1746_s1 + $0xb0] sm:$0xff]   ;;  %s1640_s6 = scalar_lea.vmem %s1745_s0, %s1370_s22  ;;  %v1426_v31 = vld [vmem:[%s1746_s1 + $0xb8] sm:$0xff]   ;;  %v1436_v39 = vld [vmem:[%s1746_s1 + $0x108] sm:$0xff]  }
  0x12   : > { %1279 = vmatpush3.bf16.msra.mxu1 %v1406_v11  ;;  %1240 = vmatprep.subr.bf16.mxu0 %v1407_v12  ;;  %v1427_v32 = vld [vmem:[%s1640_s6] ss:$24 sps:$4 sm:$0xff]   ;;  %v1429_v33 = vld [vmem:[%s1640_s6 + $0x4] ss:$24 sps:$4 sm:$0xff]   ;;  %v1437_v40 = vld [vmem:[%s1640_s6 + $0x34] ss:$24 sps:$4 sm:$0xff]  }
  0x13   : > { %1280 = vmatprep.subr.bf16.mxu1 %v1408_v13  ;;  %v1430_v34 = vld [vmem:[%s1640_s6 + $0x8] ss:$24 sps:$4 sm:$0xff]   ;;  %v1432_v35 = vld [vmem:[%s1640_s6 + $0xc] ss:$24 sps:$4 sm:$0xff]   ;;  %796 = vmatprep.mubr.bf16.mxu0 %v1429_v33  ;;  %v1439_v41 = vld [vmem:[%s1640_s6 + $0x3c] ss:$24 sps:$4 sm:$0xff]  }
  0x14   : > { %861 = vmatprep.mubr.bf16.mxu1 %v1432_v35  ;;  %v1441_v42 = vld [vmem:[%s1640_s6 + $0x30] ss:$24 sps:$4 sm:$0xff]   ;;  %v1445_v46 = vld [vmem:[%s1746_s1 + $0x158] sm:$0xff]   ;;  %v1449_v49 = vld [vmem:[%s1640_s6 + $0x6c] ss:$24 sps:$4 sm:$0xff]  }
  0x15   : > { %1241 = vmatpush3.bf16.msra.mxu0 %v1409_v14  ;;  %v1442_v43 = vld [vmem:[%s1640_s6 + $0x38] ss:$24 sps:$4 sm:$0xff]   ;;  %v1447_v48 = vld [vmem:[%s1640_s6 + $0x64] ss:$24 sps:$4 sm:$0xff]   ;;  %v1452_v52 = vld [vmem:[%s1640_s6 + $0x68] ss:$24 sps:$4 sm:$0xff]  }
  0x16   : > { %1281 = vmatpush3.bf16.msra.mxu1 %v1410_v15  ;;  %1242 = vmatprep.subr.bf16.mxu0 %v1411_v16  ;;  %v1443_v44 = vld [vmem:[%s1746_s1 + $0x150] sm:$0xff]   ;;  %v1446_v47 = vld [vmem:[%s1746_s1 + $0x118] sm:$0xff]   ;;  %v1453_v51 = vld [vmem:[%s1746_s1 + $0x160] sm:$0xff]  }
  0x17   : > { %1282 = vmatprep.subr.bf16.mxu1 %v1412_v17  ;;  %v1444_v45 = vld [vmem:[%s1746_s1 + $0x110] sm:$0xff]   ;;  %v1451_v50 = vld [vmem:[%s1640_s6 + $0x60] ss:$24 sps:$4 sm:$0xff]   ;;  %v1455_v54 = vld [vmem:[%s1746_s1 + $0x168] sm:$0xff]  }
  0x18   : > { %v1454_v53 = vld [vmem:[%s1746_s1 + $0x120] sm:$0xff]   ;;  %v1457_v55 = vld [vmem:[%s1640_s6 + $0x94] ss:$24 sps:$4 sm:$0xff]   ;;  %v1461_v59 = vld [vmem:[%s1640_s6 + $0x90] ss:$24 sps:$4 sm:$0xff]  }
  0x19   : > { %1243 = vmatpush3.bf16.msra.mxu0 %v1413_v18  ;;  %v1459_v56 = vld [vmem:[%s1640_s6 + $0x9c] ss:$24 sps:$4 sm:$0xff]   ;;  %v1456_v57 = vld [vmem:[%s1746_s1 + $0x128] sm:$0xff]   ;;  %v1462_v60 = vld [vmem:[%s1640_s6 + $0x98] ss:$24 sps:$4 sm:$0xff]  }
  0x1a   : > { %1283 = vmatpush3.bf16.msra.mxu1 %v1414_v19  ;;  %1244 = vmatprep.subr.bf16.mxu0 %v1415_v20  ;;  %v1463_v58 = vld [vmem:[%s1746_s1 + $0x170] sm:$0xff]   ;;  %v1465_v62 = vld [vmem:[%s1746_s1 + $0x178] sm:$0xff]   ;;  %v1120_v10 = vld [vmem:[%s1747_s2] ss:$0 sm:$0xff] }
  0x1b   : > { %1284 = vmatprep.subr.bf16.mxu1 %v1416_v21  ;;  %v1464_v61 = vld [vmem:[%s1746_s1 + $0x130] sm:$0xff]   ;;  %v1466_v1 = vld [vmem:[%s1746_s1 + $0x138] sm:$0xff]  }
  0x1c   : > { %v1469_v63 = vld [vmem:[%s1640_s6 + $0x14] ss:$24 sps:$4 sm:$0xff]   ;;  %v1467_v2 = vld [vmem:[%s1640_s6 + $0x10] ss:$24 sps:$4 sm:$0xff]   ;;  %v1473_v4 = vld [vmem:[%s1640_s6 + $0x44] ss:$24 sps:$4 sm:$0xff]  }
  0x1d   : > { %1245 = vmatpush3.bf16.msra.mxu0 %v1417_v22  ;;  %v1472_v0 = vld [vmem:[%s1640_s6 + $0x74] ss:$24 sps:$4 sm:$0xff]   ;;  %v1470_v3 = vld [vmem:[%s1640_s6 + $0x70] ss:$24 sps:$4 sm:$0xff]   ;;  %v1475_v5 = vld [vmem:[%s1640_s6 + $0xa4] ss:$24 sps:$4 sm:$0xff]  }
  0x1e   : > { %1285 = vmatpush3.bf16.msra.mxu1 %v1418_v23  ;;  %1246 = vmatprep.subr.bf16.mxu0 %v1419_v24  ;;  %v1477_v6 = vld [vmem:[%s1640_s6 + $0x40] ss:$24 sps:$4 sm:$0xff]  }
  0x1f   : > { %1286 = vmatprep.subr.bf16.mxu1 %v1420_v25  ;;  %v1478_v7 = vld [vmem:[%s1640_s6 + $0xa0] ss:$24 sps:$4 sm:$0xff]   ;;  %s1119_s6 = sshll.u32 %s1754_s23, 2 }
  0x20   : > { %s226_s30 = scalar_lea.vmem %s1748_s3, %s1119_s6 }
  0x21   : > { %1247 = vmatpush3.bf16.msra.mxu0 %v1421_v26 }
  0x22   : > { %1287 = vmatpush3.bf16.msra.mxu1 %v1422_v27  ;;  %1248 = vmatprep.subr.bf16.mxu0 %v1423_v28 }
  0x23   : > { %1288 = vmatprep.subr.bf16.mxu1 %v1424_v29 }
  0x25   : > { %1249 = vmatpush3.bf16.msra.mxu0 %v1425_v30 }
  0x26   : > { %1289 = vmatpush3.bf16.msra.mxu1 %v1426_v31  ;;  %1314 = vmatprep.subr.bf16.mxu0 %v1433_v36 }
  0x27   : > { %1354 = vmatprep.subr.bf16.mxu1 %v1433_v36 }
  0x28   : > { %797 = vmatmul.mubr.bf16.vlgmr.msra.gmra.mrb[0].mxu0 %v1427_v32 }
  0x29   : > { %862 = vmatmul.mubr.bf16.vlgmr.msra.gmra.mrb[0].mxu1 %v1430_v34  ;;  %1315 = vmatpush3.bf16.msra.mxu0 %v1434_v37 }
  0x2a   : > { %1362 = vmatpush3.bf16.msra.mxu1 %v1434_v37  ;;  %1316 = vmatprep.subr.bf16.mxu0 %v1435_v38 }
  0x2b   : > { %1355 = vmatprep.subr.bf16.mxu1 %v1435_v38  ;;  %804 = vmatprep.mubr.bf16.mxu0 %v1437_v40 }
  0x2c   : > { %869 = vmatprep.mubr.bf16.mxu1 %v1439_v41 }
  0x2d   : > { %1317 = vmatpush3.bf16.msra.mxu0 %v1436_v39 }
  0x2e   : > { %1363 = vmatpush3.bf16.msra.mxu1 %v1436_v39  ;;  %1318 = vmatprep.subr.bf16.mxu0 %v1443_v44 }
  0x2f   : > { %1356 = vmatprep.subr.bf16.mxu1 %v1443_v44 }
  0x30   : > { %805 = vmatmul.mubr.bf16.gmra.mrb[4].mxu0 %v1441_v42 }
  0x31   : > { %870 = vmatmul.mubr.bf16.gmra.mrb[4].mxu1 %v1442_v43  ;;  %1319 = vmatpush3.bf16.msra.mxu0 %v1444_v45 }
  0x32   : > { %1364 = vmatpush3.bf16.msra.mxu1 %v1444_v45  ;;  %1320 = vmatprep.subr.bf16.mxu0 %v1445_v46 }
  0x33   : > { %1357 = vmatprep.subr.bf16.mxu1 %v1445_v46  ;;  %812 = vmatprep.mubr.bf16.mxu0 %v1447_v48 }
  0x34   : > { %877 = vmatprep.mubr.bf16.mxu1 %v1449_v49 }
  0x35   : > { %1321 = vmatpush3.bf16.msra.mxu0 %v1446_v47 }
  0x36   : > { %1365 = vmatpush3.bf16.msra.mxu1 %v1446_v47  ;;  %1322 = vmatprep.subr.bf16.mxu0 %v1453_v51 }
  0x37   : > { %1358 = vmatprep.subr.bf16.mxu1 %v1453_v51 }
  0x38   : > { %813 = vmatmul.mubr.bf16.gmra.mrb[8].mxu0 %v1451_v50 }
  0x39   : > { %878 = vmatmul.mubr.bf16.gmra.mrb[8].mxu1 %v1452_v52  ;;  %1323 = vmatpush3.bf16.msra.mxu0 %v1454_v53 }
  0x3a   : > { %820 = vmatprep.mubr.bf16.mxu0 %v1457_v55  ;;  %1366 = vmatpush3.bf16.msra.mxu1 %v1454_v53 }
  0x3b   : > { %1324 = vmatprep.subr.bf16.mxu0 %v1455_v54  ;;  %1359 = vmatprep.subr.bf16.mxu1 %v1455_v54 }
  0x3c   : > { %885 = vmatprep.mubr.bf16.mxu1 %v1459_v56 }
  0x3d   : > { %1325 = vmatpush3.bf16.msra.mxu0 %v1456_v57 }
  0x3e   : > { %1367 = vmatpush3.bf16.msra.mxu1 %v1456_v57  ;;  %1326 = vmatprep.subr.bf16.mxu0 %v1463_v58 }
  0x3f   : > { %1360 = vmatprep.subr.bf16.mxu1 %v1463_v58 }
  0x40   : > { %821 = vmatmul.mubr.bf16.gmra.mrb[12].mxu0 %v1461_v59 }
  0x41   : > { %886 = vmatmul.mubr.bf16.gmra.mrb[12].mxu1 %v1462_v60  ;;  %926 = vmatprep.mubr.bf16.mxu0 %v1469_v63 }
  0x42   : > { %1327 = vmatpush3.bf16.msra.mxu0 %v1464_v61  ;;  %1368 = vmatpush3.bf16.msra.mxu1 %v1464_v61 }
  0x43   : > { %1328 = vmatprep.subr.bf16.mxu0 %v1465_v62  ;;  %1361 = vmatprep.subr.bf16.mxu1 %v1465_v62 }
  0x44   : > { %942 = vmatprep.mubr.bf16.mxu1 %v1472_v0 }
  0x46   : > { %1329 = vmatpush3.bf16.msra.mxu0 %v1466_v1  ;;  %1369 = vmatpush3.bf16.msra.mxu1 %v1466_v1 }
  0x49   : > { %927 = vmatmul.mubr.bf16.vlgmr.msra.gmra.mrb[16].mxu0 %v1467_v2  ;;  %943 = vmatmul.mubr.bf16.vlgmr.msra.gmra.mrb[16].mxu1 %v1470_v3 }
  0x4a   : > { %934 = vmatprep.mubr.bf16.mxu0 %v1473_v4  ;;  %950 = vmatprep.mubr.bf16.mxu1 %v1475_v5 }
  0x51   : > { %935 = vmatmul.mubr.bf16.gmra.mrb[20].mxu0 %v1477_v6  ;;  %951 = vmatmul.mubr.bf16.gmra.mrb[20].mxu1 %v1478_v7 }
  0xfb   : > { %v1250_v8 = vpop.f32.mrb[0].mxu0 }
  0xfc   : > { %v1290_v9 = vpop.f32.mrb[0].mxu1  ;;  %v1251_v11 = vpop.f32.mrb[1].mxu0 }
  0xfd   : > { %v1252_v12 = vadd.f32 %v1251_v11, %v1250_v8  ;;  %v1291_v13 = vpop.f32.mrb[1].mxu1  ;;  %v1253_v14 = vpop.f32.mrb[2].mxu0 }
  0xfe   : > { %v1292_v15 = vadd.f32 %v1291_v13, %v1290_v9  ;;  %v1293_v16 = vpop.f32.mrb[2].mxu1  ;;  %v1254_v17 = vpop.f32.mrb[3].mxu0 }
  0xff   : > { %v799_v18 = vadd.f32 %v1252_v12, %v1120_v10  ;;  %v1255_v19 = vadd.f32 %v1254_v17, %v1253_v14  ;;  %v1294_v20 = vpop.f32.mrb[3].mxu1 }
 0x100   : > { %v1295_v21 = vadd.f32 %v1294_v20, %v1293_v16 }
 0x101   : > { %v864_v22 = vadd.f32 %v1292_v15, %v799_v18  ;;  %v802_v23 = vadd.f32 %v1255_v19, %v1120_v10 }
 0x103   : > { %v1723_v24 = vadd.f32 %v1295_v21, %v802_v23  ;;  %v1256_v25 = vpop.f32.mrb[4].mxu0 }
 0x104   : > { %v1296_v26 = vpop.f32.mrb[4].mxu1  ;;  %v1257_v27 = vpop.f32.mrb[5].mxu0 }
 0x105   : > { %v1258_v28 = vadd.f32 %v1257_v27, %v1256_v25  ;;  %v1297_v29 = vpop.f32.mrb[5].mxu1  ;;  %v1259_v30 = vpop.f32.mrb[6].mxu0 }
 0x106   : > { %v1298_v31 = vadd.f32 %v1297_v29, %v1296_v26  ;;  %v1299_v32 = vpop.f32.mrb[6].mxu1  ;;  %v1260_v33 = vpop.f32.mrb[7].mxu0 }
 0x107   : > { %v807_v34 = vadd.f32 %v1258_v28, %v1120_v10  ;;  %v1261_v35 = vadd.f32 %v1260_v33, %v1259_v30  ;;  %v1300_v36 = vpop.f32.mrb[7].mxu1 }
 0x108   : > { %v1301_v37 = vadd.f32 %v1300_v36, %v1299_v32 }
 0x109   : > { %v1725_v38 = vadd.f32 %v1298_v31, %v807_v34  ;;  %v810_v39 = vadd.f32 %v1261_v35, %v1120_v10 }
 0x10b   : > { %v1727_v40 = vadd.f32 %v1301_v37, %v810_v39  ;;  %v1262_v41 = vpop.f32.mrb[8].mxu0 }
 0x10c   : > { %v1302_v42 = vpop.f32.mrb[8].mxu1  ;;  %v1263_v43 = vpop.f32.mrb[9].mxu0 }
 0x10d   : > { %v1264_v44 = vadd.f32 %v1263_v43, %v1262_v41  ;;  %v1303_v45 = vpop.f32.mrb[9].mxu1  ;;  %v1265_v46 = vpop.f32.mrb[10].mxu0 }
 0x10e   : > { %v1304_v47 = vadd.f32 %v1303_v45, %v1302_v42  ;;  %v1305_v48 = vpop.f32.mrb[10].mxu1  ;;  %v1266_v49 = vpop.f32.mrb[11].mxu0 }
 0x10f   : > { %v815_v50 = vadd.f32 %v1264_v44, %v1120_v10  ;;  %v1267_v51 = vadd.f32 %v1266_v49, %v1265_v46  ;;  %v1306_v52 = vpop.f32.mrb[11].mxu1 }
 0x110   : > { %v1307_v53 = vadd.f32 %v1306_v52, %v1305_v48 }
 0x111   : > { %v880_v54 = vadd.f32 %v1304_v47, %v815_v50  ;;  %v818_v55 = vadd.f32 %v1267_v51, %v1120_v10 }
 0x113   : > { %v883_v56 = vadd.f32 %v1307_v53, %v818_v55  ;;  %v1268_v57 = vpop.f32.mrb[12].mxu0 }
 0x114   : > { %v1308_v58 = vpop.f32.mrb[12].mxu1  ;;  %v1269_v59 = vpop.f32.mrb[13].mxu0 }
 0x115   : > { %v1270_v60 = vadd.f32 %v1269_v59, %v1268_v57  ;;  %v1309_v61 = vpop.f32.mrb[13].mxu1  ;;  %v1271_v62 = vpop.f32.mrb[14].mxu0 }
 0x116   : > { %v1310_v63 = vadd.f32 %v1309_v61, %v1308_v58  ;;  %v1311_v0 = vpop.f32.mrb[14].mxu1  ;;  %v1272_v1 = vpop.f32.mrb[15].mxu0 }
 0x117   : > { %v823_v2 = vadd.f32 %v1270_v60, %v1120_v10  ;;  %v1273_v3 = vadd.f32 %v1272_v1, %v1271_v62  ;;  %v1312_v4 = vpop.f32.mrb[15].mxu1 }
 0x118   : > { %v1313_v5 = vadd.f32 %v1312_v4, %v1311_v0 }
 0x119   : > { %v888_v6 = vadd.f32 %v1310_v63, %v823_v2  ;;  %v826_v7 = vadd.f32 %v1273_v3, %v1120_v10 }
 0x11b   : > { %v891_v8 = vadd.f32 %v1313_v5, %v826_v7 }
 0x11c   : > { %v1330_v9 = vpop.f32.mrb[16].mxu0  ;;  %v1342_v11 = vpop.f32.mrb[16].mxu1 }
 0x11d   : > { %v1331_v12 = vpop.f32.mrb[17].mxu0  ;;  %v1343_v14 = vpop.f32.mrb[17].mxu1 }
 0x11e   : > { %v1332_v13 = vadd.f32 %v1331_v12, %v1330_v9  ;;  %v1333_v15 = vpop.f32.mrb[18].mxu0  ;;  %v1344_v16 = vadd.f32 %v1343_v14, %v1342_v11  ;;  %v1345_v17 = vpop.f32.mrb[18].mxu1 }
 0x11f   : > { %v1334_v18 = vpop.f32.mrb[19].mxu0  ;;  %v1346_v21 = vpop.f32.mrb[19].mxu1 }
 0x120   : > { %v929_v19 = vadd.f32 %v1332_v13, %v864_v22  ;;  %v1335_v20 = vadd.f32 %v1334_v18, %v1333_v15  ;;  %v945_v23 = vadd.f32 %v1344_v16, %v880_v54  ;;  %v1347_v25 = vadd.f32 %v1346_v21, %v1345_v17 }
 0x122   : > { %v932_v26 = vadd.f32 %v1335_v20, %v1723_v24  ;;  %v948_v10 = vadd.f32 %v1347_v25, %v883_v56  ;;  %v959_v27 = vmax.f32 %v929_v19, 0.0  ;;  %v963_v30 = vmax.f32 %v945_v23, 0.0 }
 0x124   : > { %v960_v28 = vmax.f32 %v932_v26, 0.0  ;;  %v1336_v29 = vpop.f32.mrb[20].mxu0  ;;  %v964_v31 = vmax.f32 %v948_v10, 0.0  ;;  %v1348_v32 = vpop.f32.mrb[20].mxu1 }
 0x125   : > { %v1337_v33 = vpop.f32.mrb[21].mxu0  ;;  %v1349_v35 = vpop.f32.mrb[21].mxu1 }
 0x126   : > { %v1214_v22 = vpack.c.bf16 %v960_v28, %v959_v27  ;;  %v1338_v34 = vadd.f32 %v1337_v33, %v1336_v29  ;;  %v1339_v36 = vpop.f32.mrb[22].mxu0  ;;  %v1224_v37 = vpack.c.bf16 %v964_v31, %v963_v30  ;;  %v1350_v39 = vadd.f32 %v1349_v35, %v1348_v32  ;;  %v1351_v41 = vpop.f32.mrb[22].mxu1 }
 0x127   : > { %v1340_v24 = vpop.f32.mrb[23].mxu0  ;;  %v1352_v44 = vpop.f32.mrb[23].mxu1 }
 0x128   : > { %1215 = vst [vmem:[%s226_s30] sm:$0xff] %v1214_v22   ;;  %v937_v42 = vadd.f32 %v1338_v34, %v1725_v38  ;;  %v1341_v43 = vadd.f32 %v1340_v24, %v1339_v36  ;;  %1232 = vst [vmem:[%s226_s30 + $0x10] sm:$0xff] %v1224_v37   ;;  %v953_v45 = vadd.f32 %v1350_v39, %v888_v6 }
 0x129   : > { %v1353_v46 = vadd.f32 %v1352_v44, %v1351_v41 }
 0x12a   : > { %v940_v47 = vadd.f32 %v1341_v43, %v1727_v40  ;;  %v961_v49 = vmax.f32 %v937_v42, 0.0  ;;  %v965_v51 = vmax.f32 %v953_v45, 0.0 }
 0x12b   : > { %v956_v48 = vadd.f32 %v1353_v46, %v891_v8 }
 0x12c   : > { %v962_v50 = vmax.f32 %v940_v47, 0.0 }
 0x12d   : > { %v966_v52 = vmax.f32 %v956_v48, 0.0 }
 0x12e   : > { %v1219_v53 = vpack.c.bf16 %v962_v50, %v961_v49 }
 0x12f   : > { %v1229_v54 = vpack.c.bf16 %v966_v52, %v965_v51 }
 0x130   : > { %1231 = vst [vmem:[%s226_s30 + $0x8] sm:$0xff] %v1219_v53  }
 0x131   : > { %1233 = vst [vmem:[%s226_s30 + $0x18] sm:$0xff] %v1229_v54  }
 0x132 PF: > { %s13_s14 = sadd.s32 1, %s1501_s14   ;;  %s1749_s12 = smov %s1497_s13 }
 0x133   : > { %p10_p5 = scmp.ge.s32.totalorder %s13_s14, 4   ;;  %s1750_s13 = smov %s1752_s15 }
 0x135   :  { %12 = sbr.rel (!%p10_p5) target bundleno = 2 (0x2), region = 68 }

// kernel: forward.22
= control target key start
LH: loop header
LB: loop body
LE: loop exit
PB: predicated region body
PF: predicated region fallthrough
CT: control target
= control target key end

     0   :  { %s2348_s12 = smov 0   ;;  %s2350_s13 = smov 0   ;;  %s2932_s0 = inlined_call_operand.vmem [shape: bf16[32,1408], index: 0, kind: input, shape index: {}]   ;;  %s2933_s1 = inlined_call_operand.vmem [shape: bf16[1408,256], index: 1, kind: input, shape index: {}]   ;;  %s2934_s2 = inlined_call_operand.vmem [shape: f32[1,256], index: 2, kind: input, shape index: {}]   ;;  %s2935_s3 = inlined_call_operand.vmem [shape: bf16[32,256], index: 3, kind: output, shape index: {}]  }
   0x1   :  { %s2352_s14 = smov 0  }
   0x2 LB: > { %s25_s15 = sadd.s32 1, %s2321_s13  ;;  %p1773_p0 = scmp.ge.s32.totalorder %s2325_s14, 1  ;;  %s2325_s14 = sphi %s2352_s14, %s13_s14   ;;  %s2321_s13 = sphi %s2350_s13, %s2937_s13   ;;  %s2317_s12 = sphi %s2348_s12, %s2936_s12  }
   0x3   : > { %p27_p1 = scmp.ge.s32.totalorder %s25_s15, 2  ;;  %p174_p2 = scmp.lt.s32.totalorder %s2325_s14, 3 }
   0x5   : > { %s2939_s15 = smov (%p27_p1, %s25_s15), 0  ;;  %p175_p3 = pnand %p1773_p0, %p174_p2 }
   0x6   : > { %v2023_v0 = vld [vmem:[%s2933_s1 + $0x4] ss:$8 sps:$4 sm:$0xff] (!%p175_p3)   ;;  %v2027_v2 = vld [vmem:[%s2933_s1] ss:$8 sps:$4 sm:$0xff] (!%p175_p3)   ;;  %v2029_v4 = vld [vmem:[%s2933_s1 + $0x14] ss:$8 sps:$4 sm:$0xff] (!%p175_p3)  }
   0x7   : > { %178 = sbr.rel (%p175_p3) target bundleno = 423 (0x1a7), region = 32  ;;  %v2025_v1 = vld [vmem:[%s2933_s1 + $0x304] ss:$8 sps:$4 sm:$0xff] (!%p175_p3)   ;;  %1380 = vmatprep.subr.bf16.mxu1 (!%p175_p3), %v2023_v0  ;;  %v2028_v3 = vld [vmem:[%s2933_s1 + $0x300] ss:$8 sps:$4 sm:$0xff] (!%p175_p3)   ;;  %s1774_s30 = sshll.u32 (!%p175_p3), %s2317_s12, 1 }
   0x8   : > { %1509 = vmatprep.subr.bf16.mxu0 (!%p175_p3), %v2025_v1  ;;  %1381 = vmatpush1.bf16.msra.mxu1 (!%p175_p3), %v2027_v2  ;;  %v2031_v5 = vld [vmem:[%s2933_s1 + $0x314] ss:$8 sps:$4 sm:$0xff] (!%p175_p3)   ;;  %v2033_v6 = vld [vmem:[%s2933_s1 + $0x10] ss:$8 sps:$4 sm:$0xff] (!%p175_p3)   ;;  %v2035_v8 = vld [vmem:[%s2933_s1 + $0x24] ss:$8 sps:$4 sm:$0xff] (!%p175_p3)  }
   0x9   : > { %1510 = vmatpush1.bf16.msra.mxu0 (!%p175_p3), %v2028_v3  ;;  %1382 = vmatprep.subr.bf16.mxu1 (!%p175_p3), %v2029_v4  ;;  %v2034_v7 = vld [vmem:[%s2933_s1 + $0x310] ss:$8 sps:$4 sm:$0xff] (!%p175_p3)   ;;  %v2037_v9 = vld [vmem:[%s2933_s1 + $0x324] ss:$8 sps:$4 sm:$0xff] (!%p175_p3)   ;;  %v2039_v10 = vld [vmem:[%s2933_s1 + $0x20] ss:$8 sps:$4 sm:$0xff] (!%p175_p3)  }
   0xa   : > { %1511 = vmatprep.subr.bf16.mxu0 (!%p175_p3), %v2031_v5  ;;  %v2040_v11 = vld [vmem:[%s2933_s1 + $0x320] ss:$8 sps:$4 sm:$0xff] (!%p175_p3)   ;;  %v2041_v12 = vld [vmem:[%s2933_s1 + $0x34] ss:$8 sps:$4 sm:$0xff] (!%p175_p3)   ;;  %v2045_v14 = vld [vmem:[%s2933_s1 + $0x30] ss:$8 sps:$4 sm:$0xff] (!%p175_p3)  }
   0xb   : > { %v2043_v13 = vld [vmem:[%s2933_s1 + $0x334] ss:$8 sps:$4 sm:$0xff] (!%p175_p3)   ;;  %v2046_v15 = vld [vmem:[%s2933_s1 + $0x330] ss:$8 sps:$4 sm:$0xff] (!%p175_p3)   ;;  %v2047_v16 = vld [vmem:[%s2933_s1 + $0x44] ss:$8 sps:$4 sm:$0xff] (!%p175_p3)  }
   0xc   : > { %1383 = vmatpush1.bf16.msra.mxu1 (!%p175_p3), %v2033_v6  ;;  %v2049_v17 = vld [vmem:[%s2933_s1 + $0x344] ss:$8 sps:$4 sm:$0xff] (!%p175_p3)   ;;  %v2051_v18 = vld [vmem:[%s2933_s1 + $0x40] ss:$8 sps:$4 sm:$0xff] (!%p175_p3)   ;;  %v2053_v20 = vld [vmem:[%s2933_s1 + $0x54] ss:$8 sps:$4 sm:$0xff] (!%p175_p3)  }
   0xd   : > { %1512 = vmatpush1.bf16.msra.mxu0 (!%p175_p3), %v2034_v7  ;;  %1384 = vmatprep.subr.bf16.mxu1 (!%p175_p3), %v2035_v8  ;;  %v2052_v19 = vld [vmem:[%s2933_s1 + $0x340] ss:$8 sps:$4 sm:$0xff] (!%p175_p3)   ;;  %v2055_v21 = vld [vmem:[%s2933_s1 + $0x354] ss:$8 sps:$4 sm:$0xff] (!%p175_p3)   ;;  %v2057_v22 = vld [vmem:[%s2933_s1 + $0x50] ss:$8 sps:$4 sm:$0xff] (!%p175_p3)  }
   0xe   : > { %1513 = vmatprep.subr.bf16.mxu0 %v2037_v9  ;;  %v2058_v23 = vld [vmem:[%s2933_s1 + $0x350] ss:$8 sps:$4 sm:$0xff]   ;;  %v2059_v24 = vld [vmem:[%s2933_s1 + $0x64] ss:$8 sps:$4 sm:$0xff]   ;;  %v2063_v26 = vld [vmem:[%s2933_s1 + $0x60] ss:$8 sps:$4 sm:$0xff]  }
   0xf   : > { %v2061_v25 = vld [vmem:[%s2933_s1 + $0x364] ss:$8 sps:$4 sm:$0xff]   ;;  %v2064_v27 = vld [vmem:[%s2933_s1 + $0x360] ss:$8 sps:$4 sm:$0xff]   ;;  %v2065_v28 = vld [vmem:[%s2933_s1 + $0x74] ss:$8 sps:$4 sm:$0xff]  }
  0x10   : > { %1385 = vmatpush1.bf16.msra.mxu1 %v2039_v10  ;;  %v2067_v29 = vld [vmem:[%s2933_s1 + $0x374] ss:$8 sps:$4 sm:$0xff]   ;;  %v2069_v30 = vld [vmem:[%s2933_s1 + $0x70] ss:$8 sps:$4 sm:$0xff]   ;;  %v2071_v32 = vld [vmem:[%s2933_s1 + $0x84] ss:$8 sps:$4 sm:$0xff]  }
  0x11   : > { %1514 = vmatpush1.bf16.msra.mxu0 %v2040_v11  ;;  %1386 = vmatprep.subr.bf16.mxu1 %v2041_v12  ;;  %v2070_v31 = vld [vmem:[%s2933_s1 + $0x370] ss:$8 sps:$4 sm:$0xff]   ;;  %p214_p4 = scmp.lt.s32.totalorder %s1774_s30, 3  ;;  %v2073_v33 = vld [vmem:[%s2933_s1 + $0x384] ss:$8 sps:$4 sm:$0xff]  }
  0x12   : > { %1515 = vmatprep.subr.bf16.mxu0 %v2043_v13  ;;  %v2075_v34 = vld [vmem:[%s2933_s1 + $0x80] ss:$8 sps:$4 sm:$0xff]   ;;  %v2077_v36 = vld [vmem:[%s2933_s1 + $0x94] ss:$8 sps:$4 sm:$0xff]   ;;  %v2081_v38 = vld [vmem:[%s2933_s1 + $0x90] ss:$8 sps:$4 sm:$0xff]  }
  0x13   : > { %v2076_v35 = vld [vmem:[%s2933_s1 + $0x380] ss:$8 sps:$4 sm:$0xff]   ;;  %s2941_s30 = smov (!%p214_p4, %s1774_s30), 3  ;;  %v2079_v37 = vld [vmem:[%s2933_s1 + $0x394] ss:$8 sps:$4 sm:$0xff]  }
  0x14   : > { %1387 = vmatpush1.bf16.msra.mxu1 %v2045_v14  ;;  %v2082_v39 = vld [vmem:[%s2933_s1 + $0x390] ss:$8 sps:$4 sm:$0xff]   ;;  %v2083_v40 = vld [vmem:[%s2933_s1 + $0xa4] ss:$8 sps:$4 sm:$0xff]   ;;  %s1997_s29 = smul.u32 44, %s2941_s30 }
  0x15   : > { %1516 = vmatpush1.bf16.msra.mxu0 %v2046_v15  ;;  %1388 = vmatprep.subr.bf16.mxu1 %v2047_v16  ;;  %v2085_v41 = vld [vmem:[%s2933_s1 + $0x3a4] ss:$8 sps:$4 sm:$0xff]   ;;  %v2087_v42 = vld [vmem:[%s2933_s1 + $0xa0] ss:$8 sps:$4 sm:$0xff]   ;;  %v2089_v44 = vld [vmem:[%s2933_s1 + $0xb4] ss:$8 sps:$4 sm:$0xff]  }
  0x16   : > { %1517 = vmatprep.subr.bf16.mxu0 %v2049_v17  ;;  %v2088_v43 = vld [vmem:[%s2933_s1 + $0x3a0] ss:$8 sps:$4 sm:$0xff]   ;;  %s2510_s17 = scalar_lea.vmem %s2932_s0, %s1997_s29  ;;  %v2091_v45 = vld [vmem:[%s2933_s1 + $0x3b4] ss:$8 sps:$4 sm:$0xff]   ;;  %v2093_v46 = vld [vmem:[%s2933_s1 + $0xb0] ss:$8 sps:$4 sm:$0xff]  }
  0x17   : > { %v2094_v47 = vld [vmem:[%s2933_s1 + $0x3b0] ss:$8 sps:$4 sm:$0xff]   ;;  %v2095_v49 = vld [vmem:[%s2933_s1 + $0xc4] ss:$8 sps:$4 sm:$0xff]   ;;  %v2127_v51 = vld [vmem:[%s2510_s17 + $0x1c] ss:$44 sps:$4 sm:$0xff]  }
  0x18   : > { %1389 = vmatpush1.bf16.msra.mxu1 %v2051_v18  ;;  %v2121_v48 = vld [vmem:[%s2510_s17 + $0x4] ss:$44 sps:$4 sm:$0xff]   ;;  %v2099_v52 = vld [vmem:[%s2933_s1 + $0xc0] ss:$8 sps:$4 sm:$0xff]   ;;  %v2101_v54 = vld [vmem:[%s2933_s1 + $0xd4] ss:$8 sps:$4 sm:$0xff]   ;;  %1541 = vmatprep.mubr.bf16.mxu0 %v2127_v51 }
  0x19   : > { %1518 = vmatpush1.bf16.msra.mxu0 %v2052_v19  ;;  %1390 = vmatprep.subr.bf16.mxu1 %v2053_v20  ;;  %v2097_v50 = vld [vmem:[%s2933_s1 + $0x3c4] ss:$8 sps:$4 sm:$0xff]   ;;  %v2100_v53 = vld [vmem:[%s2933_s1 + $0x3c0] ss:$8 sps:$4 sm:$0xff]   ;;  %v2103_v55 = vld [vmem:[%s2933_s1 + $0x3d4] ss:$8 sps:$4 sm:$0xff]  }
  0x1a   : > { %1519 = vmatprep.subr.bf16.mxu0 %v2055_v21  ;;  %1412 = vmatprep.mubr.bf16.mxu1 %v2121_v48  ;;  %v2105_v56 = vld [vmem:[%s2933_s1 + $0xd0] ss:$8 sps:$4 sm:$0xff]   ;;  %v2107_v58 = vld [vmem:[%s2933_s1 + $0xe4] ss:$8 sps:$4 sm:$0xff]   ;;  %v2111_v60 = vld [vmem:[%s2933_s1 + $0xe0] ss:$8 sps:$4 sm:$0xff]  }
  0x1b   : > { %v2106_v57 = vld [vmem:[%s2933_s1 + $0x3d0] ss:$8 sps:$4 sm:$0xff]   ;;  %v2109_v59 = vld [vmem:[%s2933_s1 + $0x3e4] ss:$8 sps:$4 sm:$0xff]   ;;  %v2112_v61 = vld [vmem:[%s2933_s1 + $0x3e0] ss:$8 sps:$4 sm:$0xff]  }
  0x1c   : > { %1391 = vmatpush1.bf16.msra.mxu1 %v2057_v22  ;;  %v2113_v62 = vld [vmem:[%s2933_s1 + $0xf4] ss:$8 sps:$4 sm:$0xff]   ;;  %v2117_v0 = vld [vmem:[%s2933_s1 + $0xf0] ss:$8 sps:$4 sm:$0xff]   ;;  %v2124_v2 = vld [vmem:[%s2933_s1 + $0x104] ss:$8 sps:$4 sm:$0xff]  }
  0x1d   : > { %1520 = vmatpush1.bf16.msra.mxu0 %v2058_v23  ;;  %1392 = vmatprep.subr.bf16.mxu1 %v2059_v24  ;;  %v2115_v63 = vld [vmem:[%s2933_s1 + $0x3f4] ss:$8 sps:$4 sm:$0xff]   ;;  %v2118_v1 = vld [vmem:[%s2933_s1 + $0x3f0] ss:$8 sps:$4 sm:$0xff]   ;;  %v2130_v3 = vld [vmem:[%s2933_s1 + $0x404] ss:$8 sps:$4 sm:$0xff]  }
  0x1e   : > { %1521 = vmatprep.subr.bf16.mxu0 %v2061_v25  ;;  %v2119_v4 = vld [vmem:[%s2510_s17] ss:$44 sps:$4 sm:$0xff]   ;;  %v2125_v6 = vld [vmem:[%s2510_s17 + $0x18] ss:$44 sps:$4 sm:$0xff]   ;;  %v2133_v8 = vld [vmem:[%s2933_s1 + $0x114] ss:$8 sps:$4 sm:$0xff]  }
  0x1f   : > { %v2122_v5 = vld [vmem:[%s2933_s1 + $0x100] ss:$8 sps:$4 sm:$0xff]   ;;  %v2136_v9 = vld [vmem:[%s2933_s1 + $0x414] ss:$8 sps:$4 sm:$0xff]   ;;  %v2131_v10 = vld [vmem:[%s2933_s1 + $0x110] ss:$8 sps:$4 sm:$0xff]  }
  0x20   : > { %1393 = vmatpush1.bf16.msra.mxu1 %v2063_v26  ;;  %v2128_v7 = vld [vmem:[%s2933_s1 + $0x400] ss:$8 sps:$4 sm:$0xff]   ;;  %v2134_v11 = vld [vmem:[%s2933_s1 + $0x410] ss:$8 sps:$4 sm:$0xff]   ;;  %v2139_v12 = vld [vmem:[%s2933_s1 + $0x124] ss:$8 sps:$4 sm:$0xff]  }
  0x21   : > { %1522 = vmatpush1.bf16.msra.mxu0 %v2064_v27  ;;  %1394 = vmatprep.subr.bf16.mxu1 %v2065_v28  ;;  %v2142_v13 = vld [vmem:[%s2933_s1 + $0x424] ss:$8 sps:$4 sm:$0xff]   ;;  %v2137_v14 = vld [vmem:[%s2933_s1 + $0x120] ss:$8 sps:$4 sm:$0xff]   ;;  %v2145_v16 = vld [vmem:[%s2933_s1 + $0x134] ss:$8 sps:$4 sm:$0xff]  }
  0x22   : > { %1523 = vmatprep.subr.bf16.mxu0 %v2067_v29  ;;  %v2140_v15 = vld [vmem:[%s2933_s1 + $0x420] ss:$8 sps:$4 sm:$0xff]   ;;  %v2148_v17 = vld [vmem:[%s2933_s1 + $0x434] ss:$8 sps:$4 sm:$0xff]   ;;  %v2143_v18 = vld [vmem:[%s2933_s1 + $0x130] ss:$8 sps:$4 sm:$0xff]  }
  0x23   : > { %v2146_v19 = vld [vmem:[%s2933_s1 + $0x430] ss:$8 sps:$4 sm:$0xff]   ;;  %v2151_v20 = vld [vmem:[%s2933_s1 + $0x144] ss:$8 sps:$4 sm:$0xff]   ;;  %v2149_v22 = vld [vmem:[%s2933_s1 + $0x140] ss:$8 sps:$4 sm:$0xff]  }
  0x24   : > { %1395 = vmatpush1.bf16.msra.mxu1 %v2069_v30  ;;  %v2154_v21 = vld [vmem:[%s2933_s1 + $0x444] ss:$8 sps:$4 sm:$0xff]   ;;  %v2152_v23 = vld [vmem:[%s2933_s1 + $0x440] ss:$8 sps:$4 sm:$0xff]   ;;  %v2157_v24 = vld [vmem:[%s2933_s1 + $0x154] ss:$8 sps:$4 sm:$0xff]  }
  0x25   : > { %1524 = vmatpush1.bf16.msra.mxu0 %v2070_v31  ;;  %1396 = vmatprep.subr.bf16.mxu1 %v2071_v32  ;;  %v2160_v25 = vld [vmem:[%s2933_s1 + $0x454] ss:$8 sps:$4 sm:$0xff]   ;;  %v2155_v26 = vld [vmem:[%s2933_s1 + $0x150] ss:$8 sps:$4 sm:$0xff]   ;;  %v2163_v28 = vld [vmem:[%s2933_s1 + $0x164] ss:$8 sps:$4 sm:$0xff]  }
  0x26   : > { %1525 = vmatprep.subr.bf16.mxu0 %v2073_v33  ;;  %v2158_v27 = vld [vmem:[%s2933_s1 + $0x450] ss:$8 sps:$4 sm:$0xff]   ;;  %v2166_v29 = vld [vmem:[%s2933_s1 + $0x464] ss:$8 sps:$4 sm:$0xff]   ;;  %v2161_v30 = vld [vmem:[%s2933_s1 + $0x160] ss:$8 sps:$4 sm:$0xff]  }
  0x27   : > { %v2164_v31 = vld [vmem:[%s2933_s1 + $0x460] ss:$8 sps:$4 sm:$0xff]   ;;  %v2169_v32 = vld [vmem:[%s2933_s1 + $0x174] ss:$8 sps:$4 sm:$0xff]  }
  0x28   : > { %1397 = vmatpush1.bf16.msra.mxu1 %v2075_v34  ;;  %v2172_v33 = vld [vmem:[%s2933_s1 + $0x474] ss:$8 sps:$4 sm:$0xff]   ;;  %v2223_v34 = vld [vmem:[%s2510_s17 + $0xc] ss:$44 sps:$4 sm:$0xff]   ;;  %v2185_v48 = vld [vmem:[%s2933_s1 + $0x1a0] ss:$8 sps:$4 sm:$0xff]  }
  0x29   : > { %1526 = vmatpush1.bf16.msra.mxu0 %v2076_v35  ;;  %1398 = vmatprep.subr.bf16.mxu1 %v2077_v36  ;;  %v2167_v35 = vld [vmem:[%s2933_s1 + $0x170] ss:$8 sps:$4 sm:$0xff]   ;;  %v2196_v51 = vld [vmem:[%s2933_s1 + $0x4b4] ss:$8 sps:$4 sm:$0xff]  }
  0x2a   : > { %1527 = vmatprep.subr.bf16.mxu0 %v2079_v37  ;;  %v2170_v36 = vld [vmem:[%s2933_s1 + $0x470] ss:$8 sps:$4 sm:$0xff]  }
  0x2b   : > { %v2229_v37 = vld [vmem:[%s2510_s17 + $0x24] ss:$44 sps:$4 sm:$0xff]  }
  0x2c   : > { %1399 = vmatpush1.bf16.msra.mxu1 %v2081_v38  ;;  %v2175_v38 = vld [vmem:[%s2933_s1 + $0x184] ss:$8 sps:$4 sm:$0xff]  }
  0x2d   : > { %1528 = vmatpush1.bf16.msra.mxu0 %v2082_v39  ;;  %1400 = vmatprep.subr.bf16.mxu1 %v2083_v40  ;;  %v2178_v39 = vld [vmem:[%s2933_s1 + $0x484] ss:$8 sps:$4 sm:$0xff]   ;;  %v2173_v40 = vld [vmem:[%s2933_s1 + $0x180] ss:$8 sps:$4 sm:$0xff]  }
  0x2e   : > { %1529 = vmatprep.subr.bf16.mxu0 %v2085_v41  ;;  %v2176_v41 = vld [vmem:[%s2933_s1 + $0x480] ss:$8 sps:$4 sm:$0xff]  }
  0x30   : > { %1401 = vmatpush1.bf16.msra.mxu1 %v2087_v42  ;;  %v2181_v42 = vld [vmem:[%s2933_s1 + $0x194] ss:$8 sps:$4 sm:$0xff]  }
  0x31   : > { %1530 = vmatpush1.bf16.msra.mxu0 %v2088_v43  ;;  %1402 = vmatprep.subr.bf16.mxu1 %v2089_v44  ;;  %v2184_v43 = vld [vmem:[%s2933_s1 + $0x494] ss:$8 sps:$4 sm:$0xff]   ;;  %v2179_v44 = vld [vmem:[%s2933_s1 + $0x190] ss:$8 sps:$4 sm:$0xff]  }
  0x32   : > { %1531 = vmatprep.subr.bf16.mxu0 %v2091_v45  ;;  %v2182_v45 = vld [vmem:[%s2933_s1 + $0x490] ss:$8 sps:$4 sm:$0xff]  }
  0x34   : > { %1403 = vmatpush1.bf16.msra.mxu1 %v2093_v46  ;;  %v2187_v46 = vld [vmem:[%s2933_s1 + $0x1a4] ss:$8 sps:$4 sm:$0xff]  }
  0x35   : > { %1532 = vmatpush1.bf16.msra.mxu0 %v2094_v47  ;;  %1404 = vmatprep.subr.bf16.mxu1 %v2095_v49  ;;  %v2190_v47 = vld [vmem:[%s2933_s1 + $0x4a4] ss:$8 sps:$4 sm:$0xff]   ;;  %v2188_v49 = vld [vmem:[%s2933_s1 + $0x4a0] ss:$8 sps:$4 sm:$0xff]  }
  0x36   : > { %1533 = vmatprep.subr.bf16.mxu0 %v2097_v50  ;;  %v2193_v50 = vld [vmem:[%s2933_s1 + $0x1b4] ss:$8 sps:$4 sm:$0xff]  }
  0x38   : > { %1405 = vmatpush1.bf16.msra.mxu1 %v2099_v52  ;;  %v2191_v52 = vld [vmem:[%s2933_s1 + $0x1b0] ss:$8 sps:$4 sm:$0xff]  }
  0x39   : > { %1534 = vmatpush1.bf16.msra.mxu0 %v2100_v53  ;;  %1406 = vmatprep.subr.bf16.mxu1 %v2101_v54  ;;  %v2194_v53 = vld [vmem:[%s2933_s1 + $0x4b0] ss:$8 sps:$4 sm:$0xff]   ;;  %v2199_v54 = vld [vmem:[%s2933_s1 + $0x1c4] ss:$8 sps:$4 sm:$0xff]  }
  0x3a   : > { %1535 = vmatprep.subr.bf16.mxu0 %v2103_v55  ;;  %v2202_v55 = vld [vmem:[%s2933_s1 + $0x4c4] ss:$8 sps:$4 sm:$0xff]  }
  0x3c   : > { %1407 = vmatpush1.bf16.msra.mxu1 %v2105_v56  ;;  %v2197_v56 = vld [vmem:[%s2933_s1 + $0x1c0] ss:$8 sps:$4 sm:$0xff]  }
  0x3d   : > { %1536 = vmatpush1.bf16.msra.mxu0 %v2106_v57  ;;  %1408 = vmatprep.subr.bf16.mxu1 %v2107_v58  ;;  %v2200_v57 = vld [vmem:[%s2933_s1 + $0x4c0] ss:$8 sps:$4 sm:$0xff]   ;;  %v2205_v58 = vld [vmem:[%s2933_s1 + $0x1d4] ss:$8 sps:$4 sm:$0xff]  }
  0x3e   : > { %1537 = vmatprep.subr.bf16.mxu0 %v2109_v59  ;;  %v2208_v59 = vld [vmem:[%s2933_s1 + $0x4d4] ss:$8 sps:$4 sm:$0xff]  }
  0x40   : > { %1409 = vmatpush1.bf16.msra.mxu1 %v2111_v60  ;;  %v2203_v60 = vld [vmem:[%s2933_s1 + $0x1d0] ss:$8 sps:$4 sm:$0xff]  }
  0x41   : > { %1538 = vmatpush1.bf16.msra.mxu0 %v2112_v61  ;;  %1410 = vmatprep.subr.bf16.mxu1 %v2113_v62  ;;  %v2206_v61 = vld [vmem:[%s2933_s1 + $0x4d0] ss:$8 sps:$4 sm:$0xff]   ;;  %v2211_v62 = vld [vmem:[%s2933_s1 + $0x1e4] ss:$8 sps:$4 sm:$0xff]  }
  0x42   : > { %1539 = vmatprep.subr.bf16.mxu0 %v2115_v63  ;;  %v2214_v63 = vld [vmem:[%s2933_s1 + $0x4e4] ss:$8 sps:$4 sm:$0xff]  }
  0x44   : > { %1411 = vmatpush1.bf16.msra.mxu1 %v2117_v0  ;;  %v2209_v0 = vld [vmem:[%s2933_s1 + $0x1e0] ss:$8 sps:$4 sm:$0xff]  }
  0x45   : > { %1540 = vmatpush1.bf16.msra.mxu0 %v2118_v1  ;;  %1423 = vmatprep.subr.bf16.mxu1 %v2124_v2  ;;  %v2212_v1 = vld [vmem:[%s2933_s1 + $0x4e0] ss:$8 sps:$4 sm:$0xff]   ;;  %v2217_v2 = vld [vmem:[%s2933_s1 + $0x1f4] ss:$8 sps:$4 sm:$0xff]  }
  0x46   : > { %1552 = vmatprep.subr.bf16.mxu0 %v2130_v3  ;;  %v2220_v3 = vld [vmem:[%s2933_s1 + $0x4f4] ss:$8 sps:$4 sm:$0xff]  }
  0x47   : > { %1413 = vmatmul.mubr.bf16.vlgmr.msra.gmra.mrb[0].mxu1 %v2119_v4  ;;  %v2215_v4 = vld [vmem:[%s2933_s1 + $0x1f0] ss:$8 sps:$4 sm:$0xff]  }
  0x48   : > { %1542 = vmatmul.mubr.bf16.vlgmr.msra.gmra.mrb[0].mxu0 %v2125_v6  ;;  %1424 = vmatpush1.bf16.msra.mxu1 %v2122_v5  ;;  %v2218_v5 = vld [vmem:[%s2933_s1 + $0x4f0] ss:$8 sps:$4 sm:$0xff]   ;;  %v2226_v6 = vld [vmem:[%s2933_s1 + $0x204] ss:$8 sps:$4 sm:$0xff]  }
  0x49   : > { %1553 = vmatpush1.bf16.msra.mxu0 %v2128_v7  ;;  %1425 = vmatprep.subr.bf16.mxu1 %v2133_v8  ;;  %v2232_v7 = vld [vmem:[%s2933_s1 + $0x504] ss:$8 sps:$4 sm:$0xff]   ;;  %v2221_v8 = vld [vmem:[%s2510_s17 + $0x8] ss:$44 sps:$4 sm:$0xff]  }
  0x4a   : > { %1554 = vmatprep.subr.bf16.mxu0 %v2136_v9  ;;  %1455 = vmatprep.mubr.bf16.mxu1 %v2223_v34  ;;  %v2227_v9 = vld [vmem:[%s2510_s17 + $0x20] ss:$44 sps:$4 sm:$0xff]  }
  0x4b   : > { %1584 = vmatprep.mubr.bf16.mxu0 %v2229_v37  ;;  %v2265_v34 = vld [vmem:[%s2933_s1 + $0x264] ss:$8 sps:$4 sm:$0xff]   ;;  %v2266_v37 = vld [vmem:[%s2933_s1 + $0x560] ss:$8 sps:$4 sm:$0xff]  }
  0x4c   : > { %1426 = vmatpush1.bf16.msra.mxu1 %v2131_v10  ;;  %v2224_v10 = vld [vmem:[%s2933_s1 + $0x200] ss:$8 sps:$4 sm:$0xff]  }
  0x4d   : > { %1555 = vmatpush1.bf16.msra.mxu0 %v2134_v11  ;;  %1427 = vmatprep.subr.bf16.mxu1 %v2139_v12  ;;  %v2230_v11 = vld [vmem:[%s2933_s1 + $0x500] ss:$8 sps:$4 sm:$0xff]   ;;  %v2235_v12 = vld [vmem:[%s2933_s1 + $0x214] ss:$8 sps:$4 sm:$0xff]  }
  0x4e   : > { %1556 = vmatprep.subr.bf16.mxu0 %v2142_v13  ;;  %v2238_v13 = vld [vmem:[%s2933_s1 + $0x514] ss:$8 sps:$4 sm:$0xff]  }
  0x50   : > { %1428 = vmatpush1.bf16.msra.mxu1 %v2137_v14  ;;  %v2302_v14 = vld [vmem:[%s2510_s17 + $0x14] ss:$44 sps:$4 sm:$0xff]  }
  0x51   : > { %1557 = vmatpush1.bf16.msra.mxu0 %v2140_v15  ;;  %1429 = vmatprep.subr.bf16.mxu1 %v2145_v16  ;;  %v2233_v15 = vld [vmem:[%s2933_s1 + $0x210] ss:$8 sps:$4 sm:$0xff]  }
  0x52   : > { %1558 = vmatprep.subr.bf16.mxu0 %v2148_v17  ;;  %v2236_v16 = vld [vmem:[%s2933_s1 + $0x510] ss:$8 sps:$4 sm:$0xff]   ;;  %v2241_v17 = vld [vmem:[%s2933_s1 + $0x224] ss:$8 sps:$4 sm:$0xff]  }
  0x54   : > { %1430 = vmatpush1.bf16.msra.mxu1 %v2143_v18  ;;  %v2244_v18 = vld [vmem:[%s2933_s1 + $0x524] ss:$8 sps:$4 sm:$0xff]  }
  0x55   : > { %1559 = vmatpush1.bf16.msra.mxu0 %v2146_v19  ;;  %1431 = vmatprep.subr.bf16.mxu1 %v2151_v20  ;;  %v2327_v19 = vmov 0   ;;  %v2239_v20 = vld [vmem:[%s2933_s1 + $0x220] ss:$8 sps:$4 sm:$0xff]  }
  0x56   : > { %1560 = vmatprep.subr.bf16.mxu0 %v2154_v21  ;;  %v2242_v21 = vld [vmem:[%s2933_s1 + $0x520] ss:$8 sps:$4 sm:$0xff]  }
  0x58   : > { %1432 = vmatpush1.bf16.msra.mxu1 %v2149_v22  ;;  %v2247_v22 = vld [vmem:[%s2933_s1 + $0x234] ss:$8 sps:$4 sm:$0xff]  }
  0x59   : > { %1561 = vmatpush1.bf16.msra.mxu0 %v2152_v23  ;;  %1433 = vmatprep.subr.bf16.mxu1 %v2157_v24  ;;  %v2250_v23 = vld [vmem:[%s2933_s1 + $0x534] ss:$8 sps:$4 sm:$0xff]   ;;  %v2245_v24 = vld [vmem:[%s2933_s1 + $0x230] ss:$8 sps:$4 sm:$0xff]  }
  0x5a   : > { %1562 = vmatprep.subr.bf16.mxu0 %v2160_v25  ;;  %v2248_v25 = vld [vmem:[%s2933_s1 + $0x530] ss:$8 sps:$4 sm:$0xff]  }
  0x5c   : > { %1434 = vmatpush1.bf16.msra.mxu1 %v2155_v26  ;;  %v2253_v26 = vld [vmem:[%s2933_s1 + $0x244] ss:$8 sps:$4 sm:$0xff]  }
  0x5d   : > { %1563 = vmatpush1.bf16.msra.mxu0 %v2158_v27  ;;  %1435 = vmatprep.subr.bf16.mxu1 %v2163_v28  ;;  %v2256_v27 = vld [vmem:[%s2933_s1 + $0x544] ss:$8 sps:$4 sm:$0xff]   ;;  %v2251_v28 = vld [vmem:[%s2933_s1 + $0x240] ss:$8 sps:$4 sm:$0xff]  }
  0x5e   : > { %1564 = vmatprep.subr.bf16.mxu0 %v2166_v29  ;;  %v2254_v29 = vld [vmem:[%s2933_s1 + $0x540] ss:$8 sps:$4 sm:$0xff]  }
  0x60   : > { %1436 = vmatpush1.bf16.msra.mxu1 %v2161_v30  ;;  %v2259_v30 = vld [vmem:[%s2933_s1 + $0x254] ss:$8 sps:$4 sm:$0xff]  }
  0x61   : > { %1565 = vmatpush1.bf16.msra.mxu0 %v2164_v31  ;;  %1437 = vmatprep.subr.bf16.mxu1 %v2169_v32  ;;  %v2262_v31 = vld [vmem:[%s2933_s1 + $0x554] ss:$8 sps:$4 sm:$0xff]   ;;  %v2257_v32 = vld [vmem:[%s2933_s1 + $0x250] ss:$8 sps:$4 sm:$0xff]  }
  0x62   : > { %1566 = vmatprep.subr.bf16.mxu0 %v2172_v33  ;;  %v2260_v33 = vld [vmem:[%s2933_s1 + $0x550] ss:$8 sps:$4 sm:$0xff]  }
  0x64   : > { %1438 = vmatpush1.bf16.msra.mxu1 %v2167_v35  ;;  %v2268_v35 = vld [vmem:[%s2933_s1 + $0x564] ss:$8 sps:$4 sm:$0xff]  }
  0x65   : > { %1567 = vmatpush1.bf16.msra.mxu0 %v2170_v36  ;;  %1439 = vmatprep.subr.bf16.mxu1 %v2175_v38  ;;  %v2263_v36 = vld [vmem:[%s2933_s1 + $0x260] ss:$8 sps:$4 sm:$0xff]   ;;  %v2271_v38 = vld [vmem:[%s2933_s1 + $0x274] ss:$8 sps:$4 sm:$0xff]  }
  0x66   : > { %1568 = vmatprep.subr.bf16.mxu0 %v2178_v39  ;;  %v2274_v39 = vld [vmem:[%s2933_s1 + $0x574] ss:$8 sps:$4 sm:$0xff]  }
  0x68   : > { %1440 = vmatpush1.bf16.msra.mxu1 %v2173_v40  ;;  %v2269_v40 = vld [vmem:[%s2933_s1 + $0x270] ss:$8 sps:$4 sm:$0xff]  }
  0x69   : > { %1569 = vmatpush1.bf16.msra.mxu0 %v2176_v41  ;;  %1441 = vmatprep.subr.bf16.mxu1 %v2181_v42  ;;  %v2272_v41 = vld [vmem:[%s2933_s1 + $0x570] ss:$8 sps:$4 sm:$0xff]   ;;  %v2277_v42 = vld [vmem:[%s2933_s1 + $0x284] ss:$8 sps:$4 sm:$0xff]  }
  0x6a   : > { %1570 = vmatprep.subr.bf16.mxu0 %v2184_v43  ;;  %v2278_v43 = vld [vmem:[%s2510_s17 + $0x28] ss:$44 sps:$4 sm:$0xff]  }
  0x6c   : > { %1442 = vmatpush1.bf16.msra.mxu1 %v2179_v44  ;;  %v2275_v44 = vld [vmem:[%s2933_s1 + $0x280] ss:$8 sps:$4 sm:$0xff]  }
  0x6d   : > { %1571 = vmatpush1.bf16.msra.mxu0 %v2182_v45  ;;  %1443 = vmatprep.subr.bf16.mxu1 %v2187_v46  ;;  %v2281_v45 = vld [vmem:[%s2933_s1 + $0x294] ss:$8 sps:$4 sm:$0xff]   ;;  %v2279_v46 = vld [vmem:[%s2933_s1 + $0x290] ss:$8 sps:$4 sm:$0xff]  }
  0x6e   : > { %1572 = vmatprep.subr.bf16.mxu0 %v2190_v47  ;;  %v2284_v47 = vld [vmem:[%s2933_s1 + $0x2a4] ss:$8 sps:$4 sm:$0xff]  }
  0x70   : > { %1444 = vmatpush1.bf16.msra.mxu1 %v2185_v48  ;;  %v2282_v48 = vld [vmem:[%s2933_s1 + $0x2a0] ss:$8 sps:$4 sm:$0xff]  }
  0x71   : > { %1573 = vmatpush1.bf16.msra.mxu0 %v2188_v49  ;;  %1445 = vmatprep.subr.bf16.mxu1 %v2193_v50  ;;  %v2287_v49 = vld [vmem:[%s2933_s1 + $0x2b4] ss:$8 sps:$4 sm:$0xff]   ;;  %v2285_v50 = vld [vmem:[%s2933_s1 + $0x2b0] ss:$8 sps:$4 sm:$0xff]  }
  0x72   : > { %1574 = vmatprep.subr.bf16.mxu0 %v2196_v51  ;;  %v2290_v51 = vld [vmem:[%s2933_s1 + $0x2c4] ss:$8 sps:$4 sm:$0xff]  }
  0x74   : > { %1446 = vmatpush1.bf16.msra.mxu1 %v2191_v52  ;;  %v2288_v52 = vld [vmem:[%s2933_s1 + $0x2c0] ss:$8 sps:$4 sm:$0xff]  }
  0x75   : > { %1575 = vmatpush1.bf16.msra.mxu0 %v2194_v53  ;;  %1447 = vmatprep.subr.bf16.mxu1 %v2199_v54  ;;  %v2293_v53 = vld [vmem:[%s2933_s1 + $0x2d4] ss:$8 sps:$4 sm:$0xff]   ;;  %v2291_v54 = vld [vmem:[%s2933_s1 + $0x2d0] ss:$8 sps:$4 sm:$0xff]  }
  0x76   : > { %1576 = vmatprep.subr.bf16.mxu0 %v2202_v55  ;;  %v2296_v55 = vld [vmem:[%s2933_s1 + $0x2e4] ss:$8 sps:$4 sm:$0xff]  }
  0x78   : > { %1448 = vmatpush1.bf16.msra.mxu1 %v2197_v56  ;;  %v2294_v56 = vld [vmem:[%s2933_s1 + $0x2e0] ss:$8 sps:$4 sm:$0xff]  }
  0x79   : > { %1577 = vmatpush1.bf16.msra.mxu0 %v2200_v57  ;;  %1449 = vmatprep.subr.bf16.mxu1 %v2205_v58  ;;  %v2299_v57 = vld [vmem:[%s2933_s1 + $0x2f4] ss:$8 sps:$4 sm:$0xff]   ;;  %v2297_v58 = vld [vmem:[%s2933_s1 + $0x2f0] ss:$8 sps:$4 sm:$0xff]  }
  0x7a   : > { %1578 = vmatprep.subr.bf16.mxu0 %v2208_v59  ;;  %v2300_v59 = vld [vmem:[%s2510_s17 + $0x10] ss:$44 sps:$4 sm:$0xff]   ;;  %s1970_s17 = sshll.u32 %s2941_s30, 3 }
  0x7b   : > { %s240_s20 = scalar_lea.vmem %s2935_s3, %s1970_s17 }
  0x7c   : > { %1450 = vmatpush1.bf16.msra.mxu1 %v2203_v60 }
  0x7d   : > { %1579 = vmatpush1.bf16.msra.mxu0 %v2206_v61  ;;  %1451 = vmatprep.subr.bf16.mxu1 %v2211_v62 }
  0x7e   : > { %1580 = vmatprep.subr.bf16.mxu0 %v2214_v63 }
  0x80   : > { %1452 = vmatpush1.bf16.msra.mxu1 %v2209_v0  ;;  %v434_v0 = vlaneseq }
  0x81   : > { %1581 = vmatpush1.bf16.msra.mxu0 %v2212_v1  ;;  %1453 = vmatprep.subr.bf16.mxu1 %v2217_v2 }
  0x82   : > { %1582 = vmatprep.subr.bf16.mxu0 %v2220_v3  ;;  %v435_v1 = vshrl.u32 %v434_v0, 7  ;;  %v432_v3 = vld [vmem:[%s2934_s2] sm:$0x3] }
  0x84   : > { %1454 = vmatpush1.bf16.msra.mxu1 %v2215_v4  ;;  %v436_v2 = vsub.s32 0, %v435_v1  ;;  %v440_v4 = vsub.s32 1, %v435_v1 }
  0x85   : > { %1583 = vmatpush1.bf16.msra.mxu0 %v2218_v5  ;;  %1466 = vmatprep.subr.bf16.mxu1 %v2226_v6 }
  0x86   : > { %1595 = vmatprep.subr.bf16.mxu0 %v2232_v7  ;;  %v437_v5 = vrot.slane %v432_v3, %v436_v2  ;;  %v441_v6 = vrot.slane %v432_v3, %v440_v4 }
  0x87   : > { %1456 = vmatmul.mubr.bf16.vlgmr.msra.gmra.mrb[0].mxu1 %v2221_v8 }
  0x88   : > { %1585 = vmatmul.mubr.bf16.vlgmr.msra.gmra.mrb[0].mxu0 %v2227_v9  ;;  %1467 = vmatpush1.bf16.msra.mxu1 %v2224_v10 }
  0x89   : > { %1596 = vmatpush1.bf16.msra.mxu0 %v2230_v11  ;;  %1468 = vmatprep.subr.bf16.mxu1 %v2235_v12 }
  0x8a   : > { %1597 = vmatprep.subr.bf16.mxu0 %v2238_v13  ;;  %1627 = vmatprep.mubr.bf16.mxu0 %v2327_v19 }
  0x8b   : > { %1498 = vmatprep.mubr.bf16.mxu1 %v2302_v14 }
  0x8c   : > { %1469 = vmatpush1.bf16.msra.mxu1 %v2233_v15 }
  0x8d   : > { %1598 = vmatpush1.bf16.msra.mxu0 %v2236_v16  ;;  %1470 = vmatprep.subr.bf16.mxu1 %v2241_v17 }
  0x8e   : > { %1599 = vmatprep.subr.bf16.mxu0 %v2244_v18 }
  0x90   : > { %1471 = vmatpush1.bf16.msra.mxu1 %v2239_v20 }
  0x91   : > { %1600 = vmatpush1.bf16.msra.mxu0 %v2242_v21  ;;  %1472 = vmatprep.subr.bf16.mxu1 %v2247_v22 }
  0x92   : > { %1601 = vmatprep.subr.bf16.mxu0 %v2250_v23 }
  0x94   : > { %1473 = vmatpush1.bf16.msra.mxu1 %v2245_v24 }
  0x95   : > { %1602 = vmatpush1.bf16.msra.mxu0 %v2248_v25  ;;  %1474 = vmatprep.subr.bf16.mxu1 %v2253_v26 }
  0x96   : > { %1603 = vmatprep.subr.bf16.mxu0 %v2256_v27 }
  0x98   : > { %1475 = vmatpush1.bf16.msra.mxu1 %v2251_v28 }
  0x99   : > { %1604 = vmatpush1.bf16.msra.mxu0 %v2254_v29  ;;  %1476 = vmatprep.subr.bf16.mxu1 %v2259_v30 }
  0x9a   : > { %1605 = vmatprep.subr.bf16.mxu0 %v2262_v31 }
  0x9c   : > { %1477 = vmatpush1.bf16.msra.mxu1 %v2257_v32 }
  0x9d   : > { %1606 = vmatpush1.bf16.msra.mxu0 %v2260_v33  ;;  %1478 = vmatprep.subr.bf16.mxu1 %v2265_v34 }
  0x9e   : > { %1607 = vmatprep.subr.bf16.mxu0 %v2268_v35 }
  0xa0   : > { %1479 = vmatpush1.bf16.msra.mxu1 %v2263_v36 }
  0xa1   : > { %1608 = vmatpush1.bf16.msra.mxu0 %v2266_v37  ;;  %1480 = vmatprep.subr.bf16.mxu1 %v2271_v38 }
  0xa2   : > { %1609 = vmatprep.subr.bf16.mxu0 %v2274_v39 }
  0xa4   : > { %1481 = vmatpush1.bf16.msra.mxu1 %v2269_v40 }
  0xa5   : > { %1610 = vmatpush1.bf16.msra.mxu0 %v2272_v41  ;;  %1482 = vmatprep.subr.bf16.mxu1 %v2277_v42 }
  0xa8   : > { %1628 = vmatmul.mubr.bf16.vlgmr.msra.gmra.mrb[0].mxu0 %v2278_v43  ;;  %1483 = vmatpush1.bf16.msra.mxu1 %v2275_v44 }
  0xa9   : > { %1484 = vmatprep.subr.bf16.mxu1 %v2281_v45 }
  0xac   : > { %1485 = vmatpush1.bf16.msra.mxu1 %v2279_v46 }
  0xad   : > { %1486 = vmatprep.subr.bf16.mxu1 %v2284_v47 }
  0xb0   : > { %1487 = vmatpush1.bf16.msra.mxu1 %v2282_v48 }
  0xb1   : > { %1488 = vmatprep.subr.bf16.mxu1 %v2287_v49 }
  0xb4   : > { %1489 = vmatpush1.bf16.msra.mxu1 %v2285_v50 }
  0xb5   : > { %1490 = vmatprep.subr.bf16.mxu1 %v2290_v51 }
  0xb8   : > { %1491 = vmatpush1.bf16.msra.mxu1 %v2288_v52 }
  0xb9   : > { %1492 = vmatprep.subr.bf16.mxu1 %v2293_v53 }
  0xbc   : > { %1493 = vmatpush1.bf16.msra.mxu1 %v2291_v54 }
  0xbd   : > { %1494 = vmatprep.subr.bf16.mxu1 %v2296_v55 }
  0xc0   : > { %1495 = vmatpush1.bf16.msra.mxu1 %v2294_v56 }
  0xc1   : > { %1496 = vmatprep.subr.bf16.mxu1 %v2299_v57 }
  0xc4   : > { %1497 = vmatpush1.bf16.msra.mxu1 %v2297_v58 }
  0xc7   : > { %1499 = vmatmul.mubr.bf16.vlgmr.msra.gmra.mrb[0].mxu1 %v2300_v59 }
 0x17b   : > { %v1629_v60 = vpop.f32.mrb[0].mxu0 }
 0x17c   : > { %v1631_v61 = vpop.f32.mrb[1].mxu0 }
 0x17d   : > { %v1633_v62 = vpop.f32.mrb[2].mxu0 }
 0x17e   : > { %v1635_v63 = vpop.f32.mrb[3].mxu0 }
 0x19a   : > { %v1500_v7 = vpop.f32.mrb[0].mxu1 }
 0x19b   : > { %v1973_v8 = vadd.f32 %v1500_v7, %v437_v5  ;;  %v1502_v9 = vpop.f32.mrb[1].mxu1 }
 0x19c   : > { %v1975_v10 = vadd.f32 %v1502_v9, %v441_v6  ;;  %v1504_v11 = vpop.f32.mrb[2].mxu1 }
 0x19d   : > { %v1974_v12 = vadd.f32 %v1973_v8, %v1629_v60  ;;  %v1977_v13 = vadd.f32 %v1504_v11, %v437_v5  ;;  %v1506_v14 = vpop.f32.mrb[3].mxu1 }
 0x19e   : > { %v1976_v15 = vadd.f32 %v1975_v10, %v1631_v61  ;;  %v1979_v16 = vadd.f32 %v1506_v14, %v441_v6 }
 0x19f   : > { %v1638_v17 = vmax.f32 %v1974_v12, 0.0  ;;  %v1978_v18 = vadd.f32 %v1977_v13, %v1633_v62 }
 0x1a0   : > { %v1639_v19 = vmax.f32 %v1976_v15, 0.0  ;;  %v1980_v20 = vadd.f32 %v1979_v16, %v1635_v63 }
 0x1a1   : > { %v1640_v21 = vmax.f32 %v1978_v18, 0.0 }
 0x1a2   : > { %v1971_v22 = vpack.c.bf16 %v1639_v19, %v1638_v17  ;;  %v1641_v23 = vmax.f32 %v1980_v20, 0.0 }
 0x1a4   : > { %1654 = vst [vmem:[%s240_s20] sm:$0xff] %v1971_v22  ;;  %v1972_v24 = vpack.c.bf16 %v1641_v23, %v1640_v21 }
 0x1a6   : > { %1655 = vst [vmem:[%s240_s20 + $0x8] sm:$0xff] %v1972_v24 }
 0x1a7 PF: > { %s13_s14 = sadd.s32 1, %s2325_s14   ;;  %s2936_s12 = smov %s2321_s13 }
 0x1a8   : > { %p10_p5 = scmp.ge.s32.totalorder %s13_s14, 4   ;;  %s2937_s13 = smov %s2939_s15 }
 0x1aa   :  { %12 = sbr.rel (!%p10_p5) target bundleno = 2 (0x2), region = 68 }

// kernel: forward.35
= control target key start
LH: loop header
LB: loop body
LE: loop exit
PB: predicated region body
PF: predicated region fallthrough
CT: control target
= control target key end

     0   :  { %s2537_s12 = smov 0   ;;  %s2539_s13 = smov 0   ;;  %s3103_s0 = inlined_call_operand.vmem [shape: bf16[32,1024], index: 0, kind: input, shape index: {}]   ;;  %s3104_s1 = inlined_call_operand.vmem [shape: bf16[1024,512], index: 1, kind: input, shape index: {}]   ;;  %s3105_s2 = inlined_call_operand.vmem [shape: f32[1,512], index: 2, kind: input, shape index: {}]   ;;  %s3106_s3 = inlined_call_operand.vmem [shape: bf16[32,512], index: 3, kind: output, shape index: {}]  }
   0x1   :  { %s2541_s14 = smov 0   ;;  %s2543_s15 = smov 0  }
   0x2   :  { %s2545_s16 = smov 0  }
   0x3 LB: > { %s22_s17 = sadd.s32 1, %s2511_s15  ;;  %s2042_s18 = sadd.s32 4294967295, %s2515_s16   ;;  %s2515_s16 = sphi %s2545_s16, %s13_s16   ;;  %s2511_s15 = sphi %s2543_s15, %s3111_s15   ;;  %s2507_s14 = sphi %s2541_s14, %s3110_s14   ;;  %s2503_s13 = sphi %s2539_s13, %s3109_s13   ;;  %s2499_s12 = sphi %s2537_s12, %s3108_s12  }
   0x4   : > { %p23_p0 = scmp.ge.s32.totalorder %s22_s17, 2  ;;  %p65_p1 = scmp.ne.s32.totalorder %s2503_s13, %s2499_s12 }
   0x5   : > { %p66_p2 = scmp.eq.s32.totalorder %s2515_s16, 0  ;;  %p123_p4 = scmp.eq.s32.totalorder %s2042_s18, 1 }
   0x6   : > { %s3113_s17 = smov (%p23_p0, %s22_s17), 0  ;;  %s58_s20 = sadd.s32 1, %s2503_s13 }
   0x7   : > { %p67_p3 = por %p66_p2, %p65_p1  ;;  %s55_s19 = ssub.s32 %s2511_s15, %s3113_s17 }
   0x8   : > { %p56_p5 = scmp.eq.s32.totalorder %s55_s19, 0  ;;  %p2572_p6 = por %p123_p4, %p65_p1 }
   0x9   : > { %p2046_p7 = scmp.ge.s32.totalorder %s2515_s16, 2 }
   0xa   : > { %s2577_s22 = scalar_select %p56_p5, %s2503_s13, %s58_s20  }
   0xb   : > { %155 = sbr.rel (%p2046_p7) target bundleno = 86 (0x56), region = 20 }
  0x12   : > { %158 = sbr.rel (!%p67_p3) target bundleno = 86 (0x56), region = 24  ;;  %s160_s23 = sand.u32 (%p67_p3), 1, %s2503_s13  }
  0x13   : > { %s2207_s24 = sshll.u32 (%p67_p3), %s2511_s15, 3  ;;  %s2047_s25 = sshll.u32 (%p67_p3), %s160_s23, 10 }
  0x14   : > { %s2585_s28 = scalar_lea.vmem (%p67_p3), %s3104_s1, %s2207_s24  ;;  %s2590_s29 = scalar_lea.vmem (%p67_p3), [#allocation2], %s2047_s25 }
  0x15   : > { %v447_v0 = vld [vmem:[%s2585_s28] sm:$0xff] (%p67_p3)  ;;  %v449_v1 = vld [vmem:[%s2585_s28 + $0x10] sm:$0xff] (%p67_p3) }
  0x16   : > { %v451_v2 = vld [vmem:[%s2585_s28 + $0x20] sm:$0xff] (%p67_p3)  ;;  %448 = vst [vmem:[%s2590_s29] sm:$0xff] (%p67_p3), %v447_v0  ;;  %450 = vst [vmem:[%s2590_s29 + $0x8] sm:$0xff] (%p67_p3), %v449_v1  ;;  %v453_v3 = vld [vmem:[%s2585_s28 + $0x30] sm:$0xff] (%p67_p3) }
  0x17   : > { %452 = vst [vmem:[%s2590_s29 + $0x10] sm:$0xff] (%p67_p3), %v451_v2  ;;  %v455_v4 = vld [vmem:[%s2585_s28 + $0x40] sm:$0xff] (%p67_p3)  ;;  %v457_v5 = vld [vmem:[%s2585_s28 + $0x50] sm:$0xff] (%p67_p3)  ;;  %454 = vst [vmem:[%s2590_s29 + $0x18] sm:$0xff] (%p67_p3), %v453_v3 }
  0x18   : > { %456 = vst [vmem:[%s2590_s29 + $0x20] sm:$0xff] (%p67_p3), %v455_v4  ;;  %458 = vst [vmem:[%s2590_s29 + $0x28] sm:$0xff] (%p67_p3), %v457_v5  ;;  %v459_v6 = vld [vmem:[%s2585_s28 + $0x60] sm:$0xff] (%p67_p3)  ;;  %v461_v7 = vld [vmem:[%s2585_s28 + $0x70] sm:$0xff] (%p67_p3) }
  0x19   : > { %v463_v8 = vld [vmem:[%s2585_s28 + $0x80] sm:$0xff]  ;;  %460 = vst [vmem:[%s2590_s29 + $0x30] sm:$0xff] %v459_v6  ;;  %462 = vst [vmem:[%s2590_s29 + $0x38] sm:$0xff] %v461_v7  ;;  %v465_v9 = vld [vmem:[%s2585_s28 + $0x90] sm:$0xff] }
  0x1a   : > { %464 = vst [vmem:[%s2590_s29 + $0x40] sm:$0xff] %v463_v8  ;;  %v467_v10 = vld [vmem:[%s2585_s28 + $0xa0] sm:$0xff]  ;;  %v469_v11 = vld [vmem:[%s2585_s28 + $0xb0] sm:$0xff]  ;;  %466 = vst [vmem:[%s2590_s29 + $0x48] sm:$0xff] %v465_v9 }
  0x1b   : > { %468 = vst [vmem:[%s2590_s29 + $0x50] sm:$0xff] %v467_v10  ;;  %470 = vst [vmem:[%s2590_s29 + $0x58] sm:$0xff] %v469_v11  ;;  %v471_v12 = vld [vmem:[%s2585_s28 + $0xc0] sm:$0xff]  ;;  %v473_v13 = vld [vmem:[%s2585_s28 + $0xd0] sm:$0xff] }
  0x1c   : > { %v475_v14 = vld [vmem:[%s2585_s28 + $0xe0] sm:$0xff]  ;;  %472 = vst [vmem:[%s2590_s29 + $0x60] sm:$0xff] %v471_v12  ;;  %474 = vst [vmem:[%s2590_s29 + $0x68] sm:$0xff] %v473_v13  ;;  %v477_v15 = vld [vmem:[%s2585_s28 + $0xf0] sm:$0xff] }
  0x1d   : > { %476 = vst [vmem:[%s2590_s29 + $0x70] sm:$0xff] %v475_v14  ;;  %v479_v16 = vld [vmem:[%s2585_s28 + $0x100] sm:$0xff]  ;;  %v481_v17 = vld [vmem:[%s2585_s28 + $0x110] sm:$0xff]  ;;  %478 = vst [vmem:[%s2590_s29 + $0x78] sm:$0xff] %v477_v15 }
  0x1e   : > { %480 = vst [vmem:[%s2590_s29 + $0x80] sm:$0xff] %v479_v16  ;;  %482 = vst [vmem:[%s2590_s29 + $0x88] sm:$0xff] %v481_v17  ;;  %v483_v18 = vld [vmem:[%s2585_s28 + $0x120] sm:$0xff]  ;;  %v485_v19 = vld [vmem:[%s2585_s28 + $0x130] sm:$0xff] }
  0x1f   : > { %v487_v20 = vld [vmem:[%s2585_s28 + $0x140] sm:$0xff]  ;;  %484 = vst [vmem:[%s2590_s29 + $0x90] sm:$0xff] %v483_v18  ;;  %486 = vst [vmem:[%s2590_s29 + $0x98] sm:$0xff] %v485_v19  ;;  %v489_v21 = vld [vmem:[%s2585_s28 + $0x150] sm:$0xff] }
  0x20   : > { %488 = vst [vmem:[%s2590_s29 + $0xa0] sm:$0xff] %v487_v20  ;;  %v491_v22 = vld [vmem:[%s2585_s28 + $0x160] sm:$0xff]  ;;  %v493_v23 = vld [vmem:[%s2585_s28 + $0x170] sm:$0xff]  ;;  %490 = vst [vmem:[%s2590_s29 + $0xa8] sm:$0xff] %v489_v21 }
  0x21   : > { %492 = vst [vmem:[%s2590_s29 + $0xb0] sm:$0xff] %v491_v22  ;;  %494 = vst [vmem:[%s2590_s29 + $0xb8] sm:$0xff] %v493_v23  ;;  %v495_v24 = vld [vmem:[%s2585_s28 + $0x180] sm:$0xff]  ;;  %v497_v25 = vld [vmem:[%s2585_s28 + $0x190] sm:$0xff] }
  0x22   : > { %v499_v26 = vld [vmem:[%s2585_s28 + $0x1a0] sm:$0xff]  ;;  %496 = vst [vmem:[%s2590_s29 + $0xc0] sm:$0xff] %v495_v24  ;;  %498 = vst [vmem:[%s2590_s29 + $0xc8] sm:$0xff] %v497_v25  ;;  %v501_v27 = vld [vmem:[%s2585_s28 + $0x1b0] sm:$0xff] }
  0x23   : > { %500 = vst [vmem:[%s2590_s29 + $0xd0] sm:$0xff] %v499_v26  ;;  %v503_v28 = vld [vmem:[%s2585_s28 + $0x1c0] sm:$0xff]  ;;  %v505_v29 = vld [vmem:[%s2585_s28 + $0x1d0] sm:$0xff]  ;;  %502 = vst [vmem:[%s2590_s29 + $0xd8] sm:$0xff] %v501_v27 }
  0x24   : > { %504 = vst [vmem:[%s2590_s29 + $0xe0] sm:$0xff] %v503_v28  ;;  %506 = vst [vmem:[%s2590_s29 + $0xe8] sm:$0xff] %v505_v29  ;;  %v507_v30 = vld [vmem:[%s2585_s28 + $0x1e0] sm:$0xff]  ;;  %v509_v31 = vld [vmem:[%s2585_s28 + $0x1f0] sm:$0xff] }
  0x25   : > { %v511_v32 = vld [vmem:[%s2585_s28 + $0x200] sm:$0xff]  ;;  %508 = vst [vmem:[%s2590_s29 + $0xf0] sm:$0xff] %v507_v30  ;;  %510 = vst [vmem:[%s2590_s29 + $0xf8] sm:$0xff] %v509_v31  ;;  %v513_v33 = vld [vmem:[%s2585_s28 + $0x210] sm:$0xff] }
  0x26   : > { %512 = vst [vmem:[%s2590_s29 + $0x100] sm:$0xff] %v511_v32  ;;  %v515_v34 = vld [vmem:[%s2585_s28 + $0x220] sm:$0xff]  ;;  %v517_v35 = vld [vmem:[%s2585_s28 + $0x230] sm:$0xff]  ;;  %514 = vst [vmem:[%s2590_s29 + $0x108] sm:$0xff] %v513_v33 }
  0x27   : > { %516 = vst [vmem:[%s2590_s29 + $0x110] sm:$0xff] %v515_v34  ;;  %518 = vst [vmem:[%s2590_s29 + $0x118] sm:$0xff] %v517_v35  ;;  %v519_v36 = vld [vmem:[%s2585_s28 + $0x240] sm:$0xff]  ;;  %v521_v37 = vld [vmem:[%s2585_s28 + $0x250] sm:$0xff] }
  0x28   : > { %v523_v38 = vld [vmem:[%s2585_s28 + $0x260] sm:$0xff]  ;;  %520 = vst [vmem:[%s2590_s29 + $0x120] sm:$0xff] %v519_v36  ;;  %522 = vst [vmem:[%s2590_s29 + $0x128] sm:$0xff] %v521_v37  ;;  %v525_v39 = vld [vmem:[%s2585_s28 + $0x270] sm:$0xff] }
  0x29   : > { %524 = vst [vmem:[%s2590_s29 + $0x130] sm:$0xff] %v523_v38  ;;  %v527_v40 = vld [vmem:[%s2585_s28 + $0x280] sm:$0xff]  ;;  %v529_v41 = vld [vmem:[%s2585_s28 + $0x290] sm:$0xff]  ;;  %526 = vst [vmem:[%s2590_s29 + $0x138] sm:$0xff] %v525_v39 }
  0x2a   : > { %528 = vst [vmem:[%s2590_s29 + $0x140] sm:$0xff] %v527_v40  ;;  %530 = vst [vmem:[%s2590_s29 + $0x148] sm:$0xff] %v529_v41  ;;  %v531_v42 = vld [vmem:[%s2585_s28 + $0x2a0] sm:$0xff]  ;;  %v533_v43 = vld [vmem:[%s2585_s28 + $0x2b0] sm:$0xff] }
  0x2b   : > { %v535_v44 = vld [vmem:[%s2585_s28 + $0x2c0] sm:$0xff]  ;;  %532 = vst [vmem:[%s2590_s29 + $0x150] sm:$0xff] %v531_v42  ;;  %534 = vst [vmem:[%s2590_s29 + $0x158] sm:$0xff] %v533_v43  ;;  %v537_v45 = vld [vmem:[%s2585_s28 + $0x2d0] sm:$0xff] }
  0x2c   : > { %536 = vst [vmem:[%s2590_s29 + $0x160] sm:$0xff] %v535_v44  ;;  %v539_v46 = vld [vmem:[%s2585_s28 + $0x2e0] sm:$0xff]  ;;  %v541_v47 = vld [vmem:[%s2585_s28 + $0x2f0] sm:$0xff]  ;;  %538 = vst [vmem:[%s2590_s29 + $0x168] sm:$0xff] %v537_v45 }
  0x2d   : > { %540 = vst [vmem:[%s2590_s29 + $0x170] sm:$0xff] %v539_v46  ;;  %542 = vst [vmem:[%s2590_s29 + $0x178] sm:$0xff] %v541_v47  ;;  %v543_v48 = vld [vmem:[%s2585_s28 + $0x300] sm:$0xff]  ;;  %v545_v49 = vld [vmem:[%s2585_s28 + $0x310] sm:$0xff] }
  0x2e   : > { %v547_v50 = vld [vmem:[%s2585_s28 + $0x320] sm:$0xff]  ;;  %544 = vst [vmem:[%s2590_s29 + $0x180] sm:$0xff] %v543_v48  ;;  %546 = vst [vmem:[%s2590_s29 + $0x188] sm:$0xff] %v545_v49  ;;  %v549_v51 = vld [vmem:[%s2585_s28 + $0x330] sm:$0xff] }
  0x2f   : > { %548 = vst [vmem:[%s2590_s29 + $0x190] sm:$0xff] %v547_v50  ;;  %v551_v52 = vld [vmem:[%s2585_s28 + $0x340] sm:$0xff]  ;;  %v553_v53 = vld [vmem:[%s2585_s28 + $0x350] sm:$0xff]  ;;  %550 = vst [vmem:[%s2590_s29 + $0x198] sm:$0xff] %v549_v51 }
  0x30   : > { %552 = vst [vmem:[%s2590_s29 + $0x1a0] sm:$0xff] %v551_v52  ;;  %554 = vst [vmem:[%s2590_s29 + $0x1a8] sm:$0xff] %v553_v53  ;;  %v555_v54 = vld [vmem:[%s2585_s28 + $0x360] sm:$0xff]  ;;  %v557_v55 = vld [vmem:[%s2585_s28 + $0x370] sm:$0xff] }
  0x31   : > { %v559_v56 = vld [vmem:[%s2585_s28 + $0x380] sm:$0xff]  ;;  %556 = vst [vmem:[%s2590_s29 + $0x1b0] sm:$0xff] %v555_v54  ;;  %558 = vst [vmem:[%s2590_s29 + $0x1b8] sm:$0xff] %v557_v55  ;;  %v561_v57 = vld [vmem:[%s2585_s28 + $0x390] sm:$0xff] }
  0x32   : > { %560 = vst [vmem:[%s2590_s29 + $0x1c0] sm:$0xff] %v559_v56  ;;  %v563_v58 = vld [vmem:[%s2585_s28 + $0x3a0] sm:$0xff]  ;;  %v565_v59 = vld [vmem:[%s2585_s28 + $0x3b0] sm:$0xff]  ;;  %562 = vst [vmem:[%s2590_s29 + $0x1c8] sm:$0xff] %v561_v57 }
  0x33   : > { %564 = vst [vmem:[%s2590_s29 + $0x1d0] sm:$0xff] %v563_v58  ;;  %566 = vst [vmem:[%s2590_s29 + $0x1d8] sm:$0xff] %v565_v59  ;;  %v567_v60 = vld [vmem:[%s2585_s28 + $0x3c0] sm:$0xff]  ;;  %v569_v61 = vld [vmem:[%s2585_s28 + $0x3d0] sm:$0xff] }
  0x34   : > { %v571_v62 = vld [vmem:[%s2585_s28 + $0x3e0] sm:$0xff]  ;;  %568 = vst [vmem:[%s2590_s29 + $0x1e0] sm:$0xff] %v567_v60  ;;  %570 = vst [vmem:[%s2590_s29 + $0x1e8] sm:$0xff] %v569_v61  ;;  %v573_v63 = vld [vmem:[%s2585_s28 + $0x3f0] sm:$0xff] }
  0x35   : > { %572 = vst [vmem:[%s2590_s29 + $0x1f0] sm:$0xff] %v571_v62  ;;  %v575_v0 = vld [vmem:[%s2585_s28 + $0x400] sm:$0xff]  ;;  %v577_v1 = vld [vmem:[%s2585_s28 + $0x410] sm:$0xff]  ;;  %574 = vst [vmem:[%s2590_s29 + $0x1f8] sm:$0xff] %v573_v63 }
  0x36   : > { %576 = vst [vmem:[%s2590_s29 + $0x200] sm:$0xff] %v575_v0  ;;  %578 = vst [vmem:[%s2590_s29 + $0x208] sm:$0xff] %v577_v1  ;;  %v579_v2 = vld [vmem:[%s2585_s28 + $0x420] sm:$0xff]  ;;  %v581_v3 = vld [vmem:[%s2585_s28 + $0x430] sm:$0xff] }
  0x37   : > { %v583_v4 = vld [vmem:[%s2585_s28 + $0x440] sm:$0xff]  ;;  %580 = vst [vmem:[%s2590_s29 + $0x210] sm:$0xff] %v579_v2  ;;  %582 = vst [vmem:[%s2590_s29 + $0x218] sm:$0xff] %v581_v3  ;;  %v585_v5 = vld [vmem:[%s2585_s28 + $0x450] sm:$0xff] }
  0x38   : > { %584 = vst [vmem:[%s2590_s29 + $0x220] sm:$0xff] %v583_v4  ;;  %v587_v6 = vld [vmem:[%s2585_s28 + $0x460] sm:$0xff]  ;;  %v589_v7 = vld [vmem:[%s2585_s28 + $0x470] sm:$0xff]  ;;  %586 = vst [vmem:[%s2590_s29 + $0x228] sm:$0xff] %v585_v5 }
  0x39   : > { %588 = vst [vmem:[%s2590_s29 + $0x230] sm:$0xff] %v587_v6  ;;  %590 = vst [vmem:[%s2590_s29 + $0x238] sm:$0xff] %v589_v7  ;;  %v591_v8 = vld [vmem:[%s2585_s28 + $0x480] sm:$0xff]  ;;  %v593_v9 = vld [vmem:[%s2585_s28 + $0x490] sm:$0xff] }
  0x3a   : > { %v595_v10 = vld [vmem:[%s2585_s28 + $0x4a0] sm:$0xff]  ;;  %592 = vst [vmem:[%s2590_s29 + $0x240] sm:$0xff] %v591_v8  ;;  %594 = vst [vmem:[%s2590_s29 + $0x248] sm:$0xff] %v593_v9  ;;  %v597_v11 = vld [vmem:[%s2585_s28 + $0x4b0] sm:$0xff] }
  0x3b   : > { %596 = vst [vmem:[%s2590_s29 + $0x250] sm:$0xff] %v595_v10  ;;  %v599_v12 = vld [vmem:[%s2585_s28 + $0x4c0] sm:$0xff]  ;;  %v601_v13 = vld [vmem:[%s2585_s28 + $0x4d0] sm:$0xff]  ;;  %598 = vst [vmem:[%s2590_s29 + $0x258] sm:$0xff] %v597_v11 }
  0x3c   : > { %600 = vst [vmem:[%s2590_s29 + $0x260] sm:$0xff] %v599_v12  ;;  %602 = vst [vmem:[%s2590_s29 + $0x268] sm:$0xff] %v601_v13  ;;  %v603_v14 = vld [vmem:[%s2585_s28 + $0x4e0] sm:$0xff]  ;;  %v605_v15 = vld [vmem:[%s2585_s28 + $0x4f0] sm:$0xff] }
  0x3d   : > { %v607_v16 = vld [vmem:[%s2585_s28 + $0x500] sm:$0xff]  ;;  %604 = vst [vmem:[%s2590_s29 + $0x270] sm:$0xff] %v603_v14  ;;  %606 = vst [vmem:[%s2590_s29 + $0x278] sm:$0xff] %v605_v15  ;;  %v609_v17 = vld [vmem:[%s2585_s28 + $0x510] sm:$0xff] }
  0x3e   : > { %608 = vst [vmem:[%s2590_s29 + $0x280] sm:$0xff] %v607_v16  ;;  %v611_v18 = vld [vmem:[%s2585_s28 + $0x520] sm:$0xff]  ;;  %v613_v19 = vld [vmem:[%s2585_s28 + $0x530] sm:$0xff]  ;;  %610 = vst [vmem:[%s2590_s29 + $0x288] sm:$0xff] %v609_v17 }
  0x3f   : > { %612 = vst [vmem:[%s2590_s29 + $0x290] sm:$0xff] %v611_v18  ;;  %614 = vst [vmem:[%s2590_s29 + $0x298] sm:$0xff] %v613_v19  ;;  %v615_v20 = vld [vmem:[%s2585_s28 + $0x540] sm:$0xff]  ;;  %v617_v21 = vld [vmem:[%s2585_s28 + $0x550] sm:$0xff] }
  0x40   : > { %v619_v22 = vld [vmem:[%s2585_s28 + $0x560] sm:$0xff]  ;;  %616 = vst [vmem:[%s2590_s29 + $0x2a0] sm:$0xff] %v615_v20  ;;  %618 = vst [vmem:[%s2590_s29 + $0x2a8] sm:$0xff] %v617_v21  ;;  %v621_v23 = vld [vmem:[%s2585_s28 + $0x570] sm:$0xff] }
  0x41   : > { %620 = vst [vmem:[%s2590_s29 + $0x2b0] sm:$0xff] %v619_v22  ;;  %v623_v24 = vld [vmem:[%s2585_s28 + $0x580] sm:$0xff]  ;;  %v625_v25 = vld [vmem:[%s2585_s28 + $0x590] sm:$0xff]  ;;  %622 = vst [vmem:[%s2590_s29 + $0x2b8] sm:$0xff] %v621_v23 }
  0x42   : > { %624 = vst [vmem:[%s2590_s29 + $0x2c0] sm:$0xff] %v623_v24  ;;  %626 = vst [vmem:[%s2590_s29 + $0x2c8] sm:$0xff] %v625_v25  ;;  %v627_v26 = vld [vmem:[%s2585_s28 + $0x5a0] sm:$0xff]  ;;  %v629_v27 = vld [vmem:[%s2585_s28 + $0x5b0] sm:$0xff] }
  0x43   : > { %v631_v28 = vld [vmem:[%s2585_s28 + $0x5c0] sm:$0xff]  ;;  %628 = vst [vmem:[%s2590_s29 + $0x2d0] sm:$0xff] %v627_v26  ;;  %630 = vst [vmem:[%s2590_s29 + $0x2d8] sm:$0xff] %v629_v27  ;;  %v633_v29 = vld [vmem:[%s2585_s28 + $0x5d0] sm:$0xff] }
  0x44   : > { %632 = vst [vmem:[%s2590_s29 + $0x2e0] sm:$0xff] %v631_v28  ;;  %v635_v30 = vld [vmem:[%s2585_s28 + $0x5e0] sm:$0xff]  ;;  %v637_v31 = vld [vmem:[%s2585_s28 + $0x5f0] sm:$0xff]  ;;  %634 = vst [vmem:[%s2590_s29 + $0x2e8] sm:$0xff] %v633_v29 }
  0x45   : > { %636 = vst [vmem:[%s2590_s29 + $0x2f0] sm:$0xff] %v635_v30  ;;  %638 = vst [vmem:[%s2590_s29 + $0x2f8] sm:$0xff] %v637_v31  ;;  %v639_v32 = vld [vmem:[%s2585_s28 + $0x600] sm:$0xff]  ;;  %v641_v33 = vld [vmem:[%s2585_s28 + $0x610] sm:$0xff] }
  0x46   : > { %v643_v34 = vld [vmem:[%s2585_s28 + $0x620] sm:$0xff]  ;;  %640 = vst [vmem:[%s2590_s29 + $0x300] sm:$0xff] %v639_v32  ;;  %642 = vst [vmem:[%s2590_s29 + $0x308] sm:$0xff] %v641_v33  ;;  %v645_v35 = vld [vmem:[%s2585_s28 + $0x630] sm:$0xff] }
  0x47   : > { %644 = vst [vmem:[%s2590_s29 + $0x310] sm:$0xff] %v643_v34  ;;  %v647_v36 = vld [vmem:[%s2585_s28 + $0x640] sm:$0xff]  ;;  %v649_v37 = vld [vmem:[%s2585_s28 + $0x650] sm:$0xff]  ;;  %646 = vst [vmem:[%s2590_s29 + $0x318] sm:$0xff] %v645_v35 }
  0x48   : > { %648 = vst [vmem:[%s2590_s29 + $0x320] sm:$0xff] %v647_v36  ;;  %650 = vst [vmem:[%s2590_s29 + $0x328] sm:$0xff] %v649_v37  ;;  %v651_v38 = vld [vmem:[%s2585_s28 + $0x660] sm:$0xff]  ;;  %v653_v39 = vld [vmem:[%s2585_s28 + $0x670] sm:$0xff] }
  0x49   : > { %v655_v40 = vld [vmem:[%s2585_s28 + $0x680] sm:$0xff]  ;;  %652 = vst [vmem:[%s2590_s29 + $0x330] sm:$0xff] %v651_v38  ;;  %654 = vst [vmem:[%s2590_s29 + $0x338] sm:$0xff] %v653_v39  ;;  %v657_v41 = vld [vmem:[%s2585_s28 + $0x690] sm:$0xff] }
  0x4a   : > { %656 = vst [vmem:[%s2590_s29 + $0x340] sm:$0xff] %v655_v40  ;;  %v659_v42 = vld [vmem:[%s2585_s28 + $0x6a0] sm:$0xff]  ;;  %v661_v43 = vld [vmem:[%s2585_s28 + $0x6b0] sm:$0xff]  ;;  %658 = vst [vmem:[%s2590_s29 + $0x348] sm:$0xff] %v657_v41 }
  0x4b   : > { %660 = vst [vmem:[%s2590_s29 + $0x350] sm:$0xff] %v659_v42  ;;  %662 = vst [vmem:[%s2590_s29 + $0x358] sm:$0xff] %v661_v43  ;;  %v663_v44 = vld [vmem:[%s2585_s28 + $0x6c0] sm:$0xff]  ;;  %v665_v45 = vld [vmem:[%s2585_s28 + $0x6d0] sm:$0xff] }
  0x4c   : > { %v667_v46 = vld [vmem:[%s2585_s28 + $0x6e0] sm:$0xff]  ;;  %664 = vst [vmem:[%s2590_s29 + $0x360] sm:$0xff] %v663_v44  ;;  %666 = vst [vmem:[%s2590_s29 + $0x368] sm:$0xff] %v665_v45  ;;  %v669_v47 = vld [vmem:[%s2585_s28 + $0x6f0] sm:$0xff] }
  0x4d   : > { %668 = vst [vmem:[%s2590_s29 + $0x370] sm:$0xff] %v667_v46  ;;  %v671_v48 = vld [vmem:[%s2585_s28 + $0x700] sm:$0xff]  ;;  %v673_v49 = vld [vmem:[%s2585_s28 + $0x710] sm:$0xff]  ;;  %670 = vst [vmem:[%s2590_s29 + $0x378] sm:$0xff] %v669_v47 }
  0x4e   : > { %672 = vst [vmem:[%s2590_s29 + $0x380] sm:$0xff] %v671_v48  ;;  %674 = vst [vmem:[%s2590_s29 + $0x388] sm:$0xff] %v673_v49  ;;  %v675_v50 = vld [vmem:[%s2585_s28 + $0x720] sm:$0xff]  ;;  %v677_v51 = vld [vmem:[%s2585_s28 + $0x730] sm:$0xff] }
  0x4f   : > { %v679_v52 = vld [vmem:[%s2585_s28 + $0x740] sm:$0xff]  ;;  %676 = vst [vmem:[%s2590_s29 + $0x390] sm:$0xff] %v675_v50  ;;  %678 = vst [vmem:[%s2590_s29 + $0x398] sm:$0xff] %v677_v51  ;;  %v681_v53 = vld [vmem:[%s2585_s28 + $0x750] sm:$0xff] }
  0x50   : > { %680 = vst [vmem:[%s2590_s29 + $0x3a0] sm:$0xff] %v679_v52  ;;  %v683_v54 = vld [vmem:[%s2585_s28 + $0x760] sm:$0xff]  ;;  %v685_v55 = vld [vmem:[%s2585_s28 + $0x770] sm:$0xff]  ;;  %682 = vst [vmem:[%s2590_s29 + $0x3a8] sm:$0xff] %v681_v53 }
  0x51   : > { %684 = vst [vmem:[%s2590_s29 + $0x3b0] sm:$0xff] %v683_v54  ;;  %686 = vst [vmem:[%s2590_s29 + $0x3b8] sm:$0xff] %v685_v55  ;;  %v687_v56 = vld [vmem:[%s2585_s28 + $0x780] sm:$0xff]  ;;  %v689_v57 = vld [vmem:[%s2585_s28 + $0x790] sm:$0xff] }
  0x52   : > { %v691_v58 = vld [vmem:[%s2585_s28 + $0x7a0] sm:$0xff]  ;;  %688 = vst [vmem:[%s2590_s29 + $0x3c0] sm:$0xff] %v687_v56  ;;  %690 = vst [vmem:[%s2590_s29 + $0x3c8] sm:$0xff] %v689_v57  ;;  %v693_v59 = vld [vmem:[%s2585_s28 + $0x7b0] sm:$0xff] }
  0x53   : > { %692 = vst [vmem:[%s2590_s29 + $0x3d0] sm:$0xff] %v691_v58  ;;  %v695_v60 = vld [vmem:[%s2585_s28 + $0x7c0] sm:$0xff]  ;;  %v697_v61 = vld [vmem:[%s2585_s28 + $0x7d0] sm:$0xff]  ;;  %694 = vst [vmem:[%s2590_s29 + $0x3d8] sm:$0xff] %v693_v59 }
  0x54   : > { %696 = vst [vmem:[%s2590_s29 + $0x3e0] sm:$0xff] %v695_v60  ;;  %698 = vst [vmem:[%s2590_s29 + $0x3e8] sm:$0xff] %v697_v61  ;;  %v699_v62 = vld [vmem:[%s2585_s28 + $0x7e0] sm:$0xff]  ;;  %v701_v63 = vld [vmem:[%s2585_s28 + $0x7f0] sm:$0xff] }
  0x55   : > { %700 = vst [vmem:[%s2590_s29 + $0x3f0] sm:$0xff] %v699_v62  ;;  %702 = vst [vmem:[%s2590_s29 + $0x3f8] sm:$0xff] %v701_v63 }
  0x56 PF: > { %p2050_p8 = scmp.ge.s32.totalorder %s2515_s16, 1  ;;  %p715_p9 = scmp.lt.s32.totalorder %s2515_s16, 3 }
  0x58   : > { %p716_p10 = pnand %p2050_p8, %p715_p9 }
  0x59   : > { %s722_s30 = sand.u32 (!%p716_p10), 1, %s2499_s12   ;;  %v2851_v0 = vld [vmem:[%s3103_s0] sm:$0xff] (!%p716_p10)  ;;  %v2861_v2 = vld [vmem:[%s3103_s0 + $0x10] sm:$0xff] (!%p716_p10) }
  0x5a   : > { %719 = sbr.rel (%p716_p10) target bundleno = 462 (0x1ce), region = 66  ;;  %v2856_v1 = vld [vmem:[%s3103_s0 + $0x20] sm:$0xff] (!%p716_p10)  ;;  %s2051_s10 = sshll.u32 (!%p716_p10), %s722_s30, 10  ;;  %v2872_v5 = vld [vmem:[%s3103_s0 + $0x30] sm:$0xff] (!%p716_p10) }
  0x5b   : > { %v2054_v3 = vcombine.low (!%p716_p10), %v2851_v0, %v2856_v1  ;;  %v2055_v4 = vcombine.high (!%p716_p10), %v2851_v0, %v2856_v1  ;;  %v2058_v6 = vcombine.low (!%p716_p10), %v2861_v2, %v2872_v5  ;;  %v2059_v7 = vcombine.high (!%p716_p10), %v2861_v2, %v2872_v5  ;;  %s2878_s19 = scalar_lea.vmem (!%p716_p10), [#allocation2], %s2051_s10  ;;  %s2052_s6 = sshll.u32 (!%p716_p10), %s722_s30, 5 }
  0x5c   : > { %v2285_v8 = vld [vmem:[%s2878_s19 + $0x4] ss:$8 sps:$4 sm:$0xff] (!%p716_p10)   ;;  %v2289_v10 = vld [vmem:[%s2878_s19] ss:$8 sps:$4 sm:$0xff] (!%p716_p10)   ;;  %v2291_v12 = vld [vmem:[%s2878_s19 + $0x14] ss:$8 sps:$4 sm:$0xff] (!%p716_p10)  }
  0x5d   : > { %1677 = vmatprep.mubr.bf16.mxu1 (!%p716_p10), %v2055_v4  ;;  %v2287_v9 = vld [vmem:[%s2878_s19 + $0x204] ss:$8 sps:$4 sm:$0xff] (!%p716_p10)   ;;  %1783 = vmatprep.mubr.bf16.mxu0 (!%p716_p10), %v2059_v7  ;;  %v2290_v11 = vld [vmem:[%s2878_s19 + $0x200] ss:$8 sps:$4 sm:$0xff] (!%p716_p10)   ;;  %v2293_v13 = vld [vmem:[%s2878_s19 + $0x214] ss:$8 sps:$4 sm:$0xff] (!%p716_p10)  }
  0x5e   : > { %1645 = vmatprep.subr.bf16.mxu1 (!%p716_p10), %v2285_v8  ;;  %1751 = vmatprep.subr.bf16.mxu0 (!%p716_p10), %v2287_v9  ;;  %v2295_v14 = vld [vmem:[%s2878_s19 + $0x10] ss:$8 sps:$4 sm:$0xff] (!%p716_p10)   ;;  %v2297_v16 = vld [vmem:[%s2878_s19 + $0x24] ss:$8 sps:$4 sm:$0xff] (!%p716_p10)   ;;  %v2301_v18 = vld [vmem:[%s2878_s19 + $0x20] ss:$8 sps:$4 sm:$0xff] (!%p716_p10)  }
  0x5f   : > { %1646 = vmatpush1.bf16.msra.mxu1 (!%p716_p10), %v2289_v10  ;;  %1752 = vmatpush1.bf16.msra.mxu0 (!%p716_p10), %v2290_v11  ;;  %v2296_v15 = vld [vmem:[%s2878_s19 + $0x210] ss:$8 sps:$4 sm:$0xff] (!%p716_p10)   ;;  %v2299_v17 = vld [vmem:[%s2878_s19 + $0x224] ss:$8 sps:$4 sm:$0xff] (!%p716_p10)   ;;  %v2302_v19 = vld [vmem:[%s2878_s19 + $0x220] ss:$8 sps:$4 sm:$0xff] (!%p716_p10)  }
  0x60   : > { %1647 = vmatprep.subr.bf16.mxu1 (!%p716_p10), %v2291_v12  ;;  %1753 = vmatprep.subr.bf16.mxu0 (!%p716_p10), %v2293_v13  ;;  %v2303_v20 = vld [vmem:[%s2878_s19 + $0x34] ss:$8 sps:$4 sm:$0xff] (!%p716_p10)   ;;  %v2307_v22 = vld [vmem:[%s2878_s19 + $0x30] ss:$8 sps:$4 sm:$0xff] (!%p716_p10)   ;;  %v2309_v24 = vld [vmem:[%s2878_s19 + $0x44] ss:$8 sps:$4 sm:$0xff] (!%p716_p10)  }
  0x61   : > { %v2305_v21 = vld [vmem:[%s2878_s19 + $0x234] ss:$8 sps:$4 sm:$0xff]   ;;  %v2308_v23 = vld [vmem:[%s2878_s19 + $0x230] ss:$8 sps:$4 sm:$0xff]   ;;  %v2311_v25 = vld [vmem:[%s2878_s19 + $0x244] ss:$8 sps:$4 sm:$0xff]  }
  0x62   : > { %v2313_v26 = vld [vmem:[%s2878_s19 + $0x40] ss:$8 sps:$4 sm:$0xff]   ;;  %v2315_v28 = vld [vmem:[%s2878_s19 + $0x54] ss:$8 sps:$4 sm:$0xff]   ;;  %v2319_v30 = vld [vmem:[%s2878_s19 + $0x50] ss:$8 sps:$4 sm:$0xff]  }
  0x63   : > { %1648 = vmatpush1.bf16.msra.mxu1 %v2295_v14  ;;  %1754 = vmatpush1.bf16.msra.mxu0 %v2296_v15  ;;  %v2314_v27 = vld [vmem:[%s2878_s19 + $0x240] ss:$8 sps:$4 sm:$0xff]   ;;  %v2317_v29 = vld [vmem:[%s2878_s19 + $0x254] ss:$8 sps:$4 sm:$0xff]   ;;  %v2320_v31 = vld [vmem:[%s2878_s19 + $0x250] ss:$8 sps:$4 sm:$0xff]  }
  0x64   : > { %1649 = vmatprep.subr.bf16.mxu1 %v2297_v16  ;;  %1755 = vmatprep.subr.bf16.mxu0 %v2299_v17  ;;  %v2321_v32 = vld [vmem:[%s2878_s19 + $0x64] ss:$8 sps:$4 sm:$0xff]   ;;  %v2325_v34 = vld [vmem:[%s2878_s19 + $0x60] ss:$8 sps:$4 sm:$0xff]   ;;  %v2327_v36 = vld [vmem:[%s2878_s19 + $0x74] ss:$8 sps:$4 sm:$0xff]  }
  0x65   : > { %v2323_v33 = vld [vmem:[%s2878_s19 + $0x264] ss:$8 sps:$4 sm:$0xff]   ;;  %v2326_v35 = vld [vmem:[%s2878_s19 + $0x260] ss:$8 sps:$4 sm:$0xff]   ;;  %v2329_v37 = vld [vmem:[%s2878_s19 + $0x274] ss:$8 sps:$4 sm:$0xff]  }
  0x66   : > { %v2331_v38 = vld [vmem:[%s2878_s19 + $0x70] ss:$8 sps:$4 sm:$0xff]   ;;  %v2333_v40 = vld [vmem:[%s2878_s19 + $0x84] ss:$8 sps:$4 sm:$0xff]   ;;  %v2337_v42 = vld [vmem:[%s2878_s19 + $0x80] ss:$8 sps:$4 sm:$0xff]  }
  0x67   : > { %1650 = vmatpush1.bf16.msra.mxu1 %v2301_v18  ;;  %1756 = vmatpush1.bf16.msra.mxu0 %v2302_v19  ;;  %v2332_v39 = vld [vmem:[%s2878_s19 + $0x270] ss:$8 sps:$4 sm:$0xff]   ;;  %v2335_v41 = vld [vmem:[%s2878_s19 + $0x284] ss:$8 sps:$4 sm:$0xff]   ;;  %v2338_v43 = vld [vmem:[%s2878_s19 + $0x280] ss:$8 sps:$4 sm:$0xff]  }
  0x68   : > { %1651 = vmatprep.subr.bf16.mxu1 %v2303_v20  ;;  %1757 = vmatprep.subr.bf16.mxu0 %v2305_v21  ;;  %v2339_v44 = vld [vmem:[%s2878_s19 + $0x94] ss:$8 sps:$4 sm:$0xff]   ;;  %v2343_v46 = vld [vmem:[%s2878_s19 + $0x90] ss:$8 sps:$4 sm:$0xff]   ;;  %v2345_v48 = vld [vmem:[%s2878_s19 + $0xa4] ss:$8 sps:$4 sm:$0xff]  }
  0x69   : > { %v2341_v45 = vld [vmem:[%s2878_s19 + $0x294] ss:$8 sps:$4 sm:$0xff]   ;;  %v2344_v47 = vld [vmem:[%s2878_s19 + $0x290] ss:$8 sps:$4 sm:$0xff]   ;;  %v2347_v49 = vld [vmem:[%s2878_s19 + $0x2a4] ss:$8 sps:$4 sm:$0xff]  }
  0x6a   : > { %v2349_v50 = vld [vmem:[%s2878_s19 + $0xa0] ss:$8 sps:$4 sm:$0xff]   ;;  %v2351_v52 = vld [vmem:[%s2878_s19 + $0xb4] ss:$8 sps:$4 sm:$0xff]   ;;  %v2355_v54 = vld [vmem:[%s2878_s19 + $0xb0] ss:$8 sps:$4 sm:$0xff]  }
  0x6b   : > { %1652 = vmatpush1.bf16.msra.mxu1 %v2307_v22  ;;  %1758 = vmatpush1.bf16.msra.mxu0 %v2308_v23  ;;  %v2350_v51 = vld [vmem:[%s2878_s19 + $0x2a0] ss:$8 sps:$4 sm:$0xff]   ;;  %v2353_v53 = vld [vmem:[%s2878_s19 + $0x2b4] ss:$8 sps:$4 sm:$0xff]   ;;  %v2356_v55 = vld [vmem:[%s2878_s19 + $0x2b0] ss:$8 sps:$4 sm:$0xff]  }
  0x6c   : > { %1653 = vmatprep.subr.bf16.mxu1 %v2309_v24  ;;  %1759 = vmatprep.subr.bf16.mxu0 %v2311_v25  ;;  %v2357_v56 = vld [vmem:[%s2878_s19 + $0xc4] ss:$8 sps:$4 sm:$0xff]   ;;  %v2361_v58 = vld [vmem:[%s2878_s19 + $0xc0] ss:$8 sps:$4 sm:$0xff]   ;;  %v2363_v60 = vld [vmem:[%s2878_s19 + $0xd4] ss:$8 sps:$4 sm:$0xff]  }
  0x6d   : > { %v2359_v57 = vld [vmem:[%s2878_s19 + $0x2c4] ss:$8 sps:$4 sm:$0xff]   ;;  %v2362_v59 = vld [vmem:[%s2878_s19 + $0x2c0] ss:$8 sps:$4 sm:$0xff]   ;;  %v2365_v61 = vld [vmem:[%s2878_s19 + $0x2d4] ss:$8 sps:$4 sm:$0xff]  }
  0x6e   : > { %v2367_v62 = vld [vmem:[%s2878_s19 + $0xd0] ss:$8 sps:$4 sm:$0xff]   ;;  %v2369_v4 = vld [vmem:[%s2878_s19 + $0xe4] ss:$8 sps:$4 sm:$0xff]   ;;  %v2373_v8 = vld [vmem:[%s2878_s19 + $0xe0] ss:$8 sps:$4 sm:$0xff]  }
  0x6f   : > { %1654 = vmatpush1.bf16.msra.mxu1 %v2313_v26  ;;  %1760 = vmatpush1.bf16.msra.mxu0 %v2314_v27  ;;  %v2368_v63 = vld [vmem:[%s2878_s19 + $0x2d0] ss:$8 sps:$4 sm:$0xff]   ;;  %v2371_v7 = vld [vmem:[%s2878_s19 + $0x2e4] ss:$8 sps:$4 sm:$0xff]   ;;  %v2374_v9 = vld [vmem:[%s2878_s19 + $0x2e0] ss:$8 sps:$4 sm:$0xff]  }
  0x70   : > { %1655 = vmatprep.subr.bf16.mxu1 %v2315_v28  ;;  %1761 = vmatprep.subr.bf16.mxu0 %v2317_v29  ;;  %v2375_v10 = vld [vmem:[%s2878_s19 + $0xf4] ss:$8 sps:$4 sm:$0xff]   ;;  %v2379_v12 = vld [vmem:[%s2878_s19 + $0xf0] ss:$8 sps:$4 sm:$0xff]   ;;  %v2383_v14 = vld [vmem:[%s2878_s19 + $0x104] ss:$8 sps:$4 sm:$0xff]  }
  0x71   : > { %v2377_v11 = vld [vmem:[%s2878_s19 + $0x2f4] ss:$8 sps:$4 sm:$0xff]   ;;  %v2380_v13 = vld [vmem:[%s2878_s19 + $0x2f0] ss:$8 sps:$4 sm:$0xff]   ;;  %v2386_v15 = vld [vmem:[%s2878_s19 + $0x304] ss:$8 sps:$4 sm:$0xff]  }
  0x72   : > { %v777_v16 = vld [vmem:[%s3103_s0 + $0x40] sm:$0xff]  ;;  %v779_v18 = vld [vmem:[%s3103_s0 + $0x50] sm:$0xff]  ;;  %s3072_s7 = scalar_lea.vmem [#allocation3], %s2052_s6  ;;  %s2212_s12 = sshll.u32 (%p2572_p6), %s2507_s14, 3 }
  0x73   : > { %1656 = vmatpush1.bf16.msra.mxu1 %v2319_v30  ;;  %1762 = vmatpush1.bf16.msra.mxu0 %v2320_v31  ;;  %v781_v17 = vld [vmem:[%s3103_s0 + $0x60] sm:$0xff]  ;;  %v783_v19 = vld [vmem:[%s3103_s0 + $0x70] sm:$0xff]  ;;  %s1905_s9 = scalar_lea.vmem (%p2572_p6), %s3106_s3, %s2212_s12 }
  0x74   : > { %1657 = vmatprep.subr.bf16.mxu1 %v2321_v32  ;;  %1763 = vmatprep.subr.bf16.mxu0 %v2323_v33  ;;  %v2381_v20 = vld [vmem:[%s2878_s19 + $0x100] ss:$8 sps:$4 sm:$0xff]   ;;  %v2389_v22 = vld [vmem:[%s2878_s19 + $0x114] ss:$8 sps:$4 sm:$0xff]   ;;  %v2063_v24 = vcombine.high %v777_v16, %v781_v17  ;;  %v2067_v25 = vcombine.high %v779_v18, %v783_v19  ;;  %v2387_v26 = vld [vmem:[%s2878_s19 + $0x110] ss:$8 sps:$4 sm:$0xff]   ;;  %v2066_v2 = vcombine.low %v779_v18, %v783_v19 }
  0x75   : > { %v2384_v21 = vld [vmem:[%s2878_s19 + $0x300] ss:$8 sps:$4 sm:$0xff]   ;;  %v2392_v23 = vld [vmem:[%s2878_s19 + $0x314] ss:$8 sps:$4 sm:$0xff]   ;;  %v2390_v27 = vld [vmem:[%s2878_s19 + $0x310] ss:$8 sps:$4 sm:$0xff]  }
  0x76   : > { %v2395_v28 = vld [vmem:[%s2878_s19 + $0x124] ss:$8 sps:$4 sm:$0xff]   ;;  %v2393_v0 = vld [vmem:[%s2878_s19 + $0x120] ss:$8 sps:$4 sm:$0xff]   ;;  %v2401_v5 = vld [vmem:[%s2878_s19 + $0x134] ss:$8 sps:$4 sm:$0xff]  }
  0x77   : > { %1658 = vmatpush1.bf16.msra.mxu1 %v2325_v34  ;;  %1764 = vmatpush1.bf16.msra.mxu0 %v2326_v35  ;;  %v2398_v29 = vld [vmem:[%s2878_s19 + $0x324] ss:$8 sps:$4 sm:$0xff]   ;;  %v2396_v1 = vld [vmem:[%s2878_s19 + $0x320] ss:$8 sps:$4 sm:$0xff]   ;;  %v2399_v30 = vld [vmem:[%s2878_s19 + $0x130] ss:$8 sps:$4 sm:$0xff]  }
  0x78   : > { %1659 = vmatprep.subr.bf16.mxu1 %v2327_v36  ;;  %1765 = vmatprep.subr.bf16.mxu0 %v2329_v37  ;;  %v2402_v31 = vld [vmem:[%s2878_s19 + $0x330] ss:$8 sps:$4 sm:$0xff]   ;;  %v2407_v32 = vld [vmem:[%s2878_s19 + $0x144] ss:$8 sps:$4 sm:$0xff]   ;;  %v2405_v34 = vld [vmem:[%s2878_s19 + $0x140] ss:$8 sps:$4 sm:$0xff]  }
  0x79   : > { %v2410_v33 = vld [vmem:[%s2878_s19 + $0x344] ss:$8 sps:$4 sm:$0xff]   ;;  %v2408_v35 = vld [vmem:[%s2878_s19 + $0x340] ss:$8 sps:$4 sm:$0xff]   ;;  %v2413_v36 = vld [vmem:[%s2878_s19 + $0x154] ss:$8 sps:$4 sm:$0xff]  }
  0x7a   : > { %v2416_v37 = vld [vmem:[%s2878_s19 + $0x354] ss:$8 sps:$4 sm:$0xff]   ;;  %v2459_v18 = vld [vmem:[%s2878_s19 + $0x1d0] ss:$8 sps:$4 sm:$0xff]  }
  0x7b   : > { %1660 = vmatpush1.bf16.msra.mxu1 %v2331_v38  ;;  %1766 = vmatpush1.bf16.msra.mxu0 %v2332_v39  ;;  %v2987_v38 = vld [vmem:[%s3103_s0 + $0x8] sm:$0xff]  ;;  %v2411_v39 = vld [vmem:[%s2878_s19 + $0x150] ss:$8 sps:$4 sm:$0xff]  }
  0x7c   : > { %1661 = vmatprep.subr.bf16.mxu1 %v2333_v40  ;;  %1767 = vmatprep.subr.bf16.mxu0 %v2335_v41  ;;  %v2414_v40 = vld [vmem:[%s2878_s19 + $0x350] ss:$8 sps:$4 sm:$0xff]   ;;  %v2419_v41 = vld [vmem:[%s2878_s19 + $0x164] ss:$8 sps:$4 sm:$0xff]  }
  0x7d   : > { %v2462_v19 = vld [vmem:[%s2878_s19 + $0x3d0] ss:$8 sps:$4 sm:$0xff]  }
  0x7f   : > { %1662 = vmatpush1.bf16.msra.mxu1 %v2337_v42  ;;  %1768 = vmatpush1.bf16.msra.mxu0 %v2338_v43  ;;  %v2422_v42 = vld [vmem:[%s2878_s19 + $0x364] ss:$8 sps:$4 sm:$0xff]  }
  0x80   : > { %1663 = vmatprep.subr.bf16.mxu1 %v2339_v44  ;;  %1769 = vmatprep.subr.bf16.mxu0 %v2341_v45  ;;  %v2996_v43 = vld [vmem:[%s3103_s0 + $0x28] sm:$0xff]  ;;  %v3001_v44 = vld [vmem:[%s3103_s0 + $0x18] sm:$0xff] }
  0x81   : > { %v2057_v45 = vcombine.high %v2987_v38, %v2996_v43 }
  0x83   : > { %1664 = vmatpush1.bf16.msra.mxu1 %v2343_v46  ;;  %1770 = vmatpush1.bf16.msra.mxu0 %v2344_v47  ;;  %v3008_v46 = vld [vmem:[%s3103_s0 + $0x38] sm:$0xff] }
  0x84   : > { %1665 = vmatprep.subr.bf16.mxu1 %v2345_v48  ;;  %1771 = vmatprep.subr.bf16.mxu0 %v2347_v49  ;;  %v2061_v47 = vcombine.high %v3001_v44, %v3008_v46  ;;  %v2417_v48 = vld [vmem:[%s2878_s19 + $0x160] ss:$8 sps:$4 sm:$0xff]  }
  0x85   : > { %v2420_v49 = vld [vmem:[%s2878_s19 + $0x360] ss:$8 sps:$4 sm:$0xff]  }
  0x87   : > { %1666 = vmatpush1.bf16.msra.mxu1 %v2349_v50  ;;  %1772 = vmatpush1.bf16.msra.mxu0 %v2350_v51  ;;  %v2425_v50 = vld [vmem:[%s2878_s19 + $0x174] ss:$8 sps:$4 sm:$0xff]  }
  0x88   : > { %1667 = vmatprep.subr.bf16.mxu1 %v2351_v52  ;;  %1773 = vmatprep.subr.bf16.mxu0 %v2353_v53  ;;  %v2428_v51 = vld [vmem:[%s2878_s19 + $0x374] ss:$8 sps:$4 sm:$0xff]   ;;  %v2423_v52 = vld [vmem:[%s2878_s19 + $0x170] ss:$8 sps:$4 sm:$0xff]  }
  0x89   : > { %v2426_v53 = vld [vmem:[%s2878_s19 + $0x370] ss:$8 sps:$4 sm:$0xff]  }
  0x8b   : > { %1668 = vmatpush1.bf16.msra.mxu1 %v2355_v54  ;;  %1774 = vmatpush1.bf16.msra.mxu0 %v2356_v55  ;;  %v2431_v54 = vld [vmem:[%s2878_s19 + $0x184] ss:$8 sps:$4 sm:$0xff]  }
  0x8c   : > { %1669 = vmatprep.subr.bf16.mxu1 %v2357_v56  ;;  %1775 = vmatprep.subr.bf16.mxu0 %v2359_v57  ;;  %v2434_v55 = vld [vmem:[%s2878_s19 + $0x384] ss:$8 sps:$4 sm:$0xff]   ;;  %v2429_v56 = vld [vmem:[%s2878_s19 + $0x180] ss:$8 sps:$4 sm:$0xff]  }
  0x8d   : > { %v2432_v57 = vld [vmem:[%s2878_s19 + $0x380] ss:$8 sps:$4 sm:$0xff]  }
  0x8f   : > { %1670 = vmatpush1.bf16.msra.mxu1 %v2361_v58  ;;  %1776 = vmatpush1.bf16.msra.mxu0 %v2362_v59  ;;  %v2437_v58 = vld [vmem:[%s2878_s19 + $0x194] ss:$8 sps:$4 sm:$0xff]  }
  0x90   : > { %1671 = vmatprep.subr.bf16.mxu1 %v2363_v60  ;;  %1777 = vmatprep.subr.bf16.mxu0 %v2365_v61  ;;  %v2440_v59 = vld [vmem:[%s2878_s19 + $0x394] ss:$8 sps:$4 sm:$0xff]   ;;  %v2435_v60 = vld [vmem:[%s2878_s19 + $0x190] ss:$8 sps:$4 sm:$0xff]  }
  0x91   : > { %v2438_v61 = vld [vmem:[%s2878_s19 + $0x390] ss:$8 sps:$4 sm:$0xff]  }
  0x93   : > { %1672 = vmatpush1.bf16.msra.mxu1 %v2367_v62  ;;  %1778 = vmatpush1.bf16.msra.mxu0 %v2368_v63  ;;  %v2443_v62 = vld [vmem:[%s2878_s19 + $0x1a4] ss:$8 sps:$4 sm:$0xff]  }
  0x94   : > { %1673 = vmatprep.subr.bf16.mxu1 %v2369_v4  ;;  %1779 = vmatprep.subr.bf16.mxu0 %v2371_v7  ;;  %v2446_v63 = vld [vmem:[%s2878_s19 + $0x3a4] ss:$8 sps:$4 sm:$0xff]   ;;  %v2441_v4 = vld [vmem:[%s2878_s19 + $0x1a0] ss:$8 sps:$4 sm:$0xff]  }
  0x95   : > { %v2444_v7 = vld [vmem:[%s2878_s19 + $0x3a0] ss:$8 sps:$4 sm:$0xff]  }
  0x97   : > { %1674 = vmatpush1.bf16.msra.mxu1 %v2373_v8  ;;  %1780 = vmatpush1.bf16.msra.mxu0 %v2374_v9  ;;  %v2449_v8 = vld [vmem:[%s2878_s19 + $0x1b4] ss:$8 sps:$4 sm:$0xff]  }
  0x98   : > { %1675 = vmatprep.subr.bf16.mxu1 %v2375_v10  ;;  %1781 = vmatprep.subr.bf16.mxu0 %v2377_v11  ;;  %v2452_v9 = vld [vmem:[%s2878_s19 + $0x3b4] ss:$8 sps:$4 sm:$0xff]   ;;  %v2447_v10 = vld [vmem:[%s2878_s19 + $0x1b0] ss:$8 sps:$4 sm:$0xff]  }
  0x99   : > { %v2450_v11 = vld [vmem:[%s2878_s19 + $0x3b0] ss:$8 sps:$4 sm:$0xff]  }
  0x9b   : > { %1676 = vmatpush1.bf16.msra.mxu1 %v2379_v12  ;;  %1782 = vmatpush1.bf16.msra.mxu0 %v2380_v13  ;;  %v2455_v12 = vld [vmem:[%s2878_s19 + $0x1c4] ss:$8 sps:$4 sm:$0xff]  }
  0x9c   : > { %1698 = vmatprep.subr.bf16.mxu1 %v2383_v14  ;;  %1804 = vmatprep.subr.bf16.mxu0 %v2386_v15  ;;  %v2458_v13 = vld [vmem:[%s2878_s19 + $0x3c4] ss:$8 sps:$4 sm:$0xff]   ;;  %v2453_v14 = vld [vmem:[%s2878_s19 + $0x1c0] ss:$8 sps:$4 sm:$0xff]  }
  0x9d   : > { %v2456_v15 = vld [vmem:[%s2878_s19 + $0x3c0] ss:$8 sps:$4 sm:$0xff]  }
  0x9e   : > { %1678 = vmatmul.mubr.bf16.vlgmr.msra.gmra.mrb[0].mxu1 %v2054_v3  ;;  %1784 = vmatmul.mubr.bf16.vlgmr.msra.gmra.mrb[0].mxu0 %v2058_v6  ;;  %v2062_v3 = vcombine.low %v777_v16, %v781_v17  ;;  %v2404_v6 = vld [vmem:[%s2878_s19 + $0x334] ss:$8 sps:$4 sm:$0xff]  }
  0x9f   : > { %1699 = vmatpush1.bf16.msra.mxu1 %v2381_v20  ;;  %1805 = vmatpush1.bf16.msra.mxu0 %v2384_v21  ;;  %v2461_v16 = vld [vmem:[%s2878_s19 + $0x1d4] ss:$8 sps:$4 sm:$0xff]   ;;  %v2467_v20 = vld [vmem:[%s2878_s19 + $0x1e4] ss:$8 sps:$4 sm:$0xff]  }
  0xa0   : > { %1700 = vmatprep.subr.bf16.mxu1 %v2389_v22  ;;  %1806 = vmatprep.subr.bf16.mxu0 %v2392_v23  ;;  %v2464_v17 = vld [vmem:[%s2878_s19 + $0x3d4] ss:$8 sps:$4 sm:$0xff]   ;;  %v2470_v21 = vld [vmem:[%s2878_s19 + $0x3e4] ss:$8 sps:$4 sm:$0xff]   ;;  %v2465_v22 = vld [vmem:[%s2878_s19 + $0x1e0] ss:$8 sps:$4 sm:$0xff]  }
  0xa1   : > { %1687 = vmatprep.mubr.bf16.mxu1 %v2063_v24  ;;  %1793 = vmatprep.mubr.bf16.mxu0 %v2067_v25  ;;  %v2468_v23 = vld [vmem:[%s2878_s19 + $0x3e0] ss:$8 sps:$4 sm:$0xff]   ;;  %v2473_v24 = vld [vmem:[%s2878_s19 + $0x1f4] ss:$8 sps:$4 sm:$0xff]  }
  0xa2   : > { %v2476_v25 = vld [vmem:[%s2878_s19 + $0x3f4] ss:$8 sps:$4 sm:$0xff]  }
  0xa3   : > { %1701 = vmatpush1.bf16.msra.mxu1 %v2387_v26  ;;  %1807 = vmatpush1.bf16.msra.mxu0 %v2390_v27  ;;  %v2471_v26 = vld [vmem:[%s2878_s19 + $0x1f0] ss:$8 sps:$4 sm:$0xff]  }
  0xa4   : > { %1702 = vmatprep.subr.bf16.mxu1 %v2395_v28  ;;  %1808 = vmatprep.subr.bf16.mxu0 %v2398_v29  ;;  %v2474_v27 = vld [vmem:[%s2878_s19 + $0x3f0] ss:$8 sps:$4 sm:$0xff]   ;;  %v778_v28 = vld [vmem:[%s3103_s0 + $0x48] sm:$0xff]  ;;  %s2053_s19 = sshll.u32 %s2507_s14, 1 }
  0xa5   : > { %v782_v29 = vld [vmem:[%s3103_s0 + $0x68] sm:$0xff]  ;;  %p763_p11 = scmp.lt.s32.totalorder %s2053_s19, 3 }
  0xa6   : > { %1688 = vmatmul.mubr.bf16.gmra.mrb[4].mxu1 %v2062_v3  ;;  %1794 = vmatmul.mubr.bf16.gmra.mrb[4].mxu0 %v2066_v2  ;;  %v2056_v3 = vcombine.low %v2987_v38, %v2996_v43  ;;  %v2060_v2 = vcombine.low %v3001_v44, %v3008_v46 }
  0xa7   : > { %1703 = vmatpush1.bf16.msra.mxu1 %v2393_v0  ;;  %1809 = vmatpush1.bf16.msra.mxu0 %v2396_v1  ;;  %v780_v0 = vld [vmem:[%s3103_s0 + $0x58] sm:$0xff]  ;;  %s3115_s19 = smov (!%p763_p11, %s2053_s19), 3 }
  0xa8   : > { %1704 = vmatprep.subr.bf16.mxu1 %v2401_v5  ;;  %1810 = vmatprep.subr.bf16.mxu0 %v2404_v6  ;;  %v784_v1 = vld [vmem:[%s3103_s0 + $0x78] sm:$0xff]  ;;  %v2065_v5 = vcombine.high %v778_v28, %v782_v29  ;;  %s765_s5 = scalar_lea.vmem %s3105_s2, %s3115_s19 }
  0xa9   : > { %1730 = vmatprep.mubr.bf16.mxu1 %v2057_v45  ;;  %1836 = vmatprep.mubr.bf16.mxu0 %v2061_v47  ;;  %v2069_v6 = vcombine.high %v780_v0, %v784_v1 }
  0xab   : > { %1705 = vmatpush1.bf16.msra.mxu1 %v2399_v30  ;;  %1811 = vmatpush1.bf16.msra.mxu0 %v2402_v31  ;;  %v2064_v30 = vcombine.low %v778_v28, %v782_v29  ;;  %v2068_v31 = vcombine.low %v780_v0, %v784_v1 }
  0xac   : > { %1706 = vmatprep.subr.bf16.mxu1 %v2407_v32  ;;  %1812 = vmatprep.subr.bf16.mxu0 %v2410_v33  ;;  %v915_v32 = vlaneseq }
  0xae   : > { %v916_v33 = vshrl.u32 %v915_v32, 7 }
  0xaf   : > { %1707 = vmatpush1.bf16.msra.mxu1 %v2405_v34  ;;  %1813 = vmatpush1.bf16.msra.mxu0 %v2408_v35  ;;  %v913_v35 = vld [vmem:[%s765_s5] sm:$0x3] }
  0xb0   : > { %1708 = vmatprep.subr.bf16.mxu1 %v2413_v36  ;;  %1814 = vmatprep.subr.bf16.mxu0 %v2416_v37  ;;  %v917_v34 = vsub.s32 0, %v916_v33  ;;  %v921_v36 = vsub.s32 1, %v916_v33 }
  0xb2   : > { %v918_v37 = vrot.slane %v913_v35, %v917_v34  ;;  %v922_v38 = vrot.slane %v913_v35, %v921_v36 }
  0xb3   : > { %1709 = vmatpush1.bf16.msra.mxu1 %v2411_v39  ;;  %1815 = vmatpush1.bf16.msra.mxu0 %v2414_v40 }
  0xb4   : > { %1710 = vmatprep.subr.bf16.mxu1 %v2419_v41  ;;  %1816 = vmatprep.subr.bf16.mxu0 %v2422_v42 }
  0xb7   : > { %1711 = vmatpush1.bf16.msra.mxu1 %v2417_v48  ;;  %1817 = vmatpush1.bf16.msra.mxu0 %v2420_v49 }
  0xb8   : > { %1712 = vmatprep.subr.bf16.mxu1 %v2425_v50  ;;  %1818 = vmatprep.subr.bf16.mxu0 %v2428_v51 }
  0xbb   : > { %1713 = vmatpush1.bf16.msra.mxu1 %v2423_v52  ;;  %1819 = vmatpush1.bf16.msra.mxu0 %v2426_v53 }
  0xbc   : > { %1714 = vmatprep.subr.bf16.mxu1 %v2431_v54  ;;  %1820 = vmatprep.subr.bf16.mxu0 %v2434_v55 }
  0xbf   : > { %1715 = vmatpush1.bf16.msra.mxu1 %v2429_v56  ;;  %1821 = vmatpush1.bf16.msra.mxu0 %v2432_v57 }
  0xc0   : > { %1716 = vmatprep.subr.bf16.mxu1 %v2437_v58  ;;  %1822 = vmatprep.subr.bf16.mxu0 %v2440_v59 }
  0xc3   : > { %1717 = vmatpush1.bf16.msra.mxu1 %v2435_v60  ;;  %1823 = vmatpush1.bf16.msra.mxu0 %v2438_v61 }
  0xc4   : > { %1718 = vmatprep.subr.bf16.mxu1 %v2443_v62  ;;  %1824 = vmatprep.subr.bf16.mxu0 %v2446_v63 }
  0xc7   : > { %1719 = vmatpush1.bf16.msra.mxu1 %v2441_v4  ;;  %1825 = vmatpush1.bf16.msra.mxu0 %v2444_v7 }
  0xc8   : > { %1720 = vmatprep.subr.bf16.mxu1 %v2449_v8  ;;  %1826 = vmatprep.subr.bf16.mxu0 %v2452_v9 }
  0xcb   : > { %1721 = vmatpush1.bf16.msra.mxu1 %v2447_v10  ;;  %1827 = vmatpush1.bf16.msra.mxu0 %v2450_v11 }
  0xcc   : > { %1722 = vmatprep.subr.bf16.mxu1 %v2455_v12  ;;  %1828 = vmatprep.subr.bf16.mxu0 %v2458_v13 }
  0xcf   : > { %1723 = vmatpush1.bf16.msra.mxu1 %v2453_v14  ;;  %1829 = vmatpush1.bf16.msra.mxu0 %v2456_v15 }
  0xd0   : > { %1724 = vmatprep.subr.bf16.mxu1 %v2461_v16  ;;  %1830 = vmatprep.subr.bf16.mxu0 %v2464_v17 }
  0xd3   : > { %1725 = vmatpush1.bf16.msra.mxu1 %v2459_v18  ;;  %1831 = vmatpush1.bf16.msra.mxu0 %v2462_v19 }
  0xd4   : > { %1726 = vmatprep.subr.bf16.mxu1 %v2467_v20  ;;  %1832 = vmatprep.subr.bf16.mxu0 %v2470_v21 }
  0xd7   : > { %1727 = vmatpush1.bf16.msra.mxu1 %v2465_v22  ;;  %1833 = vmatpush1.bf16.msra.mxu0 %v2468_v23 }
  0xd8   : > { %1728 = vmatprep.subr.bf16.mxu1 %v2473_v24  ;;  %1834 = vmatprep.subr.bf16.mxu0 %v2476_v25 }
  0xdb   : > { %1729 = vmatpush1.bf16.msra.mxu1 %v2471_v26  ;;  %1835 = vmatpush1.bf16.msra.mxu0 %v2474_v27 }
  0xde   : > { %1731 = vmatmul.mubr.bf16.vlgmr.msra.gmra.mrb[0].mxu1 %v2056_v3  ;;  %1837 = vmatmul.mubr.bf16.vlgmr.msra.gmra.mrb[0].mxu0 %v2060_v2 }
  0xdf   : > { %1740 = vmatprep.mubr.bf16.mxu1 %v2065_v5  ;;  %1846 = vmatprep.mubr.bf16.mxu0 %v2069_v6 }
  0xe6   : > { %1741 = vmatmul.mubr.bf16.gmra.mrb[4].mxu1 %v2064_v30  ;;  %1847 = vmatmul.mubr.bf16.gmra.mrb[4].mxu0 %v2068_v31 }
 0x1b1   : > { %v1732_v39 = vpop.f32.mrb[0].mxu1  ;;  %v1838_v40 = vpop.f32.mrb[0].mxu0 }
 0x1b2   : > { %v2213_v41 = vadd.f32 %v1732_v39, %v918_v37  ;;  %v1734_v42 = vpop.f32.mrb[1].mxu1  ;;  %v1840_v43 = vpop.f32.mrb[1].mxu0 }
 0x1b3   : > { %v2215_v44 = vadd.f32 %v1734_v42, %v922_v38  ;;  %v1736_v45 = vpop.f32.mrb[2].mxu1  ;;  %v1842_v46 = vpop.f32.mrb[2].mxu0 }
 0x1b4   : > { %v2214_v47 = vadd.f32 %v2213_v41, %v1838_v40  ;;  %v2217_v48 = vadd.f32 %v1736_v45, %v918_v37  ;;  %v1738_v49 = vpop.f32.mrb[3].mxu1  ;;  %v1844_v50 = vpop.f32.mrb[3].mxu0 }
 0x1b5   : > { %v2216_v51 = vadd.f32 %v2215_v44, %v1840_v43  ;;  %v2219_v52 = vadd.f32 %v1738_v49, %v922_v38 }
 0x1b6   : > { %v1857_v53 = vmax.f32 %v2214_v47, 0.0  ;;  %v2218_v54 = vadd.f32 %v2217_v48, %v1842_v46 }
 0x1b7   : > { %v1858_v55 = vmax.f32 %v2216_v51, 0.0  ;;  %v2220_v56 = vadd.f32 %v2219_v52, %v1844_v50 }
 0x1b8   : > { %v1859_v57 = vmax.f32 %v2218_v54, 0.0 }
 0x1b9   : > { %v2208_v58 = vpack.c.bf16 %v1858_v55, %v1857_v53  ;;  %v1860_v59 = vmax.f32 %v2220_v56, 0.0  ;;  %v1742_v60 = vpop.f32.mrb[4].mxu1  ;;  %v1848_v61 = vpop.f32.mrb[4].mxu0 }
 0x1ba   : > { %v2221_v62 = vadd.f32 %v1742_v60, %v918_v37  ;;  %v1744_v63 = vpop.f32.mrb[5].mxu1  ;;  %v1850_v4 = vpop.f32.mrb[5].mxu0 }
 0x1bb   : > { %1889 = vst [vmem:[%s3072_s7] sm:$0xff] %v2208_v58  ;;  %v2209_v7 = vpack.c.bf16 %v1860_v59, %v1859_v57  ;;  %v2223_v8 = vadd.f32 %v1744_v63, %v922_v38  ;;  %v1746_v9 = vpop.f32.mrb[6].mxu1  ;;  %v1852_v10 = vpop.f32.mrb[6].mxu0 }
 0x1bc   : > { %v2222_v11 = vadd.f32 %v2221_v62, %v1848_v61  ;;  %v2225_v12 = vadd.f32 %v1746_v9, %v918_v37  ;;  %v1748_v13 = vpop.f32.mrb[7].mxu1  ;;  %v1854_v14 = vpop.f32.mrb[7].mxu0 }
 0x1bd   : > { %1890 = vst [vmem:[%s3072_s7 + $0x8] sm:$0xff] %v2209_v7  ;;  %v2224_v15 = vadd.f32 %v2223_v8, %v1850_v4  ;;  %v2227_v16 = vadd.f32 %v1748_v13, %v922_v38 }
 0x1be   : > { %v1861_v17 = vmax.f32 %v2222_v11, 0.0  ;;  %v2226_v18 = vadd.f32 %v2225_v12, %v1852_v10 }
 0x1bf   : > { %v1862_v19 = vmax.f32 %v2224_v15, 0.0  ;;  %v2228_v20 = vadd.f32 %v2227_v16, %v1854_v14  ;;  %1899 = sbr.rel (!%p2572_p6) target bundleno = 462 (0x1ce), region = 74 }
 0x1c0   : > { %v1863_v21 = vmax.f32 %v2226_v18, 0.0 }
 0x1c1   : > { %v2210_v22 = vpack.c.bf16 %v1862_v19, %v1861_v17  ;;  %v1864_v23 = vmax.f32 %v2228_v20, 0.0 }
 0x1c2   : > { %v1939_v25 = vld [vmem:[%s3072_s7] sm:$0xff] (%p2572_p6) }
 0x1c3   : > { %1891 = vst [vmem:[%s3072_s7 + $0x10] sm:$0xff] %v2210_v22  ;;  %v2211_v24 = vpack.c.bf16 %v1864_v23, %v1863_v21  ;;  %1940 = vst [vmem:[%s1905_s9] sm:$0xff] (%p2572_p6), %v1939_v25 }
 0x1c4   : > { %v1941_v26 = vld [vmem:[%s3072_s7 + $0x8] sm:$0xff] (%p2572_p6) }
 0x1c5   : > { %1892 = vst [vmem:[%s3072_s7 + $0x18] sm:$0xff] %v2211_v24  ;;  %1942 = vst [vmem:[%s1905_s9 + $0x10] sm:$0xff] (%p2572_p6), %v1941_v26 }
 0x1ca   : > { %v1943_v27 = vld [vmem:[%s3072_s7 + $0x10] sm:$0xff] }
 0x1cb   : > { %1944 = vst [vmem:[%s1905_s9 + $0x20] sm:$0xff] %v1943_v27 }
 0x1cc   : > { %v1945_v28 = vld [vmem:[%s3072_s7 + $0x18] sm:$0xff] }
 0x1cd   : > { %1946 = vst [vmem:[%s1905_s9 + $0x30] sm:$0xff] %v1945_v28 }
 0x1ce PF: > { %s13_s16 = sadd.s32 1, %s2515_s16   ;;  %s3108_s12 = smov %s2503_s13 }
 0x1cf   : > { %p10_p12 = scmp.ge.s32.totalorder %s13_s16, 4   ;;  %s3109_s13 = smov %s2577_s22 }
 0x1d0   : > { %s3110_s14 = smov %s2511_s15  ;;  %s3111_s15 = smov %s3113_s17 }
 0x1d1   :  { %12 = sbr.rel (!%p10_p12) target bundleno = 3 (0x3), region = 149 }

// kernel: forward.23
= control target key start
LH: loop header
LB: loop body
LE: loop exit
PB: predicated region body
PF: predicated region fallthrough
CT: control target
= control target key end

     0   :  { %s3496_s12 = smov 0   ;;  %s3498_s13 = smov 0   ;;  %s4423_s0 = inlined_call_operand.vmem [shape: bf16[32,2304], index: 0, kind: input, shape index: {}]   ;;  %s4424_s1 = inlined_call_operand.vmem [shape: bf16[2304,256], index: 1, kind: input, shape index: {}]   ;;  %s4425_s2 = inlined_call_operand.vmem [shape: f32[1,256], index: 2, kind: input, shape index: {}]   ;;  %s4426_s3 = inlined_call_operand.vmem [shape: bf16[32,256], index: 3, kind: output, shape index: {}]  }
   0x1   :  { %s3500_s14 = smov 0  }
   0x2 LB: > { %s25_s15 = sadd.s32 1, %s3470_s13  ;;  %p2613_p0 = scmp.ge.s32.totalorder %s3474_s14, 1  ;;  %s3474_s14 = sphi %s3500_s14, %s13_s14   ;;  %s3470_s13 = sphi %s3498_s13, %s4428_s13   ;;  %s3466_s12 = sphi %s3496_s12, %s4427_s12  }
   0x3   : > { %p27_p1 = scmp.ge.s32.totalorder %s25_s15, 2  ;;  %p174_p2 = scmp.lt.s32.totalorder %s3474_s14, 3 }
   0x5   : > { %s4430_s15 = smov (%p27_p1, %s25_s15), 0  ;;  %p175_p3 = pnand %p2613_p0, %p174_p2 }
   0x6   : > { %v2993_v0 = vld [vmem:[%s4424_s1 + $0x4] ss:$8 sps:$4 sm:$0xff] (!%p175_p3)   ;;  %v2997_v2 = vld [vmem:[%s4424_s1] ss:$8 sps:$4 sm:$0xff] (!%p175_p3)   ;;  %v2999_v4 = vld [vmem:[%s4424_s1 + $0x14] ss:$8 sps:$4 sm:$0xff] (!%p175_p3)  }
   0x7   : > { %178 = sbr.rel (%p175_p3) target bundleno = 550 (0x226), region = 32  ;;  %v2995_v1 = vld [vmem:[%s4424_s1 + $0x404] ss:$8 sps:$4 sm:$0xff] (!%p175_p3)   ;;  %2091 = vmatprep.subr.bf16.mxu1 (!%p175_p3), %v2993_v0  ;;  %v2998_v3 = vld [vmem:[%s4424_s1 + $0x400] ss:$8 sps:$4 sm:$0xff] (!%p175_p3)   ;;  %s2614_s30 = sshll.u32 (!%p175_p3), %s3466_s12, 1 }
   0x8   : > { %2263 = vmatprep.subr.bf16.mxu0 (!%p175_p3), %v2995_v1  ;;  %2092 = vmatpush1.bf16.msra.mxu1 (!%p175_p3), %v2997_v2  ;;  %v3001_v5 = vld [vmem:[%s4424_s1 + $0x414] ss:$8 sps:$4 sm:$0xff] (!%p175_p3)   ;;  %v3003_v6 = vld [vmem:[%s4424_s1 + $0x10] ss:$8 sps:$4 sm:$0xff] (!%p175_p3)   ;;  %v3005_v8 = vld [vmem:[%s4424_s1 + $0x24] ss:$8 sps:$4 sm:$0xff] (!%p175_p3)  }
   0x9   : > { %2264 = vmatpush1.bf16.msra.mxu0 (!%p175_p3), %v2998_v3  ;;  %2093 = vmatprep.subr.bf16.mxu1 (!%p175_p3), %v2999_v4  ;;  %v3004_v7 = vld [vmem:[%s4424_s1 + $0x410] ss:$8 sps:$4 sm:$0xff] (!%p175_p3)   ;;  %v3007_v9 = vld [vmem:[%s4424_s1 + $0x424] ss:$8 sps:$4 sm:$0xff] (!%p175_p3)   ;;  %v3009_v10 = vld [vmem:[%s4424_s1 + $0x20] ss:$8 sps:$4 sm:$0xff] (!%p175_p3)  }
   0xa   : > { %2265 = vmatprep.subr.bf16.mxu0 (!%p175_p3), %v3001_v5  ;;  %v3010_v11 = vld [vmem:[%s4424_s1 + $0x420] ss:$8 sps:$4 sm:$0xff] (!%p175_p3)   ;;  %v3011_v12 = vld [vmem:[%s4424_s1 + $0x34] ss:$8 sps:$4 sm:$0xff] (!%p175_p3)   ;;  %v3015_v14 = vld [vmem:[%s4424_s1 + $0x30] ss:$8 sps:$4 sm:$0xff] (!%p175_p3)  }
   0xb   : > { %v3013_v13 = vld [vmem:[%s4424_s1 + $0x434] ss:$8 sps:$4 sm:$0xff] (!%p175_p3)   ;;  %v3016_v15 = vld [vmem:[%s4424_s1 + $0x430] ss:$8 sps:$4 sm:$0xff] (!%p175_p3)   ;;  %v3017_v16 = vld [vmem:[%s4424_s1 + $0x44] ss:$8 sps:$4 sm:$0xff] (!%p175_p3)  }
   0xc   : > { %2094 = vmatpush1.bf16.msra.mxu1 (!%p175_p3), %v3003_v6  ;;  %v3019_v17 = vld [vmem:[%s4424_s1 + $0x444] ss:$8 sps:$4 sm:$0xff] (!%p175_p3)   ;;  %v3021_v18 = vld [vmem:[%s4424_s1 + $0x40] ss:$8 sps:$4 sm:$0xff] (!%p175_p3)   ;;  %v3023_v20 = vld [vmem:[%s4424_s1 + $0x54] ss:$8 sps:$4 sm:$0xff] (!%p175_p3)  }
   0xd   : > { %2266 = vmatpush1.bf16.msra.mxu0 (!%p175_p3), %v3004_v7  ;;  %2095 = vmatprep.subr.bf16.mxu1 (!%p175_p3), %v3005_v8  ;;  %v3022_v19 = vld [vmem:[%s4424_s1 + $0x440] ss:$8 sps:$4 sm:$0xff] (!%p175_p3)   ;;  %v3025_v21 = vld [vmem:[%s4424_s1 + $0x454] ss:$8 sps:$4 sm:$0xff] (!%p175_p3)   ;;  %v3027_v22 = vld [vmem:[%s4424_s1 + $0x50] ss:$8 sps:$4 sm:$0xff] (!%p175_p3)  }
   0xe   : > { %2267 = vmatprep.subr.bf16.mxu0 %v3007_v9  ;;  %v3028_v23 = vld [vmem:[%s4424_s1 + $0x450] ss:$8 sps:$4 sm:$0xff]   ;;  %v3029_v24 = vld [vmem:[%s4424_s1 + $0x64] ss:$8 sps:$4 sm:$0xff]   ;;  %v3033_v26 = vld [vmem:[%s4424_s1 + $0x60] ss:$8 sps:$4 sm:$0xff]  }
   0xf   : > { %v3031_v25 = vld [vmem:[%s4424_s1 + $0x464] ss:$8 sps:$4 sm:$0xff]   ;;  %v3034_v27 = vld [vmem:[%s4424_s1 + $0x460] ss:$8 sps:$4 sm:$0xff]   ;;  %v3035_v28 = vld [vmem:[%s4424_s1 + $0x74] ss:$8 sps:$4 sm:$0xff]  }
  0x10   : > { %2096 = vmatpush1.bf16.msra.mxu1 %v3009_v10  ;;  %v3037_v29 = vld [vmem:[%s4424_s1 + $0x474] ss:$8 sps:$4 sm:$0xff]   ;;  %v3039_v30 = vld [vmem:[%s4424_s1 + $0x70] ss:$8 sps:$4 sm:$0xff]   ;;  %v3041_v32 = vld [vmem:[%s4424_s1 + $0x84] ss:$8 sps:$4 sm:$0xff]  }
  0x11   : > { %2268 = vmatpush1.bf16.msra.mxu0 %v3010_v11  ;;  %2097 = vmatprep.subr.bf16.mxu1 %v3011_v12  ;;  %v3040_v31 = vld [vmem:[%s4424_s1 + $0x470] ss:$8 sps:$4 sm:$0xff]   ;;  %p214_p4 = scmp.lt.s32.totalorder %s2614_s30, 3  ;;  %v3043_v33 = vld [vmem:[%s4424_s1 + $0x484] ss:$8 sps:$4 sm:$0xff]  }
  0x12   : > { %2269 = vmatprep.subr.bf16.mxu0 %v3013_v13  ;;  %v3045_v34 = vld [vmem:[%s4424_s1 + $0x80] ss:$8 sps:$4 sm:$0xff]   ;;  %v3047_v36 = vld [vmem:[%s4424_s1 + $0x94] ss:$8 sps:$4 sm:$0xff]   ;;  %v3051_v38 = vld [vmem:[%s4424_s1 + $0x90] ss:$8 sps:$4 sm:$0xff]  }
  0x13   : > { %v3046_v35 = vld [vmem:[%s4424_s1 + $0x480] ss:$8 sps:$4 sm:$0xff]   ;;  %s4432_s30 = smov (!%p214_p4, %s2614_s30), 3  ;;  %v3049_v37 = vld [vmem:[%s4424_s1 + $0x494] ss:$8 sps:$4 sm:$0xff]  }
  0x14   : > { %2098 = vmatpush1.bf16.msra.mxu1 %v3015_v14  ;;  %v3052_v39 = vld [vmem:[%s4424_s1 + $0x490] ss:$8 sps:$4 sm:$0xff]   ;;  %v3053_v40 = vld [vmem:[%s4424_s1 + $0xa4] ss:$8 sps:$4 sm:$0xff]   ;;  %s2968_s29 = smul.u32 72, %s4432_s30 }
  0x15   : > { %2270 = vmatpush1.bf16.msra.mxu0 %v3016_v15  ;;  %2099 = vmatprep.subr.bf16.mxu1 %v3017_v16  ;;  %v3055_v41 = vld [vmem:[%s4424_s1 + $0x4a4] ss:$8 sps:$4 sm:$0xff]   ;;  %v3057_v42 = vld [vmem:[%s4424_s1 + $0xa0] ss:$8 sps:$4 sm:$0xff]   ;;  %v3059_v44 = vld [vmem:[%s4424_s1 + $0xb4] ss:$8 sps:$4 sm:$0xff]  }
  0x16   : > { %2271 = vmatprep.subr.bf16.mxu0 %v3019_v17  ;;  %v3058_v43 = vld [vmem:[%s4424_s1 + $0x4a0] ss:$8 sps:$4 sm:$0xff]   ;;  %s3658_s17 = scalar_lea.vmem %s4423_s0, %s2968_s29  ;;  %v3061_v45 = vld [vmem:[%s4424_s1 + $0x4b4] ss:$8 sps:$4 sm:$0xff]   ;;  %v3063_v46 = vld [vmem:[%s4424_s1 + $0xb0] ss:$8 sps:$4 sm:$0xff]  }
  0x17   : > { %v3064_v47 = vld [vmem:[%s4424_s1 + $0x4b0] ss:$8 sps:$4 sm:$0xff]   ;;  %v3091_v48 = vld [vmem:[%s3658_s17 + $0x4] ss:$72 sps:$4 sm:$0xff]   ;;  %v3069_v52 = vld [vmem:[%s4424_s1 + $0xc0] ss:$8 sps:$4 sm:$0xff]  }
  0x18   : > { %2100 = vmatpush1.bf16.msra.mxu1 %v3021_v18  ;;  %v3065_v49 = vld [vmem:[%s4424_s1 + $0xc4] ss:$8 sps:$4 sm:$0xff]   ;;  %2123 = vmatprep.mubr.bf16.mxu1 %v3091_v48  ;;  %v3070_v53 = vld [vmem:[%s4424_s1 + $0x4c0] ss:$8 sps:$4 sm:$0xff]   ;;  %v3071_v54 = vld [vmem:[%s4424_s1 + $0xd4] ss:$8 sps:$4 sm:$0xff]  }
  0x19   : > { %2272 = vmatpush1.bf16.msra.mxu0 %v3022_v19  ;;  %2101 = vmatprep.subr.bf16.mxu1 %v3023_v20  ;;  %v3067_v50 = vld [vmem:[%s4424_s1 + $0x4c4] ss:$8 sps:$4 sm:$0xff]   ;;  %v3073_v55 = vld [vmem:[%s4424_s1 + $0x4d4] ss:$8 sps:$4 sm:$0xff]   ;;  %v3075_v56 = vld [vmem:[%s4424_s1 + $0xd0] ss:$8 sps:$4 sm:$0xff]  }
  0x1a   : > { %2273 = vmatprep.subr.bf16.mxu0 %v3025_v21  ;;  %v3097_v51 = vld [vmem:[%s3658_s17 + $0x24] ss:$72 sps:$4 sm:$0xff]   ;;  %v3076_v57 = vld [vmem:[%s4424_s1 + $0x4d0] ss:$8 sps:$4 sm:$0xff]   ;;  %v3081_v60 = vld [vmem:[%s4424_s1 + $0xe0] ss:$8 sps:$4 sm:$0xff]  }
  0x1b   : > { %2295 = vmatprep.mubr.bf16.mxu0 %v3097_v51  ;;  %v3077_v58 = vld [vmem:[%s4424_s1 + $0xe4] ss:$8 sps:$4 sm:$0xff]   ;;  %v3082_v61 = vld [vmem:[%s4424_s1 + $0x4e0] ss:$8 sps:$4 sm:$0xff]   ;;  %v3083_v62 = vld [vmem:[%s4424_s1 + $0xf4] ss:$8 sps:$4 sm:$0xff]  }
  0x1c   : > { %2102 = vmatpush1.bf16.msra.mxu1 %v3027_v22  ;;  %v3079_v59 = vld [vmem:[%s4424_s1 + $0x4e4] ss:$8 sps:$4 sm:$0xff]   ;;  %v3085_v63 = vld [vmem:[%s4424_s1 + $0x4f4] ss:$8 sps:$4 sm:$0xff]   ;;  %v3087_v0 = vld [vmem:[%s4424_s1 + $0xf0] ss:$8 sps:$4 sm:$0xff]  }
  0x1d   : > { %2274 = vmatpush1.bf16.msra.mxu0 %v3028_v23  ;;  %2103 = vmatprep.subr.bf16.mxu1 %v3029_v24  ;;  %v3088_v1 = vld [vmem:[%s4424_s1 + $0x4f0] ss:$8 sps:$4 sm:$0xff]   ;;  %v3094_v2 = vld [vmem:[%s4424_s1 + $0x104] ss:$8 sps:$4 sm:$0xff]   ;;  %v3089_v4 = vld [vmem:[%s3658_s17] ss:$72 sps:$4 sm:$0xff]  }
  0x1e   : > { %2275 = vmatprep.subr.bf16.mxu0 %v3031_v25  ;;  %v3100_v3 = vld [vmem:[%s4424_s1 + $0x504] ss:$8 sps:$4 sm:$0xff]   ;;  %v3092_v5 = vld [vmem:[%s4424_s1 + $0x100] ss:$8 sps:$4 sm:$0xff]   ;;  %v3103_v8 = vld [vmem:[%s4424_s1 + $0x114] ss:$8 sps:$4 sm:$0xff]  }
  0x1f   : > { %v3095_v6 = vld [vmem:[%s3658_s17 + $0x20] ss:$72 sps:$4 sm:$0xff]   ;;  %v3106_v9 = vld [vmem:[%s4424_s1 + $0x514] ss:$8 sps:$4 sm:$0xff]   ;;  %v3101_v10 = vld [vmem:[%s4424_s1 + $0x110] ss:$8 sps:$4 sm:$0xff]  }
  0x20   : > { %2104 = vmatpush1.bf16.msra.mxu1 %v3033_v26  ;;  %v3098_v7 = vld [vmem:[%s4424_s1 + $0x500] ss:$8 sps:$4 sm:$0xff]   ;;  %v3104_v11 = vld [vmem:[%s4424_s1 + $0x510] ss:$8 sps:$4 sm:$0xff]   ;;  %v3109_v12 = vld [vmem:[%s4424_s1 + $0x124] ss:$8 sps:$4 sm:$0xff]  }
  0x21   : > { %2276 = vmatpush1.bf16.msra.mxu0 %v3034_v27  ;;  %2105 = vmatprep.subr.bf16.mxu1 %v3035_v28  ;;  %v3112_v13 = vld [vmem:[%s4424_s1 + $0x524] ss:$8 sps:$4 sm:$0xff]   ;;  %v3107_v14 = vld [vmem:[%s4424_s1 + $0x120] ss:$8 sps:$4 sm:$0xff]   ;;  %v3115_v16 = vld [vmem:[%s4424_s1 + $0x134] ss:$8 sps:$4 sm:$0xff]  }
  0x22   : > { %2277 = vmatprep.subr.bf16.mxu0 %v3037_v29  ;;  %v3110_v15 = vld [vmem:[%s4424_s1 + $0x520] ss:$8 sps:$4 sm:$0xff]   ;;  %v3118_v17 = vld [vmem:[%s4424_s1 + $0x534] ss:$8 sps:$4 sm:$0xff]   ;;  %v3113_v18 = vld [vmem:[%s4424_s1 + $0x130] ss:$8 sps:$4 sm:$0xff]  }
  0x23   : > { %v3116_v19 = vld [vmem:[%s4424_s1 + $0x530] ss:$8 sps:$4 sm:$0xff]   ;;  %v3121_v20 = vld [vmem:[%s4424_s1 + $0x144] ss:$8 sps:$4 sm:$0xff]   ;;  %v3119_v22 = vld [vmem:[%s4424_s1 + $0x140] ss:$8 sps:$4 sm:$0xff]  }
  0x24   : > { %2106 = vmatpush1.bf16.msra.mxu1 %v3039_v30  ;;  %v3124_v21 = vld [vmem:[%s4424_s1 + $0x544] ss:$8 sps:$4 sm:$0xff]   ;;  %v3122_v23 = vld [vmem:[%s4424_s1 + $0x540] ss:$8 sps:$4 sm:$0xff]   ;;  %v3127_v24 = vld [vmem:[%s4424_s1 + $0x154] ss:$8 sps:$4 sm:$0xff]  }
  0x25   : > { %2278 = vmatpush1.bf16.msra.mxu0 %v3040_v31  ;;  %2107 = vmatprep.subr.bf16.mxu1 %v3041_v32  ;;  %v3130_v25 = vld [vmem:[%s4424_s1 + $0x554] ss:$8 sps:$4 sm:$0xff]   ;;  %v3125_v26 = vld [vmem:[%s4424_s1 + $0x150] ss:$8 sps:$4 sm:$0xff]   ;;  %v3133_v28 = vld [vmem:[%s4424_s1 + $0x164] ss:$8 sps:$4 sm:$0xff]  }
  0x26   : > { %2279 = vmatprep.subr.bf16.mxu0 %v3043_v33  ;;  %v3128_v27 = vld [vmem:[%s4424_s1 + $0x550] ss:$8 sps:$4 sm:$0xff]   ;;  %v3136_v29 = vld [vmem:[%s4424_s1 + $0x564] ss:$8 sps:$4 sm:$0xff]   ;;  %v3131_v30 = vld [vmem:[%s4424_s1 + $0x160] ss:$8 sps:$4 sm:$0xff]  }
  0x27   : > { %v3134_v31 = vld [vmem:[%s4424_s1 + $0x560] ss:$8 sps:$4 sm:$0xff]   ;;  %v3139_v32 = vld [vmem:[%s4424_s1 + $0x174] ss:$8 sps:$4 sm:$0xff]  }
  0x28   : > { %2108 = vmatpush1.bf16.msra.mxu1 %v3045_v34  ;;  %v3142_v33 = vld [vmem:[%s4424_s1 + $0x574] ss:$8 sps:$4 sm:$0xff]   ;;  %v3155_v48 = vld [vmem:[%s4424_s1 + $0x1a0] ss:$8 sps:$4 sm:$0xff]  }
  0x29   : > { %2280 = vmatpush1.bf16.msra.mxu0 %v3046_v35  ;;  %2109 = vmatprep.subr.bf16.mxu1 %v3047_v36  ;;  %v3193_v34 = vld [vmem:[%s3658_s17 + $0xc] ss:$72 sps:$4 sm:$0xff]   ;;  %v3137_v35 = vld [vmem:[%s4424_s1 + $0x170] ss:$8 sps:$4 sm:$0xff]  }
  0x2a   : > { %2281 = vmatprep.subr.bf16.mxu0 %v3049_v37  ;;  %v3140_v36 = vld [vmem:[%s4424_s1 + $0x570] ss:$8 sps:$4 sm:$0xff]   ;;  %v3199_v37 = vld [vmem:[%s3658_s17 + $0x2c] ss:$72 sps:$4 sm:$0xff]  }
  0x2b   : > { %v3166_v51 = vld [vmem:[%s4424_s1 + $0x5b4] ss:$8 sps:$4 sm:$0xff]  }
  0x2c   : > { %2110 = vmatpush1.bf16.msra.mxu1 %v3051_v38  ;;  %v3145_v38 = vld [vmem:[%s4424_s1 + $0x184] ss:$8 sps:$4 sm:$0xff]  }
  0x2d   : > { %2282 = vmatpush1.bf16.msra.mxu0 %v3052_v39  ;;  %2111 = vmatprep.subr.bf16.mxu1 %v3053_v40  ;;  %v3148_v39 = vld [vmem:[%s4424_s1 + $0x584] ss:$8 sps:$4 sm:$0xff]   ;;  %v3143_v40 = vld [vmem:[%s4424_s1 + $0x180] ss:$8 sps:$4 sm:$0xff]  }
  0x2e   : > { %2283 = vmatprep.subr.bf16.mxu0 %v3055_v41  ;;  %v3146_v41 = vld [vmem:[%s4424_s1 + $0x580] ss:$8 sps:$4 sm:$0xff]  }
  0x30   : > { %2112 = vmatpush1.bf16.msra.mxu1 %v3057_v42  ;;  %v3151_v42 = vld [vmem:[%s4424_s1 + $0x194] ss:$8 sps:$4 sm:$0xff]  }
  0x31   : > { %2284 = vmatpush1.bf16.msra.mxu0 %v3058_v43  ;;  %2113 = vmatprep.subr.bf16.mxu1 %v3059_v44  ;;  %v3154_v43 = vld [vmem:[%s4424_s1 + $0x594] ss:$8 sps:$4 sm:$0xff]   ;;  %v3149_v44 = vld [vmem:[%s4424_s1 + $0x190] ss:$8 sps:$4 sm:$0xff]  }
  0x32   : > { %2285 = vmatprep.subr.bf16.mxu0 %v3061_v45  ;;  %v3152_v45 = vld [vmem:[%s4424_s1 + $0x590] ss:$8 sps:$4 sm:$0xff]  }
  0x34   : > { %2114 = vmatpush1.bf16.msra.mxu1 %v3063_v46  ;;  %v3157_v46 = vld [vmem:[%s4424_s1 + $0x1a4] ss:$8 sps:$4 sm:$0xff]  }
  0x35   : > { %2286 = vmatpush1.bf16.msra.mxu0 %v3064_v47  ;;  %2115 = vmatprep.subr.bf16.mxu1 %v3065_v49  ;;  %v3160_v47 = vld [vmem:[%s4424_s1 + $0x5a4] ss:$8 sps:$4 sm:$0xff]   ;;  %v3158_v49 = vld [vmem:[%s4424_s1 + $0x5a0] ss:$8 sps:$4 sm:$0xff]  }
  0x36   : > { %2287 = vmatprep.subr.bf16.mxu0 %v3067_v50  ;;  %v3163_v50 = vld [vmem:[%s4424_s1 + $0x1b4] ss:$8 sps:$4 sm:$0xff]  }
  0x38   : > { %2116 = vmatpush1.bf16.msra.mxu1 %v3069_v52  ;;  %v3161_v52 = vld [vmem:[%s4424_s1 + $0x1b0] ss:$8 sps:$4 sm:$0xff]  }
  0x39   : > { %2288 = vmatpush1.bf16.msra.mxu0 %v3070_v53  ;;  %2117 = vmatprep.subr.bf16.mxu1 %v3071_v54  ;;  %v3164_v53 = vld [vmem:[%s4424_s1 + $0x5b0] ss:$8 sps:$4 sm:$0xff]   ;;  %v3169_v54 = vld [vmem:[%s4424_s1 + $0x1c4] ss:$8 sps:$4 sm:$0xff]  }
  0x3a   : > { %2289 = vmatprep.subr.bf16.mxu0 %v3073_v55  ;;  %v3172_v55 = vld [vmem:[%s4424_s1 + $0x5c4] ss:$8 sps:$4 sm:$0xff]  }
  0x3c   : > { %2118 = vmatpush1.bf16.msra.mxu1 %v3075_v56  ;;  %v3167_v56 = vld [vmem:[%s4424_s1 + $0x1c0] ss:$8 sps:$4 sm:$0xff]  }
  0x3d   : > { %2290 = vmatpush1.bf16.msra.mxu0 %v3076_v57  ;;  %2119 = vmatprep.subr.bf16.mxu1 %v3077_v58  ;;  %v3170_v57 = vld [vmem:[%s4424_s1 + $0x5c0] ss:$8 sps:$4 sm:$0xff]   ;;  %v3175_v58 = vld [vmem:[%s4424_s1 + $0x1d4] ss:$8 sps:$4 sm:$0xff]  }
  0x3e   : > { %2291 = vmatprep.subr.bf16.mxu0 %v3079_v59  ;;  %v3178_v59 = vld [vmem:[%s4424_s1 + $0x5d4] ss:$8 sps:$4 sm:$0xff]  }
  0x40   : > { %2120 = vmatpush1.bf16.msra.mxu1 %v3081_v60  ;;  %v3173_v60 = vld [vmem:[%s4424_s1 + $0x1d0] ss:$8 sps:$4 sm:$0xff]  }
  0x41   : > { %2292 = vmatpush1.bf16.msra.mxu0 %v3082_v61  ;;  %2121 = vmatprep.subr.bf16.mxu1 %v3083_v62  ;;  %v3176_v61 = vld [vmem:[%s4424_s1 + $0x5d0] ss:$8 sps:$4 sm:$0xff]   ;;  %v3181_v62 = vld [vmem:[%s4424_s1 + $0x1e4] ss:$8 sps:$4 sm:$0xff]  }
  0x42   : > { %2293 = vmatprep.subr.bf16.mxu0 %v3085_v63  ;;  %v3184_v63 = vld [vmem:[%s4424_s1 + $0x5e4] ss:$8 sps:$4 sm:$0xff]  }
  0x44   : > { %2122 = vmatpush1.bf16.msra.mxu1 %v3087_v0  ;;  %v3179_v0 = vld [vmem:[%s4424_s1 + $0x1e0] ss:$8 sps:$4 sm:$0xff]  }
  0x45   : > { %2294 = vmatpush1.bf16.msra.mxu0 %v3088_v1  ;;  %2134 = vmatprep.subr.bf16.mxu1 %v3094_v2  ;;  %v3182_v1 = vld [vmem:[%s4424_s1 + $0x5e0] ss:$8 sps:$4 sm:$0xff]   ;;  %v3187_v2 = vld [vmem:[%s4424_s1 + $0x1f4] ss:$8 sps:$4 sm:$0xff]  }
  0x46   : > { %2306 = vmatprep.subr.bf16.mxu0 %v3100_v3  ;;  %v3190_v3 = vld [vmem:[%s4424_s1 + $0x5f4] ss:$8 sps:$4 sm:$0xff]  }
  0x47   : > { %2124 = vmatmul.mubr.bf16.vlgmr.msra.gmra.mrb[0].mxu1 %v3089_v4  ;;  %v3185_v4 = vld [vmem:[%s4424_s1 + $0x1f0] ss:$8 sps:$4 sm:$0xff]  }
  0x48   : > { %2296 = vmatmul.mubr.bf16.vlgmr.msra.gmra.mrb[0].mxu0 %v3095_v6  ;;  %2135 = vmatpush1.bf16.msra.mxu1 %v3092_v5  ;;  %v3188_v5 = vld [vmem:[%s4424_s1 + $0x5f0] ss:$8 sps:$4 sm:$0xff]   ;;  %v3196_v6 = vld [vmem:[%s4424_s1 + $0x204] ss:$8 sps:$4 sm:$0xff]  }
  0x49   : > { %2307 = vmatpush1.bf16.msra.mxu0 %v3098_v7  ;;  %2136 = vmatprep.subr.bf16.mxu1 %v3103_v8  ;;  %v3202_v7 = vld [vmem:[%s4424_s1 + $0x604] ss:$8 sps:$4 sm:$0xff]   ;;  %v3191_v8 = vld [vmem:[%s3658_s17 + $0x8] ss:$72 sps:$4 sm:$0xff]  }
  0x4a   : > { %2308 = vmatprep.subr.bf16.mxu0 %v3106_v9  ;;  %2166 = vmatprep.mubr.bf16.mxu1 %v3193_v34  ;;  %v3194_v9 = vld [vmem:[%s4424_s1 + $0x200] ss:$8 sps:$4 sm:$0xff]   ;;  %v3235_v34 = vld [vmem:[%s4424_s1 + $0x264] ss:$8 sps:$4 sm:$0xff]  }
  0x4b   : > { %2338 = vmatprep.mubr.bf16.mxu0 %v3199_v37  ;;  %v3236_v37 = vld [vmem:[%s4424_s1 + $0x660] ss:$8 sps:$4 sm:$0xff]  }
  0x4c   : > { %2137 = vmatpush1.bf16.msra.mxu1 %v3101_v10  ;;  %v3197_v10 = vld [vmem:[%s3658_s17 + $0x28] ss:$72 sps:$4 sm:$0xff]  }
  0x4d   : > { %2309 = vmatpush1.bf16.msra.mxu0 %v3104_v11  ;;  %2138 = vmatprep.subr.bf16.mxu1 %v3109_v12  ;;  %v3200_v11 = vld [vmem:[%s4424_s1 + $0x600] ss:$8 sps:$4 sm:$0xff]   ;;  %v3205_v12 = vld [vmem:[%s4424_s1 + $0x214] ss:$8 sps:$4 sm:$0xff]  }
  0x4e   : > { %2310 = vmatprep.subr.bf16.mxu0 %v3112_v13  ;;  %v3208_v13 = vld [vmem:[%s4424_s1 + $0x614] ss:$8 sps:$4 sm:$0xff]  }
  0x50   : > { %2139 = vmatpush1.bf16.msra.mxu1 %v3107_v14  ;;  %v3203_v14 = vld [vmem:[%s4424_s1 + $0x210] ss:$8 sps:$4 sm:$0xff]  }
  0x51   : > { %2311 = vmatpush1.bf16.msra.mxu0 %v3110_v15  ;;  %2140 = vmatprep.subr.bf16.mxu1 %v3115_v16  ;;  %v3206_v15 = vld [vmem:[%s4424_s1 + $0x610] ss:$8 sps:$4 sm:$0xff]   ;;  %v3211_v16 = vld [vmem:[%s4424_s1 + $0x224] ss:$8 sps:$4 sm:$0xff]  }
  0x52   : > { %2312 = vmatprep.subr.bf16.mxu0 %v3118_v17  ;;  %v3214_v17 = vld [vmem:[%s4424_s1 + $0x624] ss:$8 sps:$4 sm:$0xff]  }
  0x54   : > { %2141 = vmatpush1.bf16.msra.mxu1 %v3113_v18  ;;  %v3209_v18 = vld [vmem:[%s4424_s1 + $0x220] ss:$8 sps:$4 sm:$0xff]  }
  0x55   : > { %2313 = vmatpush1.bf16.msra.mxu0 %v3116_v19  ;;  %2142 = vmatprep.subr.bf16.mxu1 %v3121_v20  ;;  %v3295_v19 = vld [vmem:[%s3658_s17 + $0x14] ss:$72 sps:$4 sm:$0xff]   ;;  %v3212_v20 = vld [vmem:[%s4424_s1 + $0x620] ss:$8 sps:$4 sm:$0xff]  }
  0x56   : > { %2314 = vmatprep.subr.bf16.mxu0 %v3124_v21  ;;  %v3217_v21 = vld [vmem:[%s4424_s1 + $0x234] ss:$8 sps:$4 sm:$0xff]  }
  0x58   : > { %2143 = vmatpush1.bf16.msra.mxu1 %v3119_v22  ;;  %v3220_v22 = vld [vmem:[%s4424_s1 + $0x634] ss:$8 sps:$4 sm:$0xff]  }
  0x59   : > { %2315 = vmatpush1.bf16.msra.mxu0 %v3122_v23  ;;  %2144 = vmatprep.subr.bf16.mxu1 %v3127_v24  ;;  %v3301_v23 = vld [vmem:[%s3658_s17 + $0x34] ss:$72 sps:$4 sm:$0xff]   ;;  %v3215_v24 = vld [vmem:[%s4424_s1 + $0x230] ss:$8 sps:$4 sm:$0xff]  }
  0x5a   : > { %2316 = vmatprep.subr.bf16.mxu0 %v3130_v25  ;;  %v3218_v25 = vld [vmem:[%s4424_s1 + $0x630] ss:$8 sps:$4 sm:$0xff]  }
  0x5c   : > { %2145 = vmatpush1.bf16.msra.mxu1 %v3125_v26  ;;  %v3223_v26 = vld [vmem:[%s4424_s1 + $0x244] ss:$8 sps:$4 sm:$0xff]  }
  0x5d   : > { %2317 = vmatpush1.bf16.msra.mxu0 %v3128_v27  ;;  %2146 = vmatprep.subr.bf16.mxu1 %v3133_v28  ;;  %v3226_v27 = vld [vmem:[%s4424_s1 + $0x644] ss:$8 sps:$4 sm:$0xff]   ;;  %v3221_v28 = vld [vmem:[%s4424_s1 + $0x240] ss:$8 sps:$4 sm:$0xff]  }
  0x5e   : > { %2318 = vmatprep.subr.bf16.mxu0 %v3136_v29  ;;  %v3224_v29 = vld [vmem:[%s4424_s1 + $0x640] ss:$8 sps:$4 sm:$0xff]  }
  0x60   : > { %2147 = vmatpush1.bf16.msra.mxu1 %v3131_v30  ;;  %v3229_v30 = vld [vmem:[%s4424_s1 + $0x254] ss:$8 sps:$4 sm:$0xff]  }
  0x61   : > { %2319 = vmatpush1.bf16.msra.mxu0 %v3134_v31  ;;  %2148 = vmatprep.subr.bf16.mxu1 %v3139_v32  ;;  %v3232_v31 = vld [vmem:[%s4424_s1 + $0x654] ss:$8 sps:$4 sm:$0xff]   ;;  %v3227_v32 = vld [vmem:[%s4424_s1 + $0x250] ss:$8 sps:$4 sm:$0xff]  }
  0x62   : > { %2320 = vmatprep.subr.bf16.mxu0 %v3142_v33  ;;  %v3230_v33 = vld [vmem:[%s4424_s1 + $0x650] ss:$8 sps:$4 sm:$0xff]  }
  0x64   : > { %2149 = vmatpush1.bf16.msra.mxu1 %v3137_v35  ;;  %v3238_v35 = vld [vmem:[%s4424_s1 + $0x664] ss:$8 sps:$4 sm:$0xff]  }
  0x65   : > { %2321 = vmatpush1.bf16.msra.mxu0 %v3140_v36  ;;  %2150 = vmatprep.subr.bf16.mxu1 %v3145_v38  ;;  %v3233_v36 = vld [vmem:[%s4424_s1 + $0x260] ss:$8 sps:$4 sm:$0xff]   ;;  %v3241_v38 = vld [vmem:[%s4424_s1 + $0x274] ss:$8 sps:$4 sm:$0xff]  }
  0x66   : > { %2322 = vmatprep.subr.bf16.mxu0 %v3148_v39  ;;  %v3244_v39 = vld [vmem:[%s4424_s1 + $0x674] ss:$8 sps:$4 sm:$0xff]  }
  0x68   : > { %2151 = vmatpush1.bf16.msra.mxu1 %v3143_v40  ;;  %v3239_v40 = vld [vmem:[%s4424_s1 + $0x270] ss:$8 sps:$4 sm:$0xff]  }
  0x69   : > { %2323 = vmatpush1.bf16.msra.mxu0 %v3146_v41  ;;  %2152 = vmatprep.subr.bf16.mxu1 %v3151_v42  ;;  %v3242_v41 = vld [vmem:[%s4424_s1 + $0x670] ss:$8 sps:$4 sm:$0xff]   ;;  %v3247_v42 = vld [vmem:[%s4424_s1 + $0x284] ss:$8 sps:$4 sm:$0xff]  }
  0x6a   : > { %2324 = vmatprep.subr.bf16.mxu0 %v3154_v43  ;;  %v3250_v43 = vld [vmem:[%s4424_s1 + $0x684] ss:$8 sps:$4 sm:$0xff]  }
  0x6c   : > { %2153 = vmatpush1.bf16.msra.mxu1 %v3149_v44  ;;  %v3245_v44 = vld [vmem:[%s4424_s1 + $0x280] ss:$8 sps:$4 sm:$0xff]  }
  0x6d   : > { %2325 = vmatpush1.bf16.msra.mxu0 %v3152_v45  ;;  %2154 = vmatprep.subr.bf16.mxu1 %v3157_v46  ;;  %v3248_v45 = vld [vmem:[%s4424_s1 + $0x680] ss:$8 sps:$4 sm:$0xff]   ;;  %v3253_v46 = vld [vmem:[%s4424_s1 + $0x294] ss:$8 sps:$4 sm:$0xff]  }
  0x6e   : > { %2326 = vmatprep.subr.bf16.mxu0 %v3160_v47  ;;  %v3256_v47 = vld [vmem:[%s4424_s1 + $0x694] ss:$8 sps:$4 sm:$0xff]  }
  0x70   : > { %2155 = vmatpush1.bf16.msra.mxu1 %v3155_v48  ;;  %v3251_v48 = vld [vmem:[%s4424_s1 + $0x290] ss:$8 sps:$4 sm:$0xff]  }
  0x71   : > { %2327 = vmatpush1.bf16.msra.mxu0 %v3158_v49  ;;  %2156 = vmatprep.subr.bf16.mxu1 %v3163_v50  ;;  %v3254_v49 = vld [vmem:[%s4424_s1 + $0x690] ss:$8 sps:$4 sm:$0xff]   ;;  %v3259_v50 = vld [vmem:[%s4424_s1 + $0x2a4] ss:$8 sps:$4 sm:$0xff]  }
  0x72   : > { %2328 = vmatprep.subr.bf16.mxu0 %v3166_v51  ;;  %v3262_v51 = vld [vmem:[%s4424_s1 + $0x6a4] ss:$8 sps:$4 sm:$0xff]  }
  0x74   : > { %2157 = vmatpush1.bf16.msra.mxu1 %v3161_v52  ;;  %v3257_v52 = vld [vmem:[%s4424_s1 + $0x2a0] ss:$8 sps:$4 sm:$0xff]  }
  0x75   : > { %2329 = vmatpush1.bf16.msra.mxu0 %v3164_v53  ;;  %2158 = vmatprep.subr.bf16.mxu1 %v3169_v54  ;;  %v3260_v53 = vld [vmem:[%s4424_s1 + $0x6a0] ss:$8 sps:$4 sm:$0xff]   ;;  %v3265_v54 = vld [vmem:[%s4424_s1 + $0x2b4] ss:$8 sps:$4 sm:$0xff]  }
  0x76   : > { %2330 = vmatprep.subr.bf16.mxu0 %v3172_v55  ;;  %v3268_v55 = vld [vmem:[%s4424_s1 + $0x6b4] ss:$8 sps:$4 sm:$0xff]  }
  0x78   : > { %2159 = vmatpush1.bf16.msra.mxu1 %v3167_v56  ;;  %v3263_v56 = vld [vmem:[%s4424_s1 + $0x2b0] ss:$8 sps:$4 sm:$0xff]  }
  0x79   : > { %2331 = vmatpush1.bf16.msra.mxu0 %v3170_v57  ;;  %2160 = vmatprep.subr.bf16.mxu1 %v3175_v58  ;;  %v3266_v57 = vld [vmem:[%s4424_s1 + $0x6b0] ss:$8 sps:$4 sm:$0xff]   ;;  %v3271_v58 = vld [vmem:[%s4424_s1 + $0x2c4] ss:$8 sps:$4 sm:$0xff]  }
  0x7a   : > { %2332 = vmatprep.subr.bf16.mxu0 %v3178_v59  ;;  %v3274_v59 = vld [vmem:[%s4424_s1 + $0x6c4] ss:$8 sps:$4 sm:$0xff]  }
  0x7c   : > { %2161 = vmatpush1.bf16.msra.mxu1 %v3173_v60  ;;  %v3269_v60 = vld [vmem:[%s4424_s1 + $0x2c0] ss:$8 sps:$4 sm:$0xff]  }
  0x7d   : > { %2333 = vmatpush1.bf16.msra.mxu0 %v3176_v61  ;;  %2162 = vmatprep.subr.bf16.mxu1 %v3181_v62  ;;  %v3272_v61 = vld [vmem:[%s4424_s1 + $0x6c0] ss:$8 sps:$4 sm:$0xff]   ;;  %v3277_v62 = vld [vmem:[%s4424_s1 + $0x2d4] ss:$8 sps:$4 sm:$0xff]  }
  0x7e   : > { %2334 = vmatprep.subr.bf16.mxu0 %v3184_v63  ;;  %v3280_v63 = vld [vmem:[%s4424_s1 + $0x6d4] ss:$8 sps:$4 sm:$0xff]  }
  0x80   : > { %2163 = vmatpush1.bf16.msra.mxu1 %v3179_v0  ;;  %v3275_v0 = vld [vmem:[%s4424_s1 + $0x2d0] ss:$8 sps:$4 sm:$0xff]  }
  0x81   : > { %2335 = vmatpush1.bf16.msra.mxu0 %v3182_v1  ;;  %2164 = vmatprep.subr.bf16.mxu1 %v3187_v2  ;;  %v3278_v1 = vld [vmem:[%s4424_s1 + $0x6d0] ss:$8 sps:$4 sm:$0xff]   ;;  %v3283_v2 = vld [vmem:[%s4424_s1 + $0x2e4] ss:$8 sps:$4 sm:$0xff]  }
  0x82   : > { %2336 = vmatprep.subr.bf16.mxu0 %v3190_v3  ;;  %v3286_v3 = vld [vmem:[%s4424_s1 + $0x6e4] ss:$8 sps:$4 sm:$0xff]  }
  0x84   : > { %2165 = vmatpush1.bf16.msra.mxu1 %v3185_v4  ;;  %v3281_v4 = vld [vmem:[%s4424_s1 + $0x2e0] ss:$8 sps:$4 sm:$0xff]  }
  0x85   : > { %2337 = vmatpush1.bf16.msra.mxu0 %v3188_v5  ;;  %2177 = vmatprep.subr.bf16.mxu1 %v3196_v6  ;;  %v3284_v5 = vld [vmem:[%s4424_s1 + $0x6e0] ss:$8 sps:$4 sm:$0xff]   ;;  %v3289_v6 = vld [vmem:[%s4424_s1 + $0x2f4] ss:$8 sps:$4 sm:$0xff]  }
  0x86   : > { %2349 = vmatprep.subr.bf16.mxu0 %v3202_v7  ;;  %v3292_v7 = vld [vmem:[%s4424_s1 + $0x6f4] ss:$8 sps:$4 sm:$0xff]  }
  0x87   : > { %2167 = vmatmul.mubr.bf16.vlgmr.msra.gmra.mrb[0].mxu1 %v3191_v8  ;;  %v3287_v8 = vld [vmem:[%s4424_s1 + $0x2f0] ss:$8 sps:$4 sm:$0xff]  }
  0x88   : > { %2339 = vmatmul.mubr.bf16.vlgmr.msra.gmra.mrb[0].mxu0 %v3197_v10  ;;  %2178 = vmatpush1.bf16.msra.mxu1 %v3194_v9  ;;  %v3290_v9 = vld [vmem:[%s4424_s1 + $0x6f0] ss:$8 sps:$4 sm:$0xff]   ;;  %v3298_v10 = vld [vmem:[%s4424_s1 + $0x304] ss:$8 sps:$4 sm:$0xff]  }
  0x89   : > { %2350 = vmatpush1.bf16.msra.mxu0 %v3200_v11  ;;  %2179 = vmatprep.subr.bf16.mxu1 %v3205_v12  ;;  %v3304_v11 = vld [vmem:[%s4424_s1 + $0x704] ss:$8 sps:$4 sm:$0xff]   ;;  %v3293_v12 = vld [vmem:[%s3658_s17 + $0x10] ss:$72 sps:$4 sm:$0xff]  }
  0x8a   : > { %2351 = vmatprep.subr.bf16.mxu0 %v3208_v13  ;;  %2209 = vmatprep.mubr.bf16.mxu1 %v3295_v19  ;;  %v3296_v13 = vld [vmem:[%s4424_s1 + $0x300] ss:$8 sps:$4 sm:$0xff]   ;;  %v3400_v19 = vld [vmem:[%s3658_s17 + $0x3c] ss:$72 sps:$4 sm:$0xff]  }
  0x8b   : > { %2381 = vmatprep.mubr.bf16.mxu0 %v3301_v23  ;;  %v3316_v23 = vld [vmem:[%s4424_s1 + $0x724] ss:$8 sps:$4 sm:$0xff]  }
  0x8c   : > { %2180 = vmatpush1.bf16.msra.mxu1 %v3203_v14  ;;  %v3299_v14 = vld [vmem:[%s3658_s17 + $0x30] ss:$72 sps:$4 sm:$0xff]  }
  0x8d   : > { %2352 = vmatpush1.bf16.msra.mxu0 %v3206_v15  ;;  %2181 = vmatprep.subr.bf16.mxu1 %v3211_v16  ;;  %v3302_v15 = vld [vmem:[%s4424_s1 + $0x700] ss:$8 sps:$4 sm:$0xff]   ;;  %v3307_v16 = vld [vmem:[%s4424_s1 + $0x314] ss:$8 sps:$4 sm:$0xff]  }
  0x8e   : > { %2353 = vmatprep.subr.bf16.mxu0 %v3214_v17  ;;  %v3310_v17 = vld [vmem:[%s4424_s1 + $0x714] ss:$8 sps:$4 sm:$0xff]  }
  0x90   : > { %2182 = vmatpush1.bf16.msra.mxu1 %v3209_v18  ;;  %v3397_v18 = vld [vmem:[%s3658_s17 + $0x1c] ss:$72 sps:$4 sm:$0xff]  }
  0x91   : > { %2354 = vmatpush1.bf16.msra.mxu0 %v3212_v20  ;;  %2183 = vmatprep.subr.bf16.mxu1 %v3217_v21  ;;  %v3305_v20 = vld [vmem:[%s4424_s1 + $0x310] ss:$8 sps:$4 sm:$0xff]  }
  0x92   : > { %2355 = vmatprep.subr.bf16.mxu0 %v3220_v22  ;;  %v3308_v21 = vld [vmem:[%s4424_s1 + $0x710] ss:$8 sps:$4 sm:$0xff]   ;;  %v3313_v22 = vld [vmem:[%s4424_s1 + $0x324] ss:$8 sps:$4 sm:$0xff]  }
  0x94   : > { %2184 = vmatpush1.bf16.msra.mxu1 %v3215_v24  ;;  %v3311_v24 = vld [vmem:[%s4424_s1 + $0x320] ss:$8 sps:$4 sm:$0xff]  }
  0x95   : > { %2356 = vmatpush1.bf16.msra.mxu0 %v3218_v25  ;;  %2185 = vmatprep.subr.bf16.mxu1 %v3223_v26  ;;  %v3314_v25 = vld [vmem:[%s4424_s1 + $0x720] ss:$8 sps:$4 sm:$0xff]   ;;  %v3319_v26 = vld [vmem:[%s4424_s1 + $0x334] ss:$8 sps:$4 sm:$0xff]  }
  0x96   : > { %2357 = vmatprep.subr.bf16.mxu0 %v3226_v27  ;;  %v3322_v27 = vld [vmem:[%s4424_s1 + $0x734] ss:$8 sps:$4 sm:$0xff]  }
  0x98   : > { %2186 = vmatpush1.bf16.msra.mxu1 %v3221_v28  ;;  %v3317_v28 = vld [vmem:[%s4424_s1 + $0x330] ss:$8 sps:$4 sm:$0xff]  }
  0x99   : > { %2358 = vmatpush1.bf16.msra.mxu0 %v3224_v29  ;;  %2187 = vmatprep.subr.bf16.mxu1 %v3229_v30  ;;  %v3320_v29 = vld [vmem:[%s4424_s1 + $0x730] ss:$8 sps:$4 sm:$0xff]   ;;  %v3325_v30 = vld [vmem:[%s4424_s1 + $0x344] ss:$8 sps:$4 sm:$0xff]  }
  0x9a   : > { %2359 = vmatprep.subr.bf16.mxu0 %v3232_v31  ;;  %v3328_v31 = vld [vmem:[%s4424_s1 + $0x744] ss:$8 sps:$4 sm:$0xff]  }
  0x9c   : > { %2188 = vmatpush1.bf16.msra.mxu1 %v3227_v32  ;;  %v3323_v32 = vld [vmem:[%s4424_s1 + $0x340] ss:$8 sps:$4 sm:$0xff]  }
  0x9d   : > { %2360 = vmatpush1.bf16.msra.mxu0 %v3230_v33  ;;  %2189 = vmatprep.subr.bf16.mxu1 %v3235_v34  ;;  %v3326_v33 = vld [vmem:[%s4424_s1 + $0x740] ss:$8 sps:$4 sm:$0xff]   ;;  %v3331_v34 = vld [vmem:[%s4424_s1 + $0x354] ss:$8 sps:$4 sm:$0xff]  }
  0x9e   : > { %2361 = vmatprep.subr.bf16.mxu0 %v3238_v35  ;;  %v3334_v35 = vld [vmem:[%s4424_s1 + $0x754] ss:$8 sps:$4 sm:$0xff]  }
  0xa0   : > { %2190 = vmatpush1.bf16.msra.mxu1 %v3233_v36  ;;  %v3329_v36 = vld [vmem:[%s4424_s1 + $0x350] ss:$8 sps:$4 sm:$0xff]  }
  0xa1   : > { %2362 = vmatpush1.bf16.msra.mxu0 %v3236_v37  ;;  %2191 = vmatprep.subr.bf16.mxu1 %v3241_v38  ;;  %v3332_v37 = vld [vmem:[%s4424_s1 + $0x750] ss:$8 sps:$4 sm:$0xff]   ;;  %v3337_v38 = vld [vmem:[%s4424_s1 + $0x364] ss:$8 sps:$4 sm:$0xff]  }
  0xa2   : > { %2363 = vmatprep.subr.bf16.mxu0 %v3244_v39  ;;  %v3340_v39 = vld [vmem:[%s4424_s1 + $0x764] ss:$8 sps:$4 sm:$0xff]  }
  0xa4   : > { %2192 = vmatpush1.bf16.msra.mxu1 %v3239_v40  ;;  %v3335_v40 = vld [vmem:[%s4424_s1 + $0x360] ss:$8 sps:$4 sm:$0xff]  }
  0xa5   : > { %2364 = vmatpush1.bf16.msra.mxu0 %v3242_v41  ;;  %2193 = vmatprep.subr.bf16.mxu1 %v3247_v42  ;;  %v3338_v41 = vld [vmem:[%s4424_s1 + $0x760] ss:$8 sps:$4 sm:$0xff]   ;;  %v3343_v42 = vld [vmem:[%s4424_s1 + $0x374] ss:$8 sps:$4 sm:$0xff]  }
  0xa6   : > { %2365 = vmatprep.subr.bf16.mxu0 %v3250_v43  ;;  %v3346_v43 = vld [vmem:[%s4424_s1 + $0x774] ss:$8 sps:$4 sm:$0xff]  }
  0xa8   : > { %2194 = vmatpush1.bf16.msra.mxu1 %v3245_v44  ;;  %v3341_v44 = vld [vmem:[%s4424_s1 + $0x370] ss:$8 sps:$4 sm:$0xff]  }
  0xa9   : > { %2366 = vmatpush1.bf16.msra.mxu0 %v3248_v45  ;;  %2195 = vmatprep.subr.bf16.mxu1 %v3253_v46  ;;  %v3344_v45 = vld [vmem:[%s4424_s1 + $0x770] ss:$8 sps:$4 sm:$0xff]   ;;  %v3349_v46 = vld [vmem:[%s4424_s1 + $0x384] ss:$8 sps:$4 sm:$0xff]  }
  0xaa   : > { %2367 = vmatprep.subr.bf16.mxu0 %v3256_v47  ;;  %v3352_v47 = vld [vmem:[%s4424_s1 + $0x784] ss:$8 sps:$4 sm:$0xff]  }
  0xac   : > { %2196 = vmatpush1.bf16.msra.mxu1 %v3251_v48  ;;  %v3347_v48 = vld [vmem:[%s4424_s1 + $0x380] ss:$8 sps:$4 sm:$0xff]  }
  0xad   : > { %2368 = vmatpush1.bf16.msra.mxu0 %v3254_v49  ;;  %2197 = vmatprep.subr.bf16.mxu1 %v3259_v50  ;;  %v3350_v49 = vld [vmem:[%s4424_s1 + $0x780] ss:$8 sps:$4 sm:$0xff]   ;;  %v3355_v50 = vld [vmem:[%s4424_s1 + $0x394] ss:$8 sps:$4 sm:$0xff]  }
  0xae   : > { %2369 = vmatprep.subr.bf16.mxu0 %v3262_v51  ;;  %v3358_v51 = vld [vmem:[%s4424_s1 + $0x794] ss:$8 sps:$4 sm:$0xff]  }
  0xb0   : > { %2198 = vmatpush1.bf16.msra.mxu1 %v3257_v52  ;;  %v3353_v52 = vld [vmem:[%s4424_s1 + $0x390] ss:$8 sps:$4 sm:$0xff]  }
  0xb1   : > { %2370 = vmatpush1.bf16.msra.mxu0 %v3260_v53  ;;  %2199 = vmatprep.subr.bf16.mxu1 %v3265_v54  ;;  %v3356_v53 = vld [vmem:[%s4424_s1 + $0x790] ss:$8 sps:$4 sm:$0xff]   ;;  %v3361_v54 = vld [vmem:[%s4424_s1 + $0x3a4] ss:$8 sps:$4 sm:$0xff]  }
  0xb2   : > { %2371 = vmatprep.subr.bf16.mxu0 %v3268_v55  ;;  %v3364_v55 = vld [vmem:[%s4424_s1 + $0x7a4] ss:$8 sps:$4 sm:$0xff]  }
  0xb4   : > { %2200 = vmatpush1.bf16.msra.mxu1 %v3263_v56  ;;  %v3359_v56 = vld [vmem:[%s4424_s1 + $0x3a0] ss:$8 sps:$4 sm:$0xff]  }
  0xb5   : > { %2372 = vmatpush1.bf16.msra.mxu0 %v3266_v57  ;;  %2201 = vmatprep.subr.bf16.mxu1 %v3271_v58  ;;  %v3362_v57 = vld [vmem:[%s4424_s1 + $0x7a0] ss:$8 sps:$4 sm:$0xff]   ;;  %v3367_v58 = vld [vmem:[%s4424_s1 + $0x3b4] ss:$8 sps:$4 sm:$0xff]  }
  0xb6   : > { %2373 = vmatprep.subr.bf16.mxu0 %v3274_v59  ;;  %v3370_v59 = vld [vmem:[%s4424_s1 + $0x7b4] ss:$8 sps:$4 sm:$0xff]  }
  0xb8   : > { %2202 = vmatpush1.bf16.msra.mxu1 %v3269_v60  ;;  %v3365_v60 = vld [vmem:[%s4424_s1 + $0x3b0] ss:$8 sps:$4 sm:$0xff]  }
  0xb9   : > { %2374 = vmatpush1.bf16.msra.mxu0 %v3272_v61  ;;  %2203 = vmatprep.subr.bf16.mxu1 %v3277_v62  ;;  %v3368_v61 = vld [vmem:[%s4424_s1 + $0x7b0] ss:$8 sps:$4 sm:$0xff]   ;;  %v3373_v62 = vld [vmem:[%s4424_s1 + $0x3c4] ss:$8 sps:$4 sm:$0xff]  }
  0xba   : > { %2375 = vmatprep.subr.bf16.mxu0 %v3280_v63  ;;  %v3376_v63 = vld [vmem:[%s4424_s1 + $0x7c4] ss:$8 sps:$4 sm:$0xff]  }
  0xbc   : > { %2204 = vmatpush1.bf16.msra.mxu1 %v3275_v0  ;;  %v3371_v0 = vld [vmem:[%s4424_s1 + $0x3c0] ss:$8 sps:$4 sm:$0xff]  }
  0xbd   : > { %2376 = vmatpush1.bf16.msra.mxu0 %v3278_v1  ;;  %2205 = vmatprep.subr.bf16.mxu1 %v3283_v2  ;;  %v3374_v1 = vld [vmem:[%s4424_s1 + $0x7c0] ss:$8 sps:$4 sm:$0xff]   ;;  %v3379_v2 = vld [vmem:[%s4424_s1 + $0x3d4] ss:$8 sps:$4 sm:$0xff]  }
  0xbe   : > { %2377 = vmatprep.subr.bf16.mxu0 %v3286_v3  ;;  %v3382_v3 = vld [vmem:[%s4424_s1 + $0x7d4] ss:$8 sps:$4 sm:$0xff]  }
  0xc0   : > { %2206 = vmatpush1.bf16.msra.mxu1 %v3281_v4  ;;  %v3377_v4 = vld [vmem:[%s4424_s1 + $0x3d0] ss:$8 sps:$4 sm:$0xff]  }
  0xc1   : > { %2378 = vmatpush1.bf16.msra.mxu0 %v3284_v5  ;;  %2207 = vmatprep.subr.bf16.mxu1 %v3289_v6  ;;  %v3380_v5 = vld [vmem:[%s4424_s1 + $0x7d0] ss:$8 sps:$4 sm:$0xff]   ;;  %v3385_v6 = vld [vmem:[%s4424_s1 + $0x3e4] ss:$8 sps:$4 sm:$0xff]  }
  0xc2   : > { %2379 = vmatprep.subr.bf16.mxu0 %v3292_v7  ;;  %v3388_v7 = vld [vmem:[%s4424_s1 + $0x7e4] ss:$8 sps:$4 sm:$0xff]  }
  0xc4   : > { %2208 = vmatpush1.bf16.msra.mxu1 %v3287_v8  ;;  %v3383_v8 = vld [vmem:[%s4424_s1 + $0x3e0] ss:$8 sps:$4 sm:$0xff]  }
  0xc5   : > { %2380 = vmatpush1.bf16.msra.mxu0 %v3290_v9  ;;  %2220 = vmatprep.subr.bf16.mxu1 %v3298_v10  ;;  %v3386_v9 = vld [vmem:[%s4424_s1 + $0x7e0] ss:$8 sps:$4 sm:$0xff]   ;;  %v3391_v10 = vld [vmem:[%s4424_s1 + $0x3f4] ss:$8 sps:$4 sm:$0xff]  }
  0xc6   : > { %2392 = vmatprep.subr.bf16.mxu0 %v3304_v11  ;;  %v3394_v11 = vld [vmem:[%s4424_s1 + $0x7f4] ss:$8 sps:$4 sm:$0xff]  }
  0xc7   : > { %2210 = vmatmul.mubr.bf16.vlgmr.msra.gmra.mrb[0].mxu1 %v3293_v12  ;;  %v3389_v12 = vld [vmem:[%s4424_s1 + $0x3f0] ss:$8 sps:$4 sm:$0xff]  }
  0xc8   : > { %2382 = vmatmul.mubr.bf16.vlgmr.msra.gmra.mrb[0].mxu0 %v3299_v14  ;;  %2221 = vmatpush1.bf16.msra.mxu1 %v3296_v13  ;;  %v3392_v13 = vld [vmem:[%s4424_s1 + $0x7f0] ss:$8 sps:$4 sm:$0xff]   ;;  %v3403_v14 = vld [vmem:[%s4424_s1 + $0x804] ss:$8 sps:$4 sm:$0xff]  }
  0xc9   : > { %2393 = vmatpush1.bf16.msra.mxu0 %v3302_v15  ;;  %2222 = vmatprep.subr.bf16.mxu1 %v3307_v16  ;;  %v3395_v15 = vld [vmem:[%s3658_s17 + $0x18] ss:$72 sps:$4 sm:$0xff]  }
  0xca   : > { %2394 = vmatprep.subr.bf16.mxu0 %v3310_v17  ;;  %2252 = vmatprep.mubr.bf16.mxu1 %v3397_v18  ;;  %v3398_v16 = vld [vmem:[%s3658_s17 + $0x38] ss:$72 sps:$4 sm:$0xff]   ;;  %v3451_v18 = vld [vmem:[%s3658_s17 + $0x44] ss:$72 sps:$4 sm:$0xff]  }
  0xcb   : > { %2424 = vmatprep.mubr.bf16.mxu0 %v3400_v19  ;;  %v3401_v17 = vld [vmem:[%s4424_s1 + $0x800] ss:$8 sps:$4 sm:$0xff]   ;;  %v3406_v19 = vld [vmem:[%s4424_s1 + $0x814] ss:$8 sps:$4 sm:$0xff]  }
  0xcc   : > { %2223 = vmatpush1.bf16.msra.mxu1 %v3305_v20  ;;  %v3404_v20 = vld [vmem:[%s4424_s1 + $0x810] ss:$8 sps:$4 sm:$0xff]  }
  0xcd   : > { %2395 = vmatpush1.bf16.msra.mxu0 %v3308_v21  ;;  %2224 = vmatprep.subr.bf16.mxu1 %v3313_v22  ;;  %v3409_v21 = vld [vmem:[%s4424_s1 + $0x824] ss:$8 sps:$4 sm:$0xff]   ;;  %v3407_v22 = vld [vmem:[%s4424_s1 + $0x820] ss:$8 sps:$4 sm:$0xff]  }
  0xce   : > { %2396 = vmatprep.subr.bf16.mxu0 %v3316_v23  ;;  %v3412_v23 = vld [vmem:[%s4424_s1 + $0x834] ss:$8 sps:$4 sm:$0xff]  }
  0xd0   : > { %2225 = vmatpush1.bf16.msra.mxu1 %v3311_v24  ;;  %v3410_v24 = vld [vmem:[%s4424_s1 + $0x830] ss:$8 sps:$4 sm:$0xff]  }
  0xd1   : > { %2397 = vmatpush1.bf16.msra.mxu0 %v3314_v25  ;;  %2226 = vmatprep.subr.bf16.mxu1 %v3319_v26  ;;  %v3415_v25 = vld [vmem:[%s4424_s1 + $0x844] ss:$8 sps:$4 sm:$0xff]   ;;  %v3413_v26 = vld [vmem:[%s4424_s1 + $0x840] ss:$8 sps:$4 sm:$0xff]  }
  0xd2   : > { %2398 = vmatprep.subr.bf16.mxu0 %v3322_v27  ;;  %v3418_v27 = vld [vmem:[%s4424_s1 + $0x854] ss:$8 sps:$4 sm:$0xff]  }
  0xd4   : > { %2227 = vmatpush1.bf16.msra.mxu1 %v3317_v28  ;;  %v3416_v28 = vld [vmem:[%s4424_s1 + $0x850] ss:$8 sps:$4 sm:$0xff]  }
  0xd5   : > { %2399 = vmatpush1.bf16.msra.mxu0 %v3320_v29  ;;  %2228 = vmatprep.subr.bf16.mxu1 %v3325_v30  ;;  %v3421_v29 = vld [vmem:[%s4424_s1 + $0x864] ss:$8 sps:$4 sm:$0xff]   ;;  %v3419_v30 = vld [vmem:[%s4424_s1 + $0x860] ss:$8 sps:$4 sm:$0xff]  }
  0xd6   : > { %2400 = vmatprep.subr.bf16.mxu0 %v3328_v31  ;;  %v3424_v31 = vld [vmem:[%s4424_s1 + $0x874] ss:$8 sps:$4 sm:$0xff]  }
  0xd8   : > { %2229 = vmatpush1.bf16.msra.mxu1 %v3323_v32  ;;  %v3422_v32 = vld [vmem:[%s4424_s1 + $0x870] ss:$8 sps:$4 sm:$0xff]  }
  0xd9   : > { %2401 = vmatpush1.bf16.msra.mxu0 %v3326_v33  ;;  %2230 = vmatprep.subr.bf16.mxu1 %v3331_v34  ;;  %v3427_v33 = vld [vmem:[%s4424_s1 + $0x884] ss:$8 sps:$4 sm:$0xff]   ;;  %v3425_v34 = vld [vmem:[%s4424_s1 + $0x880] ss:$8 sps:$4 sm:$0xff]  }
  0xda   : > { %2402 = vmatprep.subr.bf16.mxu0 %v3334_v35  ;;  %v3430_v35 = vld [vmem:[%s4424_s1 + $0x894] ss:$8 sps:$4 sm:$0xff]  }
  0xdc   : > { %2231 = vmatpush1.bf16.msra.mxu1 %v3329_v36  ;;  %v3428_v36 = vld [vmem:[%s4424_s1 + $0x890] ss:$8 sps:$4 sm:$0xff]  }
  0xdd   : > { %2403 = vmatpush1.bf16.msra.mxu0 %v3332_v37  ;;  %2232 = vmatprep.subr.bf16.mxu1 %v3337_v38  ;;  %v3433_v37 = vld [vmem:[%s4424_s1 + $0x8a4] ss:$8 sps:$4 sm:$0xff]   ;;  %v3431_v38 = vld [vmem:[%s4424_s1 + $0x8a0] ss:$8 sps:$4 sm:$0xff]  }
  0xde   : > { %2404 = vmatprep.subr.bf16.mxu0 %v3340_v39  ;;  %v3436_v39 = vld [vmem:[%s4424_s1 + $0x8b4] ss:$8 sps:$4 sm:$0xff]  }
  0xe0   : > { %2233 = vmatpush1.bf16.msra.mxu1 %v3335_v40  ;;  %v3434_v40 = vld [vmem:[%s4424_s1 + $0x8b0] ss:$8 sps:$4 sm:$0xff]  }
  0xe1   : > { %2405 = vmatpush1.bf16.msra.mxu0 %v3338_v41  ;;  %2234 = vmatprep.subr.bf16.mxu1 %v3343_v42  ;;  %v3439_v41 = vld [vmem:[%s4424_s1 + $0x8c4] ss:$8 sps:$4 sm:$0xff]   ;;  %v3437_v42 = vld [vmem:[%s4424_s1 + $0x8c0] ss:$8 sps:$4 sm:$0xff]  }
  0xe2   : > { %2406 = vmatprep.subr.bf16.mxu0 %v3346_v43  ;;  %v3442_v43 = vld [vmem:[%s4424_s1 + $0x8d4] ss:$8 sps:$4 sm:$0xff]  }
  0xe4   : > { %2235 = vmatpush1.bf16.msra.mxu1 %v3341_v44  ;;  %v3440_v44 = vld [vmem:[%s4424_s1 + $0x8d0] ss:$8 sps:$4 sm:$0xff]  }
  0xe5   : > { %2407 = vmatpush1.bf16.msra.mxu0 %v3344_v45  ;;  %2236 = vmatprep.subr.bf16.mxu1 %v3349_v46  ;;  %v3445_v45 = vld [vmem:[%s4424_s1 + $0x8e4] ss:$8 sps:$4 sm:$0xff]   ;;  %v3443_v46 = vld [vmem:[%s4424_s1 + $0x8e0] ss:$8 sps:$4 sm:$0xff]  }
  0xe6   : > { %2408 = vmatprep.subr.bf16.mxu0 %v3352_v47  ;;  %v3448_v47 = vld [vmem:[%s4424_s1 + $0x8f4] ss:$8 sps:$4 sm:$0xff]  }
  0xe8   : > { %2237 = vmatpush1.bf16.msra.mxu1 %v3347_v48  ;;  %v3446_v48 = vld [vmem:[%s4424_s1 + $0x8f0] ss:$8 sps:$4 sm:$0xff]  }
  0xe9   : > { %2409 = vmatpush1.bf16.msra.mxu0 %v3350_v49  ;;  %2238 = vmatprep.subr.bf16.mxu1 %v3355_v50  ;;  %v3449_v49 = vld [vmem:[%s3658_s17 + $0x40] ss:$72 sps:$4 sm:$0xff]   ;;  %s2929_s17 = sshll.u32 %s4432_s30, 3 }
  0xea   : > { %2410 = vmatprep.subr.bf16.mxu0 %v3358_v51  ;;  %s240_s24 = scalar_lea.vmem %s4426_s3, %s2929_s17 }
  0xec   : > { %2239 = vmatpush1.bf16.msra.mxu1 %v3353_v52 }
  0xed   : > { %2411 = vmatpush1.bf16.msra.mxu0 %v3356_v53  ;;  %2240 = vmatprep.subr.bf16.mxu1 %v3361_v54  ;;  %v551_v54 = vlaneseq }
  0xee   : > { %2412 = vmatprep.subr.bf16.mxu0 %v3364_v55 }
  0xef   : > { %v552_v55 = vshrl.u32 %v551_v54, 7 }
  0xf0   : > { %2241 = vmatpush1.bf16.msra.mxu1 %v3359_v56 }
  0xf1   : > { %2413 = vmatpush1.bf16.msra.mxu0 %v3362_v57  ;;  %2242 = vmatprep.subr.bf16.mxu1 %v3367_v58  ;;  %v553_v56 = vsub.s32 0, %v552_v55  ;;  %v549_v57 = vld [vmem:[%s4425_s2] sm:$0x3]  ;;  %v557_v58 = vsub.s32 1, %v552_v55 }
  0xf2   : > { %2414 = vmatprep.subr.bf16.mxu0 %v3370_v59 }
  0xf3   : > { %v554_v59 = vrot.slane %v549_v57, %v553_v56 }
  0xf4   : > { %2243 = vmatpush1.bf16.msra.mxu1 %v3365_v60  ;;  %v558_v60 = vrot.slane %v549_v57, %v557_v58 }
  0xf5   : > { %2415 = vmatpush1.bf16.msra.mxu0 %v3368_v61  ;;  %2244 = vmatprep.subr.bf16.mxu1 %v3373_v62 }
  0xf6   : > { %2416 = vmatprep.subr.bf16.mxu0 %v3376_v63 }
  0xf8   : > { %2245 = vmatpush1.bf16.msra.mxu1 %v3371_v0 }
  0xf9   : > { %2417 = vmatpush1.bf16.msra.mxu0 %v3374_v1  ;;  %2246 = vmatprep.subr.bf16.mxu1 %v3379_v2 }
  0xfa   : > { %2418 = vmatprep.subr.bf16.mxu0 %v3382_v3 }
  0xfc   : > { %2247 = vmatpush1.bf16.msra.mxu1 %v3377_v4 }
  0xfd   : > { %2419 = vmatpush1.bf16.msra.mxu0 %v3380_v5  ;;  %2248 = vmatprep.subr.bf16.mxu1 %v3385_v6 }
  0xfe   : > { %2420 = vmatprep.subr.bf16.mxu0 %v3388_v7 }
 0x100   : > { %2249 = vmatpush1.bf16.msra.mxu1 %v3383_v8 }
 0x101   : > { %2421 = vmatpush1.bf16.msra.mxu0 %v3386_v9  ;;  %2250 = vmatprep.subr.bf16.mxu1 %v3391_v10 }
 0x102   : > { %2422 = vmatprep.subr.bf16.mxu0 %v3394_v11 }
 0x104   : > { %2251 = vmatpush1.bf16.msra.mxu1 %v3389_v12 }
 0x105   : > { %2423 = vmatpush1.bf16.msra.mxu0 %v3392_v13 }
 0x106   : > { %2435 = vmatprep.subr.bf16.mxu0 %v3403_v14 }
 0x107   : > { %2253 = vmatmul.mubr.bf16.vlgmr.msra.gmra.mrb[0].mxu1 %v3395_v15 }
 0x108   : > { %2425 = vmatmul.mubr.bf16.vlgmr.msra.gmra.mrb[0].mxu0 %v3398_v16 }
 0x109   : > { %2436 = vmatpush1.bf16.msra.mxu0 %v3401_v17  ;;  %2467 = vmatprep.mubr.bf16.mxu0 %v3451_v18 }
 0x10a   : > { %2437 = vmatprep.subr.bf16.mxu0 %v3406_v19 }
 0x10d   : > { %2438 = vmatpush1.bf16.msra.mxu0 %v3404_v20 }
 0x10e   : > { %2439 = vmatprep.subr.bf16.mxu0 %v3409_v21 }
 0x111   : > { %2440 = vmatpush1.bf16.msra.mxu0 %v3407_v22 }
 0x112   : > { %2441 = vmatprep.subr.bf16.mxu0 %v3412_v23 }
 0x115   : > { %2442 = vmatpush1.bf16.msra.mxu0 %v3410_v24 }
 0x116   : > { %2443 = vmatprep.subr.bf16.mxu0 %v3415_v25 }
 0x119   : > { %2444 = vmatpush1.bf16.msra.mxu0 %v3413_v26 }
 0x11a   : > { %2445 = vmatprep.subr.bf16.mxu0 %v3418_v27 }
 0x11d   : > { %2446 = vmatpush1.bf16.msra.mxu0 %v3416_v28 }
 0x11e   : > { %2447 = vmatprep.subr.bf16.mxu0 %v3421_v29 }
 0x121   : > { %2448 = vmatpush1.bf16.msra.mxu0 %v3419_v30 }
 0x122   : > { %2449 = vmatprep.subr.bf16.mxu0 %v3424_v31 }
 0x125   : > { %2450 = vmatpush1.bf16.msra.mxu0 %v3422_v32 }
 0x126   : > { %2451 = vmatprep.subr.bf16.mxu0 %v3427_v33 }
 0x129   : > { %2452 = vmatpush1.bf16.msra.mxu0 %v3425_v34 }
 0x12a   : > { %2453 = vmatprep.subr.bf16.mxu0 %v3430_v35 }
 0x12d   : > { %2454 = vmatpush1.bf16.msra.mxu0 %v3428_v36 }
 0x12e   : > { %2455 = vmatprep.subr.bf16.mxu0 %v3433_v37 }
 0x131   : > { %2456 = vmatpush1.bf16.msra.mxu0 %v3431_v38 }
 0x132   : > { %2457 = vmatprep.subr.bf16.mxu0 %v3436_v39 }
 0x135   : > { %2458 = vmatpush1.bf16.msra.mxu0 %v3434_v40 }
 0x136   : > { %2459 = vmatprep.subr.bf16.mxu0 %v3439_v41 }
 0x139   : > { %2460 = vmatpush1.bf16.msra.mxu0 %v3437_v42 }
 0x13a   : > { %2461 = vmatprep.subr.bf16.mxu0 %v3442_v43 }
 0x13d   : > { %2462 = vmatpush1.bf16.msra.mxu0 %v3440_v44 }
 0x13e   : > { %2463 = vmatprep.subr.bf16.mxu0 %v3445_v45 }
 0x141   : > { %2464 = vmatpush1.bf16.msra.mxu0 %v3443_v46 }
 0x142   : > { %2465 = vmatprep.subr.bf16.mxu0 %v3448_v47 }
 0x145   : > { %2466 = vmatpush1.bf16.msra.mxu0 %v3446_v48 }
 0x148   : > { %2468 = vmatmul.mubr.bf16.vlgmr.msra.gmra.mrb[0].mxu0 %v3449_v49 }
 0x1da   : > { %v2254_v50 = vpop.f32.mrb[0].mxu1 }
 0x1db   : > { %v2256_v51 = vpop.f32.mrb[1].mxu1  ;;  %v2932_v61 = vadd.f32 %v2254_v50, %v554_v59 }
 0x1dc   : > { %v2258_v52 = vpop.f32.mrb[2].mxu1  ;;  %v2934_v62 = vadd.f32 %v2256_v51, %v558_v60 }
 0x1dd   : > { %v2260_v53 = vpop.f32.mrb[3].mxu1  ;;  %v2936_v0 = vadd.f32 %v2258_v52, %v554_v59 }
 0x1de   : > { %v2938_v3 = vadd.f32 %v2260_v53, %v558_v60 }
 0x21b   : > { %v2469_v63 = vpop.f32.mrb[0].mxu0 }
 0x21c   : > { %v2933_v1 = vadd.f32 %v2932_v61, %v2469_v63  ;;  %v2471_v2 = vpop.f32.mrb[1].mxu0 }
 0x21d   : > { %v2935_v4 = vadd.f32 %v2934_v62, %v2471_v2  ;;  %v2473_v5 = vpop.f32.mrb[2].mxu0 }
 0x21e   : > { %v2478_v6 = vmax.f32 %v2933_v1, 0.0  ;;  %v2937_v7 = vadd.f32 %v2936_v0, %v2473_v5  ;;  %v2475_v8 = vpop.f32.mrb[3].mxu0 }
 0x21f   : > { %v2479_v9 = vmax.f32 %v2935_v4, 0.0  ;;  %v2939_v10 = vadd.f32 %v2938_v3, %v2475_v8 }
 0x220   : > { %v2480_v11 = vmax.f32 %v2937_v7, 0.0 }
 0x221   : > { %v2930_v12 = vpack.c.bf16 %v2479_v9, %v2478_v6  ;;  %v2481_v13 = vmax.f32 %v2939_v10, 0.0 }
 0x223   : > { %2494 = vst [vmem:[%s240_s24] sm:$0xff] %v2930_v12  ;;  %v2931_v14 = vpack.c.bf16 %v2481_v13, %v2480_v11 }
 0x225   : > { %2495 = vst [vmem:[%s240_s24 + $0x8] sm:$0xff] %v2931_v14 }
 0x226 PF: > { %s13_s14 = sadd.s32 1, %s3474_s14   ;;  %s4427_s12 = smov %s3470_s13 }
 0x227   : > { %p10_p5 = scmp.ge.s32.totalorder %s13_s14, 4   ;;  %s4428_s13 = smov %s4430_s15 }
 0x229   :  { %12 = sbr.rel (!%p10_p5) target bundleno = 2 (0x2), region = 68 }

// kernel: forward.24
= control target key start
LH: loop header
LB: loop body
LE: loop exit
PB: predicated region body
PF: predicated region fallthrough
CT: control target
= control target key end

     0   :  { %s3597_s15 = smov 0   ;;  %s3599_s16 = smov 0   ;;  %s4527_s0 = inlined_call_operand.vmem [shape: bf16[32,2304], index: 0, kind: input, shape index: {}]   ;;  %s4528_s1 = inlined_call_operand.vmem [shape: bf16[2304,256], index: 1, kind: input, shape index: {}]   ;;  %s4529_s2 = inlined_call_operand.vmem [shape: f32[1,256], index: 2, kind: input, shape index: {}]   ;;  %s4530_s3 = inlined_call_operand.vmem [shape: bf16[32,256], index: 3, kind: input, shape index: {}]   ;;  %s4531_s4 = inlined_call_operand.vmem [shape: bf16[32,256], index: 4, kind: output, shape index: {}]  }
   0x1   :  { %s3601_s17 = smov 0  }
   0x2 LB: > { %s26_s18 = sadd.s32 1, %s3566_s16  ;;  %p2705_p0 = scmp.ge.s32.totalorder %s3570_s17, 1  ;;  %s3570_s17 = sphi %s3601_s17, %s14_s17   ;;  %s3566_s16 = sphi %s3599_s16, %s4533_s16   ;;  %s3562_s15 = sphi %s3597_s15, %s4532_s15  }
   0x3   : > { %p28_p1 = scmp.ge.s32.totalorder %s26_s18, 2  ;;  %p218_p2 = scmp.lt.s32.totalorder %s3570_s17, 3 }
   0x5   : > { %s4535_s18 = smov (%p28_p1, %s26_s18), 0  ;;  %p219_p3 = pnand %p2705_p0, %p218_p2 }
   0x6   : > { %v3089_v0 = vld [vmem:[%s4528_s1 + $0x4] ss:$8 sps:$4 sm:$0xff] (!%p219_p3)   ;;  %v3093_v2 = vld [vmem:[%s4528_s1] ss:$8 sps:$4 sm:$0xff] (!%p219_p3)   ;;  %v3095_v4 = vld [vmem:[%s4528_s1 + $0x14] ss:$8 sps:$4 sm:$0xff] (!%p219_p3)  }
   0x7   : > { %222 = sbr.rel (%p219_p3) target bundleno = 550 (0x226), region = 36  ;;  %v3091_v1 = vld [vmem:[%s4528_s1 + $0x404] ss:$8 sps:$4 sm:$0xff] (!%p219_p3)   ;;  %2159 = vmatprep.subr.bf16.mxu1 (!%p219_p3), %v3089_v0  ;;  %v3094_v3 = vld [vmem:[%s4528_s1 + $0x400] ss:$8 sps:$4 sm:$0xff] (!%p219_p3)   ;;  %s2706_s9 = sshll.u32 (!%p219_p3), %s3562_s15, 1 }
   0x8   : > { %2331 = vmatprep.subr.bf16.mxu0 (!%p219_p3), %v3091_v1  ;;  %2160 = vmatpush1.bf16.msra.mxu1 (!%p219_p3), %v3093_v2  ;;  %v3097_v5 = vld [vmem:[%s4528_s1 + $0x414] ss:$8 sps:$4 sm:$0xff] (!%p219_p3)   ;;  %v3099_v6 = vld [vmem:[%s4528_s1 + $0x10] ss:$8 sps:$4 sm:$0xff] (!%p219_p3)   ;;  %v3101_v8 = vld [vmem:[%s4528_s1 + $0x24] ss:$8 sps:$4 sm:$0xff] (!%p219_p3)  }
   0x9   : > { %2332 = vmatpush1.bf16.msra.mxu0 (!%p219_p3), %v3094_v3  ;;  %2161 = vmatprep.subr.bf16.mxu1 (!%p219_p3), %v3095_v4  ;;  %v3100_v7 = vld [vmem:[%s4528_s1 + $0x410] ss:$8 sps:$4 sm:$0xff] (!%p219_p3)   ;;  %v3103_v9 = vld [vmem:[%s4528_s1 + $0x424] ss:$8 sps:$4 sm:$0xff] (!%p219_p3)   ;;  %v3105_v10 = vld [vmem:[%s4528_s1 + $0x20] ss:$8 sps:$4 sm:$0xff] (!%p219_p3)  }
   0xa   : > { %2333 = vmatprep.subr.bf16.mxu0 (!%p219_p3), %v3097_v5  ;;  %v3106_v11 = vld [vmem:[%s4528_s1 + $0x420] ss:$8 sps:$4 sm:$0xff] (!%p219_p3)   ;;  %v3107_v12 = vld [vmem:[%s4528_s1 + $0x34] ss:$8 sps:$4 sm:$0xff] (!%p219_p3)   ;;  %v3111_v14 = vld [vmem:[%s4528_s1 + $0x30] ss:$8 sps:$4 sm:$0xff] (!%p219_p3)  }
   0xb   : > { %v3109_v13 = vld [vmem:[%s4528_s1 + $0x434] ss:$8 sps:$4 sm:$0xff] (!%p219_p3)   ;;  %v3112_v15 = vld [vmem:[%s4528_s1 + $0x430] ss:$8 sps:$4 sm:$0xff] (!%p219_p3)   ;;  %v3113_v16 = vld [vmem:[%s4528_s1 + $0x44] ss:$8 sps:$4 sm:$0xff] (!%p219_p3)  }
   0xc   : > { %2162 = vmatpush1.bf16.msra.mxu1 (!%p219_p3), %v3099_v6  ;;  %v3115_v17 = vld [vmem:[%s4528_s1 + $0x444] ss:$8 sps:$4 sm:$0xff] (!%p219_p3)   ;;  %v3117_v18 = vld [vmem:[%s4528_s1 + $0x40] ss:$8 sps:$4 sm:$0xff] (!%p219_p3)   ;;  %v3119_v20 = vld [vmem:[%s4528_s1 + $0x54] ss:$8 sps:$4 sm:$0xff] (!%p219_p3)  }
   0xd   : > { %2334 = vmatpush1.bf16.msra.mxu0 (!%p219_p3), %v3100_v7  ;;  %2163 = vmatprep.subr.bf16.mxu1 (!%p219_p3), %v3101_v8  ;;  %v3118_v19 = vld [vmem:[%s4528_s1 + $0x440] ss:$8 sps:$4 sm:$0xff] (!%p219_p3)   ;;  %v3121_v21 = vld [vmem:[%s4528_s1 + $0x454] ss:$8 sps:$4 sm:$0xff] (!%p219_p3)   ;;  %v3123_v22 = vld [vmem:[%s4528_s1 + $0x50] ss:$8 sps:$4 sm:$0xff] (!%p219_p3)  }
   0xe   : > { %2335 = vmatprep.subr.bf16.mxu0 %v3103_v9  ;;  %v3124_v23 = vld [vmem:[%s4528_s1 + $0x450] ss:$8 sps:$4 sm:$0xff]   ;;  %v3125_v24 = vld [vmem:[%s4528_s1 + $0x64] ss:$8 sps:$4 sm:$0xff]   ;;  %v3129_v26 = vld [vmem:[%s4528_s1 + $0x60] ss:$8 sps:$4 sm:$0xff]  }
   0xf   : > { %v3127_v25 = vld [vmem:[%s4528_s1 + $0x464] ss:$8 sps:$4 sm:$0xff]   ;;  %v3130_v27 = vld [vmem:[%s4528_s1 + $0x460] ss:$8 sps:$4 sm:$0xff]   ;;  %v3131_v28 = vld [vmem:[%s4528_s1 + $0x74] ss:$8 sps:$4 sm:$0xff]  }
  0x10   : > { %2164 = vmatpush1.bf16.msra.mxu1 %v3105_v10  ;;  %v3133_v29 = vld [vmem:[%s4528_s1 + $0x474] ss:$8 sps:$4 sm:$0xff]   ;;  %v3135_v30 = vld [vmem:[%s4528_s1 + $0x70] ss:$8 sps:$4 sm:$0xff]   ;;  %v3137_v32 = vld [vmem:[%s4528_s1 + $0x84] ss:$8 sps:$4 sm:$0xff]  }
  0x11   : > { %2336 = vmatpush1.bf16.msra.mxu0 %v3106_v11  ;;  %2165 = vmatprep.subr.bf16.mxu1 %v3107_v12  ;;  %v3136_v31 = vld [vmem:[%s4528_s1 + $0x470] ss:$8 sps:$4 sm:$0xff]   ;;  %p270_p4 = scmp.lt.s32.totalorder %s2706_s9, 3  ;;  %v3139_v33 = vld [vmem:[%s4528_s1 + $0x484] ss:$8 sps:$4 sm:$0xff]  }
  0x12   : > { %2337 = vmatprep.subr.bf16.mxu0 %v3109_v13  ;;  %v3141_v34 = vld [vmem:[%s4528_s1 + $0x80] ss:$8 sps:$4 sm:$0xff]   ;;  %v3143_v36 = vld [vmem:[%s4528_s1 + $0x94] ss:$8 sps:$4 sm:$0xff]   ;;  %v3147_v38 = vld [vmem:[%s4528_s1 + $0x90] ss:$8 sps:$4 sm:$0xff]  }
  0x13   : > { %v3142_v35 = vld [vmem:[%s4528_s1 + $0x480] ss:$8 sps:$4 sm:$0xff]   ;;  %s4537_s9 = smov (!%p270_p4, %s2706_s9), 3  ;;  %v3145_v37 = vld [vmem:[%s4528_s1 + $0x494] ss:$8 sps:$4 sm:$0xff]  }
  0x14   : > { %2166 = vmatpush1.bf16.msra.mxu1 %v3111_v14  ;;  %v3148_v39 = vld [vmem:[%s4528_s1 + $0x490] ss:$8 sps:$4 sm:$0xff]   ;;  %v3149_v40 = vld [vmem:[%s4528_s1 + $0xa4] ss:$8 sps:$4 sm:$0xff]   ;;  %s3064_s10 = smul.u32 72, %s4537_s9  ;;  %s3024_s28 = sshll.u32 %s4537_s9, 3 }
  0x15   : > { %2338 = vmatpush1.bf16.msra.mxu0 %v3112_v15  ;;  %2167 = vmatprep.subr.bf16.mxu1 %v3113_v16  ;;  %v3151_v41 = vld [vmem:[%s4528_s1 + $0x4a4] ss:$8 sps:$4 sm:$0xff]   ;;  %v3153_v42 = vld [vmem:[%s4528_s1 + $0xa0] ss:$8 sps:$4 sm:$0xff]   ;;  %v3155_v44 = vld [vmem:[%s4528_s1 + $0xb4] ss:$8 sps:$4 sm:$0xff]   ;;  %s296_s7 = scalar_lea.vmem %s4530_s3, %s3024_s28  ;;  %s308_s8 = scalar_lea.vmem %s4531_s4, %s3024_s28 }
  0x16   : > { %2339 = vmatprep.subr.bf16.mxu0 %v3115_v17  ;;  %v3154_v43 = vld [vmem:[%s4528_s1 + $0x4a0] ss:$8 sps:$4 sm:$0xff]   ;;  %s3759_s24 = scalar_lea.vmem %s4527_s0, %s3064_s10  ;;  %v3157_v45 = vld [vmem:[%s4528_s1 + $0x4b4] ss:$8 sps:$4 sm:$0xff]   ;;  %v3159_v46 = vld [vmem:[%s4528_s1 + $0xb0] ss:$8 sps:$4 sm:$0xff]  }
  0x17   : > { %v3160_v47 = vld [vmem:[%s4528_s1 + $0x4b0] ss:$8 sps:$4 sm:$0xff]   ;;  %v3187_v48 = vld [vmem:[%s3759_s24 + $0x4] ss:$72 sps:$4 sm:$0xff]   ;;  %v3165_v52 = vld [vmem:[%s4528_s1 + $0xc0] ss:$8 sps:$4 sm:$0xff]  }
  0x18   : > { %2168 = vmatpush1.bf16.msra.mxu1 %v3117_v18  ;;  %v3161_v49 = vld [vmem:[%s4528_s1 + $0xc4] ss:$8 sps:$4 sm:$0xff]   ;;  %2191 = vmatprep.mubr.bf16.mxu1 %v3187_v48  ;;  %v3166_v53 = vld [vmem:[%s4528_s1 + $0x4c0] ss:$8 sps:$4 sm:$0xff]   ;;  %v3167_v54 = vld [vmem:[%s4528_s1 + $0xd4] ss:$8 sps:$4 sm:$0xff]  }
  0x19   : > { %2340 = vmatpush1.bf16.msra.mxu0 %v3118_v19  ;;  %2169 = vmatprep.subr.bf16.mxu1 %v3119_v20  ;;  %v3163_v50 = vld [vmem:[%s4528_s1 + $0x4c4] ss:$8 sps:$4 sm:$0xff]   ;;  %v3169_v55 = vld [vmem:[%s4528_s1 + $0x4d4] ss:$8 sps:$4 sm:$0xff]   ;;  %v3171_v56 = vld [vmem:[%s4528_s1 + $0xd0] ss:$8 sps:$4 sm:$0xff]  }
  0x1a   : > { %2341 = vmatprep.subr.bf16.mxu0 %v3121_v21  ;;  %v3193_v51 = vld [vmem:[%s3759_s24 + $0x24] ss:$72 sps:$4 sm:$0xff]   ;;  %v3172_v57 = vld [vmem:[%s4528_s1 + $0x4d0] ss:$8 sps:$4 sm:$0xff]   ;;  %v3177_v60 = vld [vmem:[%s4528_s1 + $0xe0] ss:$8 sps:$4 sm:$0xff]  }
  0x1b   : > { %2363 = vmatprep.mubr.bf16.mxu0 %v3193_v51  ;;  %v3173_v58 = vld [vmem:[%s4528_s1 + $0xe4] ss:$8 sps:$4 sm:$0xff]   ;;  %v3178_v61 = vld [vmem:[%s4528_s1 + $0x4e0] ss:$8 sps:$4 sm:$0xff]   ;;  %v3179_v62 = vld [vmem:[%s4528_s1 + $0xf4] ss:$8 sps:$4 sm:$0xff]  }
  0x1c   : > { %2170 = vmatpush1.bf16.msra.mxu1 %v3123_v22  ;;  %v3175_v59 = vld [vmem:[%s4528_s1 + $0x4e4] ss:$8 sps:$4 sm:$0xff]   ;;  %v3181_v63 = vld [vmem:[%s4528_s1 + $0x4f4] ss:$8 sps:$4 sm:$0xff]   ;;  %v3183_v0 = vld [vmem:[%s4528_s1 + $0xf0] ss:$8 sps:$4 sm:$0xff]  }
  0x1d   : > { %2342 = vmatpush1.bf16.msra.mxu0 %v3124_v23  ;;  %2171 = vmatprep.subr.bf16.mxu1 %v3125_v24  ;;  %v3184_v1 = vld [vmem:[%s4528_s1 + $0x4f0] ss:$8 sps:$4 sm:$0xff]   ;;  %v3190_v2 = vld [vmem:[%s4528_s1 + $0x104] ss:$8 sps:$4 sm:$0xff]   ;;  %v3185_v4 = vld [vmem:[%s3759_s24] ss:$72 sps:$4 sm:$0xff]  }
  0x1e   : > { %2343 = vmatprep.subr.bf16.mxu0 %v3127_v25  ;;  %v3196_v3 = vld [vmem:[%s4528_s1 + $0x504] ss:$8 sps:$4 sm:$0xff]   ;;  %v3188_v5 = vld [vmem:[%s4528_s1 + $0x100] ss:$8 sps:$4 sm:$0xff]   ;;  %v3199_v8 = vld [vmem:[%s4528_s1 + $0x114] ss:$8 sps:$4 sm:$0xff]  }
  0x1f   : > { %v3191_v6 = vld [vmem:[%s3759_s24 + $0x20] ss:$72 sps:$4 sm:$0xff]   ;;  %v3202_v9 = vld [vmem:[%s4528_s1 + $0x514] ss:$8 sps:$4 sm:$0xff]   ;;  %v3197_v10 = vld [vmem:[%s4528_s1 + $0x110] ss:$8 sps:$4 sm:$0xff]  }
  0x20   : > { %2172 = vmatpush1.bf16.msra.mxu1 %v3129_v26  ;;  %v3194_v7 = vld [vmem:[%s4528_s1 + $0x500] ss:$8 sps:$4 sm:$0xff]   ;;  %v3200_v11 = vld [vmem:[%s4528_s1 + $0x510] ss:$8 sps:$4 sm:$0xff]   ;;  %v3205_v12 = vld [vmem:[%s4528_s1 + $0x124] ss:$8 sps:$4 sm:$0xff]  }
  0x21   : > { %2344 = vmatpush1.bf16.msra.mxu0 %v3130_v27  ;;  %2173 = vmatprep.subr.bf16.mxu1 %v3131_v28  ;;  %v3208_v13 = vld [vmem:[%s4528_s1 + $0x524] ss:$8 sps:$4 sm:$0xff]   ;;  %v3203_v14 = vld [vmem:[%s4528_s1 + $0x120] ss:$8 sps:$4 sm:$0xff]   ;;  %v3211_v16 = vld [vmem:[%s4528_s1 + $0x134] ss:$8 sps:$4 sm:$0xff]  }
  0x22   : > { %2345 = vmatprep.subr.bf16.mxu0 %v3133_v29  ;;  %v3206_v15 = vld [vmem:[%s4528_s1 + $0x520] ss:$8 sps:$4 sm:$0xff]   ;;  %v3214_v17 = vld [vmem:[%s4528_s1 + $0x534] ss:$8 sps:$4 sm:$0xff]   ;;  %v3209_v18 = vld [vmem:[%s4528_s1 + $0x130] ss:$8 sps:$4 sm:$0xff]  }
  0x23   : > { %v3212_v19 = vld [vmem:[%s4528_s1 + $0x530] ss:$8 sps:$4 sm:$0xff]   ;;  %v3217_v20 = vld [vmem:[%s4528_s1 + $0x144] ss:$8 sps:$4 sm:$0xff]   ;;  %v3215_v22 = vld [vmem:[%s4528_s1 + $0x140] ss:$8 sps:$4 sm:$0xff]  }
  0x24   : > { %2174 = vmatpush1.bf16.msra.mxu1 %v3135_v30  ;;  %v3220_v21 = vld [vmem:[%s4528_s1 + $0x544] ss:$8 sps:$4 sm:$0xff]   ;;  %v3218_v23 = vld [vmem:[%s4528_s1 + $0x540] ss:$8 sps:$4 sm:$0xff]   ;;  %v3223_v24 = vld [vmem:[%s4528_s1 + $0x154] ss:$8 sps:$4 sm:$0xff]  }
  0x25   : > { %2346 = vmatpush1.bf16.msra.mxu0 %v3136_v31  ;;  %2175 = vmatprep.subr.bf16.mxu1 %v3137_v32  ;;  %v3226_v25 = vld [vmem:[%s4528_s1 + $0x554] ss:$8 sps:$4 sm:$0xff]   ;;  %v3221_v26 = vld [vmem:[%s4528_s1 + $0x150] ss:$8 sps:$4 sm:$0xff]   ;;  %v3229_v28 = vld [vmem:[%s4528_s1 + $0x164] ss:$8 sps:$4 sm:$0xff]  }
  0x26   : > { %2347 = vmatprep.subr.bf16.mxu0 %v3139_v33  ;;  %v3224_v27 = vld [vmem:[%s4528_s1 + $0x550] ss:$8 sps:$4 sm:$0xff]   ;;  %v3232_v29 = vld [vmem:[%s4528_s1 + $0x564] ss:$8 sps:$4 sm:$0xff]   ;;  %v3227_v30 = vld [vmem:[%s4528_s1 + $0x160] ss:$8 sps:$4 sm:$0xff]  }
  0x27   : > { %v3230_v31 = vld [vmem:[%s4528_s1 + $0x560] ss:$8 sps:$4 sm:$0xff]   ;;  %v3235_v32 = vld [vmem:[%s4528_s1 + $0x174] ss:$8 sps:$4 sm:$0xff]  }
  0x28   : > { %2176 = vmatpush1.bf16.msra.mxu1 %v3141_v34  ;;  %v3238_v33 = vld [vmem:[%s4528_s1 + $0x574] ss:$8 sps:$4 sm:$0xff]   ;;  %v3251_v48 = vld [vmem:[%s4528_s1 + $0x1a0] ss:$8 sps:$4 sm:$0xff]  }
  0x29   : > { %2348 = vmatpush1.bf16.msra.mxu0 %v3142_v35  ;;  %2177 = vmatprep.subr.bf16.mxu1 %v3143_v36  ;;  %v3289_v34 = vld [vmem:[%s3759_s24 + $0xc] ss:$72 sps:$4 sm:$0xff]   ;;  %v3233_v35 = vld [vmem:[%s4528_s1 + $0x170] ss:$8 sps:$4 sm:$0xff]  }
  0x2a   : > { %2349 = vmatprep.subr.bf16.mxu0 %v3145_v37  ;;  %v3236_v36 = vld [vmem:[%s4528_s1 + $0x570] ss:$8 sps:$4 sm:$0xff]   ;;  %v3295_v37 = vld [vmem:[%s3759_s24 + $0x2c] ss:$72 sps:$4 sm:$0xff]  }
  0x2b   : > { %v3262_v51 = vld [vmem:[%s4528_s1 + $0x5b4] ss:$8 sps:$4 sm:$0xff]  }
  0x2c   : > { %2178 = vmatpush1.bf16.msra.mxu1 %v3147_v38  ;;  %v3241_v38 = vld [vmem:[%s4528_s1 + $0x184] ss:$8 sps:$4 sm:$0xff]  }
  0x2d   : > { %2350 = vmatpush1.bf16.msra.mxu0 %v3148_v39  ;;  %2179 = vmatprep.subr.bf16.mxu1 %v3149_v40  ;;  %v3244_v39 = vld [vmem:[%s4528_s1 + $0x584] ss:$8 sps:$4 sm:$0xff]   ;;  %v3239_v40 = vld [vmem:[%s4528_s1 + $0x180] ss:$8 sps:$4 sm:$0xff]  }
  0x2e   : > { %2351 = vmatprep.subr.bf16.mxu0 %v3151_v41  ;;  %v3242_v41 = vld [vmem:[%s4528_s1 + $0x580] ss:$8 sps:$4 sm:$0xff]  }
  0x30   : > { %2180 = vmatpush1.bf16.msra.mxu1 %v3153_v42  ;;  %v3247_v42 = vld [vmem:[%s4528_s1 + $0x194] ss:$8 sps:$4 sm:$0xff]  }
  0x31   : > { %2352 = vmatpush1.bf16.msra.mxu0 %v3154_v43  ;;  %2181 = vmatprep.subr.bf16.mxu1 %v3155_v44  ;;  %v3250_v43 = vld [vmem:[%s4528_s1 + $0x594] ss:$8 sps:$4 sm:$0xff]   ;;  %v3245_v44 = vld [vmem:[%s4528_s1 + $0x190] ss:$8 sps:$4 sm:$0xff]  }
  0x32   : > { %2353 = vmatprep.subr.bf16.mxu0 %v3157_v45  ;;  %v3248_v45 = vld [vmem:[%s4528_s1 + $0x590] ss:$8 sps:$4 sm:$0xff]  }
  0x34   : > { %2182 = vmatpush1.bf16.msra.mxu1 %v3159_v46  ;;  %v3253_v46 = vld [vmem:[%s4528_s1 + $0x1a4] ss:$8 sps:$4 sm:$0xff]  }
  0x35   : > { %2354 = vmatpush1.bf16.msra.mxu0 %v3160_v47  ;;  %2183 = vmatprep.subr.bf16.mxu1 %v3161_v49  ;;  %v3256_v47 = vld [vmem:[%s4528_s1 + $0x5a4] ss:$8 sps:$4 sm:$0xff]   ;;  %v3254_v49 = vld [vmem:[%s4528_s1 + $0x5a0] ss:$8 sps:$4 sm:$0xff]  }
  0x36   : > { %2355 = vmatprep.subr.bf16.mxu0 %v3163_v50  ;;  %v3259_v50 = vld [vmem:[%s4528_s1 + $0x1b4] ss:$8 sps:$4 sm:$0xff]  }
  0x38   : > { %2184 = vmatpush1.bf16.msra.mxu1 %v3165_v52  ;;  %v3257_v52 = vld [vmem:[%s4528_s1 + $0x1b0] ss:$8 sps:$4 sm:$0xff]  }
  0x39   : > { %2356 = vmatpush1.bf16.msra.mxu0 %v3166_v53  ;;  %2185 = vmatprep.subr.bf16.mxu1 %v3167_v54  ;;  %v3260_v53 = vld [vmem:[%s4528_s1 + $0x5b0] ss:$8 sps:$4 sm:$0xff]   ;;  %v3265_v54 = vld [vmem:[%s4528_s1 + $0x1c4] ss:$8 sps:$4 sm:$0xff]  }
  0x3a   : > { %2357 = vmatprep.subr.bf16.mxu0 %v3169_v55  ;;  %v3268_v55 = vld [vmem:[%s4528_s1 + $0x5c4] ss:$8 sps:$4 sm:$0xff]  }
  0x3c   : > { %2186 = vmatpush1.bf16.msra.mxu1 %v3171_v56  ;;  %v3263_v56 = vld [vmem:[%s4528_s1 + $0x1c0] ss:$8 sps:$4 sm:$0xff]  }
  0x3d   : > { %2358 = vmatpush1.bf16.msra.mxu0 %v3172_v57  ;;  %2187 = vmatprep.subr.bf16.mxu1 %v3173_v58  ;;  %v3266_v57 = vld [vmem:[%s4528_s1 + $0x5c0] ss:$8 sps:$4 sm:$0xff]   ;;  %v3271_v58 = vld [vmem:[%s4528_s1 + $0x1d4] ss:$8 sps:$4 sm:$0xff]  }
  0x3e   : > { %2359 = vmatprep.subr.bf16.mxu0 %v3175_v59  ;;  %v3274_v59 = vld [vmem:[%s4528_s1 + $0x5d4] ss:$8 sps:$4 sm:$0xff]  }
  0x40   : > { %2188 = vmatpush1.bf16.msra.mxu1 %v3177_v60  ;;  %v3269_v60 = vld [vmem:[%s4528_s1 + $0x1d0] ss:$8 sps:$4 sm:$0xff]  }
  0x41   : > { %2360 = vmatpush1.bf16.msra.mxu0 %v3178_v61  ;;  %2189 = vmatprep.subr.bf16.mxu1 %v3179_v62  ;;  %v3272_v61 = vld [vmem:[%s4528_s1 + $0x5d0] ss:$8 sps:$4 sm:$0xff]   ;;  %v3277_v62 = vld [vmem:[%s4528_s1 + $0x1e4] ss:$8 sps:$4 sm:$0xff]  }
  0x42   : > { %2361 = vmatprep.subr.bf16.mxu0 %v3181_v63  ;;  %v3280_v63 = vld [vmem:[%s4528_s1 + $0x5e4] ss:$8 sps:$4 sm:$0xff]  }
  0x44   : > { %2190 = vmatpush1.bf16.msra.mxu1 %v3183_v0  ;;  %v3275_v0 = vld [vmem:[%s4528_s1 + $0x1e0] ss:$8 sps:$4 sm:$0xff]  }
  0x45   : > { %2362 = vmatpush1.bf16.msra.mxu0 %v3184_v1  ;;  %2202 = vmatprep.subr.bf16.mxu1 %v3190_v2  ;;  %v3278_v1 = vld [vmem:[%s4528_s1 + $0x5e0] ss:$8 sps:$4 sm:$0xff]   ;;  %v3283_v2 = vld [vmem:[%s4528_s1 + $0x1f4] ss:$8 sps:$4 sm:$0xff]  }
  0x46   : > { %2374 = vmatprep.subr.bf16.mxu0 %v3196_v3  ;;  %v3286_v3 = vld [vmem:[%s4528_s1 + $0x5f4] ss:$8 sps:$4 sm:$0xff]  }
  0x47   : > { %2192 = vmatmul.mubr.bf16.vlgmr.msra.gmra.mrb[0].mxu1 %v3185_v4  ;;  %v3281_v4 = vld [vmem:[%s4528_s1 + $0x1f0] ss:$8 sps:$4 sm:$0xff]  }
  0x48   : > { %2364 = vmatmul.mubr.bf16.vlgmr.msra.gmra.mrb[0].mxu0 %v3191_v6  ;;  %2203 = vmatpush1.bf16.msra.mxu1 %v3188_v5  ;;  %v3284_v5 = vld [vmem:[%s4528_s1 + $0x5f0] ss:$8 sps:$4 sm:$0xff]   ;;  %v3292_v6 = vld [vmem:[%s4528_s1 + $0x204] ss:$8 sps:$4 sm:$0xff]  }
  0x49   : > { %2375 = vmatpush1.bf16.msra.mxu0 %v3194_v7  ;;  %2204 = vmatprep.subr.bf16.mxu1 %v3199_v8  ;;  %v3298_v7 = vld [vmem:[%s4528_s1 + $0x604] ss:$8 sps:$4 sm:$0xff]   ;;  %v3287_v8 = vld [vmem:[%s3759_s24 + $0x8] ss:$72 sps:$4 sm:$0xff]  }
  0x4a   : > { %2376 = vmatprep.subr.bf16.mxu0 %v3202_v9  ;;  %2234 = vmatprep.mubr.bf16.mxu1 %v3289_v34  ;;  %v3290_v9 = vld [vmem:[%s4528_s1 + $0x200] ss:$8 sps:$4 sm:$0xff]   ;;  %v3331_v34 = vld [vmem:[%s4528_s1 + $0x264] ss:$8 sps:$4 sm:$0xff]  }
  0x4b   : > { %2406 = vmatprep.mubr.bf16.mxu0 %v3295_v37  ;;  %v3332_v37 = vld [vmem:[%s4528_s1 + $0x660] ss:$8 sps:$4 sm:$0xff]  }
  0x4c   : > { %2205 = vmatpush1.bf16.msra.mxu1 %v3197_v10  ;;  %v3293_v10 = vld [vmem:[%s3759_s24 + $0x28] ss:$72 sps:$4 sm:$0xff]  }
  0x4d   : > { %2377 = vmatpush1.bf16.msra.mxu0 %v3200_v11  ;;  %2206 = vmatprep.subr.bf16.mxu1 %v3205_v12  ;;  %v3296_v11 = vld [vmem:[%s4528_s1 + $0x600] ss:$8 sps:$4 sm:$0xff]   ;;  %v3301_v12 = vld [vmem:[%s4528_s1 + $0x214] ss:$8 sps:$4 sm:$0xff]  }
  0x4e   : > { %2378 = vmatprep.subr.bf16.mxu0 %v3208_v13  ;;  %v3304_v13 = vld [vmem:[%s4528_s1 + $0x614] ss:$8 sps:$4 sm:$0xff]  }
  0x50   : > { %2207 = vmatpush1.bf16.msra.mxu1 %v3203_v14  ;;  %v3299_v14 = vld [vmem:[%s4528_s1 + $0x210] ss:$8 sps:$4 sm:$0xff]  }
  0x51   : > { %2379 = vmatpush1.bf16.msra.mxu0 %v3206_v15  ;;  %2208 = vmatprep.subr.bf16.mxu1 %v3211_v16  ;;  %v3302_v15 = vld [vmem:[%s4528_s1 + $0x610] ss:$8 sps:$4 sm:$0xff]   ;;  %v3307_v16 = vld [vmem:[%s4528_s1 + $0x224] ss:$8 sps:$4 sm:$0xff]  }
  0x52   : > { %2380 = vmatprep.subr.bf16.mxu0 %v3214_v17  ;;  %v3310_v17 = vld [vmem:[%s4528_s1 + $0x624] ss:$8 sps:$4 sm:$0xff]  }
  0x54   : > { %2209 = vmatpush1.bf16.msra.mxu1 %v3209_v18  ;;  %v3305_v18 = vld [vmem:[%s4528_s1 + $0x220] ss:$8 sps:$4 sm:$0xff]  }
  0x55   : > { %2381 = vmatpush1.bf16.msra.mxu0 %v3212_v19  ;;  %2210 = vmatprep.subr.bf16.mxu1 %v3217_v20  ;;  %v3391_v19 = vld [vmem:[%s3759_s24 + $0x14] ss:$72 sps:$4 sm:$0xff]   ;;  %v3308_v20 = vld [vmem:[%s4528_s1 + $0x620] ss:$8 sps:$4 sm:$0xff]  }
  0x56   : > { %2382 = vmatprep.subr.bf16.mxu0 %v3220_v21  ;;  %v3313_v21 = vld [vmem:[%s4528_s1 + $0x234] ss:$8 sps:$4 sm:$0xff]  }
  0x58   : > { %2211 = vmatpush1.bf16.msra.mxu1 %v3215_v22  ;;  %v3316_v22 = vld [vmem:[%s4528_s1 + $0x634] ss:$8 sps:$4 sm:$0xff]  }
  0x59   : > { %2383 = vmatpush1.bf16.msra.mxu0 %v3218_v23  ;;  %2212 = vmatprep.subr.bf16.mxu1 %v3223_v24  ;;  %v3397_v23 = vld [vmem:[%s3759_s24 + $0x34] ss:$72 sps:$4 sm:$0xff]   ;;  %v3311_v24 = vld [vmem:[%s4528_s1 + $0x230] ss:$8 sps:$4 sm:$0xff]  }
  0x5a   : > { %2384 = vmatprep.subr.bf16.mxu0 %v3226_v25  ;;  %v3314_v25 = vld [vmem:[%s4528_s1 + $0x630] ss:$8 sps:$4 sm:$0xff]  }
  0x5c   : > { %2213 = vmatpush1.bf16.msra.mxu1 %v3221_v26  ;;  %v3319_v26 = vld [vmem:[%s4528_s1 + $0x244] ss:$8 sps:$4 sm:$0xff]  }
  0x5d   : > { %2385 = vmatpush1.bf16.msra.mxu0 %v3224_v27  ;;  %2214 = vmatprep.subr.bf16.mxu1 %v3229_v28  ;;  %v3322_v27 = vld [vmem:[%s4528_s1 + $0x644] ss:$8 sps:$4 sm:$0xff]   ;;  %v3317_v28 = vld [vmem:[%s4528_s1 + $0x240] ss:$8 sps:$4 sm:$0xff]  }
  0x5e   : > { %2386 = vmatprep.subr.bf16.mxu0 %v3232_v29  ;;  %v3320_v29 = vld [vmem:[%s4528_s1 + $0x640] ss:$8 sps:$4 sm:$0xff]  }
  0x60   : > { %2215 = vmatpush1.bf16.msra.mxu1 %v3227_v30  ;;  %v3325_v30 = vld [vmem:[%s4528_s1 + $0x254] ss:$8 sps:$4 sm:$0xff]  }
  0x61   : > { %2387 = vmatpush1.bf16.msra.mxu0 %v3230_v31  ;;  %2216 = vmatprep.subr.bf16.mxu1 %v3235_v32  ;;  %v3328_v31 = vld [vmem:[%s4528_s1 + $0x654] ss:$8 sps:$4 sm:$0xff]   ;;  %v3323_v32 = vld [vmem:[%s4528_s1 + $0x250] ss:$8 sps:$4 sm:$0xff]  }
  0x62   : > { %2388 = vmatprep.subr.bf16.mxu0 %v3238_v33  ;;  %v3326_v33 = vld [vmem:[%s4528_s1 + $0x650] ss:$8 sps:$4 sm:$0xff]  }
  0x64   : > { %2217 = vmatpush1.bf16.msra.mxu1 %v3233_v35  ;;  %v3334_v35 = vld [vmem:[%s4528_s1 + $0x664] ss:$8 sps:$4 sm:$0xff]  }
  0x65   : > { %2389 = vmatpush1.bf16.msra.mxu0 %v3236_v36  ;;  %2218 = vmatprep.subr.bf16.mxu1 %v3241_v38  ;;  %v3329_v36 = vld [vmem:[%s4528_s1 + $0x260] ss:$8 sps:$4 sm:$0xff]   ;;  %v3337_v38 = vld [vmem:[%s4528_s1 + $0x274] ss:$8 sps:$4 sm:$0xff]  }
  0x66   : > { %2390 = vmatprep.subr.bf16.mxu0 %v3244_v39  ;;  %v3340_v39 = vld [vmem:[%s4528_s1 + $0x674] ss:$8 sps:$4 sm:$0xff]  }
  0x68   : > { %2219 = vmatpush1.bf16.msra.mxu1 %v3239_v40  ;;  %v3335_v40 = vld [vmem:[%s4528_s1 + $0x270] ss:$8 sps:$4 sm:$0xff]  }
  0x69   : > { %2391 = vmatpush1.bf16.msra.mxu0 %v3242_v41  ;;  %2220 = vmatprep.subr.bf16.mxu1 %v3247_v42  ;;  %v3338_v41 = vld [vmem:[%s4528_s1 + $0x670] ss:$8 sps:$4 sm:$0xff]   ;;  %v3343_v42 = vld [vmem:[%s4528_s1 + $0x284] ss:$8 sps:$4 sm:$0xff]  }
  0x6a   : > { %2392 = vmatprep.subr.bf16.mxu0 %v3250_v43  ;;  %v3346_v43 = vld [vmem:[%s4528_s1 + $0x684] ss:$8 sps:$4 sm:$0xff]  }
  0x6c   : > { %2221 = vmatpush1.bf16.msra.mxu1 %v3245_v44  ;;  %v3341_v44 = vld [vmem:[%s4528_s1 + $0x280] ss:$8 sps:$4 sm:$0xff]  }
  0x6d   : > { %2393 = vmatpush1.bf16.msra.mxu0 %v3248_v45  ;;  %2222 = vmatprep.subr.bf16.mxu1 %v3253_v46  ;;  %v3344_v45 = vld [vmem:[%s4528_s1 + $0x680] ss:$8 sps:$4 sm:$0xff]   ;;  %v3349_v46 = vld [vmem:[%s4528_s1 + $0x294] ss:$8 sps:$4 sm:$0xff]  }
  0x6e   : > { %2394 = vmatprep.subr.bf16.mxu0 %v3256_v47  ;;  %v3352_v47 = vld [vmem:[%s4528_s1 + $0x694] ss:$8 sps:$4 sm:$0xff]  }
  0x70   : > { %2223 = vmatpush1.bf16.msra.mxu1 %v3251_v48  ;;  %v3347_v48 = vld [vmem:[%s4528_s1 + $0x290] ss:$8 sps:$4 sm:$0xff]  }
  0x71   : > { %2395 = vmatpush1.bf16.msra.mxu0 %v3254_v49  ;;  %2224 = vmatprep.subr.bf16.mxu1 %v3259_v50  ;;  %v3350_v49 = vld [vmem:[%s4528_s1 + $0x690] ss:$8 sps:$4 sm:$0xff]   ;;  %v3355_v50 = vld [vmem:[%s4528_s1 + $0x2a4] ss:$8 sps:$4 sm:$0xff]  }
  0x72   : > { %2396 = vmatprep.subr.bf16.mxu0 %v3262_v51  ;;  %v3358_v51 = vld [vmem:[%s4528_s1 + $0x6a4] ss:$8 sps:$4 sm:$0xff]  }
  0x74   : > { %2225 = vmatpush1.bf16.msra.mxu1 %v3257_v52  ;;  %v3353_v52 = vld [vmem:[%s4528_s1 + $0x2a0] ss:$8 sps:$4 sm:$0xff]  }
  0x75   : > { %2397 = vmatpush1.bf16.msra.mxu0 %v3260_v53  ;;  %2226 = vmatprep.subr.bf16.mxu1 %v3265_v54  ;;  %v3356_v53 = vld [vmem:[%s4528_s1 + $0x6a0] ss:$8 sps:$4 sm:$0xff]   ;;  %v3361_v54 = vld [vmem:[%s4528_s1 + $0x2b4] ss:$8 sps:$4 sm:$0xff]  }
  0x76   : > { %2398 = vmatprep.subr.bf16.mxu0 %v3268_v55  ;;  %v3364_v55 = vld [vmem:[%s4528_s1 + $0x6b4] ss:$8 sps:$4 sm:$0xff]  }
  0x78   : > { %2227 = vmatpush1.bf16.msra.mxu1 %v3263_v56  ;;  %v3359_v56 = vld [vmem:[%s4528_s1 + $0x2b0] ss:$8 sps:$4 sm:$0xff]  }
  0x79   : > { %2399 = vmatpush1.bf16.msra.mxu0 %v3266_v57  ;;  %2228 = vmatprep.subr.bf16.mxu1 %v3271_v58  ;;  %v3362_v57 = vld [vmem:[%s4528_s1 + $0x6b0] ss:$8 sps:$4 sm:$0xff]   ;;  %v3367_v58 = vld [vmem:[%s4528_s1 + $0x2c4] ss:$8 sps:$4 sm:$0xff]  }
  0x7a   : > { %2400 = vmatprep.subr.bf16.mxu0 %v3274_v59  ;;  %v3370_v59 = vld [vmem:[%s4528_s1 + $0x6c4] ss:$8 sps:$4 sm:$0xff]  }
  0x7c   : > { %2229 = vmatpush1.bf16.msra.mxu1 %v3269_v60  ;;  %v3365_v60 = vld [vmem:[%s4528_s1 + $0x2c0] ss:$8 sps:$4 sm:$0xff]  }
  0x7d   : > { %2401 = vmatpush1.bf16.msra.mxu0 %v3272_v61  ;;  %2230 = vmatprep.subr.bf16.mxu1 %v3277_v62  ;;  %v3368_v61 = vld [vmem:[%s4528_s1 + $0x6c0] ss:$8 sps:$4 sm:$0xff]   ;;  %v3373_v62 = vld [vmem:[%s4528_s1 + $0x2d4] ss:$8 sps:$4 sm:$0xff]  }
  0x7e   : > { %2402 = vmatprep.subr.bf16.mxu0 %v3280_v63  ;;  %v3376_v63 = vld [vmem:[%s4528_s1 + $0x6d4] ss:$8 sps:$4 sm:$0xff]  }
  0x80   : > { %2231 = vmatpush1.bf16.msra.mxu1 %v3275_v0  ;;  %v3371_v0 = vld [vmem:[%s4528_s1 + $0x2d0] ss:$8 sps:$4 sm:$0xff]  }
  0x81   : > { %2403 = vmatpush1.bf16.msra.mxu0 %v3278_v1  ;;  %2232 = vmatprep.subr.bf16.mxu1 %v3283_v2  ;;  %v3374_v1 = vld [vmem:[%s4528_s1 + $0x6d0] ss:$8 sps:$4 sm:$0xff]   ;;  %v3379_v2 = vld [vmem:[%s4528_s1 + $0x2e4] ss:$8 sps:$4 sm:$0xff]  }
  0x82   : > { %2404 = vmatprep.subr.bf16.mxu0 %v3286_v3  ;;  %v3382_v3 = vld [vmem:[%s4528_s1 + $0x6e4] ss:$8 sps:$4 sm:$0xff]  }
  0x84   : > { %2233 = vmatpush1.bf16.msra.mxu1 %v3281_v4  ;;  %v3377_v4 = vld [vmem:[%s4528_s1 + $0x2e0] ss:$8 sps:$4 sm:$0xff]  }
  0x85   : > { %2405 = vmatpush1.bf16.msra.mxu0 %v3284_v5  ;;  %2245 = vmatprep.subr.bf16.mxu1 %v3292_v6  ;;  %v3380_v5 = vld [vmem:[%s4528_s1 + $0x6e0] ss:$8 sps:$4 sm:$0xff]   ;;  %v3385_v6 = vld [vmem:[%s4528_s1 + $0x2f4] ss:$8 sps:$4 sm:$0xff]  }
  0x86   : > { %2417 = vmatprep.subr.bf16.mxu0 %v3298_v7  ;;  %v3388_v7 = vld [vmem:[%s4528_s1 + $0x6f4] ss:$8 sps:$4 sm:$0xff]  }
  0x87   : > { %2235 = vmatmul.mubr.bf16.vlgmr.msra.gmra.mrb[0].mxu1 %v3287_v8  ;;  %v3383_v8 = vld [vmem:[%s4528_s1 + $0x2f0] ss:$8 sps:$4 sm:$0xff]  }
  0x88   : > { %2407 = vmatmul.mubr.bf16.vlgmr.msra.gmra.mrb[0].mxu0 %v3293_v10  ;;  %2246 = vmatpush1.bf16.msra.mxu1 %v3290_v9  ;;  %v3386_v9 = vld [vmem:[%s4528_s1 + $0x6f0] ss:$8 sps:$4 sm:$0xff]   ;;  %v3394_v10 = vld [vmem:[%s4528_s1 + $0x304] ss:$8 sps:$4 sm:$0xff]  }
  0x89   : > { %2418 = vmatpush1.bf16.msra.mxu0 %v3296_v11  ;;  %2247 = vmatprep.subr.bf16.mxu1 %v3301_v12  ;;  %v3400_v11 = vld [vmem:[%s4528_s1 + $0x704] ss:$8 sps:$4 sm:$0xff]   ;;  %v3389_v12 = vld [vmem:[%s3759_s24 + $0x10] ss:$72 sps:$4 sm:$0xff]  }
  0x8a   : > { %2419 = vmatprep.subr.bf16.mxu0 %v3304_v13  ;;  %2277 = vmatprep.mubr.bf16.mxu1 %v3391_v19  ;;  %v3392_v13 = vld [vmem:[%s4528_s1 + $0x300] ss:$8 sps:$4 sm:$0xff]   ;;  %v3496_v19 = vld [vmem:[%s3759_s24 + $0x3c] ss:$72 sps:$4 sm:$0xff]  }
  0x8b   : > { %2449 = vmatprep.mubr.bf16.mxu0 %v3397_v23  ;;  %v3412_v23 = vld [vmem:[%s4528_s1 + $0x724] ss:$8 sps:$4 sm:$0xff]  }
  0x8c   : > { %2248 = vmatpush1.bf16.msra.mxu1 %v3299_v14  ;;  %v3395_v14 = vld [vmem:[%s3759_s24 + $0x30] ss:$72 sps:$4 sm:$0xff]  }
  0x8d   : > { %2420 = vmatpush1.bf16.msra.mxu0 %v3302_v15  ;;  %2249 = vmatprep.subr.bf16.mxu1 %v3307_v16  ;;  %v3398_v15 = vld [vmem:[%s4528_s1 + $0x700] ss:$8 sps:$4 sm:$0xff]   ;;  %v3403_v16 = vld [vmem:[%s4528_s1 + $0x314] ss:$8 sps:$4 sm:$0xff]  }
  0x8e   : > { %2421 = vmatprep.subr.bf16.mxu0 %v3310_v17  ;;  %v3406_v17 = vld [vmem:[%s4528_s1 + $0x714] ss:$8 sps:$4 sm:$0xff]  }
  0x90   : > { %2250 = vmatpush1.bf16.msra.mxu1 %v3305_v18  ;;  %v3493_v18 = vld [vmem:[%s3759_s24 + $0x1c] ss:$72 sps:$4 sm:$0xff]  }
  0x91   : > { %2422 = vmatpush1.bf16.msra.mxu0 %v3308_v20  ;;  %2251 = vmatprep.subr.bf16.mxu1 %v3313_v21  ;;  %v3401_v20 = vld [vmem:[%s4528_s1 + $0x310] ss:$8 sps:$4 sm:$0xff]  }
  0x92   : > { %2423 = vmatprep.subr.bf16.mxu0 %v3316_v22  ;;  %v3404_v21 = vld [vmem:[%s4528_s1 + $0x710] ss:$8 sps:$4 sm:$0xff]   ;;  %v3409_v22 = vld [vmem:[%s4528_s1 + $0x324] ss:$8 sps:$4 sm:$0xff]  }
  0x94   : > { %2252 = vmatpush1.bf16.msra.mxu1 %v3311_v24  ;;  %v3407_v24 = vld [vmem:[%s4528_s1 + $0x320] ss:$8 sps:$4 sm:$0xff]  }
  0x95   : > { %2424 = vmatpush1.bf16.msra.mxu0 %v3314_v25  ;;  %2253 = vmatprep.subr.bf16.mxu1 %v3319_v26  ;;  %v3410_v25 = vld [vmem:[%s4528_s1 + $0x720] ss:$8 sps:$4 sm:$0xff]   ;;  %v3415_v26 = vld [vmem:[%s4528_s1 + $0x334] ss:$8 sps:$4 sm:$0xff]  }
  0x96   : > { %2425 = vmatprep.subr.bf16.mxu0 %v3322_v27  ;;  %v3418_v27 = vld [vmem:[%s4528_s1 + $0x734] ss:$8 sps:$4 sm:$0xff]  }
  0x98   : > { %2254 = vmatpush1.bf16.msra.mxu1 %v3317_v28  ;;  %v3413_v28 = vld [vmem:[%s4528_s1 + $0x330] ss:$8 sps:$4 sm:$0xff]  }
  0x99   : > { %2426 = vmatpush1.bf16.msra.mxu0 %v3320_v29  ;;  %2255 = vmatprep.subr.bf16.mxu1 %v3325_v30  ;;  %v3416_v29 = vld [vmem:[%s4528_s1 + $0x730] ss:$8 sps:$4 sm:$0xff]   ;;  %v3421_v30 = vld [vmem:[%s4528_s1 + $0x344] ss:$8 sps:$4 sm:$0xff]  }
  0x9a   : > { %2427 = vmatprep.subr.bf16.mxu0 %v3328_v31  ;;  %v3424_v31 = vld [vmem:[%s4528_s1 + $0x744] ss:$8 sps:$4 sm:$0xff]  }
  0x9c   : > { %2256 = vmatpush1.bf16.msra.mxu1 %v3323_v32  ;;  %v3419_v32 = vld [vmem:[%s4528_s1 + $0x340] ss:$8 sps:$4 sm:$0xff]  }
  0x9d   : > { %2428 = vmatpush1.bf16.msra.mxu0 %v3326_v33  ;;  %2257 = vmatprep.subr.bf16.mxu1 %v3331_v34  ;;  %v3422_v33 = vld [vmem:[%s4528_s1 + $0x740] ss:$8 sps:$4 sm:$0xff]   ;;  %v3427_v34 = vld [vmem:[%s4528_s1 + $0x354] ss:$8 sps:$4 sm:$0xff]  }
  0x9e   : > { %2429 = vmatprep.subr.bf16.mxu0 %v3334_v35  ;;  %v3430_v35 = vld [vmem:[%s4528_s1 + $0x754] ss:$8 sps:$4 sm:$0xff]  }
  0xa0   : > { %2258 = vmatpush1.bf16.msra.mxu1 %v3329_v36  ;;  %v3425_v36 = vld [vmem:[%s4528_s1 + $0x350] ss:$8 sps:$4 sm:$0xff]  }
  0xa1   : > { %2430 = vmatpush1.bf16.msra.mxu0 %v3332_v37  ;;  %2259 = vmatprep.subr.bf16.mxu1 %v3337_v38  ;;  %v3428_v37 = vld [vmem:[%s4528_s1 + $0x750] ss:$8 sps:$4 sm:$0xff]   ;;  %v3433_v38 = vld [vmem:[%s4528_s1 + $0x364] ss:$8 sps:$4 sm:$0xff]  }
  0xa2   : > { %2431 = vmatprep.subr.bf16.mxu0 %v3340_v39  ;;  %v3436_v39 = vld [vmem:[%s4528_s1 + $0x764] ss:$8 sps:$4 sm:$0xff]  }
  0xa4   : > { %2260 = vmatpush1.bf16.msra.mxu1 %v3335_v40  ;;  %v3431_v40 = vld [vmem:[%s4528_s1 + $0x360] ss:$8 sps:$4 sm:$0xff]  }
  0xa5   : > { %2432 = vmatpush1.bf16.msra.mxu0 %v3338_v41  ;;  %2261 = vmatprep.subr.bf16.mxu1 %v3343_v42  ;;  %v3434_v41 = vld [vmem:[%s4528_s1 + $0x760] ss:$8 sps:$4 sm:$0xff]   ;;  %v3439_v42 = vld [vmem:[%s4528_s1 + $0x374] ss:$8 sps:$4 sm:$0xff]  }
  0xa6   : > { %2433 = vmatprep.subr.bf16.mxu0 %v3346_v43  ;;  %v3442_v43 = vld [vmem:[%s4528_s1 + $0x774] ss:$8 sps:$4 sm:$0xff]  }
  0xa8   : > { %2262 = vmatpush1.bf16.msra.mxu1 %v3341_v44  ;;  %v3437_v44 = vld [vmem:[%s4528_s1 + $0x370] ss:$8 sps:$4 sm:$0xff]  }
  0xa9   : > { %2434 = vmatpush1.bf16.msra.mxu0 %v3344_v45  ;;  %2263 = vmatprep.subr.bf16.mxu1 %v3349_v46  ;;  %v3440_v45 = vld [vmem:[%s4528_s1 + $0x770] ss:$8 sps:$4 sm:$0xff]   ;;  %v3445_v46 = vld [vmem:[%s4528_s1 + $0x384] ss:$8 sps:$4 sm:$0xff]  }
  0xaa   : > { %2435 = vmatprep.subr.bf16.mxu0 %v3352_v47  ;;  %v3448_v47 = vld [vmem:[%s4528_s1 + $0x784] ss:$8 sps:$4 sm:$0xff]  }
  0xac   : > { %2264 = vmatpush1.bf16.msra.mxu1 %v3347_v48  ;;  %v3443_v48 = vld [vmem:[%s4528_s1 + $0x380] ss:$8 sps:$4 sm:$0xff]  }
  0xad   : > { %2436 = vmatpush1.bf16.msra.mxu0 %v3350_v49  ;;  %2265 = vmatprep.subr.bf16.mxu1 %v3355_v50  ;;  %v3446_v49 = vld [vmem:[%s4528_s1 + $0x780] ss:$8 sps:$4 sm:$0xff]   ;;  %v3451_v50 = vld [vmem:[%s4528_s1 + $0x394] ss:$8 sps:$4 sm:$0xff]  }
  0xae   : > { %2437 = vmatprep.subr.bf16.mxu0 %v3358_v51  ;;  %v3454_v51 = vld [vmem:[%s4528_s1 + $0x794] ss:$8 sps:$4 sm:$0xff]  }
  0xb0   : > { %2266 = vmatpush1.bf16.msra.mxu1 %v3353_v52  ;;  %v3449_v52 = vld [vmem:[%s4528_s1 + $0x390] ss:$8 sps:$4 sm:$0xff]  }
  0xb1   : > { %2438 = vmatpush1.bf16.msra.mxu0 %v3356_v53  ;;  %2267 = vmatprep.subr.bf16.mxu1 %v3361_v54  ;;  %v3452_v53 = vld [vmem:[%s4528_s1 + $0x790] ss:$8 sps:$4 sm:$0xff]   ;;  %v3457_v54 = vld [vmem:[%s4528_s1 + $0x3a4] ss:$8 sps:$4 sm:$0xff]  }
  0xb2   : > { %2439 = vmatprep.subr.bf16.mxu0 %v3364_v55  ;;  %v3460_v55 = vld [vmem:[%s4528_s1 + $0x7a4] ss:$8 sps:$4 sm:$0xff]  }
  0xb4   : > { %2268 = vmatpush1.bf16.msra.mxu1 %v3359_v56  ;;  %v3455_v56 = vld [vmem:[%s4528_s1 + $0x3a0] ss:$8 sps:$4 sm:$0xff]  }
  0xb5   : > { %2440 = vmatpush1.bf16.msra.mxu0 %v3362_v57  ;;  %2269 = vmatprep.subr.bf16.mxu1 %v3367_v58  ;;  %v3458_v57 = vld [vmem:[%s4528_s1 + $0x7a0] ss:$8 sps:$4 sm:$0xff]   ;;  %v3463_v58 = vld [vmem:[%s4528_s1 + $0x3b4] ss:$8 sps:$4 sm:$0xff]  }
  0xb6   : > { %2441 = vmatprep.subr.bf16.mxu0 %v3370_v59  ;;  %v3466_v59 = vld [vmem:[%s4528_s1 + $0x7b4] ss:$8 sps:$4 sm:$0xff]  }
  0xb8   : > { %2270 = vmatpush1.bf16.msra.mxu1 %v3365_v60  ;;  %v3461_v60 = vld [vmem:[%s4528_s1 + $0x3b0] ss:$8 sps:$4 sm:$0xff]  }
  0xb9   : > { %2442 = vmatpush1.bf16.msra.mxu0 %v3368_v61  ;;  %2271 = vmatprep.subr.bf16.mxu1 %v3373_v62  ;;  %v3464_v61 = vld [vmem:[%s4528_s1 + $0x7b0] ss:$8 sps:$4 sm:$0xff]   ;;  %v3469_v62 = vld [vmem:[%s4528_s1 + $0x3c4] ss:$8 sps:$4 sm:$0xff]  }
  0xba   : > { %2443 = vmatprep.subr.bf16.mxu0 %v3376_v63  ;;  %v3472_v63 = vld [vmem:[%s4528_s1 + $0x7c4] ss:$8 sps:$4 sm:$0xff]  }
  0xbc   : > { %2272 = vmatpush1.bf16.msra.mxu1 %v3371_v0  ;;  %v3467_v0 = vld [vmem:[%s4528_s1 + $0x3c0] ss:$8 sps:$4 sm:$0xff]  }
  0xbd   : > { %2444 = vmatpush1.bf16.msra.mxu0 %v3374_v1  ;;  %2273 = vmatprep.subr.bf16.mxu1 %v3379_v2  ;;  %v3470_v1 = vld [vmem:[%s4528_s1 + $0x7c0] ss:$8 sps:$4 sm:$0xff]   ;;  %v3475_v2 = vld [vmem:[%s4528_s1 + $0x3d4] ss:$8 sps:$4 sm:$0xff]  }
  0xbe   : > { %2445 = vmatprep.subr.bf16.mxu0 %v3382_v3  ;;  %v3478_v3 = vld [vmem:[%s4528_s1 + $0x7d4] ss:$8 sps:$4 sm:$0xff]  }
  0xc0   : > { %2274 = vmatpush1.bf16.msra.mxu1 %v3377_v4  ;;  %v3473_v4 = vld [vmem:[%s4528_s1 + $0x3d0] ss:$8 sps:$4 sm:$0xff]  }
  0xc1   : > { %2446 = vmatpush1.bf16.msra.mxu0 %v3380_v5  ;;  %2275 = vmatprep.subr.bf16.mxu1 %v3385_v6  ;;  %v3476_v5 = vld [vmem:[%s4528_s1 + $0x7d0] ss:$8 sps:$4 sm:$0xff]   ;;  %v3481_v6 = vld [vmem:[%s4528_s1 + $0x3e4] ss:$8 sps:$4 sm:$0xff]  }
  0xc2   : > { %2447 = vmatprep.subr.bf16.mxu0 %v3388_v7  ;;  %v3484_v7 = vld [vmem:[%s4528_s1 + $0x7e4] ss:$8 sps:$4 sm:$0xff]  }
  0xc4   : > { %2276 = vmatpush1.bf16.msra.mxu1 %v3383_v8  ;;  %v3479_v8 = vld [vmem:[%s4528_s1 + $0x3e0] ss:$8 sps:$4 sm:$0xff]  }
  0xc5   : > { %2448 = vmatpush1.bf16.msra.mxu0 %v3386_v9  ;;  %2288 = vmatprep.subr.bf16.mxu1 %v3394_v10  ;;  %v3482_v9 = vld [vmem:[%s4528_s1 + $0x7e0] ss:$8 sps:$4 sm:$0xff]   ;;  %v3487_v10 = vld [vmem:[%s4528_s1 + $0x3f4] ss:$8 sps:$4 sm:$0xff]  }
  0xc6   : > { %2460 = vmatprep.subr.bf16.mxu0 %v3400_v11  ;;  %v3490_v11 = vld [vmem:[%s4528_s1 + $0x7f4] ss:$8 sps:$4 sm:$0xff]  }
  0xc7   : > { %2278 = vmatmul.mubr.bf16.vlgmr.msra.gmra.mrb[0].mxu1 %v3389_v12  ;;  %v3485_v12 = vld [vmem:[%s4528_s1 + $0x3f0] ss:$8 sps:$4 sm:$0xff]  }
  0xc8   : > { %2450 = vmatmul.mubr.bf16.vlgmr.msra.gmra.mrb[0].mxu0 %v3395_v14  ;;  %2289 = vmatpush1.bf16.msra.mxu1 %v3392_v13  ;;  %v3488_v13 = vld [vmem:[%s4528_s1 + $0x7f0] ss:$8 sps:$4 sm:$0xff]   ;;  %v3499_v14 = vld [vmem:[%s4528_s1 + $0x804] ss:$8 sps:$4 sm:$0xff]  }
  0xc9   : > { %2461 = vmatpush1.bf16.msra.mxu0 %v3398_v15  ;;  %2290 = vmatprep.subr.bf16.mxu1 %v3403_v16  ;;  %v3491_v15 = vld [vmem:[%s3759_s24 + $0x18] ss:$72 sps:$4 sm:$0xff]  }
  0xca   : > { %2462 = vmatprep.subr.bf16.mxu0 %v3406_v17  ;;  %2320 = vmatprep.mubr.bf16.mxu1 %v3493_v18  ;;  %v3494_v16 = vld [vmem:[%s3759_s24 + $0x38] ss:$72 sps:$4 sm:$0xff]   ;;  %v3547_v18 = vld [vmem:[%s3759_s24 + $0x44] ss:$72 sps:$4 sm:$0xff]  }
  0xcb   : > { %2492 = vmatprep.mubr.bf16.mxu0 %v3496_v19  ;;  %v3497_v17 = vld [vmem:[%s4528_s1 + $0x800] ss:$8 sps:$4 sm:$0xff]   ;;  %v3502_v19 = vld [vmem:[%s4528_s1 + $0x814] ss:$8 sps:$4 sm:$0xff]  }
  0xcc   : > { %2291 = vmatpush1.bf16.msra.mxu1 %v3401_v20  ;;  %v3500_v20 = vld [vmem:[%s4528_s1 + $0x810] ss:$8 sps:$4 sm:$0xff]  }
  0xcd   : > { %2463 = vmatpush1.bf16.msra.mxu0 %v3404_v21  ;;  %2292 = vmatprep.subr.bf16.mxu1 %v3409_v22  ;;  %v3505_v21 = vld [vmem:[%s4528_s1 + $0x824] ss:$8 sps:$4 sm:$0xff]   ;;  %v3503_v22 = vld [vmem:[%s4528_s1 + $0x820] ss:$8 sps:$4 sm:$0xff]  }
  0xce   : > { %2464 = vmatprep.subr.bf16.mxu0 %v3412_v23  ;;  %v3508_v23 = vld [vmem:[%s4528_s1 + $0x834] ss:$8 sps:$4 sm:$0xff]  }
  0xd0   : > { %2293 = vmatpush1.bf16.msra.mxu1 %v3407_v24  ;;  %v3506_v24 = vld [vmem:[%s4528_s1 + $0x830] ss:$8 sps:$4 sm:$0xff]  }
  0xd1   : > { %2465 = vmatpush1.bf16.msra.mxu0 %v3410_v25  ;;  %2294 = vmatprep.subr.bf16.mxu1 %v3415_v26  ;;  %v3511_v25 = vld [vmem:[%s4528_s1 + $0x844] ss:$8 sps:$4 sm:$0xff]   ;;  %v3509_v26 = vld [vmem:[%s4528_s1 + $0x840] ss:$8 sps:$4 sm:$0xff]  }
  0xd2   : > { %2466 = vmatprep.subr.bf16.mxu0 %v3418_v27  ;;  %v3514_v27 = vld [vmem:[%s4528_s1 + $0x854] ss:$8 sps:$4 sm:$0xff]  }
  0xd4   : > { %2295 = vmatpush1.bf16.msra.mxu1 %v3413_v28  ;;  %v3512_v28 = vld [vmem:[%s4528_s1 + $0x850] ss:$8 sps:$4 sm:$0xff]  }
  0xd5   : > { %2467 = vmatpush1.bf16.msra.mxu0 %v3416_v29  ;;  %2296 = vmatprep.subr.bf16.mxu1 %v3421_v30  ;;  %v3517_v29 = vld [vmem:[%s4528_s1 + $0x864] ss:$8 sps:$4 sm:$0xff]   ;;  %v3515_v30 = vld [vmem:[%s4528_s1 + $0x860] ss:$8 sps:$4 sm:$0xff]  }
  0xd6   : > { %2468 = vmatprep.subr.bf16.mxu0 %v3424_v31  ;;  %v3520_v31 = vld [vmem:[%s4528_s1 + $0x874] ss:$8 sps:$4 sm:$0xff]  }
  0xd8   : > { %2297 = vmatpush1.bf16.msra.mxu1 %v3419_v32  ;;  %v3518_v32 = vld [vmem:[%s4528_s1 + $0x870] ss:$8 sps:$4 sm:$0xff]  }
  0xd9   : > { %2469 = vmatpush1.bf16.msra.mxu0 %v3422_v33  ;;  %2298 = vmatprep.subr.bf16.mxu1 %v3427_v34  ;;  %v3523_v33 = vld [vmem:[%s4528_s1 + $0x884] ss:$8 sps:$4 sm:$0xff]   ;;  %v3521_v34 = vld [vmem:[%s4528_s1 + $0x880] ss:$8 sps:$4 sm:$0xff]  }
  0xda   : > { %2470 = vmatprep.subr.bf16.mxu0 %v3430_v35  ;;  %v3526_v35 = vld [vmem:[%s4528_s1 + $0x894] ss:$8 sps:$4 sm:$0xff]  }
  0xdc   : > { %2299 = vmatpush1.bf16.msra.mxu1 %v3425_v36  ;;  %v3524_v36 = vld [vmem:[%s4528_s1 + $0x890] ss:$8 sps:$4 sm:$0xff]  }
  0xdd   : > { %2471 = vmatpush1.bf16.msra.mxu0 %v3428_v37  ;;  %2300 = vmatprep.subr.bf16.mxu1 %v3433_v38  ;;  %v3529_v37 = vld [vmem:[%s4528_s1 + $0x8a4] ss:$8 sps:$4 sm:$0xff]   ;;  %v3527_v38 = vld [vmem:[%s4528_s1 + $0x8a0] ss:$8 sps:$4 sm:$0xff]  }
  0xde   : > { %2472 = vmatprep.subr.bf16.mxu0 %v3436_v39  ;;  %v3532_v39 = vld [vmem:[%s4528_s1 + $0x8b4] ss:$8 sps:$4 sm:$0xff]  }
  0xe0   : > { %2301 = vmatpush1.bf16.msra.mxu1 %v3431_v40  ;;  %v3530_v40 = vld [vmem:[%s4528_s1 + $0x8b0] ss:$8 sps:$4 sm:$0xff]  }
  0xe1   : > { %2473 = vmatpush1.bf16.msra.mxu0 %v3434_v41  ;;  %2302 = vmatprep.subr.bf16.mxu1 %v3439_v42  ;;  %v3535_v41 = vld [vmem:[%s4528_s1 + $0x8c4] ss:$8 sps:$4 sm:$0xff]   ;;  %v3533_v42 = vld [vmem:[%s4528_s1 + $0x8c0] ss:$8 sps:$4 sm:$0xff]  }
  0xe2   : > { %2474 = vmatprep.subr.bf16.mxu0 %v3442_v43  ;;  %v3538_v43 = vld [vmem:[%s4528_s1 + $0x8d4] ss:$8 sps:$4 sm:$0xff]  }
  0xe4   : > { %2303 = vmatpush1.bf16.msra.mxu1 %v3437_v44  ;;  %v3536_v44 = vld [vmem:[%s4528_s1 + $0x8d0] ss:$8 sps:$4 sm:$0xff]  }
  0xe5   : > { %2475 = vmatpush1.bf16.msra.mxu0 %v3440_v45  ;;  %2304 = vmatprep.subr.bf16.mxu1 %v3445_v46  ;;  %v3541_v45 = vld [vmem:[%s4528_s1 + $0x8e4] ss:$8 sps:$4 sm:$0xff]   ;;  %v3539_v46 = vld [vmem:[%s4528_s1 + $0x8e0] ss:$8 sps:$4 sm:$0xff]  }
  0xe6   : > { %2476 = vmatprep.subr.bf16.mxu0 %v3448_v47  ;;  %v3544_v47 = vld [vmem:[%s4528_s1 + $0x8f4] ss:$8 sps:$4 sm:$0xff]  }
  0xe8   : > { %2305 = vmatpush1.bf16.msra.mxu1 %v3443_v48  ;;  %v3542_v48 = vld [vmem:[%s4528_s1 + $0x8f0] ss:$8 sps:$4 sm:$0xff]  }
  0xe9   : > { %2477 = vmatpush1.bf16.msra.mxu0 %v3446_v49  ;;  %2306 = vmatprep.subr.bf16.mxu1 %v3451_v50  ;;  %v3545_v49 = vld [vmem:[%s3759_s24 + $0x40] ss:$72 sps:$4 sm:$0xff]  }
  0xea   : > { %2478 = vmatprep.subr.bf16.mxu0 %v3454_v51 }
  0xec   : > { %2307 = vmatpush1.bf16.msra.mxu1 %v3449_v52 }
  0xed   : > { %2479 = vmatpush1.bf16.msra.mxu0 %v3452_v53  ;;  %2308 = vmatprep.subr.bf16.mxu1 %v3457_v54  ;;  %v619_v54 = vlaneseq }
  0xee   : > { %2480 = vmatprep.subr.bf16.mxu0 %v3460_v55 }
  0xef   : > { %v620_v55 = vshrl.u32 %v619_v54, 7 }
  0xf0   : > { %2309 = vmatpush1.bf16.msra.mxu1 %v3455_v56 }
  0xf1   : > { %2481 = vmatpush1.bf16.msra.mxu0 %v3458_v57  ;;  %2310 = vmatprep.subr.bf16.mxu1 %v3463_v58  ;;  %v621_v56 = vsub.s32 0, %v620_v55  ;;  %v617_v57 = vld [vmem:[%s4529_s2] sm:$0x3]  ;;  %v625_v58 = vsub.s32 1, %v620_v55 }
  0xf2   : > { %2482 = vmatprep.subr.bf16.mxu0 %v3466_v59 }
  0xf3   : > { %v622_v59 = vrot.slane %v617_v57, %v621_v56 }
  0xf4   : > { %2311 = vmatpush1.bf16.msra.mxu1 %v3461_v60  ;;  %v626_v60 = vrot.slane %v617_v57, %v625_v58 }
  0xf5   : > { %2483 = vmatpush1.bf16.msra.mxu0 %v3464_v61  ;;  %2312 = vmatprep.subr.bf16.mxu1 %v3469_v62  ;;  %v2546_v61 = vld [vmem:[%s296_s7] sm:$0xff]  ;;  %v2547_v62 = vld [vmem:[%s296_s7 + $0x8] sm:$0xff] }
  0xf6   : > { %2484 = vmatprep.subr.bf16.mxu0 %v3472_v63 }
  0xf8   : > { %2313 = vmatpush1.bf16.msra.mxu1 %v3467_v0  ;;  %v2548_v0 = vunpack.c.l.bf16 %v2546_v61 }
  0xf9   : > { %2485 = vmatpush1.bf16.msra.mxu0 %v3470_v1  ;;  %2314 = vmatprep.subr.bf16.mxu1 %v3475_v2 }
  0xfa   : > { %2486 = vmatprep.subr.bf16.mxu0 %v3478_v3  ;;  %v2549_v3 = vunpack.c.h.bf16 %v2546_v61 }
  0xfc   : > { %2315 = vmatpush1.bf16.msra.mxu1 %v3473_v4 }
  0xfd   : > { %2487 = vmatpush1.bf16.msra.mxu0 %v3476_v5  ;;  %2316 = vmatprep.subr.bf16.mxu1 %v3481_v6 }
  0xfe   : > { %2488 = vmatprep.subr.bf16.mxu0 %v3484_v7  ;;  %v2550_v7 = vunpack.c.l.bf16 %v2547_v62 }
 0x100   : > { %2317 = vmatpush1.bf16.msra.mxu1 %v3479_v8 }
 0x101   : > { %2489 = vmatpush1.bf16.msra.mxu0 %v3482_v9  ;;  %2318 = vmatprep.subr.bf16.mxu1 %v3487_v10 }
 0x102   : > { %2490 = vmatprep.subr.bf16.mxu0 %v3490_v11  ;;  %v2551_v11 = vunpack.c.h.bf16 %v2547_v62 }
 0x104   : > { %2319 = vmatpush1.bf16.msra.mxu1 %v3485_v12 }
 0x105   : > { %2491 = vmatpush1.bf16.msra.mxu0 %v3488_v13 }
 0x106   : > { %2503 = vmatprep.subr.bf16.mxu0 %v3499_v14 }
 0x107   : > { %2321 = vmatmul.mubr.bf16.vlgmr.msra.gmra.mrb[0].mxu1 %v3491_v15 }
 0x108   : > { %2493 = vmatmul.mubr.bf16.vlgmr.msra.gmra.mrb[0].mxu0 %v3494_v16 }
 0x109   : > { %2504 = vmatpush1.bf16.msra.mxu0 %v3497_v17  ;;  %2535 = vmatprep.mubr.bf16.mxu0 %v3547_v18 }
 0x10a   : > { %2505 = vmatprep.subr.bf16.mxu0 %v3502_v19 }
 0x10d   : > { %2506 = vmatpush1.bf16.msra.mxu0 %v3500_v20 }
 0x10e   : > { %2507 = vmatprep.subr.bf16.mxu0 %v3505_v21 }
 0x111   : > { %2508 = vmatpush1.bf16.msra.mxu0 %v3503_v22 }
 0x112   : > { %2509 = vmatprep.subr.bf16.mxu0 %v3508_v23 }
 0x115   : > { %2510 = vmatpush1.bf16.msra.mxu0 %v3506_v24 }
 0x116   : > { %2511 = vmatprep.subr.bf16.mxu0 %v3511_v25 }
 0x119   : > { %2512 = vmatpush1.bf16.msra.mxu0 %v3509_v26 }
 0x11a   : > { %2513 = vmatprep.subr.bf16.mxu0 %v3514_v27 }
 0x11d   : > { %2514 = vmatpush1.bf16.msra.mxu0 %v3512_v28 }
 0x11e   : > { %2515 = vmatprep.subr.bf16.mxu0 %v3517_v29 }
 0x121   : > { %2516 = vmatpush1.bf16.msra.mxu0 %v3515_v30 }
 0x122   : > { %2517 = vmatprep.subr.bf16.mxu0 %v3520_v31 }
 0x125   : > { %2518 = vmatpush1.bf16.msra.mxu0 %v3518_v32 }
 0x126   : > { %2519 = vmatprep.subr.bf16.mxu0 %v3523_v33 }
 0x129   : > { %2520 = vmatpush1.bf16.msra.mxu0 %v3521_v34 }
 0x12a   : > { %2521 = vmatprep.subr.bf16.mxu0 %v3526_v35 }
 0x12d   : > { %2522 = vmatpush1.bf16.msra.mxu0 %v3524_v36 }
 0x12e   : > { %2523 = vmatprep.subr.bf16.mxu0 %v3529_v37 }
 0x131   : > { %2524 = vmatpush1.bf16.msra.mxu0 %v3527_v38 }
 0x132   : > { %2525 = vmatprep.subr.bf16.mxu0 %v3532_v39 }
 0x135   : > { %2526 = vmatpush1.bf16.msra.mxu0 %v3530_v40 }
 0x136   : > { %2527 = vmatprep.subr.bf16.mxu0 %v3535_v41 }
 0x139   : > { %2528 = vmatpush1.bf16.msra.mxu0 %v3533_v42 }
 0x13a   : > { %2529 = vmatprep.subr.bf16.mxu0 %v3538_v43 }
 0x13d   : > { %2530 = vmatpush1.bf16.msra.mxu0 %v3536_v44 }
 0x13e   : > { %2531 = vmatprep.subr.bf16.mxu0 %v3541_v45 }
 0x141   : > { %2532 = vmatpush1.bf16.msra.mxu0 %v3539_v46 }
 0x142   : > { %2533 = vmatprep.subr.bf16.mxu0 %v3544_v47 }
 0x145   : > { %2534 = vmatpush1.bf16.msra.mxu0 %v3542_v48 }
 0x148   : > { %2536 = vmatmul.mubr.bf16.vlgmr.msra.gmra.mrb[0].mxu0 %v3545_v49 }
 0x1da   : > { %v2322_v50 = vpop.f32.mrb[0].mxu1 }
 0x1db   : > { %v2324_v51 = vpop.f32.mrb[1].mxu1  ;;  %v3028_v63 = vadd.f32 %v2322_v50, %v622_v59 }
 0x1dc   : > { %v2326_v52 = vpop.f32.mrb[2].mxu1  ;;  %v3030_v1 = vadd.f32 %v2324_v51, %v626_v60 }
 0x1dd   : > { %v2328_v53 = vpop.f32.mrb[3].mxu1  ;;  %v3032_v4 = vadd.f32 %v2326_v52, %v622_v59 }
 0x1de   : > { %v3034_v8 = vadd.f32 %v2328_v53, %v626_v60 }
 0x21b   : > { %v2537_v2 = vpop.f32.mrb[0].mxu0 }
 0x21c   : > { %v3029_v5 = vadd.f32 %v3028_v63, %v2537_v2  ;;  %v2539_v6 = vpop.f32.mrb[1].mxu0 }
 0x21d   : > { %v3031_v9 = vadd.f32 %v3030_v1, %v2539_v6  ;;  %v2541_v10 = vpop.f32.mrb[2].mxu0 }
 0x21e   : > { %v2552_v12 = vadd.f32 %v3029_v5, %v2548_v0  ;;  %v3033_v13 = vadd.f32 %v3032_v4, %v2541_v10  ;;  %v2543_v14 = vpop.f32.mrb[3].mxu0 }
 0x21f   : > { %v2553_v15 = vadd.f32 %v3031_v9, %v2549_v3  ;;  %v3035_v16 = vadd.f32 %v3034_v8, %v2543_v14 }
 0x220   : > { %v2554_v17 = vadd.f32 %v3033_v13, %v2550_v7 }
 0x221   : > { %v3026_v18 = vpack.c.bf16 %v2553_v15, %v2552_v12  ;;  %v2555_v19 = vadd.f32 %v3035_v16, %v2551_v11 }
 0x223   : > { %2568 = vst [vmem:[%s308_s8] sm:$0xff] %v3026_v18  ;;  %v3027_v20 = vpack.c.bf16 %v2555_v19, %v2554_v17 }
 0x225   : > { %2569 = vst [vmem:[%s308_s8 + $0x8] sm:$0xff] %v3027_v20 }
 0x226 PF: > { %s14_s17 = sadd.s32 1, %s3570_s17   ;;  %s4532_s15 = smov %s3566_s16 }
 0x227   : > { %p11_p5 = scmp.ge.s32.totalorder %s14_s17, 4   ;;  %s4533_s16 = smov %s4535_s18 }
 0x229   :  { %13 = sbr.rel (!%p11_p5) target bundleno = 2 (0x2), region = 75 }

// kernel: forward.36
= control target key start
LH: loop header
LB: loop body
LE: loop exit
PB: predicated region body
PF: predicated region fallthrough
CT: control target
= control target key end

     0   :  { %s1397_s12 = smov 0   ;;  %s1399_s13 = smov 0   ;;  %s1680_s0 = inlined_call_operand.vmem [shape: bf16[128,512], index: 0, kind: input, shape index: {}]   ;;  %s1681_s1 = inlined_call_operand.vmem [shape: bf16[512,256], index: 1, kind: input, shape index: {}]   ;;  %s1682_s2 = inlined_call_operand.vmem [shape: f32[1,256], index: 2, kind: input, shape index: {}]   ;;  %s1683_s3 = inlined_call_operand.vmem [shape: bf16[128,256], index: 3, kind: output, shape index: {}]  }
   0x1   :  { %s1401_s14 = smov 0  }
   0x2 LB: > { %s25_s15 = sadd.s32 1, %s1371_s13  ;;  %p1070_p0 = scmp.ge.s32.totalorder %s1375_s14, 1  ;;  %s1375_s14 = sphi %s1401_s14, %s13_s14   ;;  %s1371_s13 = sphi %s1399_s13, %s1685_s13   ;;  %s1367_s12 = sphi %s1397_s12, %s1684_s12  }
   0x3   : > { %p27_p1 = scmp.ge.s32.totalorder %s25_s15, 2  ;;  %p174_p2 = scmp.lt.s32.totalorder %s1375_s14, 3 }
   0x5   : > { %s1687_s15 = smov (%p27_p1, %s25_s15), 0  ;;  %p175_p3 = pnand %p1070_p0, %p174_p2 }
   0x6   : > { %v1233_v0 = vld [vmem:[%s1681_s1 + $0x4] ss:$8 sps:$4 sm:$0xff] (!%p175_p3)   ;;  %v1237_v2 = vld [vmem:[%s1681_s1] ss:$8 sps:$4 sm:$0xff] (!%p175_p3)   ;;  %v1239_v4 = vld [vmem:[%s1681_s1 + $0x14] ss:$8 sps:$4 sm:$0xff] (!%p175_p3)  }
   0x7   : > { %178 = sbr.rel (%p175_p3) target bundleno = 319 (0x13f), region = 32  ;;  %v1235_v1 = vld [vmem:[%s1681_s1 + $0x104] ss:$8 sps:$4 sm:$0xff] (!%p175_p3)   ;;  %735 = vmatprep.subr.bf16.mxu1 (!%p175_p3), %v1233_v0  ;;  %v1238_v3 = vld [vmem:[%s1681_s1 + $0x100] ss:$8 sps:$4 sm:$0xff] (!%p175_p3)   ;;  %s1071_s30 = sshll.u32 (!%p175_p3), %s1367_s12, 3 }
   0x8   : > { %808 = vmatprep.subr.bf16.mxu0 (!%p175_p3), %v1235_v1  ;;  %736 = vmatpush1.bf16.msra.mxu1 (!%p175_p3), %v1237_v2  ;;  %v1241_v5 = vld [vmem:[%s1681_s1 + $0x114] ss:$8 sps:$4 sm:$0xff] (!%p175_p3)   ;;  %v1243_v6 = vld [vmem:[%s1681_s1 + $0x10] ss:$8 sps:$4 sm:$0xff] (!%p175_p3)   ;;  %v1245_v8 = vld [vmem:[%s1681_s1 + $0x24] ss:$8 sps:$4 sm:$0xff] (!%p175_p3)  }
   0x9   : > { %809 = vmatpush1.bf16.msra.mxu0 (!%p175_p3), %v1238_v3  ;;  %737 = vmatprep.subr.bf16.mxu1 (!%p175_p3), %v1239_v4  ;;  %v1244_v7 = vld [vmem:[%s1681_s1 + $0x110] ss:$8 sps:$4 sm:$0xff] (!%p175_p3)   ;;  %v1247_v9 = vld [vmem:[%s1681_s1 + $0x124] ss:$8 sps:$4 sm:$0xff] (!%p175_p3)   ;;  %v1249_v10 = vld [vmem:[%s1681_s1 + $0x20] ss:$8 sps:$4 sm:$0xff] (!%p175_p3)  }
   0xa   : > { %810 = vmatprep.subr.bf16.mxu0 (!%p175_p3), %v1241_v5  ;;  %v1250_v11 = vld [vmem:[%s1681_s1 + $0x120] ss:$8 sps:$4 sm:$0xff] (!%p175_p3)   ;;  %v1251_v12 = vld [vmem:[%s1681_s1 + $0x34] ss:$8 sps:$4 sm:$0xff] (!%p175_p3)   ;;  %v1255_v14 = vld [vmem:[%s1681_s1 + $0x30] ss:$8 sps:$4 sm:$0xff] (!%p175_p3)  }
   0xb   : > { %v1253_v13 = vld [vmem:[%s1681_s1 + $0x134] ss:$8 sps:$4 sm:$0xff] (!%p175_p3)   ;;  %v1256_v15 = vld [vmem:[%s1681_s1 + $0x130] ss:$8 sps:$4 sm:$0xff] (!%p175_p3)   ;;  %v1257_v16 = vld [vmem:[%s1681_s1 + $0x44] ss:$8 sps:$4 sm:$0xff] (!%p175_p3)  }
   0xc   : > { %738 = vmatpush1.bf16.msra.mxu1 (!%p175_p3), %v1243_v6  ;;  %v1259_v17 = vld [vmem:[%s1681_s1 + $0x144] ss:$8 sps:$4 sm:$0xff] (!%p175_p3)   ;;  %v1261_v18 = vld [vmem:[%s1681_s1 + $0x40] ss:$8 sps:$4 sm:$0xff] (!%p175_p3)   ;;  %v1263_v20 = vld [vmem:[%s1681_s1 + $0x54] ss:$8 sps:$4 sm:$0xff] (!%p175_p3)  }
   0xd   : > { %811 = vmatpush1.bf16.msra.mxu0 (!%p175_p3), %v1244_v7  ;;  %739 = vmatprep.subr.bf16.mxu1 (!%p175_p3), %v1245_v8  ;;  %v1262_v19 = vld [vmem:[%s1681_s1 + $0x140] ss:$8 sps:$4 sm:$0xff] (!%p175_p3)   ;;  %v1265_v21 = vld [vmem:[%s1681_s1 + $0x154] ss:$8 sps:$4 sm:$0xff] (!%p175_p3)   ;;  %v1267_v22 = vld [vmem:[%s1681_s1 + $0x50] ss:$8 sps:$4 sm:$0xff] (!%p175_p3)  }
   0xe   : > { %812 = vmatprep.subr.bf16.mxu0 %v1247_v9  ;;  %v1268_v23 = vld [vmem:[%s1681_s1 + $0x150] ss:$8 sps:$4 sm:$0xff]   ;;  %v1269_v24 = vld [vmem:[%s1681_s1 + $0x64] ss:$8 sps:$4 sm:$0xff]   ;;  %v1273_v26 = vld [vmem:[%s1681_s1 + $0x60] ss:$8 sps:$4 sm:$0xff]  }
   0xf   : > { %v1271_v25 = vld [vmem:[%s1681_s1 + $0x164] ss:$8 sps:$4 sm:$0xff]   ;;  %v1274_v27 = vld [vmem:[%s1681_s1 + $0x160] ss:$8 sps:$4 sm:$0xff]   ;;  %v1275_v28 = vld [vmem:[%s1681_s1 + $0x74] ss:$8 sps:$4 sm:$0xff]  }
  0x10   : > { %740 = vmatpush1.bf16.msra.mxu1 %v1249_v10  ;;  %v1277_v29 = vld [vmem:[%s1681_s1 + $0x174] ss:$8 sps:$4 sm:$0xff]   ;;  %v1279_v30 = vld [vmem:[%s1681_s1 + $0x70] ss:$8 sps:$4 sm:$0xff]   ;;  %v1281_v32 = vld [vmem:[%s1681_s1 + $0x84] ss:$8 sps:$4 sm:$0xff]  }
  0x11   : > { %813 = vmatpush1.bf16.msra.mxu0 %v1250_v11  ;;  %741 = vmatprep.subr.bf16.mxu1 %v1251_v12  ;;  %v1280_v31 = vld [vmem:[%s1681_s1 + $0x170] ss:$8 sps:$4 sm:$0xff]   ;;  %v1283_v33 = vld [vmem:[%s1681_s1 + $0x184] ss:$8 sps:$4 sm:$0xff]   ;;  %p214_p4 = scmp.lt.s32.totalorder %s1071_s30, 15 }
  0x12   : > { %814 = vmatprep.subr.bf16.mxu0 %v1253_v13  ;;  %v1285_v34 = vld [vmem:[%s1681_s1 + $0x80] ss:$8 sps:$4 sm:$0xff]   ;;  %v1287_v36 = vld [vmem:[%s1681_s1 + $0x94] ss:$8 sps:$4 sm:$0xff]   ;;  %v1291_v38 = vld [vmem:[%s1681_s1 + $0x90] ss:$8 sps:$4 sm:$0xff]  }
  0x13   : > { %v1286_v35 = vld [vmem:[%s1681_s1 + $0x180] ss:$8 sps:$4 sm:$0xff]   ;;  %v1289_v37 = vld [vmem:[%s1681_s1 + $0x194] ss:$8 sps:$4 sm:$0xff]   ;;  %s1689_s30 = smov (!%p214_p4, %s1071_s30), 15 }
  0x14   : > { %742 = vmatpush1.bf16.msra.mxu1 %v1255_v14  ;;  %v1292_v39 = vld [vmem:[%s1681_s1 + $0x190] ss:$8 sps:$4 sm:$0xff]   ;;  %v1293_v40 = vld [vmem:[%s1681_s1 + $0xa4] ss:$8 sps:$4 sm:$0xff]   ;;  %s1167_s5 = sshll.u32 %s1689_s30, 4 }
  0x15   : > { %815 = vmatpush1.bf16.msra.mxu0 %v1256_v15  ;;  %743 = vmatprep.subr.bf16.mxu1 %v1257_v16  ;;  %v1295_v41 = vld [vmem:[%s1681_s1 + $0x1a4] ss:$8 sps:$4 sm:$0xff]   ;;  %v1297_v42 = vld [vmem:[%s1681_s1 + $0xa0] ss:$8 sps:$4 sm:$0xff]   ;;  %v1299_v44 = vld [vmem:[%s1681_s1 + $0xb4] ss:$8 sps:$4 sm:$0xff]   ;;  %s1559_s17 = scalar_lea.vmem %s1680_s0, %s1167_s5  ;;  %v325_v16 = vlaneseq }
  0x16   : > { %816 = vmatprep.subr.bf16.mxu0 %v1259_v17  ;;  %v1298_v43 = vld [vmem:[%s1681_s1 + $0x1a0] ss:$8 sps:$4 sm:$0xff]   ;;  %v1301_v45 = vld [vmem:[%s1681_s1 + $0x1b4] ss:$8 sps:$4 sm:$0xff]   ;;  %v1303_v46 = vld [vmem:[%s1681_s1 + $0xb0] ss:$8 sps:$4 sm:$0xff]  }
  0x17   : > { %v1304_v47 = vld [vmem:[%s1681_s1 + $0x1b0] ss:$8 sps:$4 sm:$0xff]   ;;  %v1305_v48 = vld [vmem:[%s1681_s1 + $0xc4] ss:$8 sps:$4 sm:$0xff]   ;;  %v1309_v52 = vld [vmem:[%s1681_s1 + $0xc0] ss:$8 sps:$4 sm:$0xff]  }
  0x18   : > { %744 = vmatpush1.bf16.msra.mxu1 %v1261_v18  ;;  %v1331_v49 = vld [vmem:[%s1559_s17 + $0x4] ss:$16 sps:$4 sm:$0xff]   ;;  %v1334_v51 = vld [vmem:[%s1559_s17 + $0xc] ss:$16 sps:$4 sm:$0xff]   ;;  %v1310_v53 = vld [vmem:[%s1681_s1 + $0x1c0] ss:$8 sps:$4 sm:$0xff]  }
  0x19   : > { %817 = vmatpush1.bf16.msra.mxu0 %v1262_v19  ;;  %745 = vmatprep.subr.bf16.mxu1 %v1263_v20  ;;  %v1307_v50 = vld [vmem:[%s1681_s1 + $0x1c4] ss:$8 sps:$4 sm:$0xff]   ;;  %v1311_v54 = vld [vmem:[%s1681_s1 + $0xd4] ss:$8 sps:$4 sm:$0xff]   ;;  %v1315_v56 = vld [vmem:[%s1681_s1 + $0xd0] ss:$8 sps:$4 sm:$0xff]  }
  0x1a   : > { %818 = vmatprep.subr.bf16.mxu0 %v1265_v21  ;;  %767 = vmatprep.mubr.bf16.mxu1 %v1331_v49  ;;  %v1313_v55 = vld [vmem:[%s1681_s1 + $0x1d4] ss:$8 sps:$4 sm:$0xff]   ;;  %v1316_v57 = vld [vmem:[%s1681_s1 + $0x1d0] ss:$8 sps:$4 sm:$0xff]   ;;  %v1317_v58 = vld [vmem:[%s1681_s1 + $0xe4] ss:$8 sps:$4 sm:$0xff]  }
  0x1b   : > { %840 = vmatprep.mubr.bf16.mxu0 %v1334_v51  ;;  %v1319_v59 = vld [vmem:[%s1681_s1 + $0x1e4] ss:$8 sps:$4 sm:$0xff]   ;;  %v1321_v60 = vld [vmem:[%s1681_s1 + $0xe0] ss:$8 sps:$4 sm:$0xff]   ;;  %v1323_v62 = vld [vmem:[%s1681_s1 + $0xf4] ss:$8 sps:$4 sm:$0xff]  }
  0x1c   : > { %746 = vmatpush1.bf16.msra.mxu1 %v1267_v22  ;;  %v1322_v61 = vld [vmem:[%s1681_s1 + $0x1e0] ss:$8 sps:$4 sm:$0xff]   ;;  %v1325_v63 = vld [vmem:[%s1681_s1 + $0x1f4] ss:$8 sps:$4 sm:$0xff]   ;;  %v1327_v0 = vld [vmem:[%s1681_s1 + $0xf0] ss:$8 sps:$4 sm:$0xff]  }
  0x1d   : > { %819 = vmatpush1.bf16.msra.mxu0 %v1268_v23  ;;  %747 = vmatprep.subr.bf16.mxu1 %v1269_v24  ;;  %v1328_v1 = vld [vmem:[%s1681_s1 + $0x1f0] ss:$8 sps:$4 sm:$0xff]   ;;  %v1335_v4 = vld [vmem:[%s1559_s17 + $0x24] ss:$16 sps:$4 sm:$0xff]   ;;  %v1337_v5 = vld [vmem:[%s1559_s17 + $0x2c] ss:$16 sps:$4 sm:$0xff]  }
  0x1e   : > { %820 = vmatprep.subr.bf16.mxu0 %v1271_v25  ;;  %v1329_v2 = vld [vmem:[%s1559_s17] ss:$16 sps:$4 sm:$0xff]   ;;  %v1332_v3 = vld [vmem:[%s1559_s17 + $0x8] ss:$16 sps:$4 sm:$0xff]   ;;  %v1341_v8 = vld [vmem:[%s1559_s17 + $0x44] ss:$16 sps:$4 sm:$0xff]  }
  0x1f   : > { %v1339_v6 = vld [vmem:[%s1559_s17 + $0x20] ss:$16 sps:$4 sm:$0xff]   ;;  %v1340_v7 = vld [vmem:[%s1559_s17 + $0x28] ss:$16 sps:$4 sm:$0xff]   ;;  %v1343_v9 = vld [vmem:[%s1559_s17 + $0x4c] ss:$16 sps:$4 sm:$0xff]  }
  0x20   : > { %748 = vmatpush1.bf16.msra.mxu1 %v1273_v26  ;;  %v1345_v10 = vld [vmem:[%s1559_s17 + $0x40] ss:$16 sps:$4 sm:$0xff]   ;;  %v1346_v11 = vld [vmem:[%s1559_s17 + $0x48] ss:$16 sps:$4 sm:$0xff]   ;;  %v1347_v12 = vld [vmem:[%s1559_s17 + $0x64] ss:$16 sps:$4 sm:$0xff]  }
  0x21   : > { %821 = vmatpush1.bf16.msra.mxu0 %v1274_v27  ;;  %749 = vmatprep.subr.bf16.mxu1 %v1275_v28  ;;  %v1349_v13 = vld [vmem:[%s1559_s17 + $0x6c] ss:$16 sps:$4 sm:$0xff]   ;;  %v1351_v14 = vld [vmem:[%s1559_s17 + $0x60] ss:$16 sps:$4 sm:$0xff]   ;;  %v1352_v15 = vld [vmem:[%s1559_s17 + $0x68] ss:$16 sps:$4 sm:$0xff]  }
  0x22   : > { %822 = vmatprep.subr.bf16.mxu0 %v1277_v29  ;;  %v326_v17 = vshrl.u32 %v325_v16, 7  ;;  %v323_v19 = vld [vmem:[%s1682_s2] sm:$0x3]  ;;  %s1168_s17 = sshll.u32 %s1689_s30, 3 }
  0x23   : > { %s1649_s12 = scalar_lea.vmem %s1683_s3, %s1168_s17 }
  0x24   : > { %750 = vmatpush1.bf16.msra.mxu1 %v1279_v30  ;;  %v327_v18 = vsub.s32 0, %v326_v17  ;;  %v331_v20 = vsub.s32 1, %v326_v17 }
  0x25   : > { %823 = vmatpush1.bf16.msra.mxu0 %v1280_v31  ;;  %751 = vmatprep.subr.bf16.mxu1 %v1281_v32 }
  0x26   : > { %824 = vmatprep.subr.bf16.mxu0 %v1283_v33  ;;  %v1637_v21 = vrot.slane %v323_v19, %v327_v18  ;;  %v1639_v22 = vrot.slane %v323_v19, %v331_v20 }
  0x28   : > { %752 = vmatpush1.bf16.msra.mxu1 %v1285_v34 }
  0x29   : > { %825 = vmatpush1.bf16.msra.mxu0 %v1286_v35  ;;  %753 = vmatprep.subr.bf16.mxu1 %v1287_v36 }
  0x2a   : > { %826 = vmatprep.subr.bf16.mxu0 %v1289_v37 }
  0x2c   : > { %754 = vmatpush1.bf16.msra.mxu1 %v1291_v38 }
  0x2d   : > { %827 = vmatpush1.bf16.msra.mxu0 %v1292_v39  ;;  %755 = vmatprep.subr.bf16.mxu1 %v1293_v40 }
  0x2e   : > { %828 = vmatprep.subr.bf16.mxu0 %v1295_v41 }
  0x30   : > { %756 = vmatpush1.bf16.msra.mxu1 %v1297_v42 }
  0x31   : > { %829 = vmatpush1.bf16.msra.mxu0 %v1298_v43  ;;  %757 = vmatprep.subr.bf16.mxu1 %v1299_v44 }
  0x32   : > { %830 = vmatprep.subr.bf16.mxu0 %v1301_v45 }
  0x34   : > { %758 = vmatpush1.bf16.msra.mxu1 %v1303_v46 }
  0x35   : > { %831 = vmatpush1.bf16.msra.mxu0 %v1304_v47  ;;  %759 = vmatprep.subr.bf16.mxu1 %v1305_v48 }
  0x36   : > { %832 = vmatprep.subr.bf16.mxu0 %v1307_v50 }
  0x38   : > { %760 = vmatpush1.bf16.msra.mxu1 %v1309_v52 }
  0x39   : > { %833 = vmatpush1.bf16.msra.mxu0 %v1310_v53  ;;  %761 = vmatprep.subr.bf16.mxu1 %v1311_v54 }
  0x3a   : > { %834 = vmatprep.subr.bf16.mxu0 %v1313_v55 }
  0x3c   : > { %762 = vmatpush1.bf16.msra.mxu1 %v1315_v56 }
  0x3d   : > { %835 = vmatpush1.bf16.msra.mxu0 %v1316_v57  ;;  %763 = vmatprep.subr.bf16.mxu1 %v1317_v58 }
  0x3e   : > { %836 = vmatprep.subr.bf16.mxu0 %v1319_v59 }
  0x40   : > { %764 = vmatpush1.bf16.msra.mxu1 %v1321_v60 }
  0x41   : > { %837 = vmatpush1.bf16.msra.mxu0 %v1322_v61  ;;  %765 = vmatprep.subr.bf16.mxu1 %v1323_v62 }
  0x42   : > { %838 = vmatprep.subr.bf16.mxu0 %v1325_v63 }
  0x44   : > { %766 = vmatpush1.bf16.msra.mxu1 %v1327_v0 }
  0x45   : > { %839 = vmatpush1.bf16.msra.mxu0 %v1328_v1 }
  0x47   : > { %768 = vmatmul.mubr.bf16.vlgmr.msra.gmra.mrb[0].mxu1 %v1329_v2 }
  0x48   : > { %841 = vmatmul.mubr.bf16.vlgmr.msra.gmra.mrb[0].mxu0 %v1332_v3  ;;  %777 = vmatprep.mubr.bf16.mxu1 %v1335_v4 }
  0x49   : > { %850 = vmatprep.mubr.bf16.mxu0 %v1337_v5 }
  0x4f   : > { %778 = vmatmul.mubr.bf16.gmra.mrb[4].mxu1 %v1339_v6 }
  0x50   : > { %851 = vmatmul.mubr.bf16.gmra.mrb[4].mxu0 %v1340_v7  ;;  %787 = vmatprep.mubr.bf16.mxu1 %v1341_v8 }
  0x51   : > { %860 = vmatprep.mubr.bf16.mxu0 %v1343_v9 }
  0x57   : > { %788 = vmatmul.mubr.bf16.gmra.mrb[8].mxu1 %v1345_v10 }
  0x58   : > { %861 = vmatmul.mubr.bf16.gmra.mrb[8].mxu0 %v1346_v11  ;;  %797 = vmatprep.mubr.bf16.mxu1 %v1347_v12 }
  0x59   : > { %870 = vmatprep.mubr.bf16.mxu0 %v1349_v13 }
  0x5f   : > { %798 = vmatmul.mubr.bf16.gmra.mrb[12].mxu1 %v1351_v14 }
  0x60   : > { %871 = vmatmul.mubr.bf16.gmra.mrb[12].mxu0 %v1352_v15 }
 0x11a   : > { %v769_v23 = vpop.f32.mrb[0].mxu1 }
 0x11b   : > { %v842_v24 = vpop.f32.mrb[0].mxu0  ;;  %v770_v25 = vadd.f32 %v769_v23, %v1637_v21  ;;  %v771_v26 = vpop.f32.mrb[1].mxu1 }
 0x11c   : > { %v844_v27 = vpop.f32.mrb[1].mxu0  ;;  %v772_v28 = vadd.f32 %v771_v26, %v1639_v22  ;;  %v773_v29 = vpop.f32.mrb[2].mxu1 }
 0x11d   : > { %v846_v30 = vpop.f32.mrb[2].mxu0  ;;  %v843_v31 = vadd.f32 %v842_v24, %v770_v25  ;;  %v774_v32 = vadd.f32 %v773_v29, %v1637_v21  ;;  %v775_v33 = vpop.f32.mrb[3].mxu1 }
 0x11e   : > { %v848_v34 = vpop.f32.mrb[3].mxu0  ;;  %v845_v35 = vadd.f32 %v844_v27, %v772_v28  ;;  %v776_v36 = vadd.f32 %v775_v33, %v1639_v22 }
 0x11f   : > { %v881_v37 = vmax.f32 %v843_v31, 0.0  ;;  %v847_v38 = vadd.f32 %v846_v30, %v774_v32 }
 0x120   : > { %v882_v39 = vmax.f32 %v845_v35, 0.0  ;;  %v849_v40 = vadd.f32 %v848_v34, %v776_v36 }
 0x121   : > { %v883_v41 = vmax.f32 %v847_v38, 0.0 }
 0x122   : > { %v1169_v42 = vpack.c.bf16 %v882_v39, %v881_v37  ;;  %v884_v43 = vmax.f32 %v849_v40, 0.0  ;;  %v779_v44 = vpop.f32.mrb[4].mxu1 }
 0x123   : > { %v852_v45 = vpop.f32.mrb[4].mxu0  ;;  %v780_v46 = vadd.f32 %v779_v44, %v1637_v21  ;;  %v781_v47 = vpop.f32.mrb[5].mxu1 }
 0x124   : > { %v854_v48 = vpop.f32.mrb[5].mxu0  ;;  %945 = vst [vmem:[%s1649_s12] sm:$0xff] %v1169_v42  ;;  %v1170_v49 = vpack.c.bf16 %v884_v43, %v883_v41  ;;  %v782_v50 = vadd.f32 %v781_v47, %v1639_v22  ;;  %v783_v51 = vpop.f32.mrb[6].mxu1 }
 0x125   : > { %v856_v52 = vpop.f32.mrb[6].mxu0  ;;  %v853_v53 = vadd.f32 %v852_v45, %v780_v46  ;;  %v784_v54 = vadd.f32 %v783_v51, %v1637_v21  ;;  %v785_v55 = vpop.f32.mrb[7].mxu1 }
 0x126   : > { %v858_v56 = vpop.f32.mrb[7].mxu0  ;;  %946 = vst [vmem:[%s1649_s12 + $0x8] sm:$0xff] %v1170_v49  ;;  %v855_v57 = vadd.f32 %v854_v48, %v782_v50  ;;  %v786_v58 = vadd.f32 %v785_v55, %v1639_v22 }
 0x127   : > { %v885_v59 = vmax.f32 %v853_v53, 0.0  ;;  %v857_v60 = vadd.f32 %v856_v52, %v784_v54 }
 0x128   : > { %v886_v61 = vmax.f32 %v855_v57, 0.0  ;;  %v859_v62 = vadd.f32 %v858_v56, %v786_v58 }
 0x129   : > { %v887_v63 = vmax.f32 %v857_v60, 0.0 }
 0x12a   : > { %v1171_v0 = vpack.c.bf16 %v886_v61, %v885_v59  ;;  %v888_v1 = vmax.f32 %v859_v62, 0.0  ;;  %v789_v2 = vpop.f32.mrb[8].mxu1 }
 0x12b   : > { %v862_v3 = vpop.f32.mrb[8].mxu0  ;;  %v790_v4 = vadd.f32 %v789_v2, %v1637_v21  ;;  %v791_v5 = vpop.f32.mrb[9].mxu1 }
 0x12c   : > { %v864_v6 = vpop.f32.mrb[9].mxu0  ;;  %947 = vst [vmem:[%s1649_s12 + $0x10] sm:$0xff] %v1171_v0  ;;  %v1172_v7 = vpack.c.bf16 %v888_v1, %v887_v63  ;;  %v792_v8 = vadd.f32 %v791_v5, %v1639_v22  ;;  %v793_v9 = vpop.f32.mrb[10].mxu1 }
 0x12d   : > { %v866_v10 = vpop.f32.mrb[10].mxu0  ;;  %v863_v11 = vadd.f32 %v862_v3, %v790_v4  ;;  %v794_v12 = vadd.f32 %v793_v9, %v1637_v21  ;;  %v795_v13 = vpop.f32.mrb[11].mxu1 }
 0x12e   : > { %v868_v14 = vpop.f32.mrb[11].mxu0  ;;  %948 = vst [vmem:[%s1649_s12 + $0x18] sm:$0xff] %v1172_v7  ;;  %v865_v15 = vadd.f32 %v864_v6, %v792_v8  ;;  %v796_v16 = vadd.f32 %v795_v13, %v1639_v22 }
 0x12f   : > { %v889_v17 = vmax.f32 %v863_v11, 0.0  ;;  %v867_v18 = vadd.f32 %v866_v10, %v794_v12 }
 0x130   : > { %v890_v19 = vmax.f32 %v865_v15, 0.0  ;;  %v869_v20 = vadd.f32 %v868_v14, %v796_v16 }
 0x131   : > { %v891_v23 = vmax.f32 %v867_v18, 0.0 }
 0x132   : > { %v1173_v24 = vpack.c.bf16 %v890_v19, %v889_v17  ;;  %v892_v25 = vmax.f32 %v869_v20, 0.0  ;;  %v799_v26 = vpop.f32.mrb[12].mxu1 }
 0x133   : > { %v872_v27 = vpop.f32.mrb[12].mxu0  ;;  %v800_v28 = vadd.f32 %v799_v26, %v1637_v21  ;;  %v801_v29 = vpop.f32.mrb[13].mxu1 }
 0x134   : > { %v874_v30 = vpop.f32.mrb[13].mxu0  ;;  %949 = vst [vmem:[%s1649_s12 + $0x20] sm:$0xff] %v1173_v24  ;;  %v1174_v31 = vpack.c.bf16 %v892_v25, %v891_v23  ;;  %v802_v32 = vadd.f32 %v801_v29, %v1639_v22  ;;  %v803_v33 = vpop.f32.mrb[14].mxu1 }
 0x135   : > { %v876_v34 = vpop.f32.mrb[14].mxu0  ;;  %v873_v35 = vadd.f32 %v872_v27, %v800_v28  ;;  %v804_v36 = vadd.f32 %v803_v33, %v1637_v21  ;;  %v805_v37 = vpop.f32.mrb[15].mxu1 }
 0x136   : > { %v878_v38 = vpop.f32.mrb[15].mxu0  ;;  %950 = vst [vmem:[%s1649_s12 + $0x28] sm:$0xff] %v1174_v31  ;;  %v875_v39 = vadd.f32 %v874_v30, %v802_v32  ;;  %v806_v40 = vadd.f32 %v805_v37, %v1639_v22 }
 0x137   : > { %v893_v41 = vmax.f32 %v873_v35, 0.0  ;;  %v877_v42 = vadd.f32 %v876_v34, %v804_v36 }
 0x138   : > { %v894_v43 = vmax.f32 %v875_v39, 0.0  ;;  %v879_v44 = vadd.f32 %v878_v38, %v806_v40 }
 0x139   : > { %v895_v45 = vmax.f32 %v877_v42, 0.0 }
 0x13a   : > { %v1175_v46 = vpack.c.bf16 %v894_v43, %v893_v41  ;;  %v896_v47 = vmax.f32 %v879_v44, 0.0 }
 0x13c   : > { %951 = vst [vmem:[%s1649_s12 + $0x30] sm:$0xff] %v1175_v46  ;;  %v1176_v48 = vpack.c.bf16 %v896_v47, %v895_v45 }
 0x13e   : > { %952 = vst [vmem:[%s1649_s12 + $0x38] sm:$0xff] %v1176_v48 }
 0x13f PF: > { %s13_s14 = sadd.s32 1, %s1375_s14   ;;  %s1684_s12 = smov %s1371_s13 }
 0x140   : > { %p10_p5 = scmp.ge.s32.totalorder %s13_s14, 4   ;;  %s1685_s13 = smov %s1687_s15 }
 0x142   :  { %12 = sbr.rel (!%p10_p5) target bundleno = 2 (0x2), region = 68 }

// kernel: forward.37
= control target key start
LH: loop header
LB: loop body
LE: loop exit
PB: predicated region body
PF: predicated region fallthrough
CT: control target
= control target key end

     0   :  { %s6322_s12 = smov 0   ;;  %s6324_s13 = smov 0   ;;  %s7476_s0 = inlined_call_operand.vmem [shape: bf16[512,3200], index: 0, kind: input, shape index: {}]   ;;  %s7477_s1 = inlined_call_operand.vmem [shape: bf16[3200,128], index: 1, kind: input, shape index: {}]   ;;  %s7478_s2 = inlined_call_operand.vmem [shape: f32[1,128], index: 2, kind: input, shape index: {}]   ;;  %s7479_s3 = inlined_call_operand.vmem [shape: f32[512,128], index: 3, kind: output, shape index: {}]  }
   0x1   :  { %s6326_s14 = smov 0  }
   0x2 LB: > { %s25_s15 = sadd.s32 1, %s6296_s13  ;;  %p4485_p0 = scmp.ge.s32.totalorder %s6300_s14, 1  ;;  %s6300_s14 = sphi %s6326_s14, %s13_s14   ;;  %s6296_s13 = sphi %s6324_s13, %s7481_s13   ;;  %s6292_s12 = sphi %s6322_s12, %s7480_s12  }
   0x3   : > { %p27_p1 = scmp.ge.s32.totalorder %s25_s15, 4  ;;  %p170_p2 = scmp.lt.s32.totalorder %s6300_s14, 5 }
   0x5   : > { %s7483_s15 = smov (%p27_p1, %s25_s15), 0  ;;  %p171_p3 = pnand %p4485_p0, %p170_p2 }
   0x6   : > { %v5750_v0 = vld [vmem:[%s7477_s1 + $0x40] sm:$0xff] (!%p171_p3)   ;;  %v5754_v4 = vld [vmem:[%s7477_s1 + $0x48] sm:$0xff] (!%p171_p3)   ;;  %v5758_v8 = vld [vmem:[%s7477_s1 + $0x50] sm:$0xff] (!%p171_p3)   ;;  %s4486_s23 = sshll.u32 (!%p171_p3), %s6292_s12, 4 }
   0x7   : > { %174 = sbr.rel (%p171_p3) target bundleno = 669 (0x29d), region = 32  ;;  %v5751_v1 = vld [vmem:[%s7477_s1 + $0xc0] sm:$0xff] (!%p171_p3)   ;;  %4893 = vmatprep.subr.bf16.mxu0 (!%p171_p3), %v5750_v0  ;;  %v5755_v5 = vld [vmem:[%s7477_s1 + $0xc8] sm:$0xff] (!%p171_p3)   ;;  %v5759_v9 = vld [vmem:[%s7477_s1 + $0xd0] sm:$0xff] (!%p171_p3)   ;;  %p206_p4 = scmp.lt.s32.totalorder (!%p171_p3), %s4486_s23, 63 }
   0x8   : > { %v5752_v2 = vld [vmem:[%s7477_s1] sm:$0xff] (!%p171_p3)   ;;  %4957 = vmatprep.subr.bf16.mxu1 (!%p171_p3), %v5751_v1  ;;  %v5756_v6 = vld [vmem:[%s7477_s1 + $0x8] sm:$0xff] (!%p171_p3)   ;;  %v5760_v10 = vld [vmem:[%s7477_s1 + $0x10] sm:$0xff] (!%p171_p3)  }
   0x9   : > { %v5753_v3 = vld [vmem:[%s7477_s1 + $0x80] sm:$0xff] (!%p171_p3)   ;;  %4894 = vmatpush3.bf16.msra.mxu0 (!%p171_p3), %v5752_v2  ;;  %v5757_v7 = vld [vmem:[%s7477_s1 + $0x88] sm:$0xff] (!%p171_p3)   ;;  %v5761_v11 = vld [vmem:[%s7477_s1 + $0x90] sm:$0xff] (!%p171_p3)  }
   0xa   : > { %4958 = vmatpush3.bf16.msra.mxu1 (!%p171_p3), %v5753_v3  ;;  %4895 = vmatprep.subr.bf16.mxu0 (!%p171_p3), %v5754_v4  ;;  %v5762_v12 = vld [vmem:[%s7477_s1 + $0x58] sm:$0xff] (!%p171_p3)   ;;  %v5766_v16 = vld [vmem:[%s7477_s1 + $0x60] sm:$0xff] (!%p171_p3)   ;;  %v5770_v20 = vld [vmem:[%s7477_s1 + $0x68] sm:$0xff] (!%p171_p3)  }
   0xb   : > { %4959 = vmatprep.subr.bf16.mxu1 (!%p171_p3), %v5755_v5  ;;  %v5763_v13 = vld [vmem:[%s7477_s1 + $0xd8] sm:$0xff] (!%p171_p3)   ;;  %v5767_v17 = vld [vmem:[%s7477_s1 + $0xe0] sm:$0xff] (!%p171_p3)   ;;  %v5771_v21 = vld [vmem:[%s7477_s1 + $0xe8] sm:$0xff] (!%p171_p3)  }
   0xc   : > { %v5764_v14 = vld [vmem:[%s7477_s1 + $0x18] sm:$0xff] (!%p171_p3)   ;;  %v5768_v18 = vld [vmem:[%s7477_s1 + $0x20] sm:$0xff] (!%p171_p3)   ;;  %v5772_v22 = vld [vmem:[%s7477_s1 + $0x28] sm:$0xff] (!%p171_p3)  }
   0xd   : > { %4896 = vmatpush3.bf16.msra.mxu0 (!%p171_p3), %v5756_v6  ;;  %v5765_v15 = vld [vmem:[%s7477_s1 + $0x98] sm:$0xff] (!%p171_p3)   ;;  %v5769_v19 = vld [vmem:[%s7477_s1 + $0xa0] sm:$0xff] (!%p171_p3)   ;;  %v5773_v23 = vld [vmem:[%s7477_s1 + $0xa8] sm:$0xff] (!%p171_p3)  }
   0xe   : > { %4960 = vmatpush3.bf16.msra.mxu1 %v5757_v7  ;;  %4897 = vmatprep.subr.bf16.mxu0 %v5758_v8  ;;  %s7485_s23 = smov (!%p206_p4, %s4486_s23), 63  ;;  %v5774_v24 = vld [vmem:[%s7477_s1 + $0x70] sm:$0xff]   ;;  %v5778_v28 = vld [vmem:[%s7477_s1 + $0x78] sm:$0xff]   ;;  %v5788_v36 = vld [vmem:[%s7477_s1 + $0x140] sm:$0xff]  }
   0xf   : > { %4961 = vmatprep.subr.bf16.mxu1 %v5759_v9  ;;  %v5775_v25 = vld [vmem:[%s7477_s1 + $0xf0] sm:$0xff]   ;;  %s5725_s22 = smul.u32 100, %s7485_s23  ;;  %v5779_v29 = vld [vmem:[%s7477_s1 + $0xf8] sm:$0xff]   ;;  %v5789_v37 = vld [vmem:[%s7477_s1 + $0x1c0] sm:$0xff]  }
  0x10   : > { %v5776_v26 = vld [vmem:[%s7477_s1 + $0x30] sm:$0xff]   ;;  %v5780_v30 = vld [vmem:[%s7477_s1 + $0x38] sm:$0xff]   ;;  %v5790_v38 = vld [vmem:[%s7477_s1 + $0x100] sm:$0xff]  }
  0x11   : > { %4898 = vmatpush3.bf16.msra.mxu0 %v5760_v10  ;;  %v5777_v27 = vld [vmem:[%s7477_s1 + $0xb0] sm:$0xff]   ;;  %s6439_s6 = scalar_lea.vmem %s7476_s0, %s5725_s22  ;;  %v5781_v31 = vld [vmem:[%s7477_s1 + $0xb8] sm:$0xff]   ;;  %v5791_v39 = vld [vmem:[%s7477_s1 + $0x180] sm:$0xff]  }
  0x12   : > { %4962 = vmatpush3.bf16.msra.mxu1 %v5761_v11  ;;  %4899 = vmatprep.subr.bf16.mxu0 %v5762_v12  ;;  %v5782_v32 = vld [vmem:[%s6439_s6] ss:$100 sps:$4 sm:$0xff]   ;;  %v5785_v34 = vld [vmem:[%s6439_s6 + $0x8] ss:$100 sps:$4 sm:$0xff]   ;;  %v5794_v41 = vld [vmem:[%s6439_s6 + $0xd4] ss:$100 sps:$4 sm:$0xff]  }
  0x13   : > { %4963 = vmatprep.subr.bf16.mxu1 %v5763_v13  ;;  %v5784_v33 = vld [vmem:[%s6439_s6 + $0x4] ss:$100 sps:$4 sm:$0xff]   ;;  %v5787_v35 = vld [vmem:[%s6439_s6 + $0xc] ss:$100 sps:$4 sm:$0xff]   ;;  %v5802_v48 = vld [vmem:[%s6439_s6 + $0x194] ss:$100 sps:$4 sm:$0xff]  }
  0x14   : > { %3084 = vmatprep.mubr.bf16.mxu0 %v5784_v33  ;;  %3181 = vmatprep.mubr.bf16.mxu1 %v5787_v35  ;;  %v5792_v40 = vld [vmem:[%s6439_s6 + $0xcc] ss:$100 sps:$4 sm:$0xff]   ;;  %v5804_v49 = vld [vmem:[%s6439_s6 + $0x19c] ss:$100 sps:$4 sm:$0xff]   ;;  %v5814_v57 = vld [vmem:[%s6439_s6 + $0x264] ss:$100 sps:$4 sm:$0xff]  }
  0x15   : > { %4900 = vmatpush3.bf16.msra.mxu0 %v5764_v14  ;;  %v5796_v42 = vld [vmem:[%s6439_s6 + $0xc8] ss:$100 sps:$4 sm:$0xff]   ;;  %v5797_v43 = vld [vmem:[%s6439_s6 + $0xd0] ss:$100 sps:$4 sm:$0xff]   ;;  %v5807_v51 = vld [vmem:[%s6439_s6 + $0x198] ss:$100 sps:$4 sm:$0xff]  }
  0x16   : > { %4964 = vmatpush3.bf16.msra.mxu1 %v5765_v15  ;;  %4901 = vmatprep.subr.bf16.mxu0 %v5766_v16  ;;  %v5798_v44 = vld [vmem:[%s7477_s1 + $0x148] sm:$0xff]   ;;  %v5806_v50 = vld [vmem:[%s6439_s6 + $0x190] ss:$100 sps:$4 sm:$0xff]   ;;  %v5812_v56 = vld [vmem:[%s6439_s6 + $0x25c] ss:$100 sps:$4 sm:$0xff]  }
  0x17   : > { %4965 = vmatprep.subr.bf16.mxu1 %v5767_v17  ;;  %v5799_v45 = vld [vmem:[%s7477_s1 + $0x1c8] sm:$0xff]   ;;  %v5808_v52 = vld [vmem:[%s7477_s1 + $0x150] sm:$0xff]   ;;  %v5816_v58 = vld [vmem:[%s6439_s6 + $0x258] ss:$100 sps:$4 sm:$0xff]  }
  0x18   : > { %v5800_v46 = vld [vmem:[%s7477_s1 + $0x108] sm:$0xff]   ;;  %v5809_v53 = vld [vmem:[%s7477_s1 + $0x1d0] sm:$0xff]   ;;  %v5817_v59 = vld [vmem:[%s6439_s6 + $0x260] ss:$100 sps:$4 sm:$0xff]  }
  0x19   : > { %4902 = vmatpush3.bf16.msra.mxu0 %v5768_v18  ;;  %v5801_v47 = vld [vmem:[%s7477_s1 + $0x188] sm:$0xff]   ;;  %v5810_v54 = vld [vmem:[%s7477_s1 + $0x110] sm:$0xff]   ;;  %v5818_v60 = vld [vmem:[%s7477_s1 + $0x158] sm:$0xff]  }
  0x1a   : > { %4966 = vmatpush3.bf16.msra.mxu1 %v5769_v19  ;;  %4903 = vmatprep.subr.bf16.mxu0 %v5770_v20  ;;  %v5811_v55 = vld [vmem:[%s7477_s1 + $0x190] sm:$0xff]   ;;  %v5819_v61 = vld [vmem:[%s7477_s1 + $0x1d8] sm:$0xff]   ;;  %v5822_v0 = vld [vmem:[%s6439_s6 + $0x324] ss:$100 sps:$4 sm:$0xff]  }
  0x1b   : > { %4967 = vmatprep.subr.bf16.mxu1 %v5771_v21  ;;  %v5820_v62 = vld [vmem:[%s7477_s1 + $0x118] sm:$0xff]   ;;  %v5824_v1 = vld [vmem:[%s6439_s6 + $0x32c] ss:$100 sps:$4 sm:$0xff]   ;;  %v5826_v2 = vld [vmem:[%s6439_s6 + $0x320] ss:$100 sps:$4 sm:$0xff]  }
  0x1c   : > { %v5821_v63 = vld [vmem:[%s7477_s1 + $0x198] sm:$0xff]   ;;  %v5828_v3 = vld [vmem:[%s7477_s1 + $0x160] sm:$0xff]   ;;  %v5827_v4 = vld [vmem:[%s6439_s6 + $0x328] ss:$100 sps:$4 sm:$0xff]  }
  0x1d   : > { %4904 = vmatpush3.bf16.msra.mxu0 %v5772_v22  ;;  %v5829_v5 = vld [vmem:[%s7477_s1 + $0x1e0] sm:$0xff]   ;;  %v5832_v8 = vld [vmem:[%s6439_s6 + $0x3ec] ss:$100 sps:$4 sm:$0xff]   ;;  %v5834_v9 = vld [vmem:[%s6439_s6 + $0x3f4] ss:$100 sps:$4 sm:$0xff]  }
  0x1e   : > { %4968 = vmatpush3.bf16.msra.mxu1 %v5773_v23  ;;  %4905 = vmatprep.subr.bf16.mxu0 %v5774_v24  ;;  %v5830_v6 = vld [vmem:[%s7477_s1 + $0x120] sm:$0xff]   ;;  %v5838_v10 = vld [vmem:[%s7477_s1 + $0x168] sm:$0xff]   ;;  %v5837_v15 = vld [vmem:[%s6439_s6 + $0x3f0] ss:$100 sps:$4 sm:$0xff]  }
  0x1f   : > { %4969 = vmatprep.subr.bf16.mxu1 %v5775_v25  ;;  %v5831_v7 = vld [vmem:[%s7477_s1 + $0x1a0] sm:$0xff]   ;;  %v5839_v11 = vld [vmem:[%s7477_s1 + $0x1e8] sm:$0xff]   ;;  %v5842_v16 = vld [vmem:[%s6439_s6 + $0x4b4] ss:$100 sps:$4 sm:$0xff]  }
  0x20   : > { %v5836_v12 = vld [vmem:[%s6439_s6 + $0x3e8] ss:$100 sps:$4 sm:$0xff]   ;;  %v5844_v17 = vld [vmem:[%s6439_s6 + $0x4bc] ss:$100 sps:$4 sm:$0xff]   ;;  %v5848_v18 = vld [vmem:[%s7477_s1 + $0x170] sm:$0xff]  }
  0x21   : > { %4906 = vmatpush3.bf16.msra.mxu0 %v5776_v26  ;;  %v5840_v13 = vld [vmem:[%s7477_s1 + $0x128] sm:$0xff]   ;;  %v5849_v19 = vld [vmem:[%s7477_s1 + $0x1f0] sm:$0xff]   ;;  %v5847_v23 = vld [vmem:[%s6439_s6 + $0x4b8] ss:$100 sps:$4 sm:$0xff]  }
  0x22   : > { %4970 = vmatpush3.bf16.msra.mxu1 %v5777_v27  ;;  %4907 = vmatprep.subr.bf16.mxu0 %v5778_v28  ;;  %v5841_v14 = vld [vmem:[%s7477_s1 + $0x1a8] sm:$0xff]   ;;  %v5850_v20 = vld [vmem:[%s7477_s1 + $0x130] sm:$0xff]   ;;  %v5852_v24 = vld [vmem:[%s6439_s6 + $0x57c] ss:$100 sps:$4 sm:$0xff]  }
  0x23   : > { %4971 = vmatprep.subr.bf16.mxu1 %v5779_v29  ;;  %v5851_v21 = vld [vmem:[%s7477_s1 + $0x1b0] sm:$0xff]   ;;  %v5854_v25 = vld [vmem:[%s6439_s6 + $0x584] ss:$100 sps:$4 sm:$0xff]   ;;  %v5858_v26 = vld [vmem:[%s7477_s1 + $0x178] sm:$0xff]  }
  0x24   : > { %v5846_v22 = vld [vmem:[%s6439_s6 + $0x4b0] ss:$100 sps:$4 sm:$0xff]   ;;  %v5859_v27 = vld [vmem:[%s7477_s1 + $0x1f8] sm:$0xff]   ;;  %v5868_v33 = vld [vmem:[%s7477_s1 + $0x240] sm:$0xff]  }
  0x25   : > { %4908 = vmatpush3.bf16.msra.mxu0 %v5780_v30  ;;  %v5860_v28 = vld [vmem:[%s7477_s1 + $0x138] sm:$0xff]  }
  0x26   : > { %4972 = vmatpush3.bf16.msra.mxu1 %v5781_v31  ;;  %5021 = vmatprep.subr.bf16.mxu0 %v5788_v36  ;;  %v5861_v29 = vld [vmem:[%s7477_s1 + $0x1b8] sm:$0xff]   ;;  %v5857_v31 = vld [vmem:[%s6439_s6 + $0x580] ss:$100 sps:$4 sm:$0xff]   ;;  %v5862_v36 = vld [vmem:[%s6439_s6 + $0x10] ss:$100 sps:$4 sm:$0xff]  }
  0x27   : > { %5085 = vmatprep.subr.bf16.mxu1 %v5789_v37  ;;  %v5856_v30 = vld [vmem:[%s6439_s6 + $0x578] ss:$100 sps:$4 sm:$0xff]  }
  0x28   : > { %3085 = vmatmul.mubr.bf16.vlgmr.msra.gmra.mrb[0].mxu0 %v5782_v32  ;;  %v5864_v32 = vld [vmem:[%s6439_s6 + $0x14] ss:$100 sps:$4 sm:$0xff]   ;;  %v5867_v35 = vld [vmem:[%s6439_s6 + $0x1c] ss:$100 sps:$4 sm:$0xff]  }
  0x29   : > { %3182 = vmatmul.mubr.bf16.vlgmr.msra.gmra.mrb[0].mxu1 %v5785_v34  ;;  %5022 = vmatpush3.bf16.msra.mxu0 %v5790_v38  ;;  %v5869_v34 = vld [vmem:[%s7477_s1 + $0x2c0] sm:$0xff]   ;;  %v5865_v37 = vld [vmem:[%s6439_s6 + $0x18] ss:$100 sps:$4 sm:$0xff]  }
  0x2a   : > { %5086 = vmatpush3.bf16.msra.mxu1 %v5791_v39  ;;  %3092 = vmatprep.mubr.bf16.mxu0 %v5792_v40  ;;  %v5870_v38 = vld [vmem:[%s7477_s1 + $0x200] sm:$0xff]  }
  0x2b   : > { %3189 = vmatprep.mubr.bf16.mxu1 %v5794_v41  ;;  %5023 = vmatprep.subr.bf16.mxu0 %v5798_v44  ;;  %v5871_v39 = vld [vmem:[%s7477_s1 + $0x280] sm:$0xff]   ;;  %v5880_v44 = vld [vmem:[%s7477_s1 + $0x208] sm:$0xff]  }
  0x2c   : > { %5087 = vmatprep.subr.bf16.mxu1 %v5799_v45  ;;  %v5872_v40 = vld [vmem:[%s6439_s6 + $0xdc] ss:$100 sps:$4 sm:$0xff]   ;;  %v5874_v41 = vld [vmem:[%s6439_s6 + $0xe4] ss:$100 sps:$4 sm:$0xff]  }
  0x2d   : > { %5024 = vmatpush3.bf16.msra.mxu0 %v5800_v46  ;;  %v5881_v45 = vld [vmem:[%s7477_s1 + $0x288] sm:$0xff]   ;;  %v5876_v46 = vld [vmem:[%s6439_s6 + $0xd8] ss:$100 sps:$4 sm:$0xff]  }
  0x2e   : > { %5088 = vmatpush3.bf16.msra.mxu1 %v5801_v47  ;;  %5025 = vmatprep.subr.bf16.mxu0 %v5808_v52  ;;  %v5888_v47 = vld [vmem:[%s7477_s1 + $0x250] sm:$0xff]  }
  0x2f   : > { %5089 = vmatprep.subr.bf16.mxu1 %v5809_v53  ;;  %v5890_v52 = vld [vmem:[%s7477_s1 + $0x210] sm:$0xff]  }
  0x30   : > { %3093 = vmatmul.mubr.bf16.gmra.mrb[4].mxu0 %v5796_v42  ;;  %v5878_v42 = vld [vmem:[%s7477_s1 + $0x248] sm:$0xff]   ;;  %v5891_v53 = vld [vmem:[%s7477_s1 + $0x290] sm:$0xff]  }
  0x31   : > { %3190 = vmatmul.mubr.bf16.gmra.mrb[4].mxu1 %v5797_v43  ;;  %3100 = vmatprep.mubr.bf16.mxu0 %v5802_v48  ;;  %v5879_v43 = vld [vmem:[%s7477_s1 + $0x2c8] sm:$0xff]   ;;  %v5877_v48 = vld [vmem:[%s6439_s6 + $0xe0] ss:$100 sps:$4 sm:$0xff]  }
  0x32   : > { %3197 = vmatprep.mubr.bf16.mxu1 %v5804_v49  ;;  %5026 = vmatpush3.bf16.msra.mxu0 %v5810_v54  ;;  %v5889_v49 = vld [vmem:[%s7477_s1 + $0x2d0] sm:$0xff]   ;;  %v5898_v54 = vld [vmem:[%s7477_s1 + $0x258] sm:$0xff]  }
  0x33   : > { %5090 = vmatpush3.bf16.msra.mxu1 %v5811_v55  ;;  %5027 = vmatprep.subr.bf16.mxu0 %v5818_v60  ;;  %v5899_v55 = vld [vmem:[%s7477_s1 + $0x2d8] sm:$0xff]   ;;  %v5892_v60 = vld [vmem:[%s6439_s6 + $0x26c] ss:$100 sps:$4 sm:$0xff]  }
  0x34   : > { %5091 = vmatprep.subr.bf16.mxu1 %v5819_v61  ;;  %v5894_v61 = vld [vmem:[%s6439_s6 + $0x274] ss:$100 sps:$4 sm:$0xff]  }
  0x36   : > { %5028 = vmatpush3.bf16.msra.mxu0 %v5820_v62  ;;  %v5908_v62 = vld [vmem:[%s7477_s1 + $0x260] sm:$0xff]  }
  0x37   : > { %5092 = vmatpush3.bf16.msra.mxu1 %v5821_v63  ;;  %5029 = vmatprep.subr.bf16.mxu0 %v5828_v3  ;;  %v5909_v63 = vld [vmem:[%s7477_s1 + $0x2e0] sm:$0xff]   ;;  %v5897_v3 = vld [vmem:[%s6439_s6 + $0x270] ss:$100 sps:$4 sm:$0xff]  }
  0x38   : > { %3101 = vmatmul.mubr.bf16.gmra.mrb[8].mxu0 %v5806_v50  ;;  %5093 = vmatprep.subr.bf16.mxu1 %v5829_v5  ;;  %v5882_v50 = vld [vmem:[%s6439_s6 + $0x1a4] ss:$100 sps:$4 sm:$0xff]   ;;  %v5904_v5 = vld [vmem:[%s6439_s6 + $0x33c] ss:$100 sps:$4 sm:$0xff]  }
  0x39   : > { %3198 = vmatmul.mubr.bf16.gmra.mrb[8].mxu1 %v5807_v51  ;;  %3108 = vmatprep.mubr.bf16.mxu0 %v5812_v56  ;;  %v5884_v51 = vld [vmem:[%s6439_s6 + $0x1ac] ss:$100 sps:$4 sm:$0xff]   ;;  %v5886_v56 = vld [vmem:[%s6439_s6 + $0x1a0] ss:$100 sps:$4 sm:$0xff]  }
  0x3a   : > { %3205 = vmatprep.mubr.bf16.mxu1 %v5814_v57  ;;  %5030 = vmatpush3.bf16.msra.mxu0 %v5830_v6  ;;  %v5900_v57 = vld [vmem:[%s7477_s1 + $0x218] sm:$0xff]   ;;  %v5918_v6 = vld [vmem:[%s7477_s1 + $0x268] sm:$0xff]  }
  0x3b   : > { %5094 = vmatpush3.bf16.msra.mxu1 %v5831_v7  ;;  %5031 = vmatprep.subr.bf16.mxu0 %v5838_v10  ;;  %v5919_v7 = vld [vmem:[%s7477_s1 + $0x2e8] sm:$0xff]   ;;  %v5906_v10 = vld [vmem:[%s6439_s6 + $0x330] ss:$100 sps:$4 sm:$0xff]  }
  0x3c   : > { %5095 = vmatprep.subr.bf16.mxu1 %v5839_v11  ;;  %v5907_v11 = vld [vmem:[%s6439_s6 + $0x338] ss:$100 sps:$4 sm:$0xff]  }
  0x3e   : > { %5032 = vmatpush3.bf16.msra.mxu0 %v5840_v13  ;;  %v5914_v13 = vld [vmem:[%s6439_s6 + $0x404] ss:$100 sps:$4 sm:$0xff]  }
  0x3f   : > { %5096 = vmatpush3.bf16.msra.mxu1 %v5841_v14  ;;  %5033 = vmatprep.subr.bf16.mxu0 %v5848_v18  ;;  %v5928_v14 = vld [vmem:[%s7477_s1 + $0x270] sm:$0xff]   ;;  %v5916_v18 = vld [vmem:[%s6439_s6 + $0x3f8] ss:$100 sps:$4 sm:$0xff]  }
  0x40   : > { %3109 = vmatmul.mubr.bf16.gmra.mrb[12].mxu0 %v5816_v58  ;;  %5097 = vmatprep.subr.bf16.mxu1 %v5849_v19  ;;  %v5901_v58 = vld [vmem:[%s7477_s1 + $0x298] sm:$0xff]   ;;  %v5917_v19 = vld [vmem:[%s6439_s6 + $0x400] ss:$100 sps:$4 sm:$0xff]  }
  0x41   : > { %3206 = vmatmul.mubr.bf16.gmra.mrb[12].mxu1 %v5817_v59  ;;  %3116 = vmatprep.mubr.bf16.mxu0 %v5822_v0  ;;  %v5887_v59 = vld [vmem:[%s6439_s6 + $0x1a8] ss:$100 sps:$4 sm:$0xff]   ;;  %v5910_v0 = vld [vmem:[%s7477_s1 + $0x220] sm:$0xff]  }
  0x42   : > { %3213 = vmatprep.mubr.bf16.mxu1 %v5824_v1  ;;  %5034 = vmatpush3.bf16.msra.mxu0 %v5850_v20  ;;  %v5911_v1 = vld [vmem:[%s7477_s1 + $0x2a0] sm:$0xff]  }
  0x43   : > { %5098 = vmatpush3.bf16.msra.mxu1 %v5851_v21  ;;  %5035 = vmatprep.subr.bf16.mxu0 %v5858_v26  ;;  %v5922_v20 = vld [vmem:[%s6439_s6 + $0x4c4] ss:$100 sps:$4 sm:$0xff]   ;;  %v5938_v21 = vld [vmem:[%s7477_s1 + $0x278] sm:$0xff]  }
  0x44   : > { %5099 = vmatprep.subr.bf16.mxu1 %v5859_v27  ;;  %v5926_v26 = vld [vmem:[%s6439_s6 + $0x4c0] ss:$100 sps:$4 sm:$0xff]  }
  0x45   : > { %v5948_v27 = vld [vmem:[%s7477_s1 + $0x340] sm:$0xff]  }
  0x46   : > { %5036 = vmatpush3.bf16.msra.mxu0 %v5860_v28  ;;  %v5949_v28 = vld [vmem:[%s7477_s1 + $0x3c0] sm:$0xff]  }
  0x47   : > { %5100 = vmatpush3.bf16.msra.mxu1 %v5861_v29  ;;  %5149 = vmatprep.subr.bf16.mxu0 %v5868_v33  ;;  %v5927_v29 = vld [vmem:[%s6439_s6 + $0x4c8] ss:$100 sps:$4 sm:$0xff]   ;;  %v5937_v33 = vld [vmem:[%s6439_s6 + $0x590] ss:$100 sps:$4 sm:$0xff]  }
  0x48   : > { %3117 = vmatmul.mubr.bf16.gmra.mrb[16].mxu0 %v5826_v2  ;;  %5213 = vmatprep.subr.bf16.mxu1 %v5869_v34  ;;  %v5896_v2 = vld [vmem:[%s6439_s6 + $0x268] ss:$100 sps:$4 sm:$0xff]  }
  0x49   : > { %3214 = vmatmul.mubr.bf16.gmra.mrb[16].mxu1 %v5827_v4  ;;  %3124 = vmatprep.mubr.bf16.mxu0 %v5832_v8  ;;  %v5902_v4 = vld [vmem:[%s6439_s6 + $0x334] ss:$100 sps:$4 sm:$0xff]   ;;  %v5920_v8 = vld [vmem:[%s7477_s1 + $0x228] sm:$0xff]  }
  0x4a   : > { %3221 = vmatprep.mubr.bf16.mxu1 %v5834_v9  ;;  %v5921_v9 = vld [vmem:[%s7477_s1 + $0x2a8] sm:$0xff]  }
  0x4b   : > { %v5944_v34 = vld [vmem:[%s6439_s6 + $0x24] ss:$100 sps:$4 sm:$0xff]  }
  0x50   : > { %3125 = vmatmul.mubr.bf16.gmra.mrb[20].mxu0 %v5836_v12  ;;  %v5912_v12 = vld [vmem:[%s6439_s6 + $0x3fc] ss:$100 sps:$4 sm:$0xff]  }
  0x51   : > { %3222 = vmatmul.mubr.bf16.gmra.mrb[20].mxu1 %v5837_v15  ;;  %3132 = vmatprep.mubr.bf16.mxu0 %v5842_v16  ;;  %v5929_v15 = vld [vmem:[%s7477_s1 + $0x2f0] sm:$0xff]  }
  0x52   : > { %3229 = vmatprep.mubr.bf16.mxu1 %v5844_v17  ;;  %v5930_v16 = vld [vmem:[%s7477_s1 + $0x230] sm:$0xff]  }
  0x53   : > { %v5931_v17 = vld [vmem:[%s7477_s1 + $0x2b0] sm:$0xff]  }
  0x58   : > { %3133 = vmatmul.mubr.bf16.gmra.mrb[24].mxu0 %v5846_v22  ;;  %v5924_v22 = vld [vmem:[%s6439_s6 + $0x4cc] ss:$100 sps:$4 sm:$0xff]  }
  0x59   : > { %3230 = vmatmul.mubr.bf16.gmra.mrb[24].mxu1 %v5847_v23  ;;  %3140 = vmatprep.mubr.bf16.mxu0 %v5852_v24  ;;  %v5939_v23 = vld [vmem:[%s7477_s1 + $0x2f8] sm:$0xff]  }
  0x5a   : > { %3237 = vmatprep.mubr.bf16.mxu1 %v5854_v25  ;;  %v5940_v24 = vld [vmem:[%s7477_s1 + $0x238] sm:$0xff]  }
  0x5b   : > { %v5941_v25 = vld [vmem:[%s7477_s1 + $0x2b8] sm:$0xff]  }
  0x60   : > { %3141 = vmatmul.mubr.bf16.gmra.mrb[28].mxu0 %v5856_v30  ;;  %v5932_v30 = vld [vmem:[%s6439_s6 + $0x58c] ss:$100 sps:$4 sm:$0xff]  }
  0x61   : > { %3238 = vmatmul.mubr.bf16.gmra.mrb[28].mxu1 %v5857_v31  ;;  %3278 = vmatprep.mubr.bf16.mxu0 %v5864_v32  ;;  %v5934_v31 = vld [vmem:[%s6439_s6 + $0x594] ss:$100 sps:$4 sm:$0xff]   ;;  %v5936_v32 = vld [vmem:[%s6439_s6 + $0x588] ss:$100 sps:$4 sm:$0xff]  }
  0x62   : > { %3375 = vmatprep.mubr.bf16.mxu1 %v5867_v35  ;;  %v5947_v35 = vld [vmem:[%s6439_s6 + $0x2c] ss:$100 sps:$4 sm:$0xff]  }
  0x68   : > { %3279 = vmatmul.mubr.bf16.vlgmr.msra.gmra.mrb[32].mxu0 %v5862_v36  ;;  %v5942_v36 = vld [vmem:[%s6439_s6 + $0x20] ss:$100 sps:$4 sm:$0xff]  }
  0x69   : > { %3376 = vmatmul.mubr.bf16.vlgmr.msra.gmra.mrb[32].mxu1 %v5865_v37  ;;  %5150 = vmatpush3.bf16.msra.mxu0 %v5870_v38  ;;  %v5945_v37 = vld [vmem:[%s6439_s6 + $0x28] ss:$100 sps:$4 sm:$0xff]   ;;  %v5950_v38 = vld [vmem:[%s7477_s1 + $0x300] sm:$0xff]  }
  0x6a   : > { %5214 = vmatpush3.bf16.msra.mxu1 %v5871_v39  ;;  %3286 = vmatprep.mubr.bf16.mxu0 %v5872_v40  ;;  %v5951_v39 = vld [vmem:[%s7477_s1 + $0x380] sm:$0xff]   ;;  %v5952_v40 = vld [vmem:[%s6439_s6 + $0xec] ss:$100 sps:$4 sm:$0xff]  }
  0x6b   : > { %3383 = vmatprep.mubr.bf16.mxu1 %v5874_v41  ;;  %5151 = vmatprep.subr.bf16.mxu0 %v5878_v42  ;;  %v5954_v41 = vld [vmem:[%s6439_s6 + $0xf4] ss:$100 sps:$4 sm:$0xff]   ;;  %v5958_v42 = vld [vmem:[%s7477_s1 + $0x348] sm:$0xff]  }
  0x6c   : > { %5215 = vmatprep.subr.bf16.mxu1 %v5879_v43  ;;  %v5959_v43 = vld [vmem:[%s7477_s1 + $0x3c8] sm:$0xff]  }
  0x6d   : > { %5152 = vmatpush3.bf16.msra.mxu0 %v5880_v44  ;;  %v5960_v44 = vld [vmem:[%s7477_s1 + $0x308] sm:$0xff]  }
  0x6e   : > { %5216 = vmatpush3.bf16.msra.mxu1 %v5881_v45  ;;  %5153 = vmatprep.subr.bf16.mxu0 %v5888_v47  ;;  %v5961_v45 = vld [vmem:[%s7477_s1 + $0x388] sm:$0xff]   ;;  %v5968_v47 = vld [vmem:[%s7477_s1 + $0x350] sm:$0xff]  }
  0x6f   : > { %5217 = vmatprep.subr.bf16.mxu1 %v5889_v49  ;;  %v5962_v49 = vld [vmem:[%s6439_s6 + $0x1b4] ss:$100 sps:$4 sm:$0xff]  }
  0x70   : > { %3287 = vmatmul.mubr.bf16.gmra.mrb[36].mxu0 %v5876_v46  ;;  %v5956_v46 = vld [vmem:[%s6439_s6 + $0xe8] ss:$100 sps:$4 sm:$0xff]  }
  0x71   : > { %3384 = vmatmul.mubr.bf16.gmra.mrb[36].mxu1 %v5877_v48  ;;  %3294 = vmatprep.mubr.bf16.mxu0 %v5882_v50  ;;  %v5957_v48 = vld [vmem:[%s6439_s6 + $0xf0] ss:$100 sps:$4 sm:$0xff]  }
  0x72   : > { %3391 = vmatprep.mubr.bf16.mxu1 %v5884_v51  ;;  %5154 = vmatpush3.bf16.msra.mxu0 %v5890_v52  ;;  %v5969_v50 = vld [vmem:[%s7477_s1 + $0x3d0] sm:$0xff]   ;;  %v5964_v51 = vld [vmem:[%s6439_s6 + $0x1bc] ss:$100 sps:$4 sm:$0xff]  }
  0x73   : > { %5218 = vmatpush3.bf16.msra.mxu1 %v5891_v53  ;;  %5155 = vmatprep.subr.bf16.mxu0 %v5898_v54  ;;  %v5970_v52 = vld [vmem:[%s7477_s1 + $0x310] sm:$0xff]   ;;  %v5978_v54 = vld [vmem:[%s7477_s1 + $0x358] sm:$0xff]  }
  0x74   : > { %5219 = vmatprep.subr.bf16.mxu1 %v5899_v55  ;;  %v5971_v53 = vld [vmem:[%s7477_s1 + $0x390] sm:$0xff]   ;;  %v5979_v55 = vld [vmem:[%s7477_s1 + $0x3d8] sm:$0xff]  }
  0x76   : > { %5156 = vmatpush3.bf16.msra.mxu0 %v5900_v57  ;;  %v5980_v57 = vld [vmem:[%s7477_s1 + $0x318] sm:$0xff]  }
  0x77   : > { %5220 = vmatpush3.bf16.msra.mxu1 %v5901_v58  ;;  %5157 = vmatprep.subr.bf16.mxu0 %v5908_v62  ;;  %v5981_v58 = vld [vmem:[%s7477_s1 + $0x398] sm:$0xff]   ;;  %v5974_v62 = vld [vmem:[%s6439_s6 + $0x284] ss:$100 sps:$4 sm:$0xff]  }
  0x78   : > { %3295 = vmatmul.mubr.bf16.gmra.mrb[40].mxu0 %v5886_v56  ;;  %5221 = vmatprep.subr.bf16.mxu1 %v5909_v63  ;;  %v5966_v56 = vld [vmem:[%s6439_s6 + $0x1b0] ss:$100 sps:$4 sm:$0xff]   ;;  %v5989_v63 = vld [vmem:[%s7477_s1 + $0x3e0] sm:$0xff]  }
  0x79   : > { %3392 = vmatmul.mubr.bf16.gmra.mrb[40].mxu1 %v5887_v59  ;;  %3302 = vmatprep.mubr.bf16.mxu0 %v5892_v60  ;;  %v5967_v59 = vld [vmem:[%s6439_s6 + $0x1b8] ss:$100 sps:$4 sm:$0xff]  }
  0x7a   : > { %3399 = vmatprep.mubr.bf16.mxu1 %v5894_v61  ;;  %5158 = vmatpush3.bf16.msra.mxu0 %v5910_v0  ;;  %v5972_v60 = vld [vmem:[%s6439_s6 + $0x27c] ss:$100 sps:$4 sm:$0xff]  }
  0x7b   : > { %5222 = vmatpush3.bf16.msra.mxu1 %v5911_v1  ;;  %5159 = vmatprep.subr.bf16.mxu0 %v5918_v6  ;;  %v5988_v61 = vld [vmem:[%s7477_s1 + $0x360] sm:$0xff]   ;;  %v6001_v6 = vld [vmem:[%s7477_s1 + $0x3a8] sm:$0xff]  }
  0x7c   : > { %5223 = vmatprep.subr.bf16.mxu1 %v5919_v7  ;;  %v5990_v0 = vld [vmem:[%s7477_s1 + $0x320] sm:$0xff]  }
  0x7d   : > { %v5991_v1 = vld [vmem:[%s7477_s1 + $0x3a0] sm:$0xff]  }
  0x7e   : > { %5160 = vmatpush3.bf16.msra.mxu0 %v5920_v8  ;;  %v5977_v7 = vld [vmem:[%s6439_s6 + $0x280] ss:$100 sps:$4 sm:$0xff]  }
  0x7f   : > { %5224 = vmatpush3.bf16.msra.mxu1 %v5921_v9  ;;  %5161 = vmatprep.subr.bf16.mxu0 %v5928_v14  ;;  %v5982_v8 = vld [vmem:[%s6439_s6 + $0x344] ss:$100 sps:$4 sm:$0xff]   ;;  %v6008_v9 = vld [vmem:[%s7477_s1 + $0x370] sm:$0xff]   ;;  %v6018_v14 = vld [vmem:[%s7477_s1 + $0x378] sm:$0xff]  }
  0x80   : > { %3303 = vmatmul.mubr.bf16.gmra.mrb[44].mxu0 %v5896_v2  ;;  %5225 = vmatprep.subr.bf16.mxu1 %v5929_v15  ;;  %v5998_v2 = vld [vmem:[%s7477_s1 + $0x368] sm:$0xff]   ;;  %v6019_v15 = vld [vmem:[%s7477_s1 + $0x3f8] sm:$0xff]  }
  0x81   : > { %3400 = vmatmul.mubr.bf16.gmra.mrb[44].mxu1 %v5897_v3  ;;  %3310 = vmatprep.mubr.bf16.mxu0 %v5902_v4  ;;  %v5999_v3 = vld [vmem:[%s7477_s1 + $0x3e8] sm:$0xff]  }
  0x82   : > { %3407 = vmatprep.mubr.bf16.mxu1 %v5904_v5  ;;  %5162 = vmatpush3.bf16.msra.mxu0 %v5930_v16  ;;  %v6000_v4 = vld [vmem:[%s7477_s1 + $0x328] sm:$0xff]   ;;  %v5976_v5 = vld [vmem:[%s6439_s6 + $0x278] ss:$100 sps:$4 sm:$0xff]   ;;  %v5986_v16 = vld [vmem:[%s6439_s6 + $0x340] ss:$100 sps:$4 sm:$0xff]  }
  0x83   : > { %5226 = vmatpush3.bf16.msra.mxu1 %v5931_v17  ;;  %5163 = vmatprep.subr.bf16.mxu0 %v5938_v21  ;;  %v6020_v17 = vld [vmem:[%s7477_s1 + $0x338] sm:$0xff]  }
  0x84   : > { %5227 = vmatprep.subr.bf16.mxu1 %v5939_v23  ;;  %v5994_v21 = vld [vmem:[%s6439_s6 + $0x414] ss:$100 sps:$4 sm:$0xff]   ;;  %v6029_v23 = vld [vmem:[%s7477_s1 + $0x4c0] sm:$0xff]  }
  0x86   : > { %5164 = vmatpush3.bf16.msra.mxu0 %v5940_v24  ;;  %v5996_v24 = vld [vmem:[%s6439_s6 + $0x408] ss:$100 sps:$4 sm:$0xff]  }
  0x87   : > { %5228 = vmatpush3.bf16.msra.mxu1 %v5941_v25  ;;  %5277 = vmatprep.subr.bf16.mxu0 %v5948_v27  ;;  %v5997_v25 = vld [vmem:[%s6439_s6 + $0x410] ss:$100 sps:$4 sm:$0xff]   ;;  %v6004_v27 = vld [vmem:[%s6439_s6 + $0x4dc] ss:$100 sps:$4 sm:$0xff]  }
  0x88   : > { %3311 = vmatmul.mubr.bf16.gmra.mrb[48].mxu0 %v5906_v10  ;;  %5341 = vmatprep.subr.bf16.mxu1 %v5949_v28  ;;  %v6009_v10 = vld [vmem:[%s7477_s1 + $0x3f0] sm:$0xff]  }
  0x89   : > { %3408 = vmatmul.mubr.bf16.gmra.mrb[48].mxu1 %v5907_v11  ;;  %3318 = vmatprep.mubr.bf16.mxu0 %v5912_v12  ;;  %v5984_v11 = vld [vmem:[%s6439_s6 + $0x34c] ss:$100 sps:$4 sm:$0xff]  }
  0x8a   : > { %3415 = vmatprep.mubr.bf16.mxu1 %v5914_v13  ;;  %v6010_v12 = vld [vmem:[%s7477_s1 + $0x330] sm:$0xff]  }
  0x8b   : > { %v6011_v13 = vld [vmem:[%s7477_s1 + $0x3b0] sm:$0xff]  }
  0x8c   : > { %v6006_v28 = vld [vmem:[%s6439_s6 + $0x4d0] ss:$100 sps:$4 sm:$0xff]  }
  0x90   : > { %3319 = vmatmul.mubr.bf16.gmra.mrb[52].mxu0 %v5916_v18  ;;  %v6021_v18 = vld [vmem:[%s7477_s1 + $0x3b8] sm:$0xff]  }
  0x91   : > { %3416 = vmatmul.mubr.bf16.gmra.mrb[52].mxu1 %v5917_v19  ;;  %3326 = vmatprep.mubr.bf16.mxu0 %v5922_v20  ;;  %v5987_v19 = vld [vmem:[%s6439_s6 + $0x348] ss:$100 sps:$4 sm:$0xff]  }
  0x92   : > { %3423 = vmatprep.mubr.bf16.mxu1 %v5924_v22  ;;  %v5992_v20 = vld [vmem:[%s6439_s6 + $0x40c] ss:$100 sps:$4 sm:$0xff]   ;;  %v6028_v22 = vld [vmem:[%s7477_s1 + $0x440] sm:$0xff]  }
  0x98   : > { %3327 = vmatmul.mubr.bf16.gmra.mrb[56].mxu0 %v5926_v26  ;;  %v6002_v26 = vld [vmem:[%s6439_s6 + $0x4d4] ss:$100 sps:$4 sm:$0xff]  }
  0x99   : > { %3424 = vmatmul.mubr.bf16.gmra.mrb[56].mxu1 %v5927_v29  ;;  %3334 = vmatprep.mubr.bf16.mxu0 %v5932_v30  ;;  %v6007_v29 = vld [vmem:[%s6439_s6 + $0x4d8] ss:$100 sps:$4 sm:$0xff]  }
  0x9a   : > { %3431 = vmatprep.mubr.bf16.mxu1 %v5934_v31  ;;  %v6012_v30 = vld [vmem:[%s6439_s6 + $0x59c] ss:$100 sps:$4 sm:$0xff]   ;;  %v6014_v31 = vld [vmem:[%s6439_s6 + $0x5a4] ss:$100 sps:$4 sm:$0xff]  }
  0xa0   : > { %3335 = vmatmul.mubr.bf16.gmra.mrb[60].mxu0 %v5936_v32  ;;  %v6016_v32 = vld [vmem:[%s6439_s6 + $0x598] ss:$100 sps:$4 sm:$0xff]  }
  0xa1   : > { %3432 = vmatmul.mubr.bf16.gmra.mrb[60].mxu1 %v5937_v33  ;;  %3472 = vmatprep.mubr.bf16.mxu0 %v5944_v34  ;;  %v6017_v33 = vld [vmem:[%s6439_s6 + $0x5a0] ss:$100 sps:$4 sm:$0xff]   ;;  %v6024_v34 = vld [vmem:[%s6439_s6 + $0x34] ss:$100 sps:$4 sm:$0xff]  }
  0xa2   : > { %3569 = vmatprep.mubr.bf16.mxu1 %v5947_v35  ;;  %v6027_v35 = vld [vmem:[%s6439_s6 + $0x3c] ss:$100 sps:$4 sm:$0xff]  }
  0xa8   : > { %3473 = vmatmul.mubr.bf16.vlgmr.msra.gmra.mrb[64].mxu0 %v5942_v36  ;;  %v6022_v36 = vld [vmem:[%s6439_s6 + $0x30] ss:$100 sps:$4 sm:$0xff]  }
  0xa9   : > { %3570 = vmatmul.mubr.bf16.vlgmr.msra.gmra.mrb[64].mxu1 %v5945_v37  ;;  %5278 = vmatpush3.bf16.msra.mxu0 %v5950_v38  ;;  %v6025_v37 = vld [vmem:[%s6439_s6 + $0x38] ss:$100 sps:$4 sm:$0xff]   ;;  %v6030_v38 = vld [vmem:[%s7477_s1 + $0x400] sm:$0xff]  }
  0xaa   : > { %5342 = vmatpush3.bf16.msra.mxu1 %v5951_v39  ;;  %3480 = vmatprep.mubr.bf16.mxu0 %v5952_v40  ;;  %v6031_v39 = vld [vmem:[%s7477_s1 + $0x480] sm:$0xff]  }
  0xab   : > { %3577 = vmatprep.mubr.bf16.mxu1 %v5954_v41  ;;  %5279 = vmatprep.subr.bf16.mxu0 %v5958_v42  ;;  %v6032_v40 = vld [vmem:[%s6439_s6 + $0xfc] ss:$100 sps:$4 sm:$0xff]   ;;  %v6034_v41 = vld [vmem:[%s6439_s6 + $0x104] ss:$100 sps:$4 sm:$0xff]  }
  0xac   : > { %5343 = vmatprep.subr.bf16.mxu1 %v5959_v43  ;;  %v6038_v42 = vld [vmem:[%s7477_s1 + $0x448] sm:$0xff]  }
  0xad   : > { %5280 = vmatpush3.bf16.msra.mxu0 %v5960_v44  ;;  %v6039_v43 = vld [vmem:[%s7477_s1 + $0x4c8] sm:$0xff]  }
  0xae   : > { %5344 = vmatpush3.bf16.msra.mxu1 %v5961_v45  ;;  %5281 = vmatprep.subr.bf16.mxu0 %v5968_v47  ;;  %v6040_v44 = vld [vmem:[%s7477_s1 + $0x408] sm:$0xff]   ;;  %v6048_v47 = vld [vmem:[%s7477_s1 + $0x450] sm:$0xff]  }
  0xaf   : > { %5345 = vmatprep.subr.bf16.mxu1 %v5969_v50  ;;  %v6041_v45 = vld [vmem:[%s7477_s1 + $0x488] sm:$0xff]  }
  0xb0   : > { %3481 = vmatmul.mubr.bf16.gmra.mrb[68].mxu0 %v5956_v46  ;;  %v6036_v46 = vld [vmem:[%s6439_s6 + $0xf8] ss:$100 sps:$4 sm:$0xff]   ;;  %v6042_v50 = vld [vmem:[%s6439_s6 + $0x1c4] ss:$100 sps:$4 sm:$0xff]  }
  0xb1   : > { %3578 = vmatmul.mubr.bf16.gmra.mrb[68].mxu1 %v5957_v48  ;;  %3488 = vmatprep.mubr.bf16.mxu0 %v5962_v49  ;;  %v6049_v48 = vld [vmem:[%s7477_s1 + $0x4d0] sm:$0xff]   ;;  %v6037_v49 = vld [vmem:[%s6439_s6 + $0x100] ss:$100 sps:$4 sm:$0xff]  }
  0xb2   : > { %3585 = vmatprep.mubr.bf16.mxu1 %v5964_v51  ;;  %5282 = vmatpush3.bf16.msra.mxu0 %v5970_v52  ;;  %v6044_v51 = vld [vmem:[%s6439_s6 + $0x1cc] ss:$100 sps:$4 sm:$0xff]  }
  0xb3   : > { %5346 = vmatpush3.bf16.msra.mxu1 %v5971_v53  ;;  %5283 = vmatprep.subr.bf16.mxu0 %v5978_v54  ;;  %v6050_v52 = vld [vmem:[%s7477_s1 + $0x410] sm:$0xff]   ;;  %v6058_v54 = vld [vmem:[%s7477_s1 + $0x458] sm:$0xff]  }
  0xb4   : > { %5347 = vmatprep.subr.bf16.mxu1 %v5979_v55  ;;  %v6051_v53 = vld [vmem:[%s7477_s1 + $0x490] sm:$0xff]   ;;  %v6059_v55 = vld [vmem:[%s7477_s1 + $0x4d8] sm:$0xff]  }
  0xb6   : > { %5284 = vmatpush3.bf16.msra.mxu0 %v5980_v57  ;;  %v6046_v57 = vld [vmem:[%s6439_s6 + $0x1c0] ss:$100 sps:$4 sm:$0xff]  }
  0xb7   : > { %5348 = vmatpush3.bf16.msra.mxu1 %v5981_v58  ;;  %5285 = vmatprep.subr.bf16.mxu0 %v5988_v61  ;;  %v6061_v58 = vld [vmem:[%s7477_s1 + $0x498] sm:$0xff]   ;;  %v6068_v61 = vld [vmem:[%s7477_s1 + $0x460] sm:$0xff]  }
  0xb8   : > { %3489 = vmatmul.mubr.bf16.gmra.mrb[72].mxu0 %v5966_v56  ;;  %5349 = vmatprep.subr.bf16.mxu1 %v5989_v63  ;;  %v6060_v56 = vld [vmem:[%s7477_s1 + $0x418] sm:$0xff]  }
  0xb9   : > { %3586 = vmatmul.mubr.bf16.gmra.mrb[72].mxu1 %v5967_v59  ;;  %3496 = vmatprep.mubr.bf16.mxu0 %v5972_v60  ;;  %v6047_v59 = vld [vmem:[%s6439_s6 + $0x1c8] ss:$100 sps:$4 sm:$0xff]   ;;  %v6054_v63 = vld [vmem:[%s6439_s6 + $0x294] ss:$100 sps:$4 sm:$0xff]  }
  0xba   : > { %3593 = vmatprep.mubr.bf16.mxu1 %v5974_v62  ;;  %5286 = vmatpush3.bf16.msra.mxu0 %v5990_v0  ;;  %v6052_v60 = vld [vmem:[%s6439_s6 + $0x28c] ss:$100 sps:$4 sm:$0xff]   ;;  %v6069_v62 = vld [vmem:[%s7477_s1 + $0x4e0] sm:$0xff]  }
  0xbb   : > { %5350 = vmatpush3.bf16.msra.mxu1 %v5991_v1  ;;  %5287 = vmatprep.subr.bf16.mxu0 %v5998_v2  ;;  %v6070_v0 = vld [vmem:[%s7477_s1 + $0x420] sm:$0xff]   ;;  %v6078_v2 = vld [vmem:[%s7477_s1 + $0x468] sm:$0xff]  }
  0xbc   : > { %5351 = vmatprep.subr.bf16.mxu1 %v5999_v3  ;;  %v6071_v1 = vld [vmem:[%s7477_s1 + $0x4a0] sm:$0xff]   ;;  %v6079_v3 = vld [vmem:[%s7477_s1 + $0x4e8] sm:$0xff]  }
  0xbe   : > { %5288 = vmatpush3.bf16.msra.mxu0 %v6000_v4  ;;  %v6914_v4 = vld [vmem:[%s7478_s2] ss:$0 sm:$0xff] }
  0xbf   : > { %5352 = vmatpush3.bf16.msra.mxu1 %v6001_v6  ;;  %5289 = vmatprep.subr.bf16.mxu0 %v6008_v9  ;;  %v6080_v6 = vld [vmem:[%s7477_s1 + $0x428] sm:$0xff]   ;;  %v6057_v9 = vld [vmem:[%s6439_s6 + $0x290] ss:$100 sps:$4 sm:$0xff]  }
  0xc0   : > { %3497 = vmatmul.mubr.bf16.gmra.mrb[76].mxu0 %v5976_v5  ;;  %5353 = vmatprep.subr.bf16.mxu1 %v6009_v10  ;;  %v6056_v5 = vld [vmem:[%s6439_s6 + $0x288] ss:$100 sps:$4 sm:$0xff]   ;;  %v6062_v10 = vld [vmem:[%s6439_s6 + $0x354] ss:$100 sps:$4 sm:$0xff]  }
  0xc1   : > { %3594 = vmatmul.mubr.bf16.gmra.mrb[76].mxu1 %v5977_v7  ;;  %3504 = vmatprep.mubr.bf16.mxu0 %v5982_v8  ;;  %v6081_v7 = vld [vmem:[%s7477_s1 + $0x4a8] sm:$0xff]  }
  0xc2   : > { %3601 = vmatprep.mubr.bf16.mxu1 %v5984_v11  ;;  %5290 = vmatpush3.bf16.msra.mxu0 %v6010_v12  ;;  %v6088_v11 = vld [vmem:[%s7477_s1 + $0x470] sm:$0xff]  }
  0xc3   : > { %5354 = vmatpush3.bf16.msra.mxu1 %v6011_v13  ;;  %5291 = vmatprep.subr.bf16.mxu0 %v6018_v14  ;;  %v6064_v14 = vld [vmem:[%s6439_s6 + $0x35c] ss:$100 sps:$4 sm:$0xff]  }
  0xc4   : > { %5355 = vmatprep.subr.bf16.mxu1 %v6019_v15  ;;  %v6089_v15 = vld [vmem:[%s7477_s1 + $0x4f0] sm:$0xff]  }
  0xc6   : > { %5292 = vmatpush3.bf16.msra.mxu0 %v6020_v17 }
  0xc7   : > { %5356 = vmatpush3.bf16.msra.mxu1 %v6021_v18  ;;  %5405 = vmatprep.subr.bf16.mxu0 %v6028_v22 }
  0xc8   : > { %3505 = vmatmul.mubr.bf16.gmra.mrb[80].mxu0 %v5986_v16  ;;  %5469 = vmatprep.subr.bf16.mxu1 %v6029_v23 }
  0xc9   : > { %3602 = vmatmul.mubr.bf16.gmra.mrb[80].mxu1 %v5987_v19  ;;  %3512 = vmatprep.mubr.bf16.mxu0 %v5992_v20  ;;  %v6090_v19 = vld [vmem:[%s7477_s1 + $0x430] sm:$0xff]  }
  0xca   : > { %3609 = vmatprep.mubr.bf16.mxu1 %v5994_v21  ;;  %v6091_v20 = vld [vmem:[%s7477_s1 + $0x4b0] sm:$0xff]  }
  0xd0   : > { %3513 = vmatmul.mubr.bf16.gmra.mrb[84].mxu0 %v5996_v24 }
  0xd1   : > { %3610 = vmatmul.mubr.bf16.gmra.mrb[84].mxu1 %v5997_v25  ;;  %3520 = vmatprep.mubr.bf16.mxu0 %v6002_v26 }
  0xd2   : > { %3617 = vmatprep.mubr.bf16.mxu1 %v6004_v27  ;;  %v6098_v27 = vld [vmem:[%s7477_s1 + $0x478] sm:$0xff]  }
  0xd8   : > { %3521 = vmatmul.mubr.bf16.gmra.mrb[88].mxu0 %v6006_v28 }
  0xd9   : > { %3618 = vmatmul.mubr.bf16.gmra.mrb[88].mxu1 %v6007_v29  ;;  %3528 = vmatprep.mubr.bf16.mxu0 %v6012_v30  ;;  %v6099_v29 = vld [vmem:[%s7477_s1 + $0x4f8] sm:$0xff]  }
  0xda   : > { %3625 = vmatprep.mubr.bf16.mxu1 %v6014_v31 }
  0xe0   : > { %3529 = vmatmul.mubr.bf16.gmra.mrb[92].mxu0 %v6016_v32  ;;  %v6066_v32 = vld [vmem:[%s6439_s6 + $0x350] ss:$100 sps:$4 sm:$0xff]  }
  0xe1   : > { %3626 = vmatmul.mubr.bf16.gmra.mrb[92].mxu1 %v6017_v33  ;;  %3666 = vmatprep.mubr.bf16.mxu0 %v6024_v34  ;;  %v6100_v33 = vld [vmem:[%s7477_s1 + $0x438] sm:$0xff]  }
  0xe2   : > { %3763 = vmatprep.mubr.bf16.mxu1 %v6027_v35 }
  0xe8   : > { %3667 = vmatmul.mubr.bf16.vlgmr.msra.gmra.mrb[96].mxu0 %v6022_v36  ;;  %v6067_v36 = vld [vmem:[%s6439_s6 + $0x358] ss:$100 sps:$4 sm:$0xff]  }
  0xe9   : > { %3764 = vmatmul.mubr.bf16.vlgmr.msra.gmra.mrb[96].mxu1 %v6025_v37  ;;  %5406 = vmatpush3.bf16.msra.mxu0 %v6030_v38  ;;  %v6072_v37 = vld [vmem:[%s6439_s6 + $0x41c] ss:$100 sps:$4 sm:$0xff]  }
  0xea   : > { %5470 = vmatpush3.bf16.msra.mxu1 %v6031_v39  ;;  %3674 = vmatprep.mubr.bf16.mxu0 %v6032_v40  ;;  %v6101_v38 = vld [vmem:[%s7477_s1 + $0x4b8] sm:$0xff]   ;;  %v6108_v39 = vld [vmem:[%s7477_s1 + $0x540] sm:$0xff]  }
  0xeb   : > { %3771 = vmatprep.mubr.bf16.mxu1 %v6034_v41  ;;  %5407 = vmatprep.subr.bf16.mxu0 %v6038_v42  ;;  %v6109_v40 = vld [vmem:[%s7477_s1 + $0x5c0] sm:$0xff]  }
  0xec   : > { %5471 = vmatprep.subr.bf16.mxu1 %v6039_v43 }
  0xed   : > { %5408 = vmatpush3.bf16.msra.mxu0 %v6040_v44 }
  0xee   : > { %5472 = vmatpush3.bf16.msra.mxu1 %v6041_v45  ;;  %5409 = vmatprep.subr.bf16.mxu0 %v6048_v47 }
  0xef   : > { %5473 = vmatprep.subr.bf16.mxu1 %v6049_v48 }
  0xf0   : > { %3675 = vmatmul.mubr.bf16.gmra.mrb[100].mxu0 %v6036_v46 }
  0xf1   : > { %3772 = vmatmul.mubr.bf16.gmra.mrb[100].mxu1 %v6037_v49  ;;  %3682 = vmatprep.mubr.bf16.mxu0 %v6042_v50  ;;  %v6074_v49 = vld [vmem:[%s6439_s6 + $0x424] ss:$100 sps:$4 sm:$0xff]  }
  0xf2   : > { %3779 = vmatprep.mubr.bf16.mxu1 %v6044_v51  ;;  %5410 = vmatpush3.bf16.msra.mxu0 %v6050_v52 }
  0xf3   : > { %5474 = vmatpush3.bf16.msra.mxu1 %v6051_v53  ;;  %5411 = vmatprep.subr.bf16.mxu0 %v6058_v54 }
  0xf4   : > { %5475 = vmatprep.subr.bf16.mxu1 %v6059_v55 }
  0xf6   : > { %5412 = vmatpush3.bf16.msra.mxu0 %v6060_v56  ;;  %v6076_v56 = vld [vmem:[%s6439_s6 + $0x418] ss:$100 sps:$4 sm:$0xff]  }
  0xf7   : > { %5476 = vmatpush3.bf16.msra.mxu1 %v6061_v58  ;;  %5413 = vmatprep.subr.bf16.mxu0 %v6068_v61 }
  0xf8   : > { %3683 = vmatmul.mubr.bf16.gmra.mrb[104].mxu0 %v6046_v57  ;;  %5477 = vmatprep.subr.bf16.mxu1 %v6069_v62 }
  0xf9   : > { %3780 = vmatmul.mubr.bf16.gmra.mrb[104].mxu1 %v6047_v59  ;;  %3690 = vmatprep.mubr.bf16.mxu0 %v6052_v60  ;;  %v6077_v59 = vld [vmem:[%s6439_s6 + $0x420] ss:$100 sps:$4 sm:$0xff]  }
  0xfa   : > { %3787 = vmatprep.mubr.bf16.mxu1 %v6054_v63  ;;  %5414 = vmatpush3.bf16.msra.mxu0 %v6070_v0  ;;  %v6082_v60 = vld [vmem:[%s6439_s6 + $0x4e4] ss:$100 sps:$4 sm:$0xff]  }
  0xfb   : > { %v4909_v8 = vpop.f32.mrb[0].mxu0  ;;  %5478 = vmatpush3.bf16.msra.mxu1 %v6071_v1  ;;  %5415 = vmatprep.subr.bf16.mxu0 %v6078_v2  ;;  %v6084_v2 = vld [vmem:[%s6439_s6 + $0x4ec] ss:$100 sps:$4 sm:$0xff]  }
  0xfc   : > { %v4973_v12 = vpop.f32.mrb[0].mxu1  ;;  %v4910_v13 = vpop.f32.mrb[1].mxu0  ;;  %5479 = vmatprep.subr.bf16.mxu1 %v6079_v3 }
  0xfd   : > { %v4911_v16 = vadd.f32 %v4910_v13, %v4909_v8  ;;  %v4974_v17 = vpop.f32.mrb[1].mxu1  ;;  %v4912_v18 = vpop.f32.mrb[2].mxu0  ;;  %v6086_v13 = vld [vmem:[%s6439_s6 + $0x4e0] ss:$100 sps:$4 sm:$0xff]  }
  0xfe   : > { %v4975_v21 = vadd.f32 %v4974_v17, %v4973_v12  ;;  %v4976_v22 = vpop.f32.mrb[2].mxu1  ;;  %v4913_v23 = vpop.f32.mrb[3].mxu0  ;;  %5416 = vmatpush3.bf16.msra.mxu0 %v6080_v6  ;;  %v6092_v17 = vld [vmem:[%s6439_s6 + $0x5ac] ss:$100 sps:$4 sm:$0xff]  }
  0xff   : > { %v3087_v24 = vadd.f32 %v4911_v16, %v6914_v4  ;;  %v4914_v25 = vadd.f32 %v4913_v23, %v4912_v18  ;;  %v4977_v26 = vpop.f32.mrb[3].mxu1  ;;  %5480 = vmatpush3.bf16.msra.mxu1 %v6081_v7  ;;  %5417 = vmatprep.subr.bf16.mxu0 %v6088_v11  ;;  %v6087_v16 = vld [vmem:[%s6439_s6 + $0x4e8] ss:$100 sps:$4 sm:$0xff]  }
 0x100   : > { %v4978_v28 = vadd.f32 %v4977_v26, %v4976_v22  ;;  %3691 = vmatmul.mubr.bf16.gmra.mrb[108].mxu0 %v6056_v5  ;;  %5481 = vmatprep.subr.bf16.mxu1 %v6089_v15 }
 0x101   : > { %v6945_v30 = vadd.f32 %v4975_v21, %v3087_v24  ;;  %v3090_v31 = vadd.f32 %v4914_v25, %v6914_v4  ;;  %3788 = vmatmul.mubr.bf16.gmra.mrb[108].mxu1 %v6057_v9  ;;  %3698 = vmatprep.mubr.bf16.mxu0 %v6062_v10 }
 0x102   : > { %3795 = vmatprep.mubr.bf16.mxu1 %v6064_v14  ;;  %5418 = vmatpush3.bf16.msra.mxu0 %v6090_v19 }
 0x103   : > { %v6952_v34 = vadd.f32 %v4978_v28, %v3090_v31  ;;  %v4915_v35 = vpop.f32.mrb[4].mxu0  ;;  %5482 = vmatpush3.bf16.msra.mxu1 %v6091_v20  ;;  %5419 = vmatprep.subr.bf16.mxu0 %v6098_v27  ;;  %v6094_v20 = vld [vmem:[%s6439_s6 + $0x5b4] ss:$100 sps:$4 sm:$0xff]  }
 0x104   : > { %v4979_v41 = vpop.f32.mrb[4].mxu1  ;;  %v4916_v42 = vpop.f32.mrb[5].mxu0  ;;  %5483 = vmatprep.subr.bf16.mxu1 %v6099_v29 }
 0x105   : > { %v4917_v43 = vadd.f32 %v4916_v42, %v4915_v35  ;;  %v4980_v44 = vpop.f32.mrb[5].mxu1  ;;  %v4918_v45 = vpop.f32.mrb[6].mxu0  ;;  %v6096_v35 = vld [vmem:[%s6439_s6 + $0x5a8] ss:$100 sps:$4 sm:$0xff]  }
 0x106   : > { %v4981_v46 = vadd.f32 %v4980_v44, %v4979_v41  ;;  %v4982_v47 = vpop.f32.mrb[6].mxu1  ;;  %v4919_v48 = vpop.f32.mrb[7].mxu0  ;;  %5420 = vmatpush3.bf16.msra.mxu0 %v6100_v33  ;;  %v6104_v41 = vld [vmem:[%s6439_s6 + $0x44] ss:$100 sps:$4 sm:$0xff]  }
 0x107   : > { %v3095_v50 = vadd.f32 %v4917_v43, %v6914_v4  ;;  %v4920_v51 = vadd.f32 %v4919_v48, %v4918_v45  ;;  %v4983_v52 = vpop.f32.mrb[7].mxu1  ;;  %5484 = vmatpush3.bf16.msra.mxu1 %v6101_v38  ;;  %5533 = vmatprep.subr.bf16.mxu0 %v6108_v39  ;;  %v6097_v38 = vld [vmem:[%s6439_s6 + $0x5b0] ss:$100 sps:$4 sm:$0xff]  }
 0x108   : > { %v4984_v53 = vadd.f32 %v4983_v52, %v4982_v47  ;;  %3699 = vmatmul.mubr.bf16.gmra.mrb[112].mxu0 %v6066_v32  ;;  %5597 = vmatprep.subr.bf16.mxu1 %v6109_v40  ;;  %v6107_v48 = vld [vmem:[%s6439_s6 + $0x4c] ss:$100 sps:$4 sm:$0xff]  }
 0x109   : > { %v6967_v54 = vadd.f32 %v4981_v46, %v3095_v50  ;;  %v3098_v55 = vadd.f32 %v4920_v51, %v6914_v4  ;;  %3796 = vmatmul.mubr.bf16.gmra.mrb[112].mxu1 %v6067_v36  ;;  %3706 = vmatprep.mubr.bf16.mxu0 %v6072_v37 }
 0x10a   : > { %3803 = vmatprep.mubr.bf16.mxu1 %v6074_v49 }
 0x10b   : > { %v6971_v57 = vadd.f32 %v4984_v53, %v3098_v55  ;;  %v4921_v58 = vpop.f32.mrb[8].mxu0 }
 0x10c   : > { %v4985_v61 = vpop.f32.mrb[8].mxu1  ;;  %v4922_v62 = vpop.f32.mrb[9].mxu0 }
 0x10d   : > { %v4923_v63 = vadd.f32 %v4922_v62, %v4921_v58  ;;  %v4986_v0 = vpop.f32.mrb[9].mxu1  ;;  %v4924_v1 = vpop.f32.mrb[10].mxu0 }
 0x10e   : > { %v4987_v3 = vadd.f32 %v4986_v0, %v4985_v61  ;;  %v4988_v5 = vpop.f32.mrb[10].mxu1  ;;  %v4925_v6 = vpop.f32.mrb[11].mxu0 }
 0x10f   : > { %v3103_v7 = vadd.f32 %v4923_v63, %v6914_v4  ;;  %v4926_v8 = vadd.f32 %v4925_v6, %v4924_v1  ;;  %v4989_v9 = vpop.f32.mrb[11].mxu1  ;;  %v6110_v63 = vld [vmem:[%s7477_s1 + $0x500] sm:$0xff]  }
 0x110   : > { %v4990_v10 = vadd.f32 %v4989_v9, %v4988_v5  ;;  %3707 = vmatmul.mubr.bf16.gmra.mrb[116].mxu0 %v6076_v56  ;;  %v6102_v56 = vld [vmem:[%s6439_s6 + $0x40] ss:$100 sps:$4 sm:$0xff]   ;;  %v6114_v9 = vld [vmem:[%s6439_s6 + $0x114] ss:$100 sps:$4 sm:$0xff]  }
 0x111   : > { %v6977_v11 = vadd.f32 %v4987_v3, %v3103_v7  ;;  %v3106_v12 = vadd.f32 %v4926_v8, %v6914_v4  ;;  %3804 = vmatmul.mubr.bf16.gmra.mrb[116].mxu1 %v6077_v59  ;;  %3714 = vmatprep.mubr.bf16.mxu0 %v6082_v60  ;;  %v6105_v60 = vld [vmem:[%s6439_s6 + $0x48] ss:$100 sps:$4 sm:$0xff]   ;;  %v6111_v8 = vld [vmem:[%s7477_s1 + $0x580] sm:$0xff]  }
 0x112   : > { %3811 = vmatprep.mubr.bf16.mxu1 %v6084_v2  ;;  %v6112_v3 = vld [vmem:[%s6439_s6 + $0x10c] ss:$100 sps:$4 sm:$0xff]  }
 0x113   : > { %v6981_v14 = vadd.f32 %v4990_v10, %v3106_v12  ;;  %v4927_v15 = vpop.f32.mrb[12].mxu0  ;;  %v6118_v10 = vld [vmem:[%s7477_s1 + $0x548] sm:$0xff]  }
 0x114   : > { %v4991_v18 = vpop.f32.mrb[12].mxu1  ;;  %v4928_v19 = vpop.f32.mrb[13].mxu0 }
 0x115   : > { %v4929_v21 = vadd.f32 %v4928_v19, %v4927_v15  ;;  %v4992_v22 = vpop.f32.mrb[13].mxu1  ;;  %v4930_v23 = vpop.f32.mrb[14].mxu0 }
 0x116   : > { %v4993_v24 = vadd.f32 %v4992_v22, %v4991_v18  ;;  %v4994_v25 = vpop.f32.mrb[14].mxu1  ;;  %v4931_v26 = vpop.f32.mrb[15].mxu0  ;;  %v6120_v18 = vld [vmem:[%s7477_s1 + $0x508] sm:$0xff]  }
 0x117   : > { %v3111_v27 = vadd.f32 %v4929_v21, %v6914_v4  ;;  %v4932_v28 = vadd.f32 %v4931_v26, %v4930_v23  ;;  %v4995_v29 = vpop.f32.mrb[15].mxu1  ;;  %v6121_v21 = vld [vmem:[%s7477_s1 + $0x588] sm:$0xff]   ;;  %v6128_v23 = vld [vmem:[%s7477_s1 + $0x550] sm:$0xff]  }
 0x118   : > { %v4996_v31 = vadd.f32 %v4995_v29, %v4994_v25  ;;  %3715 = vmatmul.mubr.bf16.gmra.mrb[120].mxu0 %v6086_v13  ;;  %v6116_v22 = vld [vmem:[%s6439_s6 + $0x108] ss:$100 sps:$4 sm:$0xff]   ;;  %v6117_v26 = vld [vmem:[%s6439_s6 + $0x110] ss:$100 sps:$4 sm:$0xff]  }
 0x119   : > { %v6987_v32 = vadd.f32 %v4993_v24, %v3111_v27  ;;  %v3114_v33 = vadd.f32 %v4932_v28, %v6914_v4  ;;  %3812 = vmatmul.mubr.bf16.gmra.mrb[120].mxu1 %v6087_v16  ;;  %3722 = vmatprep.mubr.bf16.mxu0 %v6092_v17  ;;  %v6119_v16 = vld [vmem:[%s7477_s1 + $0x5c8] sm:$0xff]   ;;  %v6129_v27 = vld [vmem:[%s7477_s1 + $0x5d0] sm:$0xff]  }
 0x11a   : > { %3819 = vmatprep.mubr.bf16.mxu1 %v6094_v20 }
 0x11b   : > { %v6991_v36 = vadd.f32 %v4996_v31, %v3114_v33  ;;  %v4933_v37 = vpop.f32.mrb[16].mxu0  ;;  %v6122_v31 = vld [vmem:[%s6439_s6 + $0x1d4] ss:$100 sps:$4 sm:$0xff]  }
 0x11c   : > { %v4997_v39 = vpop.f32.mrb[16].mxu1  ;;  %v4934_v40 = vpop.f32.mrb[17].mxu0 }
 0x11d   : > { %v4935_v42 = vadd.f32 %v4934_v40, %v4933_v37  ;;  %v4998_v43 = vpop.f32.mrb[17].mxu1  ;;  %v4936_v44 = vpop.f32.mrb[18].mxu0  ;;  %v6131_v40 = vld [vmem:[%s7477_s1 + $0x590] sm:$0xff]  }
 0x11e   : > { %v4999_v45 = vadd.f32 %v4998_v43, %v4997_v39  ;;  %v5000_v46 = vpop.f32.mrb[18].mxu1  ;;  %v4937_v47 = vpop.f32.mrb[19].mxu0  ;;  %v6130_v39 = vld [vmem:[%s7477_s1 + $0x510] sm:$0xff]  }
 0x11f   : > { %v3119_v49 = vadd.f32 %v4935_v42, %v6914_v4  ;;  %v4938_v50 = vadd.f32 %v4937_v47, %v4936_v44  ;;  %v5001_v51 = vpop.f32.mrb[19].mxu1  ;;  %v6138_v47 = vld [vmem:[%s7477_s1 + $0x558] sm:$0xff]  }
 0x120   : > { %v5002_v52 = vadd.f32 %v5001_v51, %v5000_v46  ;;  %3723 = vmatmul.mubr.bf16.gmra.mrb[124].mxu0 %v6096_v35 }
 0x121   : > { %v6997_v53 = vadd.f32 %v4999_v45, %v3119_v49  ;;  %v3122_v55 = vadd.f32 %v4938_v50, %v6914_v4  ;;  %3820 = vmatmul.mubr.bf16.gmra.mrb[124].mxu1 %v6097_v38  ;;  %3860 = vmatprep.mubr.bf16.mxu0 %v6104_v41  ;;  %v6124_v38 = vld [vmem:[%s6439_s6 + $0x1dc] ss:$100 sps:$4 sm:$0xff]  }
 0x122   : > { %3957 = vmatprep.mubr.bf16.mxu1 %v6107_v48  ;;  %v6139_v49 = vld [vmem:[%s7477_s1 + $0x5d8] sm:$0xff]  }
 0x123   : > { %v7001_v58 = vadd.f32 %v5002_v52, %v3122_v55  ;;  %v4939_v59 = vpop.f32.mrb[20].mxu0  ;;  %v6126_v52 = vld [vmem:[%s6439_s6 + $0x1d0] ss:$100 sps:$4 sm:$0xff]   ;;  %v6140_v55 = vld [vmem:[%s7477_s1 + $0x518] sm:$0xff]  }
 0x124   : > { %v5003_v61 = vpop.f32.mrb[20].mxu1  ;;  %v4940_v62 = vpop.f32.mrb[21].mxu0 }
 0x125   : > { %v4941_v0 = vadd.f32 %v4940_v62, %v4939_v59  ;;  %v5004_v1 = vpop.f32.mrb[21].mxu1  ;;  %v4942_v2 = vpop.f32.mrb[22].mxu0  ;;  %v6141_v62 = vld [vmem:[%s7477_s1 + $0x598] sm:$0xff]  }
 0x126   : > { %v5005_v5 = vadd.f32 %v5004_v1, %v5003_v61  ;;  %v5006_v6 = vpop.f32.mrb[22].mxu1  ;;  %v4943_v7 = vpop.f32.mrb[23].mxu0  ;;  %v6132_v61 = vld [vmem:[%s6439_s6 + $0x29c] ss:$100 sps:$4 sm:$0xff]  }
 0x127   : > { %v3127_v12 = vadd.f32 %v4941_v0, %v6914_v4  ;;  %v4944_v13 = vadd.f32 %v4943_v7, %v4942_v2  ;;  %v5007_v15 = vpop.f32.mrb[23].mxu1  ;;  %v6134_v2 = vld [vmem:[%s6439_s6 + $0x2a4] ss:$100 sps:$4 sm:$0xff]  }
 0x128   : > { %v5008_v17 = vadd.f32 %v5007_v15, %v5006_v6  ;;  %3861 = vmatmul.mubr.bf16.vlgmr.msra.gmra.mrb[128].mxu0 %v6102_v56 }
 0x129   : > { %v7022_v19 = vadd.f32 %v5005_v5, %v3127_v12  ;;  %v3130_v20 = vadd.f32 %v4944_v13, %v6914_v4  ;;  %3958 = vmatmul.mubr.bf16.vlgmr.msra.gmra.mrb[128].mxu1 %v6105_v60  ;;  %5534 = vmatpush3.bf16.msra.mxu0 %v6110_v63  ;;  %v6127_v60 = vld [vmem:[%s6439_s6 + $0x1d8] ss:$100 sps:$4 sm:$0xff]   ;;  %v6148_v63 = vld [vmem:[%s7477_s1 + $0x560] sm:$0xff]  }
 0x12a   : > { %5598 = vmatpush3.bf16.msra.mxu1 %v6111_v8  ;;  %3868 = vmatprep.mubr.bf16.mxu0 %v6112_v3  ;;  %v6149_v3 = vld [vmem:[%s7477_s1 + $0x5e0] sm:$0xff]  }
 0x12b   : > { %v7032_v24 = vadd.f32 %v5008_v17, %v3130_v20  ;;  %v4945_v25 = vpop.f32.mrb[24].mxu0  ;;  %3965 = vmatprep.mubr.bf16.mxu1 %v6114_v9  ;;  %5535 = vmatprep.subr.bf16.mxu0 %v6118_v10  ;;  %v6150_v8 = vld [vmem:[%s7477_s1 + $0x520] sm:$0xff]  }
 0x12c   : > { %v5009_v28 = vpop.f32.mrb[24].mxu1  ;;  %v4946_v29 = vpop.f32.mrb[25].mxu0  ;;  %5599 = vmatprep.subr.bf16.mxu1 %v6119_v16  ;;  %v6151_v9 = vld [vmem:[%s7477_s1 + $0x5a0] sm:$0xff]  }
 0x12d   : > { %v4947_v33 = vadd.f32 %v4946_v29, %v4945_v25  ;;  %v5010_v35 = vpop.f32.mrb[25].mxu1  ;;  %v4948_v37 = vpop.f32.mrb[26].mxu0  ;;  %5536 = vmatpush3.bf16.msra.mxu0 %v6120_v18  ;;  %v6158_v18 = vld [vmem:[%s7477_s1 + $0x568] sm:$0xff]  }
 0x12e   : > { %v5011_v41 = vadd.f32 %v5010_v35, %v5009_v28  ;;  %v5012_v42 = vpop.f32.mrb[26].mxu1  ;;  %v4949_v43 = vpop.f32.mrb[27].mxu0  ;;  %5600 = vmatpush3.bf16.msra.mxu1 %v6121_v21  ;;  %5537 = vmatprep.subr.bf16.mxu0 %v6128_v23  ;;  %v6159_v21 = vld [vmem:[%s7477_s1 + $0x5e8] sm:$0xff]  }
 0x12f   : > { %v3135_v44 = vadd.f32 %v4947_v33, %v6914_v4  ;;  %v4950_v45 = vadd.f32 %v4949_v43, %v4948_v37  ;;  %v5013_v46 = vpop.f32.mrb[27].mxu1  ;;  %5601 = vmatprep.subr.bf16.mxu1 %v6129_v27  ;;  %v6160_v25 = vld [vmem:[%s7477_s1 + $0x528] sm:$0xff]  }
 0x130   : > { %v5014_v48 = vadd.f32 %v5013_v46, %v5012_v42  ;;  %3869 = vmatmul.mubr.bf16.gmra.mrb[132].mxu0 %v6116_v22  ;;  %v6161_v27 = vld [vmem:[%s7477_s1 + $0x5a8] sm:$0xff]  }
 0x131   : > { %v7053_v50 = vadd.f32 %v5011_v41, %v3135_v44  ;;  %v3138_v51 = vadd.f32 %v4950_v45, %v6914_v4  ;;  %3966 = vmatmul.mubr.bf16.gmra.mrb[132].mxu1 %v6117_v26  ;;  %3876 = vmatprep.mubr.bf16.mxu0 %v6122_v31  ;;  %v6136_v26 = vld [vmem:[%s6439_s6 + $0x298] ss:$100 sps:$4 sm:$0xff]   ;;  %v6137_v31 = vld [vmem:[%s6439_s6 + $0x2a0] ss:$100 sps:$4 sm:$0xff]  }
 0x132   : > { %3973 = vmatprep.mubr.bf16.mxu1 %v6124_v38  ;;  %5538 = vmatpush3.bf16.msra.mxu0 %v6130_v39  ;;  %v6142_v33 = vld [vmem:[%s6439_s6 + $0x364] ss:$100 sps:$4 sm:$0xff]   ;;  %v6144_v38 = vld [vmem:[%s6439_s6 + $0x36c] ss:$100 sps:$4 sm:$0xff]  }
 0x133   : > { %v7060_v56 = vadd.f32 %v5014_v48, %v3138_v51  ;;  %v4951_v59 = vpop.f32.mrb[28].mxu0  ;;  %5602 = vmatpush3.bf16.msra.mxu1 %v6131_v40  ;;  %5539 = vmatprep.subr.bf16.mxu0 %v6138_v47  ;;  %v6169_v39 = vld [vmem:[%s7477_s1 + $0x5f0] sm:$0xff]  }
 0x134   : > { %v5015_v0 = vpop.f32.mrb[28].mxu1  ;;  %v4952_v1 = vpop.f32.mrb[29].mxu0  ;;  %5603 = vmatprep.subr.bf16.mxu1 %v6139_v49  ;;  %v6170_v40 = vld [vmem:[%s7477_s1 + $0x530] sm:$0xff]  }
 0x135   : > { %v4953_v5 = vadd.f32 %v4952_v1, %v4951_v59  ;;  %v5016_v6 = vpop.f32.mrb[29].mxu1  ;;  %v4954_v7 = vpop.f32.mrb[30].mxu0  ;;  %v6171_v47 = vld [vmem:[%s7477_s1 + $0x5b0] sm:$0xff]   ;;  %v6179_v59 = vld [vmem:[%s7477_s1 + $0x5f8] sm:$0xff]  }
 0x136   : > { %v5017_v10 = vadd.f32 %v5016_v6, %v5015_v0  ;;  %v5018_v12 = vpop.f32.mrb[30].mxu1  ;;  %v4955_v13 = vpop.f32.mrb[31].mxu0  ;;  %5540 = vmatpush3.bf16.msra.mxu0 %v6140_v55  ;;  %v6152_v6 = vld [vmem:[%s6439_s6 + $0x42c] ss:$100 sps:$4 sm:$0xff]  }
 0x137   : > { %v3143_v15 = vadd.f32 %v4953_v5, %v6914_v4  ;;  %v4956_v16 = vadd.f32 %v4955_v13, %v4954_v7  ;;  %v5019_v17 = vpop.f32.mrb[31].mxu1  ;;  %5604 = vmatpush3.bf16.msra.mxu1 %v6141_v62  ;;  %5541 = vmatprep.subr.bf16.mxu0 %v6148_v63  ;;  %v6146_v62 = vld [vmem:[%s6439_s6 + $0x360] ss:$100 sps:$4 sm:$0xff]   ;;  %v6181_v63 = vld [vmem:[%s7477_s1 + $0x5b8] sm:$0xff]   ;;  %v6147_v5 = vld [vmem:[%s6439_s6 + $0x368] ss:$100 sps:$4 sm:$0xff]  }
 0x138   : > { %v5020_v20 = vadd.f32 %v5019_v17, %v5018_v12  ;;  %3877 = vmatmul.mubr.bf16.gmra.mrb[136].mxu0 %v6126_v52  ;;  %5605 = vmatprep.subr.bf16.mxu1 %v6149_v3  ;;  %v6178_v52 = vld [vmem:[%s7477_s1 + $0x578] sm:$0xff]  }
 0x139   : > { %v7087_v22 = vadd.f32 %v5017_v10, %v3143_v15  ;;  %v3146_v23 = vadd.f32 %v4956_v16, %v6914_v4  ;;  %3974 = vmatmul.mubr.bf16.gmra.mrb[136].mxu1 %v6127_v60  ;;  %3884 = vmatprep.mubr.bf16.mxu0 %v6132_v61  ;;  %v6168_v4 = vld [vmem:[%s7477_s1 + $0x570] sm:$0xff]   ;;  %v6180_v61 = vld [vmem:[%s7477_s1 + $0x538] sm:$0xff]  }
 0x13a   : > { %3981 = vmatprep.mubr.bf16.mxu1 %v6134_v2  ;;  %5542 = vmatpush3.bf16.msra.mxu0 %v6150_v8  ;;  %v6154_v15 = vld [vmem:[%s6439_s6 + $0x434] ss:$100 sps:$4 sm:$0xff]  }
 0x13b   : > { %v7097_v28 = vadd.f32 %v5020_v20, %v3146_v23  ;;  %v5037_v29 = vpop.f32.mrb[32].mxu0  ;;  %5606 = vmatpush3.bf16.msra.mxu1 %v6151_v9  ;;  %5543 = vmatprep.subr.bf16.mxu0 %v6158_v18 }
 0x13c   : > { %v5101_v35 = vpop.f32.mrb[32].mxu1  ;;  %v5038_v37 = vpop.f32.mrb[33].mxu0  ;;  %5607 = vmatprep.subr.bf16.mxu1 %v6159_v21 }
 0x13d   : > { %v5039_v41 = vadd.f32 %v5038_v37, %v5037_v29  ;;  %v5102_v42 = vpop.f32.mrb[33].mxu1  ;;  %v5040_v43 = vpop.f32.mrb[34].mxu0 }
 0x13e   : > { %v5103_v44 = vadd.f32 %v5102_v42, %v5101_v35  ;;  %v5104_v45 = vpop.f32.mrb[34].mxu1  ;;  %v5041_v46 = vpop.f32.mrb[35].mxu0  ;;  %5544 = vmatpush3.bf16.msra.mxu0 %v6160_v25 }
 0x13f   : > { %v3281_v48 = vadd.f32 %v5039_v41, %v6945_v30  ;;  %v5042_v49 = vadd.f32 %v5041_v46, %v5040_v43  ;;  %v5105_v51 = vpop.f32.mrb[35].mxu1  ;;  %5608 = vmatpush3.bf16.msra.mxu1 %v6161_v27  ;;  %5545 = vmatprep.subr.bf16.mxu0 %v6168_v4 }
 0x140   : > { %v5106_v55 = vadd.f32 %v5105_v51, %v5104_v45  ;;  %3885 = vmatmul.mubr.bf16.gmra.mrb[140].mxu0 %v6136_v26  ;;  %5609 = vmatprep.subr.bf16.mxu1 %v6169_v39  ;;  %v6156_v26 = vld [vmem:[%s6439_s6 + $0x428] ss:$100 sps:$4 sm:$0xff]   ;;  %v6167_v51 = vld [vmem:[%s6439_s6 + $0x4f8] ss:$100 sps:$4 sm:$0xff]  }
 0x141   : > { %v7121_v60 = vadd.f32 %v5103_v44, %v3281_v48  ;;  %v3284_v30 = vadd.f32 %v5042_v49, %v6952_v34  ;;  %3982 = vmatmul.mubr.bf16.gmra.mrb[140].mxu1 %v6137_v31  ;;  %3892 = vmatprep.mubr.bf16.mxu0 %v6142_v33  ;;  %v7136_v34 = vld [vmem:[%s7477_s1 + $0x600] sm:$0xff]   ;;  %v6157_v31 = vld [vmem:[%s6439_s6 + $0x430] ss:$100 sps:$4 sm:$0xff]  }
 0x142   : > { %3989 = vmatprep.mubr.bf16.mxu1 %v6144_v38  ;;  %5546 = vmatpush3.bf16.msra.mxu0 %v6170_v40  ;;  %v6162_v33 = vld [vmem:[%s6439_s6 + $0x4f4] ss:$100 sps:$4 sm:$0xff]   ;;  %v6164_v40 = vld [vmem:[%s6439_s6 + $0x4fc] ss:$100 sps:$4 sm:$0xff]  }
 0x143   : > { %v7131_v0 = vadd.f32 %v5106_v55, %v3284_v30  ;;  %v5043_v1 = vpop.f32.mrb[36].mxu0  ;;  %5610 = vmatpush3.bf16.msra.mxu1 %v6171_v47  ;;  %5547 = vmatprep.subr.bf16.mxu0 %v6178_v52  ;;  %v6166_v47 = vld [vmem:[%s6439_s6 + $0x4f0] ss:$100 sps:$4 sm:$0xff]   ;;  %v6172_v55 = vld [vmem:[%s6439_s6 + $0x5bc] ss:$100 sps:$4 sm:$0xff]  }
 0x144   : > { %v5107_v2 = vpop.f32.mrb[36].mxu1  ;;  %v5044_v3 = vpop.f32.mrb[37].mxu0  ;;  %5611 = vmatprep.subr.bf16.mxu1 %v6179_v59 }
 0x145   : > { %v5045_v7 = vadd.f32 %v5044_v3, %v5043_v1  ;;  %v5108_v8 = vpop.f32.mrb[37].mxu1  ;;  %v5046_v9 = vpop.f32.mrb[38].mxu0 }
 0x146   : > { %v5109_v10 = vadd.f32 %v5108_v8, %v5107_v2  ;;  %v5110_v12 = vpop.f32.mrb[38].mxu1  ;;  %v5047_v13 = vpop.f32.mrb[39].mxu0  ;;  %5548 = vmatpush3.bf16.msra.mxu0 %v6180_v61 }
 0x147   : > { %v3289_v16 = vadd.f32 %v5045_v7, %v6967_v54  ;;  %v5048_v17 = vadd.f32 %v5047_v13, %v5046_v9  ;;  %v5111_v18 = vpop.f32.mrb[39].mxu1  ;;  %5612 = vmatpush3.bf16.msra.mxu1 %v6181_v63  ;;  %5677 = vmatprep.subr.bf16.mxu0 %v7136_v34 }
 0x148   : > { %v5112_v20 = vadd.f32 %v5111_v18, %v5110_v12  ;;  %3893 = vmatmul.mubr.bf16.gmra.mrb[144].mxu0 %v6146_v62  ;;  %5709 = vmatprep.subr.bf16.mxu1 %v7136_v34  ;;  %v6174_v62 = vld [vmem:[%s6439_s6 + $0x5c4] ss:$100 sps:$4 sm:$0xff]  }
 0x149   : > { %v7144_v21 = vadd.f32 %v5109_v10, %v3289_v16  ;;  %v3292_v23 = vadd.f32 %v5048_v17, %v6971_v57  ;;  %3990 = vmatmul.mubr.bf16.gmra.mrb[144].mxu1 %v6147_v5  ;;  %3900 = vmatprep.mubr.bf16.mxu0 %v6152_v6  ;;  %v6177_v18 = vld [vmem:[%s6439_s6 + $0x5c0] ss:$100 sps:$4 sm:$0xff]  }
 0x14a   : > { %3997 = vmatprep.mubr.bf16.mxu1 %v6154_v15 }
 0x14b   : > { %v7147_v54 = vadd.f32 %v5112_v20, %v3292_v23  ;;  %v5049_v25 = vpop.f32.mrb[40].mxu0  ;;  %v6184_v20 = vld [vmem:[%s6439_s6 + $0x54] ss:$100 sps:$4 sm:$0xff]  }
 0x14c   : > { %v5113_v27 = vpop.f32.mrb[40].mxu1  ;;  %v5050_v29 = vpop.f32.mrb[41].mxu0 }
 0x14d   : > { %v5051_v4 = vadd.f32 %v5050_v29, %v5049_v25  ;;  %v5114_v35 = vpop.f32.mrb[41].mxu1  ;;  %v5052_v37 = vpop.f32.mrb[42].mxu0 }
 0x14e   : > { %v5115_v38 = vadd.f32 %v5114_v35, %v5113_v27  ;;  %v5116_v39 = vpop.f32.mrb[42].mxu1  ;;  %v5053_v57 = vpop.f32.mrb[43].mxu0 }
 0x14f   : > { %v3297_v41 = vadd.f32 %v5051_v4, %v6977_v11  ;;  %v5054_v42 = vadd.f32 %v5053_v57, %v5052_v37  ;;  %v5117_v43 = vpop.f32.mrb[43].mxu1 }
 0x150   : > { %v5118_v44 = vadd.f32 %v5117_v43, %v5116_v39  ;;  %3901 = vmatmul.mubr.bf16.gmra.mrb[148].mxu0 %v6156_v26  ;;  %v6185_v43 = vld [vmem:[%s6439_s6 + $0x58] ss:$100 sps:$4 sm:$0xff]  }
 0x151   : > { %v7154_v45 = vadd.f32 %v5115_v38, %v3297_v41  ;;  %v3300_v46 = vadd.f32 %v5054_v42, %v6981_v14  ;;  %3998 = vmatmul.mubr.bf16.gmra.mrb[148].mxu1 %v6157_v31  ;;  %3908 = vmatprep.mubr.bf16.mxu0 %v6162_v33 }
 0x152   : > { %4005 = vmatprep.mubr.bf16.mxu1 %v6164_v40 }
 0x153   : > { %v7158_v48 = vadd.f32 %v5118_v44, %v3300_v46  ;;  %v5055_v49 = vpop.f32.mrb[44].mxu0 }
 0x154   : > { %v5119_v52 = vpop.f32.mrb[44].mxu1  ;;  %v5056_v11 = vpop.f32.mrb[45].mxu0 }
 0x155   : > { %v5057_v59 = vadd.f32 %v5056_v11, %v5055_v49  ;;  %v5120_v30 = vpop.f32.mrb[45].mxu1  ;;  %v5058_v61 = vpop.f32.mrb[46].mxu0  ;;  %v6189_v49 = vld [vmem:[%s6439_s6 + $0x11c] ss:$100 sps:$4 sm:$0xff]   ;;  %v6191_v11 = vld [vmem:[%s6439_s6 + $0x124] ss:$100 sps:$4 sm:$0xff]  }
 0x156   : > { %v5121_v63 = vadd.f32 %v5120_v30, %v5119_v52  ;;  %v5122_v1 = vpop.f32.mrb[46].mxu1  ;;  %v5059_v2 = vpop.f32.mrb[47].mxu0 }
 0x157   : > { %v3305_v14 = vadd.f32 %v5057_v59, %v6987_v32  ;;  %v5060_v3 = vadd.f32 %v5059_v2, %v5058_v61  ;;  %v5123_v5 = vpop.f32.mrb[47].mxu1  ;;  %v6176_v32 = vld [vmem:[%s6439_s6 + $0x5b8] ss:$100 sps:$4 sm:$0xff]  }
 0x158   : > { %v5124_v6 = vadd.f32 %v5123_v5, %v5122_v1  ;;  %3909 = vmatmul.mubr.bf16.gmra.mrb[152].mxu0 %v6166_v47  ;;  %v6193_v2 = vld [vmem:[%s6439_s6 + $0x118] ss:$100 sps:$4 sm:$0xff]  }
 0x159   : > { %v7164_v7 = vadd.f32 %v5121_v63, %v3305_v14  ;;  %v3308_v8 = vadd.f32 %v5060_v3, %v6991_v36  ;;  %4006 = vmatmul.mubr.bf16.gmra.mrb[152].mxu1 %v6167_v51  ;;  %3916 = vmatprep.mubr.bf16.mxu0 %v6172_v55  ;;  %v6187_v36 = vld [vmem:[%s6439_s6 + $0x5c] ss:$100 sps:$4 sm:$0xff]   ;;  %v6195_v55 = vld [vmem:[%s7477_s1 + $0x608] sm:$0xff]  }
 0x15a   : > { %4013 = vmatprep.mubr.bf16.mxu1 %v6174_v62 }
 0x15b   : > { %v7167_v9 = vadd.f32 %v5124_v6, %v3308_v8  ;;  %v5061_v10 = vpop.f32.mrb[48].mxu0  ;;  %v6196_v6 = vld [vmem:[%s6439_s6 + $0x1e4] ss:$100 sps:$4 sm:$0xff]  }
 0x15c   : > { %v5125_v12 = vpop.f32.mrb[48].mxu1  ;;  %v5062_v13 = vpop.f32.mrb[49].mxu0 }
 0x15d   : > { %v5063_v15 = vadd.f32 %v5062_v13, %v5061_v10  ;;  %v5126_v16 = vpop.f32.mrb[49].mxu1  ;;  %v5064_v17 = vpop.f32.mrb[50].mxu0  ;;  %v6198_v13 = vld [vmem:[%s6439_s6 + $0x1ec] ss:$100 sps:$4 sm:$0xff]  }
 0x15e   : > { %v5127_v23 = vadd.f32 %v5126_v16, %v5125_v12  ;;  %v5128_v25 = vpop.f32.mrb[50].mxu1  ;;  %v5065_v26 = vpop.f32.mrb[51].mxu0 }
 0x15f   : > { %v3313_v27 = vadd.f32 %v5063_v15, %v6997_v53  ;;  %v5066_v29 = vadd.f32 %v5065_v26, %v5064_v17  ;;  %v5129_v31 = vpop.f32.mrb[51].mxu1  ;;  %v6182_v53 = vld [vmem:[%s6439_s6 + $0x50] ss:$100 sps:$4 sm:$0xff]   ;;  %v6209_v17 = vld [vmem:[%s7477_s1 + $0x618] sm:$0xff]   ;;  %v6216_v26 = vld [vmem:[%s7477_s1 + $0x620] sm:$0xff]  }
 0x160   : > { %v5130_v33 = vadd.f32 %v5129_v31, %v5128_v25  ;;  %3917 = vmatmul.mubr.bf16.gmra.mrb[156].mxu0 %v6176_v32 }
 0x161   : > { %v7174_v4 = vadd.f32 %v5127_v23, %v3313_v27  ;;  %v3316_v35 = vadd.f32 %v5066_v29, %v7001_v58  ;;  %4014 = vmatmul.mubr.bf16.gmra.mrb[156].mxu1 %v6177_v18  ;;  %4054 = vmatprep.mubr.bf16.mxu0 %v6184_v20  ;;  %v6200_v29 = vld [vmem:[%s6439_s6 + $0x1e0] ss:$100 sps:$4 sm:$0xff]  }
 0x162   : > { %4151 = vmatprep.mubr.bf16.mxu1 %v6187_v36 }
 0x163   : > { %v7177_v37 = vadd.f32 %v5130_v33, %v3316_v35  ;;  %v5067_v38 = vpop.f32.mrb[52].mxu0  ;;  %v6201_v35 = vld [vmem:[%s6439_s6 + $0x1e8] ss:$100 sps:$4 sm:$0xff]  }
 0x164   : > { %v5131_v39 = vpop.f32.mrb[52].mxu1  ;;  %v5068_v57 = vpop.f32.mrb[53].mxu0 }
 0x165   : > { %v5069_v40 = vadd.f32 %v5068_v57, %v5067_v38  ;;  %v5132_v41 = vpop.f32.mrb[53].mxu1  ;;  %v5070_v42 = vpop.f32.mrb[54].mxu0  ;;  %v6203_v38 = vld [vmem:[%s6439_s6 + $0x2ac] ss:$100 sps:$4 sm:$0xff]  }
 0x166   : > { %v5133_v44 = vadd.f32 %v5132_v41, %v5131_v39  ;;  %v5134_v46 = vpop.f32.mrb[54].mxu1  ;;  %v5071_v47 = vpop.f32.mrb[55].mxu0 }
 0x167   : > { %v3321_v58 = vadd.f32 %v5069_v40, %v7022_v19  ;;  %v5072_v51 = vadd.f32 %v5071_v47, %v5070_v42  ;;  %v5135_v52 = vpop.f32.mrb[55].mxu1  ;;  %v6202_v19 = vld [vmem:[%s7477_s1 + $0x610] sm:$0xff]  }
 0x168   : > { %v5136_v59 = vadd.f32 %v5135_v52, %v5134_v46  ;;  %4055 = vmatmul.mubr.bf16.vlgmr.msra.gmra.mrb[160].mxu0 %v6182_v53  ;;  %v6205_v40 = vld [vmem:[%s6439_s6 + $0x2b4] ss:$100 sps:$4 sm:$0xff]  }
 0x169   : > { %v7187_v30 = vadd.f32 %v5133_v44, %v3321_v58  ;;  %v3324_v61 = vadd.f32 %v5072_v51, %v7032_v24  ;;  %4152 = vmatmul.mubr.bf16.vlgmr.msra.gmra.mrb[160].mxu1 %v6185_v43  ;;  %5678 = vmatpush3.bf16.msra.mxu0 %v7136_v34  ;;  %v6223_v44 = vld [vmem:[%s7477_s1 + $0x628] sm:$0xff]   ;;  %v6230_v51 = vld [vmem:[%s7477_s1 + $0x630] sm:$0xff]  }
 0x16a   : > { %5717 = vmatpush3.bf16.msra.mxu1 %v7136_v34  ;;  %4062 = vmatprep.mubr.bf16.mxu0 %v6189_v49  ;;  %v6194_v34 = vld [vmem:[%s6439_s6 + $0x120] ss:$100 sps:$4 sm:$0xff]  }
 0x16b   : > { %v7195_v62 = vadd.f32 %v5136_v59, %v3324_v61  ;;  %v5073_v63 = vpop.f32.mrb[56].mxu0  ;;  %4159 = vmatprep.mubr.bf16.mxu1 %v6191_v11  ;;  %5679 = vmatprep.subr.bf16.mxu0 %v6195_v55 }
 0x16c   : > { %v5137_v1 = vpop.f32.mrb[56].mxu1  ;;  %v5074_v24 = vpop.f32.mrb[57].mxu0  ;;  %5710 = vmatprep.subr.bf16.mxu1 %v6195_v55 }
 0x16d   : > { %v5075_v14 = vadd.f32 %v5074_v24, %v5073_v63  ;;  %v5138_v3 = vpop.f32.mrb[57].mxu1  ;;  %v5076_v5 = vpop.f32.mrb[58].mxu0  ;;  %5680 = vmatpush3.bf16.msra.mxu0 %v6195_v55  ;;  %v6210_v63 = vld [vmem:[%s6439_s6 + $0x374] ss:$100 sps:$4 sm:$0xff]  }
 0x16e   : > { %v5139_v8 = vadd.f32 %v5138_v3, %v5137_v1  ;;  %v5140_v10 = vpop.f32.mrb[58].mxu1  ;;  %v5077_v12 = vpop.f32.mrb[59].mxu0  ;;  %5718 = vmatpush3.bf16.msra.mxu1 %v6195_v55  ;;  %5681 = vmatprep.subr.bf16.mxu0 %v6202_v19  ;;  %v6207_v55 = vld [vmem:[%s6439_s6 + $0x2a8] ss:$100 sps:$4 sm:$0xff]  }
 0x16f   : > { %v3329_v32 = vadd.f32 %v5075_v14, %v7053_v50  ;;  %v5078_v15 = vadd.f32 %v5077_v12, %v5076_v5  ;;  %v5141_v16 = vpop.f32.mrb[59].mxu1  ;;  %5711 = vmatprep.subr.bf16.mxu1 %v6202_v19  ;;  %v6212_v14 = vld [vmem:[%s6439_s6 + $0x37c] ss:$100 sps:$4 sm:$0xff]  }
 0x170   : > { %v5142_v18 = vadd.f32 %v5141_v16, %v5140_v10  ;;  %4063 = vmatmul.mubr.bf16.gmra.mrb[164].mxu0 %v6193_v2  ;;  %v6214_v16 = vld [vmem:[%s6439_s6 + $0x370] ss:$100 sps:$4 sm:$0xff]  }
 0x171   : > { %v7205_v20 = vadd.f32 %v5139_v8, %v3329_v32  ;;  %v3332_v23 = vadd.f32 %v5078_v15, %v7060_v56  ;;  %4160 = vmatmul.mubr.bf16.gmra.mrb[164].mxu1 %v6194_v34  ;;  %4070 = vmatprep.mubr.bf16.mxu0 %v6196_v6  ;;  %v6237_v6 = vld [vmem:[%s7477_s1 + $0x638] sm:$0xff]  }
 0x172   : > { %4167 = vmatprep.mubr.bf16.mxu1 %v6198_v13  ;;  %5682 = vmatpush3.bf16.msra.mxu0 %v6202_v19 }
 0x173   : > { %v7208_v50 = vadd.f32 %v5142_v18, %v3332_v23  ;;  %v5079_v25 = vpop.f32.mrb[60].mxu0  ;;  %5719 = vmatpush3.bf16.msra.mxu1 %v6202_v19  ;;  %5683 = vmatprep.subr.bf16.mxu0 %v6209_v17  ;;  %v6208_v19 = vld [vmem:[%s6439_s6 + $0x2b0] ss:$100 sps:$4 sm:$0xff]  }
 0x174   : > { %v5143_v36 = vpop.f32.mrb[60].mxu1  ;;  %v5080_v27 = vpop.f32.mrb[61].mxu0  ;;  %5712 = vmatprep.subr.bf16.mxu1 %v6209_v17 }
 0x175   : > { %v5081_v56 = vadd.f32 %v5080_v27, %v5079_v25  ;;  %v5144_v31 = vpop.f32.mrb[61].mxu1  ;;  %v5082_v33 = vpop.f32.mrb[62].mxu0  ;;  %v6217_v25 = vld [vmem:[%s6439_s6 + $0x43c] ss:$100 sps:$4 sm:$0xff]  }
 0x176   : > { %v5145_v39 = vadd.f32 %v5144_v31, %v5143_v36  ;;  %v5146_v57 = vpop.f32.mrb[62].mxu1  ;;  %v5083_v53 = vpop.f32.mrb[63].mxu0  ;;  %5684 = vmatpush3.bf16.msra.mxu0 %v6209_v17 }
 0x177   : > { %v3337_v41 = vadd.f32 %v5081_v56, %v7087_v22  ;;  %v5084_v42 = vadd.f32 %v5083_v53, %v5082_v33  ;;  %v5147_v43 = vpop.f32.mrb[63].mxu1  ;;  %5720 = vmatpush3.bf16.msra.mxu1 %v6209_v17  ;;  %5685 = vmatprep.subr.bf16.mxu0 %v6216_v26 }
 0x178   : > { %v5148_v46 = vadd.f32 %v5147_v43, %v5146_v57  ;;  %4071 = vmatmul.mubr.bf16.gmra.mrb[168].mxu0 %v6200_v29  ;;  %5713 = vmatprep.subr.bf16.mxu1 %v6216_v26  ;;  %v6219_v29 = vld [vmem:[%s6439_s6 + $0x444] ss:$100 sps:$4 sm:$0xff]  }
 0x179   : > { %v7221_v47 = vadd.f32 %v5145_v39, %v3337_v41  ;;  %v3340_v49 = vadd.f32 %v5084_v42, %v7097_v28  ;;  %4168 = vmatmul.mubr.bf16.gmra.mrb[168].mxu1 %v6201_v35  ;;  %4078 = vmatprep.mubr.bf16.mxu0 %v6203_v38  ;;  %v6221_v41 = vld [vmem:[%s6439_s6 + $0x438] ss:$100 sps:$4 sm:$0xff]  }
 0x17a   : > { %4175 = vmatprep.mubr.bf16.mxu1 %v6205_v40  ;;  %5686 = vmatpush3.bf16.msra.mxu0 %v6216_v26 }
 0x17b   : > { %v7224_v22 = vadd.f32 %v5148_v46, %v3340_v49  ;;  %v5165_v58 = vpop.f32.mrb[64].mxu0  ;;  %5721 = vmatpush3.bf16.msra.mxu1 %v6216_v26  ;;  %5687 = vmatprep.subr.bf16.mxu0 %v6223_v44  ;;  %v6222_v46 = vld [vmem:[%s6439_s6 + $0x440] ss:$100 sps:$4 sm:$0xff]  }
 0x17c   : > { %v5229_v52 = vpop.f32.mrb[64].mxu1  ;;  %v5166_v11 = vpop.f32.mrb[65].mxu0  ;;  %5714 = vmatprep.subr.bf16.mxu1 %v6223_v44  ;;  %v6224_v49 = vld [vmem:[%s6439_s6 + $0x504] ss:$100 sps:$4 sm:$0xff]  }
 0x17d   : > { %v5167_v28 = vadd.f32 %v5166_v11, %v5165_v58  ;;  %v5230_v59 = vpop.f32.mrb[65].mxu1  ;;  %v5168_v61 = vpop.f32.mrb[66].mxu0 }
 0x17e   : > { %v5231_v1 = vadd.f32 %v5230_v59, %v5229_v52  ;;  %v5232_v24 = vpop.f32.mrb[66].mxu1  ;;  %v5169_v2 = vpop.f32.mrb[67].mxu0  ;;  %5688 = vmatpush3.bf16.msra.mxu0 %v6223_v44 }
 0x17f   : > { %v3475_v3 = vadd.f32 %v5167_v28, %v7121_v60  ;;  %v5170_v5 = vadd.f32 %v5169_v2, %v5168_v61  ;;  %v5233_v34 = vpop.f32.mrb[67].mxu1  ;;  %5722 = vmatpush3.bf16.msra.mxu1 %v6223_v44  ;;  %5689 = vmatprep.subr.bf16.mxu0 %v6230_v51 }
 0x180   : > { %v5234_v8 = vadd.f32 %v5233_v34, %v5232_v24  ;;  %4079 = vmatmul.mubr.bf16.gmra.mrb[172].mxu0 %v6207_v55  ;;  %5715 = vmatprep.subr.bf16.mxu1 %v6230_v51  ;;  %v6229_v34 = vld [vmem:[%s6439_s6 + $0x508] ss:$100 sps:$4 sm:$0xff]  }
 0x181   : > { %v7237_v10 = vadd.f32 %v5231_v1, %v3475_v3  ;;  %v3478_v12 = vadd.f32 %v5170_v5, %v7131_v0  ;;  %4176 = vmatmul.mubr.bf16.gmra.mrb[172].mxu1 %v6208_v19  ;;  %4086 = vmatprep.mubr.bf16.mxu0 %v6210_v63  ;;  %v6215_v0 = vld [vmem:[%s6439_s6 + $0x378] ss:$100 sps:$4 sm:$0xff]  }
 0x182   : > { %4183 = vmatprep.mubr.bf16.mxu1 %v6212_v14  ;;  %5690 = vmatpush3.bf16.msra.mxu0 %v6230_v51 }
 0x183   : > { %v7240_v60 = vadd.f32 %v5234_v8, %v3478_v12  ;;  %v5171_v13 = vpop.f32.mrb[68].mxu0  ;;  %5723 = vmatpush3.bf16.msra.mxu1 %v6230_v51  ;;  %5691 = vmatprep.subr.bf16.mxu0 %v6237_v6 }
 0x184   : > { %v5235_v32 = vpop.f32.mrb[68].mxu1  ;;  %v5172_v15 = vpop.f32.mrb[69].mxu0  ;;  %5716 = vmatprep.subr.bf16.mxu1 %v6237_v6 }
 0x185   : > { %v5173_v17 = vadd.f32 %v5172_v15, %v5171_v13  ;;  %v5236_v18 = vpop.f32.mrb[69].mxu1  ;;  %v5174_v23 = vpop.f32.mrb[70].mxu0 }
 0x186   : > { %v5237_v26 = vadd.f32 %v5236_v18, %v5235_v32  ;;  %v5238_v36 = vpop.f32.mrb[70].mxu1  ;;  %v5175_v27 = vpop.f32.mrb[71].mxu0  ;;  %5692 = vmatpush3.bf16.msra.mxu0 %v6237_v6 }
 0x187   : > { %v3483_v56 = vadd.f32 %v5173_v17, %v7144_v21  ;;  %v5176_v31 = vadd.f32 %v5175_v27, %v5174_v23  ;;  %v5239_v33 = vpop.f32.mrb[71].mxu1  ;;  %5724 = vmatpush3.bf16.msra.mxu1 %v6237_v6  ;;  %v6231_v6 = vld [vmem:[%s6439_s6 + $0x5cc] ss:$100 sps:$4 sm:$0xff]  }
 0x188   : > { %v5240_v35 = vadd.f32 %v5239_v33, %v5238_v36  ;;  %4087 = vmatmul.mubr.bf16.gmra.mrb[176].mxu0 %v6214_v16  ;;  %v6238_v33 = vld [vmem:[%s6439_s6 + $0x60] ss:$100 sps:$4 sm:$0xff]  }
 0x189   : > { %v7247_v38 = vadd.f32 %v5237_v26, %v3483_v56  ;;  %v3486_v39 = vadd.f32 %v5176_v31, %v7147_v54  ;;  %4184 = vmatmul.mubr.bf16.gmra.mrb[176].mxu1 %v6215_v0  ;;  %4094 = vmatprep.mubr.bf16.mxu0 %v6217_v25  ;;  %v6226_v54 = vld [vmem:[%s6439_s6 + $0x50c] ss:$100 sps:$4 sm:$0xff]  }
 0x18a   : > { %4191 = vmatprep.mubr.bf16.mxu1 %v6219_v29  ;;  %v6236_v31 = vld [vmem:[%s6439_s6 + $0x5d0] ss:$100 sps:$4 sm:$0xff]  }
 0x18b   : > { %v7250_v57 = vadd.f32 %v5240_v35, %v3486_v39  ;;  %v5177_v53 = vpop.f32.mrb[72].mxu0 }
 0x18c   : > { %v5241_v40 = vpop.f32.mrb[72].mxu1  ;;  %v5178_v21 = vpop.f32.mrb[73].mxu0 }
 0x18d   : > { %v5179_v42 = vadd.f32 %v5178_v21, %v5177_v53  ;;  %v5242_v43 = vpop.f32.mrb[73].mxu1  ;;  %v5180_v44 = vpop.f32.mrb[74].mxu0 }
 0x18e   : > { %v5243_v58 = vadd.f32 %v5242_v43, %v5241_v40  ;;  %v5244_v51 = vpop.f32.mrb[74].mxu1  ;;  %v5181_v52 = vpop.f32.mrb[75].mxu0 }
 0x18f   : > { %v3491_v11 = vadd.f32 %v5179_v42, %v7154_v45  ;;  %v5182_v55 = vadd.f32 %v5181_v52, %v5180_v44  ;;  %v5245_v28 = vpop.f32.mrb[75].mxu1  ;;  %v6228_v45 = vld [vmem:[%s6439_s6 + $0x500] ss:$100 sps:$4 sm:$0xff]  }
 0x190   : > { %v5246_v59 = vadd.f32 %v5245_v28, %v5244_v51  ;;  %4095 = vmatmul.mubr.bf16.gmra.mrb[180].mxu0 %v6221_v41  ;;  %v6242_v28 = vld [vmem:[%s6439_s6 + $0x1f0] ss:$100 sps:$4 sm:$0xff]  }
 0x191   : > { %v7257_v61 = vadd.f32 %v5243_v58, %v3491_v11  ;;  %v3494_v19 = vadd.f32 %v5182_v55, %v7158_v48  ;;  %4192 = vmatmul.mubr.bf16.gmra.mrb[180].mxu1 %v6222_v46  ;;  %4102 = vmatprep.mubr.bf16.mxu0 %v6224_v49  ;;  %v6233_v48 = vld [vmem:[%s6439_s6 + $0x5d4] ss:$100 sps:$4 sm:$0xff]   ;;  %v6241_v55 = vld [vmem:[%s6439_s6 + $0x448] ss:$100 sps:$4 sm:$0xff]  }
 0x192   : > { %4199 = vmatprep.mubr.bf16.mxu1 %v6226_v54 }
 0x193   : > { %v7260_v63 = vadd.f32 %v5246_v59, %v3494_v19  ;;  %v5183_v1 = vpop.f32.mrb[76].mxu0 }
 0x194   : > { %v5247_v24 = vpop.f32.mrb[76].mxu1  ;;  %v5184_v2 = vpop.f32.mrb[77].mxu0 }
 0x195   : > { %v5185_v14 = vadd.f32 %v5184_v2, %v5183_v1  ;;  %v5248_v3 = vpop.f32.mrb[77].mxu1  ;;  %v5186_v5 = vpop.f32.mrb[78].mxu0 }
 0x196   : > { %v5249_v8 = vadd.f32 %v5248_v3, %v5247_v24  ;;  %v5250_v12 = vpop.f32.mrb[78].mxu1  ;;  %v5187_v13 = vpop.f32.mrb[79].mxu0 }
 0x197   : > { %v3499_v32 = vadd.f32 %v5185_v14, %v7164_v7  ;;  %v5188_v15 = vadd.f32 %v5187_v13, %v5186_v5  ;;  %v5251_v16 = vpop.f32.mrb[79].mxu1  ;;  %v6235_v7 = vld [vmem:[%s6439_s6 + $0x5c8] ss:$100 sps:$4 sm:$0xff]   ;;  %v6244_v13 = vld [vmem:[%s6439_s6 + $0x2b8] ss:$100 sps:$4 sm:$0xff]  }
 0x198   : > { %v5252_v17 = vadd.f32 %v5251_v16, %v5250_v12  ;;  %4103 = vmatmul.mubr.bf16.gmra.mrb[184].mxu0 %v6228_v45 }
 0x199   : > { %v7267_v18 = vadd.f32 %v5249_v8, %v3499_v32  ;;  %v3502_v23 = vadd.f32 %v5188_v15, %v7167_v9  ;;  %4200 = vmatmul.mubr.bf16.gmra.mrb[184].mxu1 %v6229_v34  ;;  %4110 = vmatprep.mubr.bf16.mxu0 %v6231_v6  ;;  %v6239_v9 = vld [vmem:[%s6439_s6 + $0x380] ss:$100 sps:$4 sm:$0xff]   ;;  %v6245_v15 = vld [vmem:[%s6439_s6 + $0x5d8] ss:$100 sps:$4 sm:$0xff]  }
 0x19a   : > { %4207 = vmatprep.mubr.bf16.mxu1 %v6233_v48 }
 0x19b   : > { %v7270_v0 = vadd.f32 %v5252_v17, %v3502_v23  ;;  %v5189_v25 = vpop.f32.mrb[80].mxu0 }
 0x19c   : > { %v5253_v26 = vpop.f32.mrb[80].mxu1  ;;  %v5190_v36 = vpop.f32.mrb[81].mxu0 }
 0x19d   : > { %v5191_v27 = vadd.f32 %v5190_v36, %v5189_v25  ;;  %v5254_v29 = vpop.f32.mrb[81].mxu1  ;;  %v5192_v56 = vpop.f32.mrb[82].mxu0 }
 0x19e   : > { %v5255_v35 = vadd.f32 %v5254_v29, %v5253_v26  ;;  %v5256_v39 = vpop.f32.mrb[82].mxu1  ;;  %v5193_v53 = vpop.f32.mrb[83].mxu0 }
 0x19f   : > { %v3507_v40 = vadd.f32 %v5191_v27, %v7174_v4  ;;  %v5194_v21 = vadd.f32 %v5193_v53, %v5192_v56  ;;  %v5257_v41 = vpop.f32.mrb[83].mxu1  ;;  %v6240_v4 = vld [vmem:[%s6439_s6 + $0x128] ss:$100 sps:$4 sm:$0xff]  }
 0x1a0   : > { %v5258_v42 = vadd.f32 %v5257_v41, %v5256_v39  ;;  %4111 = vmatmul.mubr.bf16.gmra.mrb[188].mxu0 %v6235_v7 }
 0x1a1   : > { %v7277_v43 = vadd.f32 %v5255_v35, %v3507_v40  ;;  %v3510_v44 = vadd.f32 %v5194_v21, %v7177_v37  ;;  %4208 = vmatmul.mubr.bf16.gmra.mrb[188].mxu1 %v6236_v31  ;;  %5693 = vmatprep.mubr.bf16.mxu0 %v6238_v33  ;;  %v6243_v37 = vld [vmem:[%s6439_s6 + $0x510] ss:$100 sps:$4 sm:$0xff]   ;;  %s4489_s6 = sshll.u32 %s7485_s23, 3 }
 0x1a2   : > { %5701 = vmatprep.mubr.bf16.mxu1 %v6239_v9  ;;  %s7449_s26 = scalar_lea.vmem %s7479_s3, %s4489_s6 }
 0x1a3   : > { %v7280_v46 = vadd.f32 %v5258_v42, %v3510_v44  ;;  %v5195_v49 = vpop.f32.mrb[84].mxu0 }
 0x1a4   : > { %v5259_v58 = vpop.f32.mrb[84].mxu1  ;;  %v5196_v51 = vpop.f32.mrb[85].mxu0 }
 0x1a5   : > { %v5197_v52 = vadd.f32 %v5196_v51, %v5195_v49  ;;  %v5260_v54 = vpop.f32.mrb[85].mxu1  ;;  %v5198_v11 = vpop.f32.mrb[86].mxu0 }
 0x1a6   : > { %v5261_v59 = vadd.f32 %v5260_v54, %v5259_v58  ;;  %v5262_v19 = vpop.f32.mrb[86].mxu1  ;;  %v5199_v1 = vpop.f32.mrb[87].mxu0 }
 0x1a7   : > { %v3515_v24 = vadd.f32 %v5197_v52, %v7187_v30  ;;  %v5200_v2 = vadd.f32 %v5199_v1, %v5198_v11  ;;  %v5263_v45 = vpop.f32.mrb[87].mxu1 }
 0x1a8   : > { %v5264_v14 = vadd.f32 %v5263_v45, %v5262_v19  ;;  %5694 = vmatmul.mubr.bf16.vlgmr.msra.gmra.mrb[192].mxu0 %v6240_v4 }
 0x1a9   : > { %v7287_v3 = vadd.f32 %v5261_v59, %v3515_v24  ;;  %v3518_v5 = vadd.f32 %v5200_v2, %v7195_v62  ;;  %5702 = vmatmul.mubr.bf16.vlgmr.msra.gmra.mrb[192].mxu1 %v6241_v55  ;;  %5697 = vmatprep.mubr.bf16.mxu0 %v6242_v28 }
 0x1aa   : > { %5705 = vmatprep.mubr.bf16.mxu1 %v6243_v37 }
 0x1ab   : > { %v7290_v34 = vadd.f32 %v5264_v14, %v3518_v5  ;;  %v5201_v6 = vpop.f32.mrb[88].mxu0 }
 0x1ac   : > { %v5265_v8 = vpop.f32.mrb[88].mxu1  ;;  %v5202_v12 = vpop.f32.mrb[89].mxu0 }
 0x1ad   : > { %v5203_v48 = vadd.f32 %v5202_v12, %v5201_v6  ;;  %v5266_v30 = vpop.f32.mrb[89].mxu1  ;;  %v5204_v32 = vpop.f32.mrb[90].mxu0 }
 0x1ae   : > { %v5267_v16 = vadd.f32 %v5266_v30, %v5265_v8  ;;  %v5268_v17 = vpop.f32.mrb[90].mxu1  ;;  %v5205_v23 = vpop.f32.mrb[91].mxu0 }
 0x1af   : > { %v3523_v25 = vadd.f32 %v5203_v48, %v7205_v20  ;;  %v5206_v26 = vadd.f32 %v5205_v23, %v5204_v32  ;;  %v5269_v62 = vpop.f32.mrb[91].mxu1 }
 0x1b0   : > { %v5270_v36 = vadd.f32 %v5269_v62, %v5268_v17  ;;  %5698 = vmatmul.mubr.bf16.gmra.mrb[196].mxu0 %v6244_v13 }
 0x1b1   : > { %v7295_v7 = vadd.f32 %v5267_v16, %v3523_v25  ;;  %v3526_v27 = vadd.f32 %v5206_v26, %v7208_v50  ;;  %5706 = vmatmul.mubr.bf16.gmra.mrb[196].mxu1 %v6245_v15 }
 0x1b3   : > { %v7298_v29 = vadd.f32 %v5270_v36, %v3526_v27  ;;  %v5207_v56 = vpop.f32.mrb[92].mxu0 }
 0x1b4   : > { %v5271_v31 = vpop.f32.mrb[92].mxu1  ;;  %v5208_v33 = vpop.f32.mrb[93].mxu0 }
 0x1b5   : > { %v5209_v35 = vadd.f32 %v5208_v33, %v5207_v56  ;;  %v5272_v39 = vpop.f32.mrb[93].mxu1  ;;  %v5210_v53 = vpop.f32.mrb[94].mxu0 }
 0x1b6   : > { %v5273_v9 = vadd.f32 %v5272_v39, %v5271_v31  ;;  %v5274_v40 = vpop.f32.mrb[94].mxu1  ;;  %v5211_v20 = vpop.f32.mrb[95].mxu0 }
 0x1b7   : > { %v3531_v21 = vadd.f32 %v5209_v35, %v7221_v47  ;;  %v5212_v41 = vadd.f32 %v5211_v20, %v5210_v53  ;;  %v5275_v42 = vpop.f32.mrb[95].mxu1 }
 0x1b8   : > { %v5276_v44 = vadd.f32 %v5275_v42, %v5274_v40 }
 0x1b9   : > { %v7301_v49 = vadd.f32 %v5273_v9, %v3531_v21  ;;  %v3534_v50 = vadd.f32 %v5212_v41, %v7224_v22 }
 0x1bb   : > { %v7304_v58 = vadd.f32 %v5276_v44, %v3534_v50  ;;  %v5293_v51 = vpop.f32.mrb[96].mxu0 }
 0x1bc   : > { %v5357_v4 = vpop.f32.mrb[96].mxu1  ;;  %v5294_v52 = vpop.f32.mrb[97].mxu0 }
 0x1bd   : > { %v5295_v54 = vadd.f32 %v5294_v52, %v5293_v51  ;;  %v5358_v11 = vpop.f32.mrb[97].mxu1  ;;  %v5296_v55 = vpop.f32.mrb[98].mxu0 }
 0x1be   : > { %v5359_v28 = vadd.f32 %v5358_v11, %v5357_v4  ;;  %v5360_v59 = vpop.f32.mrb[98].mxu1  ;;  %v5297_v19 = vpop.f32.mrb[99].mxu0 }
 0x1bf   : > { %v3669_v47 = vadd.f32 %v5295_v54, %v7237_v10  ;;  %v5298_v1 = vadd.f32 %v5297_v19, %v5296_v55  ;;  %v5361_v37 = vpop.f32.mrb[99].mxu1 }
 0x1c0   : > { %v5362_v24 = vadd.f32 %v5361_v37, %v5360_v59 }
 0x1c1   : > { %v7307_v2 = vadd.f32 %v5359_v28, %v3669_v47  ;;  %v3672_v22 = vadd.f32 %v5298_v1, %v7240_v60 }
 0x1c3   : > { %v7310_v45 = vadd.f32 %v5362_v24, %v3672_v22  ;;  %v5299_v14 = vpop.f32.mrb[100].mxu0 }
 0x1c4   : > { %v5363_v5 = vpop.f32.mrb[100].mxu1  ;;  %v5300_v6 = vpop.f32.mrb[101].mxu0 }
 0x1c5   : > { %v5301_v8 = vadd.f32 %v5300_v6, %v5299_v14  ;;  %v5364_v12 = vpop.f32.mrb[101].mxu1  ;;  %v5302_v13 = vpop.f32.mrb[102].mxu0 }
 0x1c6   : > { %v5365_v48 = vadd.f32 %v5364_v12, %v5363_v5  ;;  %v5366_v30 = vpop.f32.mrb[102].mxu1  ;;  %v5303_v32 = vpop.f32.mrb[103].mxu0 }
 0x1c7   : > { %v3677_v10 = vadd.f32 %v5301_v8, %v7247_v38  ;;  %v5304_v15 = vadd.f32 %v5303_v32, %v5302_v13  ;;  %v5367_v16 = vpop.f32.mrb[103].mxu1 }
 0x1c8   : > { %v5368_v17 = vadd.f32 %v5367_v16, %v5366_v30 }
 0x1c9   : > { %v7313_v23 = vadd.f32 %v5365_v48, %v3677_v10  ;;  %v3680_v60 = vadd.f32 %v5304_v15, %v7250_v57 }
 0x1cb   : > { %v7316_v25 = vadd.f32 %v5368_v17, %v3680_v60  ;;  %v5305_v26 = vpop.f32.mrb[104].mxu0 }
 0x1cc   : > { %v5369_v62 = vpop.f32.mrb[104].mxu1  ;;  %v5306_v36 = vpop.f32.mrb[105].mxu0 }
 0x1cd   : > { %v5307_v27 = vadd.f32 %v5306_v36, %v5305_v26  ;;  %v5370_v56 = vpop.f32.mrb[105].mxu1  ;;  %v5308_v31 = vpop.f32.mrb[106].mxu0 }
 0x1ce   : > { %v5371_v33 = vadd.f32 %v5370_v56, %v5369_v62  ;;  %v5372_v35 = vpop.f32.mrb[106].mxu1  ;;  %v5309_v39 = vpop.f32.mrb[107].mxu0 }
 0x1cf   : > { %v3685_v38 = vadd.f32 %v5307_v27, %v7257_v61  ;;  %v5310_v53 = vadd.f32 %v5309_v39, %v5308_v31  ;;  %v5373_v9 = vpop.f32.mrb[107].mxu1 }
 0x1d0   : > { %v5374_v40 = vadd.f32 %v5373_v9, %v5372_v35 }
 0x1d1   : > { %v7319_v20 = vadd.f32 %v5371_v33, %v3685_v38  ;;  %v3688_v57 = vadd.f32 %v5310_v53, %v7260_v63 }
 0x1d3   : > { %v7322_v21 = vadd.f32 %v5374_v40, %v3688_v57  ;;  %v5311_v41 = vpop.f32.mrb[108].mxu0 }
 0x1d4   : > { %v5375_v42 = vpop.f32.mrb[108].mxu1  ;;  %v5312_v44 = vpop.f32.mrb[109].mxu0 }
 0x1d5   : > { %v5313_v50 = vadd.f32 %v5312_v44, %v5311_v41  ;;  %v5376_v51 = vpop.f32.mrb[109].mxu1  ;;  %v5314_v4 = vpop.f32.mrb[110].mxu0 }
 0x1d6   : > { %v5377_v52 = vadd.f32 %v5376_v51, %v5375_v42  ;;  %v5378_v54 = vpop.f32.mrb[110].mxu1  ;;  %v5315_v11 = vpop.f32.mrb[111].mxu0 }
 0x1d7   : > { %v3693_v61 = vadd.f32 %v5313_v50, %v7267_v18  ;;  %v5316_v55 = vadd.f32 %v5315_v11, %v5314_v4  ;;  %v5379_v28 = vpop.f32.mrb[111].mxu1 }
 0x1d8   : > { %v5380_v59 = vadd.f32 %v5379_v28, %v5378_v54 }
 0x1d9   : > { %v7325_v19 = vadd.f32 %v5377_v52, %v3693_v61  ;;  %v3696_v63 = vadd.f32 %v5316_v55, %v7270_v0 }
 0x1db   : > { %v7328_v47 = vadd.f32 %v5380_v59, %v3696_v63  ;;  %v5317_v1 = vpop.f32.mrb[112].mxu0 }
 0x1dc   : > { %v5381_v37 = vpop.f32.mrb[112].mxu1  ;;  %v5318_v24 = vpop.f32.mrb[113].mxu0 }
 0x1dd   : > { %v5319_v22 = vadd.f32 %v5318_v24, %v5317_v1  ;;  %v5382_v14 = vpop.f32.mrb[113].mxu1  ;;  %v5320_v5 = vpop.f32.mrb[114].mxu0 }
 0x1de   : > { %v5383_v6 = vadd.f32 %v5382_v14, %v5381_v37  ;;  %v5384_v8 = vpop.f32.mrb[114].mxu1  ;;  %v5321_v12 = vpop.f32.mrb[115].mxu0 }
 0x1df   : > { %v3701_v18 = vadd.f32 %v5319_v22, %v7277_v43  ;;  %v5322_v13 = vadd.f32 %v5321_v12, %v5320_v5  ;;  %v5385_v48 = vpop.f32.mrb[115].mxu1 }
 0x1e0   : > { %v5386_v30 = vadd.f32 %v5385_v48, %v5384_v8 }
 0x1e1   : > { %v7331_v32 = vadd.f32 %v5383_v6, %v3701_v18  ;;  %v3704_v0 = vadd.f32 %v5322_v13, %v7280_v46 }
 0x1e3   : > { %v7334_v10 = vadd.f32 %v5386_v30, %v3704_v0  ;;  %v5323_v15 = vpop.f32.mrb[116].mxu0 }
 0x1e4   : > { %v5387_v16 = vpop.f32.mrb[116].mxu1  ;;  %v5324_v17 = vpop.f32.mrb[117].mxu0 }
 0x1e5   : > { %v5325_v60 = vadd.f32 %v5324_v17, %v5323_v15  ;;  %v5388_v26 = vpop.f32.mrb[117].mxu1  ;;  %v5326_v62 = vpop.f32.mrb[118].mxu0 }
 0x1e6   : > { %v5389_v36 = vadd.f32 %v5388_v26, %v5387_v16  ;;  %v5390_v27 = vpop.f32.mrb[118].mxu1  ;;  %v5327_v56 = vpop.f32.mrb[119].mxu0 }
 0x1e7   : > { %v3709_v43 = vadd.f32 %v5325_v60, %v7287_v3  ;;  %v5328_v31 = vadd.f32 %v5327_v56, %v5326_v62  ;;  %v5391_v33 = vpop.f32.mrb[119].mxu1 }
 0x1e8   : > { %v5392_v35 = vadd.f32 %v5391_v33, %v5390_v27 }
 0x1e9   : > { %v7337_v39 = vadd.f32 %v5389_v36, %v3709_v43  ;;  %v3712_v46 = vadd.f32 %v5328_v31, %v7290_v34 }
 0x1eb   : > { %v7340_v38 = vadd.f32 %v5392_v35, %v3712_v46  ;;  %v5329_v53 = vpop.f32.mrb[120].mxu0 }
 0x1ec   : > { %v5393_v9 = vpop.f32.mrb[120].mxu1  ;;  %v5330_v40 = vpop.f32.mrb[121].mxu0 }
 0x1ed   : > { %v5331_v57 = vadd.f32 %v5330_v40, %v5329_v53  ;;  %v5394_v41 = vpop.f32.mrb[121].mxu1  ;;  %v5332_v42 = vpop.f32.mrb[122].mxu0 }
 0x1ee   : > { %v5395_v44 = vadd.f32 %v5394_v41, %v5393_v9  ;;  %v5396_v50 = vpop.f32.mrb[122].mxu1  ;;  %v5333_v51 = vpop.f32.mrb[123].mxu0 }
 0x1ef   : > { %v3717_v3 = vadd.f32 %v5331_v57, %v7295_v7  ;;  %v5334_v4 = vadd.f32 %v5333_v51, %v5332_v42  ;;  %v5397_v52 = vpop.f32.mrb[123].mxu1 }
 0x1f0   : > { %v5398_v54 = vadd.f32 %v5397_v52, %v5396_v50 }
 0x1f1   : > { %v7343_v11 = vadd.f32 %v5395_v44, %v3717_v3  ;;  %v3720_v34 = vadd.f32 %v5334_v4, %v7298_v29 }
 0x1f3   : > { %v7346_v61 = vadd.f32 %v5398_v54, %v3720_v34  ;;  %v5335_v55 = vpop.f32.mrb[124].mxu0 }
 0x1f4   : > { %v5399_v28 = vpop.f32.mrb[124].mxu1  ;;  %v5336_v59 = vpop.f32.mrb[125].mxu0 }
 0x1f5   : > { %v5337_v63 = vadd.f32 %v5336_v59, %v5335_v55  ;;  %v5400_v1 = vpop.f32.mrb[125].mxu1  ;;  %v5338_v37 = vpop.f32.mrb[126].mxu0 }
 0x1f6   : > { %v5401_v24 = vadd.f32 %v5400_v1, %v5399_v28  ;;  %v5402_v22 = vpop.f32.mrb[126].mxu1  ;;  %v5339_v14 = vpop.f32.mrb[127].mxu0 }
 0x1f7   : > { %v3725_v7 = vadd.f32 %v5337_v63, %v7301_v49  ;;  %v5340_v5 = vadd.f32 %v5339_v14, %v5338_v37  ;;  %v5403_v6 = vpop.f32.mrb[127].mxu1 }
 0x1f8   : > { %v5404_v8 = vadd.f32 %v5403_v6, %v5402_v22 }
 0x1f9   : > { %v7349_v12 = vadd.f32 %v5401_v24, %v3725_v7  ;;  %v3728_v29 = vadd.f32 %v5340_v5, %v7304_v58 }
 0x1fb   : > { %v7352_v18 = vadd.f32 %v5404_v8, %v3728_v29  ;;  %v5421_v13 = vpop.f32.mrb[128].mxu0 }
 0x1fc   : > { %v5485_v48 = vpop.f32.mrb[128].mxu1  ;;  %v5422_v30 = vpop.f32.mrb[129].mxu0 }
 0x1fd   : > { %v5423_v0 = vadd.f32 %v5422_v30, %v5421_v13  ;;  %v5486_v15 = vpop.f32.mrb[129].mxu1  ;;  %v5424_v16 = vpop.f32.mrb[130].mxu0 }
 0x1fe   : > { %v5487_v17 = vadd.f32 %v5486_v15, %v5485_v48  ;;  %v5488_v60 = vpop.f32.mrb[130].mxu1  ;;  %v5425_v26 = vpop.f32.mrb[131].mxu0 }
 0x1ff   : > { %v3863_v49 = vadd.f32 %v5423_v0, %v7307_v2  ;;  %v5426_v62 = vadd.f32 %v5425_v26, %v5424_v16  ;;  %v5489_v36 = vpop.f32.mrb[131].mxu1 }
 0x200   : > { %v5490_v27 = vadd.f32 %v5489_v36, %v5488_v60 }
 0x201   : > { %v7355_v56 = vadd.f32 %v5487_v17, %v3863_v49  ;;  %v3866_v58 = vadd.f32 %v5426_v62, %v7310_v45 }
 0x203   : > { %v7358_v43 = vadd.f32 %v5490_v27, %v3866_v58  ;;  %v5427_v31 = vpop.f32.mrb[132].mxu0 }
 0x204   : > { %v5491_v33 = vpop.f32.mrb[132].mxu1  ;;  %v5428_v35 = vpop.f32.mrb[133].mxu0 }
 0x205   : > { %v5429_v46 = vadd.f32 %v5428_v35, %v5427_v31  ;;  %v5492_v53 = vpop.f32.mrb[133].mxu1  ;;  %v5430_v9 = vpop.f32.mrb[134].mxu0 }
 0x206   : > { %v5493_v40 = vadd.f32 %v5492_v53, %v5491_v33  ;;  %v5494_v57 = vpop.f32.mrb[134].mxu1  ;;  %v5431_v41 = vpop.f32.mrb[135].mxu0 }
 0x207   : > { %v3871_v2 = vadd.f32 %v5429_v46, %v7313_v23  ;;  %v5432_v42 = vadd.f32 %v5431_v41, %v5430_v9  ;;  %v5495_v44 = vpop.f32.mrb[135].mxu1 }
 0x208   : > { %v5496_v50 = vadd.f32 %v5495_v44, %v5494_v57 }
 0x209   : > { %v7361_v51 = vadd.f32 %v5493_v40, %v3871_v2  ;;  %v3874_v45 = vadd.f32 %v5432_v42, %v7316_v25 }
 0x20b   : > { %v7364_v3 = vadd.f32 %v5496_v50, %v3874_v45  ;;  %v5433_v4 = vpop.f32.mrb[136].mxu0 }
 0x20c   : > { %v5497_v52 = vpop.f32.mrb[136].mxu1  ;;  %v5434_v54 = vpop.f32.mrb[137].mxu0 }
 0x20d   : > { %v5435_v34 = vadd.f32 %v5434_v54, %v5433_v4  ;;  %v5498_v55 = vpop.f32.mrb[137].mxu1  ;;  %v5436_v28 = vpop.f32.mrb[138].mxu0 }
 0x20e   : > { %v5499_v59 = vadd.f32 %v5498_v55, %v5497_v52  ;;  %v5500_v63 = vpop.f32.mrb[138].mxu1  ;;  %v5437_v1 = vpop.f32.mrb[139].mxu0 }
 0x20f   : > { %v3879_v23 = vadd.f32 %v5435_v34, %v7319_v20  ;;  %v5438_v37 = vadd.f32 %v5437_v1, %v5436_v28  ;;  %v5501_v24 = vpop.f32.mrb[139].mxu1 }
 0x210   : > { %v5502_v22 = vadd.f32 %v5501_v24, %v5500_v63 }
 0x211   : > { %v7367_v14 = vadd.f32 %v5499_v59, %v3879_v23  ;;  %v3882_v25 = vadd.f32 %v5438_v37, %v7322_v21 }
 0x213   : > { %v7370_v7 = vadd.f32 %v5502_v22, %v3882_v25  ;;  %v5439_v5 = vpop.f32.mrb[140].mxu0 }
 0x214   : > { %v5503_v6 = vpop.f32.mrb[140].mxu1  ;;  %v5440_v8 = vpop.f32.mrb[141].mxu0 }
 0x215   : > { %v5441_v29 = vadd.f32 %v5440_v8, %v5439_v5  ;;  %v5504_v13 = vpop.f32.mrb[141].mxu1  ;;  %v5442_v48 = vpop.f32.mrb[142].mxu0 }
 0x216   : > { %v5505_v30 = vadd.f32 %v5504_v13, %v5503_v6  ;;  %v5506_v0 = vpop.f32.mrb[142].mxu1  ;;  %v5443_v15 = vpop.f32.mrb[143].mxu0 }
 0x217   : > { %v3887_v20 = vadd.f32 %v5441_v29, %v7325_v19  ;;  %v5444_v16 = vadd.f32 %v5443_v15, %v5442_v48  ;;  %v5507_v17 = vpop.f32.mrb[143].mxu1 }
 0x218   : > { %v5508_v60 = vadd.f32 %v5507_v17, %v5506_v0 }
 0x219   : > { %v7373_v26 = vadd.f32 %v5505_v30, %v3887_v20  ;;  %v3890_v21 = vadd.f32 %v5444_v16, %v7328_v47 }
 0x21b   : > { %v7376_v49 = vadd.f32 %v5508_v60, %v3890_v21  ;;  %v5445_v62 = vpop.f32.mrb[144].mxu0 }
 0x21c   : > { %v5509_v36 = vpop.f32.mrb[144].mxu1  ;;  %v5446_v27 = vpop.f32.mrb[145].mxu0 }
 0x21d   : > { %v5447_v58 = vadd.f32 %v5446_v27, %v5445_v62  ;;  %v5510_v31 = vpop.f32.mrb[145].mxu1  ;;  %v5448_v33 = vpop.f32.mrb[146].mxu0 }
 0x21e   : > { %v5511_v35 = vadd.f32 %v5510_v31, %v5509_v36  ;;  %v5512_v46 = vpop.f32.mrb[146].mxu1  ;;  %v5449_v53 = vpop.f32.mrb[147].mxu0 }
 0x21f   : > { %v3895_v19 = vadd.f32 %v5447_v58, %v7331_v32  ;;  %v5450_v9 = vadd.f32 %v5449_v53, %v5448_v33  ;;  %v5513_v40 = vpop.f32.mrb[147].mxu1 }
 0x220   : > { %v5514_v57 = vadd.f32 %v5513_v40, %v5512_v46 }
 0x221   : > { %v7379_v41 = vadd.f32 %v5511_v35, %v3895_v19  ;;  %v3898_v47 = vadd.f32 %v5450_v9, %v7334_v10 }
 0x223   : > { %v7382_v2 = vadd.f32 %v5514_v57, %v3898_v47  ;;  %v5451_v42 = vpop.f32.mrb[148].mxu0 }
 0x224   : > { %v5515_v44 = vpop.f32.mrb[148].mxu1  ;;  %v5452_v50 = vpop.f32.mrb[149].mxu0 }
 0x225   : > { %v5453_v45 = vadd.f32 %v5452_v50, %v5451_v42  ;;  %v5516_v4 = vpop.f32.mrb[149].mxu1  ;;  %v5454_v52 = vpop.f32.mrb[150].mxu0 }
 0x226   : > { %v5517_v54 = vadd.f32 %v5516_v4, %v5515_v44  ;;  %v5518_v34 = vpop.f32.mrb[150].mxu1  ;;  %v5455_v55 = vpop.f32.mrb[151].mxu0 }
 0x227   : > { %v3903_v32 = vadd.f32 %v5453_v45, %v7337_v39  ;;  %v5456_v28 = vadd.f32 %v5455_v55, %v5454_v52  ;;  %v5519_v59 = vpop.f32.mrb[151].mxu1 }
 0x228   : > { %v5520_v63 = vadd.f32 %v5519_v59, %v5518_v34 }
 0x229   : > { %v7385_v1 = vadd.f32 %v5517_v54, %v3903_v32  ;;  %v3906_v10 = vadd.f32 %v5456_v28, %v7340_v38 }
 0x22b   : > { %v7388_v23 = vadd.f32 %v5520_v63, %v3906_v10  ;;  %v5457_v37 = vpop.f32.mrb[152].mxu0 }
 0x22c   : > { %v5521_v24 = vpop.f32.mrb[152].mxu1  ;;  %v5458_v22 = vpop.f32.mrb[153].mxu0 }
 0x22d   : > { %v5459_v25 = vadd.f32 %v5458_v22, %v5457_v37  ;;  %v5522_v5 = vpop.f32.mrb[153].mxu1  ;;  %v5460_v6 = vpop.f32.mrb[154].mxu0 }
 0x22e   : > { %v5523_v8 = vadd.f32 %v5522_v5, %v5521_v24  ;;  %v5524_v29 = vpop.f32.mrb[154].mxu1  ;;  %v5461_v13 = vpop.f32.mrb[155].mxu0 }
 0x22f   : > { %v3911_v39 = vadd.f32 %v5459_v25, %v7343_v11  ;;  %v5462_v48 = vadd.f32 %v5461_v13, %v5460_v6  ;;  %v5525_v30 = vpop.f32.mrb[155].mxu1 }
 0x230   : > { %v5526_v0 = vadd.f32 %v5525_v30, %v5524_v29 }
 0x231   : > { %v7391_v15 = vadd.f32 %v5523_v8, %v3911_v39  ;;  %v3914_v38 = vadd.f32 %v5462_v48, %v7346_v61 }
 0x233   : > { %v7394_v20 = vadd.f32 %v5526_v0, %v3914_v38  ;;  %v5463_v16 = vpop.f32.mrb[156].mxu0 }
 0x234   : > { %v5527_v17 = vpop.f32.mrb[156].mxu1  ;;  %v5464_v60 = vpop.f32.mrb[157].mxu0 }
 0x235   : > { %v5465_v21 = vadd.f32 %v5464_v60, %v5463_v16  ;;  %v5528_v62 = vpop.f32.mrb[157].mxu1  ;;  %v5466_v36 = vpop.f32.mrb[158].mxu0 }
 0x236   : > { %v5529_v27 = vadd.f32 %v5528_v62, %v5527_v17  ;;  %v5530_v58 = vpop.f32.mrb[158].mxu1  ;;  %v5467_v31 = vpop.f32.mrb[159].mxu0 }
 0x237   : > { %v3919_v11 = vadd.f32 %v5465_v21, %v7349_v12  ;;  %v5468_v33 = vadd.f32 %v5467_v31, %v5466_v36  ;;  %v5531_v35 = vpop.f32.mrb[159].mxu1 }
 0x238   : > { %v5532_v46 = vadd.f32 %v5531_v35, %v5530_v58 }
 0x239   : > { %v7397_v53 = vadd.f32 %v5529_v27, %v3919_v11  ;;  %v3922_v61 = vadd.f32 %v5468_v33, %v7352_v18 }
 0x23b   : > { %v7400_v19 = vadd.f32 %v5532_v46, %v3922_v61  ;;  %v5549_v9 = vpop.f32.mrb[160].mxu0 }
 0x23c   : > { %v5613_v40 = vpop.f32.mrb[160].mxu1  ;;  %v5550_v57 = vpop.f32.mrb[161].mxu0 }
 0x23d   : > { %v5551_v47 = vadd.f32 %v5550_v57, %v5549_v9  ;;  %v5614_v42 = vpop.f32.mrb[161].mxu1  ;;  %v5552_v44 = vpop.f32.mrb[162].mxu0 }
 0x23e   : > { %v5615_v50 = vadd.f32 %v5614_v42, %v5613_v40  ;;  %v5616_v45 = vpop.f32.mrb[162].mxu1  ;;  %v5553_v4 = vpop.f32.mrb[163].mxu0 }
 0x23f   : > { %v4057_v12 = vadd.f32 %v5551_v47, %v7355_v56  ;;  %v5554_v52 = vadd.f32 %v5553_v4, %v5552_v44  ;;  %v5617_v54 = vpop.f32.mrb[163].mxu1 }
 0x240   : > { %v5618_v34 = vadd.f32 %v5617_v54, %v5616_v45 }
 0x241   : > { %v4060_v55 = vadd.f32 %v5554_v52, %v7358_v43  ;;  %v7404_v32 = vadd.f32 %v5615_v50, %v4057_v12 }
 0x243   : > { %v5555_v18 = vpop.f32.mrb[164].mxu0  ;;  %v7406_v28 = vadd.f32 %v5618_v34, %v4060_v55 }
 0x244   : > { %v5619_v59 = vpop.f32.mrb[164].mxu1  ;;  %v5556_v63 = vpop.f32.mrb[165].mxu0 }
 0x245   : > { %v5557_v10 = vadd.f32 %v5556_v63, %v5555_v18  ;;  %v5620_v37 = vpop.f32.mrb[165].mxu1  ;;  %v5558_v24 = vpop.f32.mrb[166].mxu0 }
 0x246   : > { %v5621_v22 = vadd.f32 %v5620_v37, %v5619_v59  ;;  %v5622_v25 = vpop.f32.mrb[166].mxu1  ;;  %v5559_v5 = vpop.f32.mrb[167].mxu0 }
 0x247   : > { %v4065_v56 = vadd.f32 %v5557_v10, %v7361_v51  ;;  %v5560_v6 = vadd.f32 %v5559_v5, %v5558_v24  ;;  %v5623_v8 = vpop.f32.mrb[167].mxu1 }
 0x248   : > { %v5624_v29 = vadd.f32 %v5623_v8, %v5622_v25 }
 0x249   : > { %v4068_v43 = vadd.f32 %v5560_v6, %v7364_v3  ;;  %v7410_v13 = vadd.f32 %v5621_v22, %v4065_v56 }
 0x24b   : > { %v5561_v39 = vpop.f32.mrb[168].mxu0  ;;  %v7412_v48 = vadd.f32 %v5624_v29, %v4068_v43 }
 0x24c   : > { %v5625_v30 = vpop.f32.mrb[168].mxu1  ;;  %v5562_v0 = vpop.f32.mrb[169].mxu0 }
 0x24d   : > { %v5563_v38 = vadd.f32 %v5562_v0, %v5561_v39  ;;  %v5626_v16 = vpop.f32.mrb[169].mxu1  ;;  %v5564_v17 = vpop.f32.mrb[170].mxu0 }
 0x24e   : > { %v5627_v60 = vadd.f32 %v5626_v16, %v5625_v30  ;;  %v5628_v21 = vpop.f32.mrb[170].mxu1  ;;  %v5565_v62 = vpop.f32.mrb[171].mxu0 }
 0x24f   : > { %v4073_v51 = vadd.f32 %v5563_v38, %v7367_v14  ;;  %v5566_v36 = vadd.f32 %v5565_v62, %v5564_v17  ;;  %v5629_v27 = vpop.f32.mrb[171].mxu1 }
 0x250   : > { %v5630_v58 = vadd.f32 %v5629_v27, %v5628_v21 }
 0x251   : > { %v4076_v3 = vadd.f32 %v5566_v36, %v7370_v7  ;;  %v7416_v31 = vadd.f32 %v5627_v60, %v4073_v51 }
 0x253   : > { %v5567_v11 = vpop.f32.mrb[172].mxu0  ;;  %v7418_v33 = vadd.f32 %v5630_v58, %v4076_v3 }
 0x254   : > { %v5631_v35 = vpop.f32.mrb[172].mxu1  ;;  %v5568_v46 = vpop.f32.mrb[173].mxu0 }
 0x255   : > { %v5569_v61 = vadd.f32 %v5568_v46, %v5567_v11  ;;  %v5632_v9 = vpop.f32.mrb[173].mxu1  ;;  %v5570_v40 = vpop.f32.mrb[174].mxu0 }
 0x256   : > { %v5633_v57 = vadd.f32 %v5632_v9, %v5631_v35  ;;  %v5634_v47 = vpop.f32.mrb[174].mxu1  ;;  %v5571_v42 = vpop.f32.mrb[175].mxu0 }
 0x257   : > { %v4081_v14 = vadd.f32 %v5569_v61, %v7373_v26  ;;  %v5572_v44 = vadd.f32 %v5571_v42, %v5570_v40  ;;  %v5635_v50 = vpop.f32.mrb[175].mxu1 }
 0x258   : > { %v5636_v45 = vadd.f32 %v5635_v50, %v5634_v47 }
 0x259   : > { %v4084_v7 = vadd.f32 %v5572_v44, %v7376_v49  ;;  %v7422_v4 = vadd.f32 %v5633_v57, %v4081_v14 }
 0x25b   : > { %v5573_v12 = vpop.f32.mrb[176].mxu0  ;;  %v7424_v52 = vadd.f32 %v5636_v45, %v4084_v7 }
 0x25c   : > { %v5637_v54 = vpop.f32.mrb[176].mxu1  ;;  %v5574_v34 = vpop.f32.mrb[177].mxu0 }
 0x25d   : > { %v5575_v55 = vadd.f32 %v5574_v34, %v5573_v12  ;;  %v5638_v18 = vpop.f32.mrb[177].mxu1  ;;  %v5576_v59 = vpop.f32.mrb[178].mxu0 }
 0x25e   : > { %v5639_v63 = vadd.f32 %v5638_v18, %v5637_v54  ;;  %v5640_v10 = vpop.f32.mrb[178].mxu1  ;;  %v5577_v37 = vpop.f32.mrb[179].mxu0 }
 0x25f   : > { %v4089_v26 = vadd.f32 %v5575_v55, %v7379_v41  ;;  %v5578_v24 = vadd.f32 %v5577_v37, %v5576_v59  ;;  %v5641_v22 = vpop.f32.mrb[179].mxu1 }
 0x260   : > { %v5642_v25 = vadd.f32 %v5641_v22, %v5640_v10 }
 0x261   : > { %v4092_v49 = vadd.f32 %v5578_v24, %v7382_v2  ;;  %v4186_v5 = vadd.f32 %v5639_v63, %v4089_v26 }
 0x263   : > { %v5579_v56 = vpop.f32.mrb[180].mxu0  ;;  %v7428_v6 = vadd.f32 %v5642_v25, %v4092_v49 }
 0x264   : > { %v5643_v8 = vpop.f32.mrb[180].mxu1  ;;  %v5580_v29 = vpop.f32.mrb[181].mxu0 }
 0x265   : > { %v5581_v43 = vadd.f32 %v5580_v29, %v5579_v56  ;;  %v5644_v39 = vpop.f32.mrb[181].mxu1  ;;  %v5582_v30 = vpop.f32.mrb[182].mxu0 }
 0x266   : > { %v5645_v0 = vadd.f32 %v5644_v39, %v5643_v8  ;;  %v5646_v38 = vpop.f32.mrb[182].mxu1  ;;  %v5583_v16 = vpop.f32.mrb[183].mxu0 }
 0x267   : > { %v4097_v17 = vadd.f32 %v5581_v43, %v7385_v1  ;;  %v5584_v41 = vadd.f32 %v5583_v16, %v5582_v30  ;;  %v5647_v60 = vpop.f32.mrb[183].mxu1 }
 0x268   : > { %v5648_v21 = vadd.f32 %v5647_v60, %v5646_v38 }
 0x269   : > { %v4100_v62 = vadd.f32 %v5584_v41, %v7388_v23  ;;  %v4194_v2 = vadd.f32 %v5645_v0, %v4097_v17 }
 0x26b   : > { %v5585_v51 = vpop.f32.mrb[184].mxu0  ;;  %v4197_v36 = vadd.f32 %v5648_v21, %v4100_v62 }
 0x26c   : > { %v5649_v27 = vpop.f32.mrb[184].mxu1  ;;  %v5586_v58 = vpop.f32.mrb[185].mxu0 }
 0x26d   : > { %v5587_v3 = vadd.f32 %v5586_v58, %v5585_v51  ;;  %v5650_v11 = vpop.f32.mrb[185].mxu1  ;;  %v5588_v35 = vpop.f32.mrb[186].mxu0 }
 0x26e   : > { %v5651_v46 = vadd.f32 %v5650_v11, %v5649_v27  ;;  %v5652_v61 = vpop.f32.mrb[186].mxu1  ;;  %v5589_v9 = vpop.f32.mrb[187].mxu0 }
 0x26f   : > { %v4105_v40 = vadd.f32 %v5587_v3, %v7391_v15  ;;  %v5590_v57 = vadd.f32 %v5589_v9, %v5588_v35  ;;  %v5653_v1 = vpop.f32.mrb[187].mxu1 }
 0x270   : > { %v5654_v47 = vadd.f32 %v5653_v1, %v5652_v61 }
 0x271   : > { %v4108_v42 = vadd.f32 %v5590_v57, %v7394_v20  ;;  %v4202_v14 = vadd.f32 %v5651_v46, %v4105_v40 }
 0x273   : > { %v5591_v23 = vpop.f32.mrb[188].mxu0  ;;  %v4205_v44 = vadd.f32 %v5654_v47, %v4108_v42 }
 0x274   : > { %v5655_v50 = vpop.f32.mrb[188].mxu1  ;;  %v5592_v45 = vpop.f32.mrb[189].mxu0 }
 0x275   : > { %v5593_v7 = vadd.f32 %v5592_v45, %v5591_v23  ;;  %v5656_v12 = vpop.f32.mrb[189].mxu1  ;;  %v5594_v54 = vpop.f32.mrb[190].mxu0 }
 0x276   : > { %v5657_v34 = vadd.f32 %v5656_v12, %v5655_v50  ;;  %v5658_v55 = vpop.f32.mrb[190].mxu1  ;;  %v5595_v18 = vpop.f32.mrb[191].mxu0 }
 0x277   : > { %v4113_v59 = vadd.f32 %v5593_v7, %v7397_v53  ;;  %v5596_v63 = vadd.f32 %v5595_v18, %v5594_v54  ;;  %v5659_v15 = vpop.f32.mrb[191].mxu1 }
 0x278   : > { %v5660_v10 = vadd.f32 %v5659_v15, %v5658_v55 }
 0x279   : > { %v4116_v37 = vadd.f32 %v5596_v63, %v7400_v19  ;;  %v4210_v26 = vadd.f32 %v5657_v34, %v4113_v59 }
 0x27b   : > { %v5695_v20 = vpop.f32.mrb[192].mxu0  ;;  %v4213_v24 = vadd.f32 %v5660_v10, %v4116_v37 }
 0x27c   : > { %v4259_v22 = vadd.f32 %v5695_v20, %v7410_v13  ;;  %v5703_v25 = vpop.f32.mrb[192].mxu1  ;;  %v4250_v49 = vpop.f32.mrb[193].mxu0 }
 0x27d   : > { %v4291_v56 = vadd.f32 %v5703_v25, %v4194_v2  ;;  %v4251_v8 = vadd.f32 %v4250_v49, %v7404_v32  ;;  %v4282_v29 = vpop.f32.mrb[193].mxu1  ;;  %v5696_v43 = vpop.f32.mrb[194].mxu0 }
 0x27e   : > { %6246 = vtanh.f32 %v4259_v22  ;;  %v4283_v39 = vadd.f32 %v4282_v29, %v4186_v5  ;;  %v4262_v53 = vadd.f32 %v5696_v43, %v7412_v48  ;;  %v5704_v30 = vpop.f32.mrb[194].mxu1  ;;  %v4253_v0 = vpop.f32.mrb[195].mxu0 }
 0x27f   : > { %6248 = vtanh.f32 %v4291_v56  ;;  %v4294_v19 = vadd.f32 %v5704_v30, %v4197_v36  ;;  %v4254_v38 = vadd.f32 %v4253_v0, %v7406_v28  ;;  %v4285_v16 = vpop.f32.mrb[195].mxu1 }
 0x280   : > { %6250 = vtanh.f32 %v4251_v8  ;;  %v4286_v13 = vadd.f32 %v4285_v16, %v7428_v6 }
 0x281   : > { %6252 = vtanh.f32 %v4283_v39 }
 0x282   : > { %6254 = vtanh.f32 %v4262_v53 }
 0x283   : > { %6256 = vtanh.f32 %v4294_v19  ;;  %v5699_v32 = vpop.f32.mrb[196].mxu0 }
 0x284   : > { %6258 = vtanh.f32 %v4254_v38  ;;  %v4275_v5 = vadd.f32 %v5699_v32, %v7422_v4  ;;  %v5707_v17 = vpop.f32.mrb[196].mxu1  ;;  %v4266_v48 = vpop.f32.mrb[197].mxu0 }
 0x285   : > { %6260 = vtanh.f32 %v4286_v13  ;;  %v4307_v41 = vadd.f32 %v5707_v17, %v4210_v26  ;;  %v4267_v60 = vadd.f32 %v4266_v48, %v7416_v31  ;;  %v4298_v21 = vpop.f32.mrb[197].mxu1  ;;  %v5700_v28 = vpop.f32.mrb[198].mxu0 }
 0x286   : > { %6262 = vtanh.f32 %v4275_v5  ;;  %v4299_v62 = vadd.f32 %v4298_v21, %v4202_v14  ;;  %v4278_v6 = vadd.f32 %v5700_v28, %v7424_v52  ;;  %v5708_v2 = vpop.f32.mrb[198].mxu1  ;;  %v4269_v51 = vpop.f32.mrb[199].mxu0 }
 0x287   : > { %6264 = vtanh.f32 %v4307_v41  ;;  %v4310_v36 = vadd.f32 %v5708_v2, %v4213_v24  ;;  %v4270_v27 = vadd.f32 %v4269_v51, %v7418_v33  ;;  %v4301_v4 = vpop.f32.mrb[199].mxu1 }
 0x288   : > { %v6247_v58 = vpop.eup %6246  ;;  %6266 = vtanh.f32 %v4267_v60  ;;  %v4302_v3 = vadd.f32 %v4301_v4, %v4205_v44 }
 0x289   : > { %v6249_v11 = vpop.eup %6248  ;;  %v4331_v35 = vadd.f32 1.0, %v6247_v58  ;;  %6268 = vtanh.f32 %v4299_v62 }
 0x28a   : > { %v6251_v31 = vpop.eup %6250  ;;  %v4339_v52 = vadd.f32 1.0, %v6249_v11  ;;  %6270 = vtanh.f32 %v4278_v6 }
 0x28b   : > { %v6253_v46 = vpop.eup %6252  ;;  %v4347_v61 = vmul.f32 0.5, %v4331_v35  ;;  %v4329_v33 = vadd.f32 1.0, %v6251_v31  ;;  %6272 = vtanh.f32 %v4310_v36 }
 0x28c   : > { %v6255_v9 = vpop.eup %6254  ;;  %v4355_v40 = vmul.f32 0.5, %v4339_v52  ;;  %v4337_v57 = vadd.f32 1.0, %v6253_v46  ;;  %6274 = vtanh.f32 %v4270_v27 }
 0x28d   : > { %v6257_v1 = vpop.eup %6256  ;;  %4363 = vst [vmem:[%s7449_s26 + $0x10] sm:$0xff] %v4347_v61  ;;  %v4345_v47 = vmul.f32 0.5, %v4329_v33  ;;  %v4332_v42 = vadd.f32 1.0, %v6255_v9  ;;  %6276 = vtanh.f32 %v4302_v3 }
 0x28e   : > { %v6259_v14 = vpop.eup %6258  ;;  %4371 = vst [vmem:[%s7449_s26 + $0x50] sm:$0xff] %v4355_v40  ;;  %v4353_v23 = vmul.f32 0.5, %v4337_v57  ;;  %v4340_v44 = vadd.f32 1.0, %v6257_v1 }
 0x28f   : > { %v6261_v50 = vpop.eup %6260  ;;  %4361 = vst [vmem:[%s7449_s26] sm:$0xff] %v4345_v47  ;;  %v4348_v45 = vmul.f32 0.5, %v4332_v42  ;;  %v4330_v7 = vadd.f32 1.0, %v6259_v14 }
 0x290   : > { %v6263_v12 = vpop.eup %6262  ;;  %4369 = vst [vmem:[%s7449_s26 + $0x40] sm:$0xff] %v4353_v23  ;;  %v4356_v54 = vmul.f32 0.5, %v4340_v44  ;;  %v4338_v34 = vadd.f32 1.0, %v6261_v50 }
 0x291   : > { %v6265_v55 = vpop.eup %6264  ;;  %4364 = vst [vmem:[%s7449_s26 + $0x18] sm:$0xff] %v4348_v45  ;;  %v4346_v18 = vmul.f32 0.5, %v4330_v7  ;;  %v4335_v59 = vadd.f32 1.0, %v6263_v12 }
 0x292   : > { %v6267_v63 = vpop.eup %6266  ;;  %4372 = vst [vmem:[%s7449_s26 + $0x58] sm:$0xff] %v4356_v54  ;;  %v4354_v15 = vmul.f32 0.5, %v4338_v34  ;;  %v4343_v10 = vadd.f32 1.0, %v6265_v55 }
 0x293   : > { %v6269_v37 = vpop.eup %6268  ;;  %4362 = vst [vmem:[%s7449_s26 + $0x8] sm:$0xff] %v4346_v18  ;;  %v4351_v26 = vmul.f32 0.5, %v4335_v59  ;;  %v4333_v20 = vadd.f32 1.0, %v6267_v63 }
 0x294   : > { %v6271_v24 = vpop.eup %6270  ;;  %4370 = vst [vmem:[%s7449_s26 + $0x48] sm:$0xff] %v4354_v15  ;;  %v4359_v22 = vmul.f32 0.5, %v4343_v10  ;;  %v4341_v25 = vadd.f32 1.0, %v6269_v37 }
 0x295   : > { %v6273_v49 = vpop.eup %6272  ;;  %4367 = vst [vmem:[%s7449_s26 + $0x30] sm:$0xff] %v4351_v26  ;;  %v4349_v56 = vmul.f32 0.5, %v4333_v20  ;;  %v4336_v8 = vadd.f32 1.0, %v6271_v24 }
 0x296   : > { %v6275_v29 = vpop.eup %6274  ;;  %4375 = vst [vmem:[%s7449_s26 + $0x70] sm:$0xff] %v4359_v22  ;;  %v4357_v43 = vmul.f32 0.5, %v4341_v25  ;;  %v4344_v39 = vadd.f32 1.0, %v6273_v49 }
 0x297   : > { %v6277_v53 = vpop.eup %6276  ;;  %4365 = vst [vmem:[%s7449_s26 + $0x20] sm:$0xff] %v4349_v56  ;;  %v4352_v30 = vmul.f32 0.5, %v4336_v8  ;;  %v4334_v0 = vadd.f32 1.0, %v6275_v29 }
 0x298   : > { %4373 = vst [vmem:[%s7449_s26 + $0x60] sm:$0xff] %v4357_v43  ;;  %v4360_v19 = vmul.f32 0.5, %v4344_v39  ;;  %v4342_v38 = vadd.f32 1.0, %v6277_v53 }
 0x299   : > { %4368 = vst [vmem:[%s7449_s26 + $0x38] sm:$0xff] %v4352_v30  ;;  %v4350_v16 = vmul.f32 0.5, %v4334_v0 }
 0x29a   : > { %4376 = vst [vmem:[%s7449_s26 + $0x78] sm:$0xff] %v4360_v19  ;;  %v4358_v13 = vmul.f32 0.5, %v4342_v38 }
 0x29b   : > { %4366 = vst [vmem:[%s7449_s26 + $0x28] sm:$0xff] %v4350_v16 }
 0x29c   : > { %4374 = vst [vmem:[%s7449_s26 + $0x68] sm:$0xff] %v4358_v13 }
 0x29d PF: > { %s13_s14 = sadd.s32 1, %s6300_s14   ;;  %s7480_s12 = smov %s6296_s13 }
 0x29e   : > { %p10_p5 = scmp.ge.s32.totalorder %s13_s14, 6   ;;  %s7481_s13 = smov %s7483_s15 }
 0x2a0   :  { %12 = sbr.rel (!%p10_p5) target bundleno = 2 (0x2), region = 68 }

</bundles_post_ra>
